<compile_context>
chip_gen: v5e
topology: v5e:2x2
jax: 0.10.0
libtpu: 0.0.40
codegen_flags: <defaults>
</compile_context>

<pallas_src>
import functools

import jax
import jax.numpy as jnp
from jax.experimental import pallas as pl
from jax.experimental.pallas import tpu as pltpu


def _round_up(n, m):
    return ((n + m - 1) // m) * m


def _mlp_kernel(x_ref, w1_ref, b1_ref, w2_ref, b2_ref, o_ref, *, h_chunk):
    # x_ref: (TM, D_in) in input dtype; w1/w2 in compute dtype (usually bf16);
    # b1: (1, H) f32; b2: (1, D_out) f32.
    cdt = w1_ref.dtype
    xc = x_ref[...].astype(cdt)                       # cast once per tile (VPU)
    d_hidden = w1_ref.shape[1]
    tm = x_ref.shape[0]
    d_out = o_ref.shape[1]

    acc = jnp.zeros((tm, d_out), jnp.float32)
    n_chunks = d_hidden // h_chunk                    # static; wrapper guarantees divisibility
    for c in range(n_chunks):                         # static unrolled loop over hidden chunks
        lo = c * h_chunk
        hi = lo + h_chunk
        h = jnp.dot(xc, w1_ref[:, lo:hi],             # MXU, f32 accumulation
                    preferred_element_type=jnp.float32)
        h = jnp.maximum(h + b1_ref[:, lo:hi], 0.0)    # bias + ReLU on the VPU (f32)
        acc = acc + jnp.dot(h.astype(cdt), w2_ref[lo:hi, :],
                            preferred_element_type=jnp.float32)
    o_ref[...] = (acc + b2_ref[...]).astype(o_ref.dtype)


@functools.partial(jax.jit, static_argnames=("row_tile", "h_chunk", "compute_dtype"))
def bio_to_text_projection(x, w1, b1, w2, b2, *, row_tile=256, h_chunk=512,
                           compute_dtype=jnp.bfloat16):
    """Fused Pallas MLP projection (Linear -> ReLU -> Linear).

    x : (B, S, D_in) or (S, D_in)   -- mirrors the PyTorch forward (unsqueeze)
    returns (B, S, D_out)           -- (1, S, D_out) if input was 2-D
    """
    if x.ndim == 2:
        x = x[None, ...]                              # unsqueeze(0), like PyTorch
    B, S, d_in = x.shape
    d_hidden = w1.shape[1]
    d_out = w2.shape[1]
    out_dtype = x.dtype

    M = B * S
    x2d = x.reshape(M, d_in)

    # --- Row tiling: big tiles for MXU occupancy, but keep >= 2 grid steps
    #     when M allows (so v7x's two TensorCores both get work). ---
    tile = int(row_tile)
    if M < 2 * tile:
        tile = min(tile, max(8, _round_up(pl.cdiv(M, 2), 8)))
    M_pad = _round_up(M, tile)
    if M_pad != M:
        x2d = jnp.pad(x2d, ((0, M_pad - M), (0, 0)))  # padded rows sliced off below

    # --- Hidden chunking: bound the live (tile, h_chunk) f32 intermediate. ---
    chunk = h_chunk if (d_hidden > h_chunk and d_hidden % h_chunk == 0) else d_hidden

    # --- Weights in compute dtype (bf16 by default), biases kept f32. ---
    w1c = w1.astype(compute_dtype)
    w2c = w2.astype(compute_dtype)
    b1_2d = b1.reshape(1, d_hidden).astype(jnp.float32)
    b2_2d = b2.reshape(1, d_out).astype(jnp.float32)

    grid = (M_pad // tile,)

    flops = 2 * M_pad * (d_in * d_hidden + d_hidden * d_out)
    bytes_accessed = (
        M_pad * d_in * x2d.dtype.itemsize
        + w1c.size * w1c.dtype.itemsize
        + w2c.size * w2c.dtype.itemsize
        + b1_2d.size * 4 + b2_2d.size * 4
        + M_pad * d_out * jnp.dtype(out_dtype).itemsize)

    out2d = pl.pallas_call(
        functools.partial(_mlp_kernel, h_chunk=chunk),
        out_shape=jax.ShapeDtypeStruct((M_pad, d_out), out_dtype),
        grid_spec=pltpu.PrefetchScalarGridSpec(
            num_scalar_prefetch=0,
            grid=grid,
            in_specs=[
                pl.BlockSpec((tile, d_in), lambda i: (i, 0)),        # x row tile
                pl.BlockSpec((d_in, d_hidden), lambda i: (0, 0)),    # W1 (resident)
                pl.BlockSpec((1, d_hidden), lambda i: (0, 0)),       # b1
                pl.BlockSpec((d_hidden, d_out), lambda i: (0, 0)),   # W2 (resident)
                pl.BlockSpec((1, d_out), lambda i: (0, 0)),          # b2
            ],
            out_specs=pl.BlockSpec((tile, d_out), lambda i: (i, 0)),
        ),
        compiler_params=pltpu.CompilerParams(
            dimension_semantics=("parallel",),
            vmem_limit_bytes=48 * 1024 * 1024,
        ),
        cost_estimate=pl.CostEstimate(
            flops=flops, transcendentals=0, bytes_accessed=bytes_accessed),
    )(x2d, w1c, b1_2d, w2c, b2_2d)

    if M_pad != M:
        out2d = out2d[:M]
    return out2d.reshape(B, S, d_out)


def _reference(x, w1, b1, w2, b2):
    if x.ndim == 2:
        x = x[None, ...]
    h = jnp.maximum(x @ w1 + b1, 0.0)
    return h @ w2 + b2


if __name__ == "__main__":
    # Module-default dims (input_dim=768, hidden_dim=1024, target_dim=2048),
    # small batch/seq. num_tokens=4 is unused in the forward pass.
    batch, seq = 2, 8
    input_dim, hidden_dim, target_dim = 768, 1024, 2048

    key = jax.random.PRNGKey(0)
    kx, k1, kb1, k2, kb2 = jax.random.split(key, 5)

    x = jax.random.normal(kx, (batch, seq, input_dim), dtype=jnp.float32)
    # Deterministic synthetic parameters (nn.Linear weights stored transposed).
    w1 = jax.random.normal(k1, (input_dim, hidden_dim), dtype=jnp.float32) * 0.02
    b1 = jax.random.normal(kb1, (hidden_dim,), dtype=jnp.float32) * 0.01
    w2 = jax.random.normal(k2, (hidden_dim, target_dim), dtype=jnp.float32) * 0.02
    b2 = jax.random.normal(kb2, (target_dim,), dtype=jnp.float32) * 0.01

    ref = _reference(x, w1, b1, w2, b2)

    # Default (bf16 compute, f32 accumulation) path.
    out = jax.block_until_ready(bio_to_text_projection(x, w1, b1, w2, b2))
    assert out.shape == (batch, seq, target_dim)
    assert jnp.allclose(out, ref, atol=5e-2, rtol=5e-2), "bf16 path mismatch vs reference"

    # Exact f32 compute path.
    out_f32 = jax.block_until_ready(
        bio_to_text_projection(x, w1, b1, w2, b2, compute_dtype=jnp.float32))
    assert jnp.allclose(out_f32, ref, atol=1e-4, rtol=1e-4), "f32 path mismatch vs reference"

    # 2-D input path (unsqueeze semantics).
    out2 = jax.block_until_ready(bio_to_text_projection(x[0], w1, b1, w2, b2))
    assert out2.shape == (1, seq, target_dim)
    assert jnp.allclose(out2, _reference(x[0], w1, b1, w2, b2), atol=5e-2, rtol=5e-2)

    # Row count not divisible by the tile -> exercises the padding path.
    x_odd = jax.random.normal(kx, (3, 5, input_dim), dtype=jnp.float32)
    out_odd = jax.block_until_ready(
        bio_to_text_projection(x_odd, w1, b1, w2, b2, compute_dtype=jnp.float32))
    assert out_odd.shape == (3, 5, target_dim)
    assert jnp.allclose(out_odd, _reference(x_odd, w1, b1, w2, b2), atol=1e-4, rtol=1e-4)

    # Larger row count -> exercises the full 256-row tile and a multi-step grid.
    x_big = jax.random.normal(kx, (4, 256, input_dim), dtype=jnp.float32)
    out_big = jax.block_until_ready(bio_to_text_projection(x_big, w1, b1, w2, b2))
    assert out_big.shape == (4, 256, target_dim)
    assert jnp.allclose(out_big, _reference(x_big, w1, b1, w2, b2), atol=5e-2, rtol=5e-2)

    print("KERNEL_OK")
</pallas_src>

<mosaic_0001>
module attributes {stable_mosaic.version = 11 : i64} {
  func.func @_mlp_kernel(%arg0: i32, %arg1: memref<8x768xf32, #tpu.memory_space<vmem>>, %arg2: memref<768x1024xbf16, #tpu.memory_space<vmem>>, %arg3: memref<1x1024xf32, #tpu.memory_space<vmem>>, %arg4: memref<1024x2048xbf16, #tpu.memory_space<vmem>>, %arg5: memref<1x2048xf32, #tpu.memory_space<vmem>>, %arg6: memref<8x2048xf32, #tpu.memory_space<vmem>>) attributes {dimension_semantics = [#tpu.dimension_semantics<parallel>], iteration_bounds = array<i64: 2>, scalar_prefetch = 0 : i64, scratch_operands = 0 : i64, tpu.core_type = #tpu.core_type<tc>, window_params = [{transform_indices = @transform_0, window_bounds = array<i64: 8, 768>}, {pipeline_mode = #tpu.pipeline_mode<synchronous>, transform_indices = @transform_1, window_bounds = array<i64: 768, 1024>}, {pipeline_mode = #tpu.pipeline_mode<synchronous>, transform_indices = @transform_2, window_bounds = array<i64: 1, 1024>}, {pipeline_mode = #tpu.pipeline_mode<synchronous>, transform_indices = @transform_3, window_bounds = array<i64: 1024, 2048>}, {pipeline_mode = #tpu.pipeline_mode<synchronous>, transform_indices = @transform_4, window_bounds = array<i64: 1, 2048>}, {transform_indices = @transform_5, window_bounds = array<i64: 8, 2048>}]} {
    %c0 = arith.constant 0 : index
    %c0_0 = arith.constant 0 : index
    %0 = vector.load %arg1[%c0, %c0_0] : memref<8x768xf32, #tpu.memory_space<vmem>>, vector<8x768xf32>
    %1 = arith.truncf %0 : vector<8x768xf32> to vector<8x768xbf16>
    %cst = arith.constant 0.000000e+00 : f32
    %2 = vector.broadcast %cst : f32 to vector<8x2048xf32>
    %c0_1 = arith.constant 0 : index
    %c0_2 = arith.constant 0 : index
    %3 = vector.load %arg2[%c0_1, %c0_2] : memref<768x1024xbf16, #tpu.memory_space<vmem>>, vector<768x512xbf16>
    %cst_3 = arith.constant dense<0.000000e+00> : vector<8x512xf32>
    %4 = tpu.matmul %1, %3, %cst_3 {dimension_numbers = #tpu.dot_dimension_numbers<[1], [0], [0], [1], [0, 0, 1, 1], [], []>} : vector<8x768xbf16>, vector<768x512xbf16>, vector<8x512xf32> -> vector<8x512xf32>
    %c0_4 = arith.constant 0 : index
    %c0_5 = arith.constant 0 : index
    %5 = vector.load %arg3[%c0_4, %c0_5] : memref<1x1024xf32, #tpu.memory_space<vmem>>, vector<1x512xf32>
    %6 = vector.broadcast %5 : vector<1x512xf32> to vector<8x512xf32>
    %7 = arith.addf %4, %6 : vector<8x512xf32>
    %cst_6 = arith.constant 0.000000e+00 : f32
    %8 = vector.broadcast %cst_6 : f32 to vector<8x512xf32>
    %9 = arith.maximumf %7, %8 : vector<8x512xf32>
    %10 = arith.truncf %9 : vector<8x512xf32> to vector<8x512xbf16>
    %c0_7 = arith.constant 0 : index
    %c0_8 = arith.constant 0 : index
    %11 = vector.load %arg4[%c0_7, %c0_8] : memref<1024x2048xbf16, #tpu.memory_space<vmem>>, vector<512x2048xbf16>
    %cst_9 = arith.constant dense<0.000000e+00> : vector<8x2048xf32>
    %12 = tpu.matmul %10, %11, %cst_9 {dimension_numbers = #tpu.dot_dimension_numbers<[1], [0], [0], [1], [0, 0, 1, 1], [], []>} : vector<8x512xbf16>, vector<512x2048xbf16>, vector<8x2048xf32> -> vector<8x2048xf32>
    %13 = arith.addf %2, %12 : vector<8x2048xf32>
    %c0_10 = arith.constant 0 : index
    %c512 = arith.constant 512 : index
    %14 = vector.load %arg2[%c0_10, %c512] : memref<768x1024xbf16, #tpu.memory_space<vmem>>, vector<768x512xbf16>
    %cst_11 = arith.constant dense<0.000000e+00> : vector<8x512xf32>
    %15 = tpu.matmul %1, %14, %cst_11 {dimension_numbers = #tpu.dot_dimension_numbers<[1], [0], [0], [1], [0, 0, 1, 1], [], []>} : vector<8x768xbf16>, vector<768x512xbf16>, vector<8x512xf32> -> vector<8x512xf32>
    %c0_12 = arith.constant 0 : index
    %c512_13 = arith.constant 512 : index
    %16 = vector.load %arg3[%c0_12, %c512_13] : memref<1x1024xf32, #tpu.memory_space<vmem>>, vector<1x512xf32>
    %17 = vector.broadcast %16 : vector<1x512xf32> to vector<8x512xf32>
    %18 = arith.addf %15, %17 : vector<8x512xf32>
    %cst_14 = arith.constant 0.000000e+00 : f32
    %19 = vector.broadcast %cst_14 : f32 to vector<8x512xf32>
    %20 = arith.maximumf %18, %19 : vector<8x512xf32>
    %21 = arith.truncf %20 : vector<8x512xf32> to vector<8x512xbf16>
    %c512_15 = arith.constant 512 : index
    %c0_16 = arith.constant 0 : index
    %22 = vector.load %arg4[%c512_15, %c0_16] : memref<1024x2048xbf16, #tpu.memory_space<vmem>>, vector<512x2048xbf16>
    %cst_17 = arith.constant dense<0.000000e+00> : vector<8x2048xf32>
    %23 = tpu.matmul %21, %22, %cst_17 {dimension_numbers = #tpu.dot_dimension_numbers<[1], [0], [0], [1], [0, 0, 1, 1], [], []>} : vector<8x512xbf16>, vector<512x2048xbf16>, vector<8x2048xf32> -> vector<8x2048xf32>
    %24 = arith.addf %13, %23 : vector<8x2048xf32>
    %c0_18 = arith.constant 0 : index
    %c0_19 = arith.constant 0 : index
    %25 = vector.load %arg5[%c0_18, %c0_19] : memref<1x2048xf32, #tpu.memory_space<vmem>>, vector<1x2048xf32>
    %26 = vector.broadcast %25 : vector<1x2048xf32> to vector<8x2048xf32>
    %27 = arith.addf %24, %26 : vector<8x2048xf32>
    %c0_20 = arith.constant 0 : index
    %c0_21 = arith.constant 0 : index
    %28 = vector.load %arg6[%c0_20, %c0_21] : memref<8x2048xf32, #tpu.memory_space<vmem>>, vector<8x2048xf32>
    tpu.vector_store %arg6[%c0_20, %c0_21], %27 {strides = array<i32>} : memref<8x2048xf32, #tpu.memory_space<vmem>>, vector<8x2048xf32>,
    return
  }
  func.func @transform_0(%arg0: i32) -> (i32, i32) {
    %c0_i32 = arith.constant 0 : i32
    %c0_i32_0 = arith.constant 0 : i32
    return %arg0, %c0_i32 : i32, i32
  }
  func.func @transform_1(%arg0: i32) -> (i32, i32) {
    %c0_i32 = arith.constant 0 : i32
    %c0_i32_0 = arith.constant 0 : i32
    %c0_i32_1 = arith.constant 0 : i32
    return %c0_i32, %c0_i32_0 : i32, i32
  }
  func.func @transform_2(%arg0: i32) -> (i32, i32) {
    %c0_i32 = arith.constant 0 : i32
    %c0_i32_0 = arith.constant 0 : i32
    %c0_i32_1 = arith.constant 0 : i32
    return %c0_i32, %c0_i32_0 : i32, i32
  }
  func.func @transform_3(%arg0: i32) -> (i32, i32) {
    %c0_i32 = arith.constant 0 : i32
    %c0_i32_0 = arith.constant 0 : i32
    %c0_i32_1 = arith.constant 0 : i32
    return %c0_i32, %c0_i32_0 : i32, i32
  }
  func.func @transform_4(%arg0: i32) -> (i32, i32) {
    %c0_i32 = arith.constant 0 : i32
    %c0_i32_0 = arith.constant 0 : i32
    %c0_i32_1 = arith.constant 0 : i32
    return %c0_i32, %c0_i32_0 : i32, i32
  }
  func.func @transform_5(%arg0: i32) -> (i32, i32) {
    %c0_i32 = arith.constant 0 : i32
    %c0_i32_0 = arith.constant 0 : i32
    return %arg0, %c0_i32 : i32, i32
  }
}

</mosaic_0001>

<bundles_post_ra>
// kernel: bio_to_text_projection.1
= control target key start
LH: loop header
LB: loop body
LE: loop exit
PB: predicated region body
PF: predicated region fallthrough
CT: control target
= control target key end

     0   :  { %10 = vsyncpa [#allocation3], 0  ;;  %s27434_s0 = inlined_call_operand.vmem [shape: f32[16,768], index: 0, kind: input, shape index: {}]   ;;  %s27435_s1 = inlined_call_operand.vmem [shape: bf16[768,1024], index: 1, kind: input, shape index: {}]   ;;  %s27436_s2 = inlined_call_operand.vmem [shape: f32[1,1024], index: 2, kind: input, shape index: {}]   ;;  %s27437_s3 = inlined_call_operand.vmem [shape: bf16[1024,2048], index: 3, kind: input, shape index: {}]   ;;  %s27438_s4 = inlined_call_operand.vmem [shape: f32[1,2048], index: 4, kind: input, shape index: {}]   ;;  %s27439_s5 = inlined_call_operand.hbm [shape: f32[16,2048], index: 5, kind: output, shape index: {}]  }
   0x1   :  { %12 = vsyncpa [#allocation3 + $0x1], 0  ;;  %s18339_s18 = smov 0   ;;  %s18341_s19 = smov 0  }
   0x2   :  { %s18343_s20 = smov 0   ;;  %s18345_s21 = smov 0  }
   0x3 LB: > { %s18360_s22 = sadd.s32 4294967295, %s18307_s21   ;;  %s11151_s23 = sadd.s32 4294967294, %s18307_s21   ;;  %s18307_s21 = sphi %s18345_s21, %s27445_s21   ;;  %s18303_s20 = sphi %s18343_s20, %s27444_s20   ;;  %s18299_s19 = sphi %s18341_s19, %s27443_s19   ;;  %s18295_s18 = sphi %s18339_s18, %s27442_s18  }
   0x4   : > { %s18364_s24 = sadd.s32 1, %s18307_s21   ;;  %s135_s25 = sadd.s32 1, %s18303_s20 }
   0x5   : > { %s132_s26 = ssub.s32 %s18307_s21, %s18364_s24  ;;  %p145_p0 = scmp.ne.s32.totalorder %s18303_s20, %s18299_s19 }
   0x6   : > { %p133_p1 = scmp.eq.s32.totalorder %s132_s26, 0  ;;  %p146_p2 = scmp.eq.s32.totalorder %s18360_s22, 1 }
   0x7   : > { %p151_p3 = scmp.ne.s32.totalorder %s18299_s19, %s18295_s18  ;;  %p152_p4 = scmp.eq.s32.totalorder %s11151_s23, 1 }
   0x8   : > { %s18375_s27 = scalar_select %p133_p1, %s18303_s20, %s135_s25  }
   0x9   : > { %p18377_p5 = por %p146_p2, %p145_p0  ;;  %p18381_p6 = por %p152_p4, %p151_p3 }
   0xa   : > { %p11154_p7 = scmp.ge.s32.totalorder %s18307_s21, 1  ;;  %p190_p8 = scmp.lt.s32.totalorder %s18307_s21, 3 }
   0xc   : > { %p191_p9 = pnand %p11154_p7, %p190_p8 }
   0xd   : > { %p218_p10 = scmp.lt.s32.totalorder (!%p191_p9), %s18360_s22, 1  ;;  %s18202_s8 = sshll.u32 (!%p191_p9), %s18360_s22, 7 }
   0xe   : > { %194 = sbr.rel (%p191_p9) target bundleno = 1722 (0x6ba), region = 40  ;;  %s11087_s12 = scalar_lea.hbm (!%p191_p9), %s27439_s5, %s18202_s8 }
   0xf   : > { %s11091_s15 = sshll.u32 (!%p191_p9), %s11087_s12, 4  ;;  %s11092_s15 = int_to_ptr.hbm [resolvable:$true] %s11091_s15 }
  0x10   : > { %s18259_s23 = sshra.s32 (!%p191_p9), %s11092_s15, 4  ;;  %s18260_s23 = int_to_ptr.hbm [resolvable:$true] %s18259_s23 }
  0x11   : > { %p18266_p0 = scmp.lt.s32.totalorder (!%p191_p9), %s18260_s23, %s27439_s5 }
  0x13   : > { %v11271_v0 = vld [vmem:[%s27435_s1 + $0x1c0] sm:$0xf]  ;;  %s219_s17 = scalar_select %p218_p10, %s18360_s22, 1 }
  0x14   : > { %v16824_v1 = vld [vmem:[%s27435_s1 + $0x1dc] sm:$0xf0]  ;;  %s18261_s22 = scalar_lea.hbm %s18260_s23, 128 }
  0x15   : > { %v11399_v2 = vld [vmem:[%s27435_s1 + $0x3c0] sm:$0xf]  ;;  %v11272_v3 = vor.u32 %v16824_v1, %v11271_v0  ;;  %s18203_s10 = smul.u32 48, %s219_s17  ;;  %p18262_p11 = scmp.ne.s32.totalorder %s18260_s23, %s18261_s22 }
  0x16   : > { %v16856_v4 = vld [vmem:[%s27435_s1 + $0x3dc] sm:$0xf0] }
  0x17   : > { %v11527_v5 = vld [vmem:[%s27435_s1 + $0x5c0] sm:$0xf]  ;;  %v11400_v7 = vor.u32 %v16856_v4, %v11399_v2  ;;  %1397 = vmatpush.bf16.msra.mxu0 %v11272_v3  ;;  %s18704_s9 = scalar_lea.vmem %s27434_s0, %s18203_s10  ;;  %p18263_p12 = pnand %p18262_p11, %p18377_p5 }
  0x18   : > { %v16888_v6 = vld [vmem:[%s27435_s1 + $0x5dc] sm:$0xf0] }
  0x19   : > { %v11528_v8 = vor.u32 %v16888_v6, %v11527_v5  ;;  %v11655_v9 = vld [vmem:[%s27435_s1 + $0x7c0] sm:$0xf]  ;;  %1410 = vmatpush.bf16.msra.mxu1 %v11400_v7  ;;  %p18264_p13 = pneg %p18263_p12 }
  0x1a   : > { %v16920_v10 = vld [vmem:[%s27435_s1 + $0x7dc] sm:$0xf0] }
  0x1b   : > { %v11255_v11 = vld [vmem:[%s27435_s1 + $0x180] sm:$0xf]  ;;  %v11656_v12 = vor.u32 %v16920_v10, %v11655_v9  ;;  %1423 = vmatpush.bf16.msra.mxu2 %v11528_v8 }
  0x1c   : > { %v16820_v13 = vld [vmem:[%s27435_s1 + $0x19c] sm:$0xf0] }
  0x1d   : > { %v11383_v14 = vld [vmem:[%s27435_s1 + $0x380] sm:$0xf]  ;;  %v11256_v16 = vor.u32 %v16820_v13, %v11255_v11  ;;  %1436 = vmatpush.bf16.msra.mxu3 %v11656_v12 }
  0x1e   : > { %v16852_v15 = vld [vmem:[%s27435_s1 + $0x39c] sm:$0xf0] }
  0x1f   : > { %v11384_v17 = vor.u32 %v16852_v15, %v11383_v14  ;;  %v11511_v18 = vld [vmem:[%s27435_s1 + $0x580] sm:$0xf]  ;;  %1398 = vmatpush.bf16.msra.mxu0 %v11256_v16 }
  0x20   : > { %v16884_v19 = vld [vmem:[%s27435_s1 + $0x59c] sm:$0xf0] }
  0x21   : > { %v11639_v20 = vld [vmem:[%s27435_s1 + $0x780] sm:$0xf]  ;;  %v11512_v21 = vor.u32 %v16884_v19, %v11511_v18  ;;  %1411 = vmatpush.bf16.msra.mxu1 %v11384_v17 }
  0x22   : > { %v16916_v22 = vld [vmem:[%s27435_s1 + $0x79c] sm:$0xf0] }
  0x23   : > { %v11239_v23 = vld [vmem:[%s27435_s1 + $0x140] sm:$0xf]  ;;  %v11640_v25 = vor.u32 %v16916_v22, %v11639_v20  ;;  %1424 = vmatpush.bf16.msra.mxu2 %v11512_v21 }
  0x24   : > { %v16816_v24 = vld [vmem:[%s27435_s1 + $0x15c] sm:$0xf0] }
  0x25   : > { %v11367_v26 = vld [vmem:[%s27435_s1 + $0x340] sm:$0xf]  ;;  %v11240_v29 = vor.u32 %v16816_v24, %v11239_v23  ;;  %1437 = vmatpush.bf16.msra.mxu3 %v11640_v25 }
  0x26   : > { %v16848_v27 = vld [vmem:[%s27435_s1 + $0x35c] sm:$0xf0] }
  0x27   : > { %v11495_v28 = vld [vmem:[%s27435_s1 + $0x540] sm:$0xf]  ;;  %v11368_v33 = vor.u32 %v16848_v27, %v11367_v26  ;;  %1399 = vmatpush.bf16.msra.mxu0 %v11240_v29 }
  0x28   : > { %v16880_v30 = vld [vmem:[%s27435_s1 + $0x55c] sm:$0xf0] }
  0x29   : > { %v11623_v31 = vld [vmem:[%s27435_s1 + $0x740] sm:$0xf]  ;;  %v11496_v34 = vor.u32 %v16880_v30, %v11495_v28  ;;  %1412 = vmatpush.bf16.msra.mxu1 %v11368_v33  ;;  %v16822_v33 = vld [vmem:[%s27435_s1 + $0x1c4] sm:$0xf] }
  0x2a   : > { %v16912_v32 = vld [vmem:[%s27435_s1 + $0x75c] sm:$0xf0] }
  0x2b   : > { %v11223_v35 = vld [vmem:[%s27435_s1 + $0x100] sm:$0xf]  ;;  %v11624_v38 = vor.u32 %v16912_v32, %v11623_v31  ;;  %1425 = vmatpush.bf16.msra.mxu2 %v11496_v34  ;;  %v11273_v34 = vld [vmem:[%s27435_s1 + $0x1e0] sm:$0xf0] }
  0x2c   : > { %v16812_v36 = vld [vmem:[%s27435_s1 + $0x11c] sm:$0xf0] }
  0x2d   : > { %v11351_v37 = vld [vmem:[%s27435_s1 + $0x300] sm:$0xf]  ;;  %v11224_v44 = vor.u32 %v16812_v36, %v11223_v35  ;;  %1438 = vmatpush.bf16.msra.mxu3 %v11624_v38  ;;  %v11401_v38 = vld [vmem:[%s27435_s1 + $0x3e0] sm:$0xf0] }
  0x2e   : > { %v16844_v39 = vld [vmem:[%s27435_s1 + $0x31c] sm:$0xf0] }
  0x2f   : > { %v11479_v40 = vld [vmem:[%s27435_s1 + $0x500] sm:$0xf]  ;;  %v11352_v45 = vor.u32 %v16844_v39, %v11351_v37  ;;  %1400 = vmatpush.bf16.msra.mxu0 %v11224_v44  ;;  %v16854_v37 = vld [vmem:[%s27435_s1 + $0x3c4] sm:$0xf] }
  0x30   : > { %v16876_v41 = vld [vmem:[%s27435_s1 + $0x51c] sm:$0xf0] }
  0x31   : > { %v11607_v42 = vld [vmem:[%s27435_s1 + $0x700] sm:$0xf]  ;;  %v11480_v46 = vor.u32 %v16876_v41, %v11479_v40  ;;  %1413 = vmatpush.bf16.msra.mxu1 %v11352_v45 }
  0x32   : > { %v16908_v43 = vld [vmem:[%s27435_s1 + $0x71c] sm:$0xf0] }
  0x33   : > { %v11207_v47 = vld [vmem:[%s27435_s1 + $0xc0] sm:$0xf]  ;;  %v11608_v50 = vor.u32 %v16908_v43, %v11607_v42  ;;  %1426 = vmatpush.bf16.msra.mxu2 %v11480_v46  ;;  %v11276_v42 = vor.u32 %v16822_v33, %v11273_v34  ;;  %v11404_v46 = vor.u32 %v16854_v37, %v11401_v38 }
  0x34   : > { %v16808_v48 = vld [vmem:[%s27435_s1 + $0xdc] sm:$0xf0] }
  0x35   : > { %v11335_v49 = vld [vmem:[%s27435_s1 + $0x2c0] sm:$0xf]  ;;  %v11208_v56 = vor.u32 %v16808_v48, %v11207_v47  ;;  %1439 = vmatpush.bf16.msra.mxu3 %v11608_v50  ;;  %v16818_v48 = vld [vmem:[%s27435_s1 + $0x184] sm:$0xf] }
  0x36   : > { %v16840_v51 = vld [vmem:[%s27435_s1 + $0x2dc] sm:$0xf0]  ;;  %v16850_v50 = vld [vmem:[%s27435_s1 + $0x384] sm:$0xf] }
  0x37   : > { %v11463_v52 = vld [vmem:[%s27435_s1 + $0x4c0] sm:$0xf]  ;;  %v11336_v57 = vor.u32 %v16840_v51, %v11335_v49  ;;  %1401 = vmatpush.bf16.msra.mxu0 %v11208_v56  ;;  %v11257_v49 = vld [vmem:[%s27435_s1 + $0x1a0] sm:$0xf0] }
  0x38   : > { %v16872_v53 = vld [vmem:[%s27435_s1 + $0x4dc] sm:$0xf0]  ;;  %v11385_v51 = vld [vmem:[%s27435_s1 + $0x3a0] sm:$0xf0] }
  0x39   : > { %v11591_v54 = vld [vmem:[%s27435_s1 + $0x6c0] sm:$0xf]  ;;  %v11464_v58 = vor.u32 %v16872_v53, %v11463_v52  ;;  %1414 = vmatpush.bf16.msra.mxu1 %v11336_v57 }
  0x3a   : > { %v16904_v55 = vld [vmem:[%s27435_s1 + $0x6dc] sm:$0xf0] }
  0x3b   : > { %v11191_v59 = vld [vmem:[%s27435_s1 + $0x80] sm:$0xf]  ;;  %v11592_v62 = vor.u32 %v16904_v55, %v11591_v54  ;;  %1427 = vmatpush.bf16.msra.mxu2 %v11464_v58  ;;  %v11260_v54 = vor.u32 %v16818_v48, %v11257_v49  ;;  %v11388_v58 = vor.u32 %v16850_v50, %v11385_v51 }
  0x3c   : > { %v16804_v60 = vld [vmem:[%s27435_s1 + $0x9c] sm:$0xf0] }
  0x3d   : > { %v11319_v61 = vld [vmem:[%s27435_s1 + $0x280] sm:$0xf]  ;;  %v11192_v4 = vor.u32 %v16804_v60, %v11191_v59  ;;  %1440 = vmatpush.bf16.msra.mxu3 %v11592_v62  ;;  %v16814_v60 = vld [vmem:[%s27435_s1 + $0x144] sm:$0xf] }
  0x3e   : > { %v16836_v63 = vld [vmem:[%s27435_s1 + $0x29c] sm:$0xf0]  ;;  %v16846_v62 = vld [vmem:[%s27435_s1 + $0x344] sm:$0xf] }
  0x3f   : > { %v11447_v0 = vld [vmem:[%s27435_s1 + $0x480] sm:$0xf]  ;;  %v11320_v5 = vor.u32 %v16836_v63, %v11319_v61  ;;  %1402 = vmatpush.bf16.msra.mxu0 %v11192_v4  ;;  %v11241_v61 = vld [vmem:[%s27435_s1 + $0x160] sm:$0xf0] }
  0x40   : > { %v16868_v1 = vld [vmem:[%s27435_s1 + $0x49c] sm:$0xf0]  ;;  %v11369_v63 = vld [vmem:[%s27435_s1 + $0x360] sm:$0xf0] }
  0x41   : > { %v11575_v2 = vld [vmem:[%s27435_s1 + $0x680] sm:$0xf]  ;;  %v11448_v6 = vor.u32 %v16868_v1, %v11447_v0  ;;  %1415 = vmatpush.bf16.msra.mxu1 %v11320_v5 }
  0x42   : > { %v16900_v3 = vld [vmem:[%s27435_s1 + $0x69c] sm:$0xf0] }
  0x43   : > { %v11175_v7 = vld [vmem:[%s27435_s1 + $0x40] sm:$0xf]  ;;  %v11576_v10 = vor.u32 %v16900_v3, %v11575_v2  ;;  %1428 = vmatpush.bf16.msra.mxu2 %v11448_v6  ;;  %v11244_v3 = vor.u32 %v16814_v60, %v11241_v61 }
  0x44   : > { %v16800_v8 = vld [vmem:[%s27435_s1 + $0x5c] sm:$0xf0] }
  0x45   : > { %v11303_v9 = vld [vmem:[%s27435_s1 + $0x240] sm:$0xf]  ;;  %v11176_v16 = vor.u32 %v16800_v8, %v11175_v7  ;;  %1441 = vmatpush.bf16.msra.mxu3 %v11576_v10  ;;  %v11372_v7 = vor.u32 %v16846_v62, %v11369_v63  ;;  %v16810_v8 = vld [vmem:[%s27435_s1 + $0x104] sm:$0xf] }
  0x46   : > { %v16832_v11 = vld [vmem:[%s27435_s1 + $0x25c] sm:$0xf0]  ;;  %v16842_v10 = vld [vmem:[%s27435_s1 + $0x304] sm:$0xf] }
  0x47   : > { %v11431_v12 = vld [vmem:[%s27435_s1 + $0x440] sm:$0xf]  ;;  %v11304_v19 = vor.u32 %v16832_v11, %v11303_v9  ;;  %1403 = vmatpush.bf16.msra.mxu0 %v11176_v16  ;;  %v11225_v9 = vld [vmem:[%s27435_s1 + $0x120] sm:$0xf0] }
  0x48   : > { %v16864_v13 = vld [vmem:[%s27435_s1 + $0x45c] sm:$0xf0]  ;;  %v11353_v11 = vld [vmem:[%s27435_s1 + $0x320] sm:$0xf0]  ;;  %v11228_v16 = vor.u32 %v16810_v8, %v11225_v9 }
  0x49   : > { %v11559_v14 = vld [vmem:[%s27435_s1 + $0x640] sm:$0xf]  ;;  %v11432_v20 = vor.u32 %v16864_v13, %v11431_v12  ;;  %1416 = vmatpush.bf16.msra.mxu1 %v11304_v19  ;;  %v16806_v19 = vld [vmem:[%s27435_s1 + $0xc4] sm:$0xf] }
  0x4a   : > { %v16896_v15 = vld [vmem:[%s27435_s1 + $0x65c] sm:$0xf0]  ;;  %v16794_v63 = vld [vmem:[%s27435_s1 + $0x4] sm:$0xf] }
  0x4b   : > { %v11159_v17 = vld [vmem:[%s27435_s1] sm:$0xf]  ;;  %v11560_v24 = vor.u32 %v16896_v15, %v11559_v14  ;;  %1429 = vmatpush.bf16.msra.mxu2 %v11432_v20  ;;  %v11356_v20 = vor.u32 %v16842_v10, %v11353_v11  ;;  %v11657_v8 = vld [vmem:[%s27435_s1 + $0x7e0] sm:$0xf0] }
  0x4c   : > { %v16796_v18 = vld [vmem:[%s27435_s1 + $0x1c] sm:$0xf0]  ;;  %v16950_v9 = vld [vmem:[%s27435_s1 + $0x9c4] sm:$0xf] }
  0x4d   : > { %v11287_v21 = vld [vmem:[%s27435_s1 + $0x200] sm:$0xf]  ;;  %v11160_v31 = vor.u32 %v16796_v18, %v11159_v17  ;;  %1442 = vmatpush.bf16.msra.mxu3 %v11560_v24  ;;  %v225_v24 = vld [vmem:[%s18704_s9 + $0x10] sm:$0xff]  ;;  %v11785_v10 = vld [vmem:[%s27435_s1 + $0x9e0] sm:$0xf0] }
  0x4e   : > { %v16828_v22 = vld [vmem:[%s27435_s1 + $0x21c] sm:$0xf0] }
  0x4f   : > { %v11415_v23 = vld [vmem:[%s27435_s1 + $0x400] sm:$0xf]  ;;  %v11288_v35 = vor.u32 %v16828_v22, %v11287_v21  ;;  %1404 = vmatpush.bf16.msra.mxu0 %v11160_v31  ;;  %v11209_v21 = vld [vmem:[%s27435_s1 + $0xe0] sm:$0xf0]  ;;  %v224_v31 = vld [vmem:[%s18704_s9 + $0x8] sm:$0xff] }
  0x50   : > { %v16860_v25 = vld [vmem:[%s27435_s1 + $0x41c] sm:$0xf0]  ;;  %v16838_v22 = vld [vmem:[%s27435_s1 + $0x2c4] sm:$0xf]  ;;  %v11212_v33 = vor.u32 %v16806_v19, %v11209_v21  ;;  %v18725_v37 = vpack.c.bf16 %v224_v31, %v224_v31 }
  0x51   : > { %v11543_v26 = vld [vmem:[%s27435_s1 + $0x600] sm:$0xf]  ;;  %v11416_v36 = vor.u32 %v16860_v25, %v11415_v23  ;;  %1417 = vmatpush.bf16.msra.mxu1 %v11288_v35  ;;  %v11337_v23 = vld [vmem:[%s27435_s1 + $0x2e0] sm:$0xf0] }
  0x52   : > { %v16892_v27 = vld [vmem:[%s27435_s1 + $0x61c] sm:$0xf0]  ;;  %v11340_v38 = vor.u32 %v16838_v22, %v11337_v23  ;;  %v16882_v21 = vld [vmem:[%s27435_s1 + $0x584] sm:$0xf] }
  0x53   : > { %v11783_v28 = vld [vmem:[%s27435_s1 + $0x9c0] sm:$0xf]  ;;  %v11544_v39 = vor.u32 %v16892_v27, %v11543_v26  ;;  %1430 = vmatpush.bf16.msra.mxu2 %v11416_v36  ;;  %v226_v26 = vld [vmem:[%s18704_s9 + $0x18] sm:$0xff]  ;;  %v11513_v22 = vld [vmem:[%s27435_s1 + $0x5a0] sm:$0xf0] }
  0x54   : > { %v16952_v29 = vld [vmem:[%s27435_s1 + $0x9dc] sm:$0xf0]  ;;  %1418 = vmatmul.bf16.vlgmr.msra.gmra.mxu1 %v18725_v37  ;;  %v16914_v23 = vld [vmem:[%s27435_s1 + $0x784] sm:$0xf] }
  0x55   : > { %v11911_v30 = vld [vmem:[%s27435_s1 + $0xbc0] sm:$0xf]  ;;  %v11784_v40 = vor.u32 %v16952_v29, %v11783_v28  ;;  %1443 = vmatpush.bf16.msra.mxu3 %v11544_v39  ;;  %v18709_v28 = vpack.c.bf16 %v225_v24, %v225_v24 }
  0x56   : > { %v16984_v32 = vld [vmem:[%s27435_s1 + $0xbdc] sm:$0xf0] }
  0x57   : > { %v11912_v41 = vor.u32 %v16984_v32, %v11911_v30  ;;  %v11767_v43 = vld [vmem:[%s27435_s1 + $0x980] sm:$0xf]  ;;  %1449 = vmatpush.bf16.msrb.mxu0 %v11784_v40  ;;  %1475 = vmatpush.bf16.msrb.mxu2 %v11276_v42  ;;  %v18713_v30 = vpack.c.bf16 %v226_v26, %v226_v26  ;;  %v16802_v40 = vld [vmem:[%s27435_s1 + $0x84] sm:$0xf] }
  0x58   : > { %v16948_v44 = vld [vmem:[%s27435_s1 + $0x99c] sm:$0xf0]  ;;  %1431 = vmatmul.bf16.vlgmr.msra.gmra.mxu2 %v18709_v28  ;;  %v16834_v42 = vld [vmem:[%s27435_s1 + $0x284] sm:$0xf] }
  0x59   : > { %v11895_v45 = vld [vmem:[%s27435_s1 + $0xb80] sm:$0xf]  ;;  %v11768_v52 = vor.u32 %v16948_v44, %v11767_v43  ;;  %1462 = vmatpush.bf16.msrb.mxu1 %v11912_v41  ;;  %1488 = vmatpush.bf16.msrb.mxu3 %v11404_v46  ;;  %v11193_v41 = vld [vmem:[%s27435_s1 + $0xa0] sm:$0xf0] }
  0x5a   : > { %v16980_v47 = vld [vmem:[%s27435_s1 + $0xb9c] sm:$0xf0]  ;;  %v11321_v43 = vld [vmem:[%s27435_s1 + $0x2a0] sm:$0xf0]  ;;  %1444 = vmatmul.bf16.vlgmr.msra.gmra.mxu3 %v18713_v30  ;;  %v11196_v46 = vor.u32 %v16802_v40, %v11193_v41 }
  0x5b   : > { %v11896_v53 = vor.u32 %v16980_v47, %v11895_v45  ;;  %v11751_v55 = vld [vmem:[%s27435_s1 + $0x940] sm:$0xf]  ;;  %1450 = vmatpush.bf16.msrb.mxu0 %v11768_v52  ;;  %1476 = vmatpush.bf16.msrb.mxu2 %v11260_v54  ;;  %v11324_v50 = vor.u32 %v16834_v42, %v11321_v43  ;;  %v16798_v52 = vld [vmem:[%s27435_s1 + $0x44] sm:$0xf] }
  0x5c   : > { %v16944_v56 = vld [vmem:[%s27435_s1 + $0x95c] sm:$0xf0]  ;;  %v16830_v54 = vld [vmem:[%s27435_s1 + $0x244] sm:$0xf] }
  0x5d   : > { %v11879_v57 = vld [vmem:[%s27435_s1 + $0xb40] sm:$0xf]  ;;  %v11752_v0 = vor.u32 %v16944_v56, %v11751_v55  ;;  %1463 = vmatpush.bf16.msrb.mxu1 %v11896_v53  ;;  %1489 = vmatpush.bf16.msrb.mxu3 %v11388_v58  ;;  %v11177_v53 = vld [vmem:[%s27435_s1 + $0x60] sm:$0xf0] }
  0x5e   : > { %v16976_v59 = vld [vmem:[%s27435_s1 + $0xb5c] sm:$0xf0]  ;;  %v11305_v55 = vld [vmem:[%s27435_s1 + $0x260] sm:$0xf0]  ;;  %v11180_v60 = vor.u32 %v16798_v52, %v11177_v53 }
  0x5f   : > { %v11735_v1 = vld [vmem:[%s27435_s1 + $0x900] sm:$0xf]  ;;  %v11880_v2 = vor.u32 %v16976_v59, %v11879_v57  ;;  %1451 = vmatpush.bf16.msrb.mxu0 %v11752_v0  ;;  %1477 = vmatpush.bf16.msrb.mxu2 %v11244_v3  ;;  %v11308_v0 = vor.u32 %v16830_v54, %v11305_v55  ;;  %v11289_v3 = vld [vmem:[%s27435_s1 + $0x220] sm:$0xf0] }
  0x60   : > { %v16940_v4 = vld [vmem:[%s27435_s1 + $0x91c] sm:$0xf0]  ;;  %v16946_v26 = vld [vmem:[%s27435_s1 + $0x984] sm:$0xf] }
  0x61   : > { %v11863_v5 = vld [vmem:[%s27435_s1 + $0xb00] sm:$0xf]  ;;  %v11736_v12 = vor.u32 %v16940_v4, %v11735_v1  ;;  %1464 = vmatpush.bf16.msrb.mxu1 %v11880_v2  ;;  %1490 = vmatpush.bf16.msrb.mxu3 %v11372_v7  ;;  %v11161_v1 = vld [vmem:[%s27435_s1 + $0x20] sm:$0xf0] }
  0x62   : > { %v16972_v6 = vld [vmem:[%s27435_s1 + $0xb1c] sm:$0xf0]  ;;  %v16826_v2 = vld [vmem:[%s27435_s1 + $0x204] sm:$0xf] }
  0x63   : > { %v11719_v13 = vld [vmem:[%s27435_s1 + $0x8c0] sm:$0xf]  ;;  %v11864_v15 = vor.u32 %v16972_v6, %v11863_v5  ;;  %1452 = vmatpush.bf16.msrb.mxu0 %v11736_v12  ;;  %1478 = vmatpush.bf16.msrb.mxu2 %v11228_v16  ;;  %v16886_v4 = vld [vmem:[%s27435_s1 + $0x5c4] sm:$0xf]  ;;  %v11164_v12 = vor.u32 %v16794_v63, %v11161_v1  ;;  %v11292_v16 = vor.u32 %v16826_v2, %v11289_v3 }
  0x64   : > { %v16936_v14 = vld [vmem:[%s27435_s1 + $0x8dc] sm:$0xf0]  ;;  %v11529_v5 = vld [vmem:[%s27435_s1 + $0x5e0] sm:$0xf0] }
  0x65   : > { %v11847_v17 = vld [vmem:[%s27435_s1 + $0xac0] sm:$0xf]  ;;  %v11720_v27 = vor.u32 %v16936_v14, %v11719_v13  ;;  %1465 = vmatpush.bf16.msrb.mxu1 %v11864_v15  ;;  %1491 = vmatpush.bf16.msrb.mxu3 %v11356_v20  ;;  %v16918_v6 = vld [vmem:[%s27435_s1 + $0x7c4] sm:$0xf]  ;;  %v11788_v20 = vor.u32 %v16950_v9, %v11785_v10 }
  0x66   : > { %v16968_v18 = vld [vmem:[%s27435_s1 + $0xadc] sm:$0xf0]  ;;  %v16982_v13 = vld [vmem:[%s27435_s1 + $0xbc4] sm:$0xf]  ;;  %v11660_v19 = vor.u32 %v16918_v6, %v11657_v8 }
  0x67   : > { %v223_v25 = vld [vmem:[%s18704_s9] sm:$0xff]  ;;  %v11848_v32 = vor.u32 %v16968_v18, %v11847_v17  ;;  %1453 = vmatpush.bf16.msrb.mxu0 %v11720_v27  ;;  %1479 = vmatpush.bf16.msrb.mxu2 %v11212_v33  ;;  %v11532_v17 = vor.u32 %v16886_v4, %v11529_v5  ;;  %v228_v18 = vld [vmem:[%s18704_s9 + $0x28] sm:$0xff] }
  0x68   : > { %v18711_v29 = vpack.c.bf16 %v223_v25, %v223_v25  ;;  %v11703_v34 = vld [vmem:[%s27435_s1 + $0x880] sm:$0xf]  ;;  %v11913_v14 = vld [vmem:[%s27435_s1 + $0xbe0] sm:$0xf0] }
  0x69   : > { %v16932_v35 = vld [vmem:[%s27435_s1 + $0x89c] sm:$0xf0]  ;;  %1466 = vmatpush.bf16.msrb.mxu1 %v11848_v32  ;;  %1492 = vmatpush.bf16.msrb.mxu3 %v11340_v38  ;;  %v11916_v24 = vor.u32 %v16982_v13, %v11913_v14  ;;  %v11641_v25 = vld [vmem:[%s27435_s1 + $0x7a0] sm:$0xf0] }
  0x6a   : > { %v11831_v36 = vld [vmem:[%s27435_s1 + $0xa80] sm:$0xf]  ;;  %1405 = vmatmul.bf16.vlgmr.msra.gmra.mxu0 %v18711_v29  ;;  %v11704_v44 = vor.u32 %v16932_v35, %v11703_v34  ;;  %v11769_v27 = vld [vmem:[%s27435_s1 + $0x9a0] sm:$0xf0]  ;;  %v18846_v34 = vpack.c.bf16 %v228_v18, %v228_v18  ;;  %v11516_v35 = vor.u32 %v16882_v21, %v11513_v22 }
  0x6b   : > { %v16964_v39 = vld [vmem:[%s27435_s1 + $0xa9c] sm:$0xf0]  ;;  %1480 = vmatpush.bf16.msrb.mxu2 %v11196_v46  ;;  %v16978_v32 = vld [vmem:[%s27435_s1 + $0xb84] sm:$0xf]  ;;  %v11772_v38 = vor.u32 %v16946_v26, %v11769_v27 }
  0x6c   : > { %v11832_v45 = vor.u32 %v16964_v39, %v11831_v36  ;;  %v11687_v47 = vld [vmem:[%s27435_s1 + $0x840] sm:$0xf]  ;;  %1454 = vmatpush.bf16.msrb.mxu0 %v11704_v44  ;;  %v11897_v33 = vld [vmem:[%s27435_s1 + $0xba0] sm:$0xf0]  ;;  %v11644_v36 = vor.u32 %v16914_v23, %v11641_v25 }
  0x6d   : > { %v16928_v48 = vld [vmem:[%s27435_s1 + $0x85c] sm:$0xf0]  ;;  %1493 = vmatpush.bf16.msrb.mxu3 %v11324_v50  ;;  %v16878_v39 = vld [vmem:[%s27435_s1 + $0x544] sm:$0xf]  ;;  %v11900_v42 = vor.u32 %v16978_v32, %v11897_v33 }
  0x6e   : > { %v11815_v49 = vld [vmem:[%s27435_s1 + $0xa40] sm:$0xf]  ;;  %v11688_v56 = vor.u32 %v16928_v48, %v11687_v47  ;;  %1467 = vmatpush.bf16.msrb.mxu1 %v11832_v45  ;;  %v11497_v40 = vld [vmem:[%s27435_s1 + $0x560] sm:$0xf0] }
  0x6f   : > { %v16960_v51 = vld [vmem:[%s27435_s1 + $0xa5c] sm:$0xf0]  ;;  %1481 = vmatpush.bf16.msrb.mxu2 %v11180_v60  ;;  %v16910_v41 = vld [vmem:[%s27435_s1 + $0x744] sm:$0xf]  ;;  %v11500_v48 = vor.u32 %v16878_v39, %v11497_v40 }
  0x70   : > { %v11671_v57 = vld [vmem:[%s27435_s1 + $0x800] sm:$0xf]  ;;  %v11816_v59 = vor.u32 %v16960_v51, %v11815_v49  ;;  %1455 = vmatpush.bf16.msrb.mxu0 %v11688_v56  ;;  %v11625_v43 = vld [vmem:[%s27435_s1 + $0x760] sm:$0xf0] }
  0x71   : > { %v16924_v58 = vld [vmem:[%s27435_s1 + $0x81c] sm:$0xf0]  ;;  %1494 = vmatpush.bf16.msrb.mxu3 %v11308_v0  ;;  %v16942_v44 = vld [vmem:[%s27435_s1 + $0x944] sm:$0xf]  ;;  %v11628_v49 = vor.u32 %v16910_v41, %v11625_v43 }
  0x72   : > { %v11799_v61 = vld [vmem:[%s27435_s1 + $0xa00] sm:$0xf]  ;;  %v11672_v7 = vor.u32 %v16924_v58, %v11671_v57  ;;  %1468 = vmatpush.bf16.msrb.mxu1 %v11816_v59  ;;  %v11753_v45 = vld [vmem:[%s27435_s1 + $0x960] sm:$0xf0] }
  0x73   : > { %v16956_v62 = vld [vmem:[%s27435_s1 + $0xa1c] sm:$0xf0]  ;;  %1482 = vmatpush.bf16.msrb.mxu2 %v11164_v12  ;;  %v16974_v46 = vld [vmem:[%s27435_s1 + $0xb44] sm:$0xf]  ;;  %v11756_v50 = vor.u32 %v16942_v44, %v11753_v45 }
  0x74   : > { %v11800_v11 = vor.u32 %v16956_v62, %v11799_v61  ;;  %v227_v15 = vld [vmem:[%s18704_s9 + $0x20] sm:$0xff]  ;;  %1456 = vmatpush.bf16.msrb.mxu0 %v11672_v7  ;;  %s215_s9 = sand.u32 1, %s18299_s19  }
  0x75   : > { %v18838_v31 = vpack.c.bf16 %v227_v15, %v227_v15  ;;  %1495 = vmatpush.bf16.msrb.mxu3 %v11292_v16  ;;  %v11881_v47 = vld [vmem:[%s27435_s1 + $0xb60] sm:$0xf0]  ;;  %s25610_s7 = sshll.u32 %s215_s9, 7  ;;  %s11076_s16 = scalar_lea.sflag [#allocation3], %s215_s9 }
  0x76   : > { %1469 = vmatpush.bf16.msrb.mxu1 %v11800_v11  ;;  %1483 = vmatmul.bf16.vlgmr.msrb.gmra.mxu2 %v18711_v29  ;;  %v16874_v51 = vld [vmem:[%s27435_s1 + $0x504] sm:$0xf]  ;;  %v11884_v54 = vor.u32 %v16974_v46, %v11881_v47  ;;  %s25666_s13 = scalar_lea.vmem [#allocation2], %s25610_s7  ;;  %s18265_s7 = scalar_lea.hbm %s27439_s5, 256 }
  0x77   : > { %1527 = vmatpush.bf16.msra.mxu2 %v11788_v20  ;;  %v11481_v52 = vld [vmem:[%s27435_s1 + $0x520] sm:$0xf0]  ;;  %s11089_s14 = sshll.u32 %s25666_s13, 4  ;;  %p18267_p1 = scmp.lt.s32.totalorder %s18265_s7, %s18261_s22  ;;  %s11090_s14 = int_to_ptr.vmem [resolvable:$true] %s11089_s14 }
  0x78   : > { %1501 = vmatpush.bf16.msra.mxu0 %v11532_v17  ;;  %1496 = vmatmul.bf16.vlgmr.msrb.gmra.mxu3 %v18725_v37  ;;  %v16906_v53 = vld [vmem:[%s27435_s1 + $0x704] sm:$0xf]  ;;  %v11484_v60 = vor.u32 %v16874_v51, %v11481_v52  ;;  %v16825_v51 = vld [vmem:[%s27435_s1 + $0x1e4] sm:$0xf0] }
  0x79   : > { %1540 = vmatpush.bf16.msra.mxu3 %v11916_v24  ;;  %1470 = vmatmul.bf16.vlgmr.msrb.gmra.mxu1 %v18846_v34  ;;  %v11609_v55 = vld [vmem:[%s27435_s1 + $0x720] sm:$0xf0]  ;;  %v11407_v52 = vld [vmem:[%s27435_s1 + $0x3c8] sm:$0xf]  ;;  %p18268_p2 = por %p18267_p1, %p18266_p0 }
  0x7a   : > { %1514 = vmatpush.bf16.msra.mxu1 %v11660_v19  ;;  %1457 = vmatmul.bf16.vlgmr.msrb.gmra.mxu0 %v18838_v31  ;;  %v16938_v56 = vld [vmem:[%s27435_s1 + $0x904] sm:$0xf]  ;;  %v11612_v61 = vor.u32 %v16906_v53, %v11609_v55  ;;  %v11535_v55 = vld [vmem:[%s27435_s1 + $0x5c8] sm:$0xf] }
  0x7b   : > { %1528 = vmatpush.bf16.msra.mxu2 %v11772_v38  ;;  %v11737_v57 = vld [vmem:[%s27435_s1 + $0x920] sm:$0xf0]  ;;  %p18269_p3 = pnand %p18268_p2, %p18264_p13 }
  0x7c   : > { %1502 = vmatpush.bf16.msra.mxu0 %v11516_v35  ;;  %v16970_v58 = vld [vmem:[%s27435_s1 + $0xb04] sm:$0xf]  ;;  %v11740_v62 = vor.u32 %v16938_v56, %v11737_v57  ;;  %v16889_v56 = vld [vmem:[%s27435_s1 + $0x5e4] sm:$0xf0] }
  0x7d   : > { %1541 = vmatpush.bf16.msra.mxu3 %v11900_v42  ;;  %v11865_v59 = vld [vmem:[%s27435_s1 + $0xb20] sm:$0xf0] }
  0x7e   : > { %1515 = vmatpush.bf16.msra.mxu1 %v11644_v36  ;;  %v16870_v63 = vld [vmem:[%s27435_s1 + $0x4c4] sm:$0xf]  ;;  %v11868_v2 = vor.u32 %v16970_v58, %v11865_v59  ;;  %v11663_v59 = vld [vmem:[%s27435_s1 + $0x7c8] sm:$0xf] }
  0x7f   : > { %1529 = vmatpush.bf16.msra.mxu2 %v11756_v50  ;;  %v11465_v0 = vld [vmem:[%s27435_s1 + $0x4e0] sm:$0xf0]  ;;  %v11279_v50 = vld [vmem:[%s27435_s1 + $0x1c8] sm:$0xf] }
  0x80   : > { %1503 = vmatpush.bf16.msra.mxu0 %v11500_v48  ;;  %v16902_v1 = vld [vmem:[%s27435_s1 + $0x6c4] sm:$0xf]  ;;  %v11468_v8 = vor.u32 %v16870_v63, %v11465_v0  ;;  %v11536_v0 = vor.u32 %v16889_v56, %v11535_v55  ;;  %v11199_v55 = vld [vmem:[%s27435_s1 + $0x88] sm:$0xf] }
  0x81   : > { %1542 = vmatpush.bf16.msra.mxu3 %v11884_v54  ;;  %v11593_v3 = vld [vmem:[%s27435_s1 + $0x6e0] sm:$0xf0]  ;;  %v16857_v54 = vld [vmem:[%s27435_s1 + $0x3e4] sm:$0xf0] }
  0x82   : > { %1516 = vmatpush.bf16.msra.mxu1 %v11628_v49  ;;  %v16934_v4 = vld [vmem:[%s27435_s1 + $0x8c4] sm:$0xf]  ;;  %v11596_v9 = vor.u32 %v16902_v1, %v11593_v3  ;;  %v11408_v63 = vor.u32 %v16857_v54, %v11407_v52  ;;  %v11263_v1 = vld [vmem:[%s27435_s1 + $0x188] sm:$0xf] }
  0x83   : > { %v11721_v5 = vld [vmem:[%s27435_s1 + $0x8e0] sm:$0xf0]  ;;  %1530 = vmatpush.bf16.msra.mxu2 %v11740_v62  ;;  %v11280_v62 = vor.u32 %v16825_v51, %v11279_v50  ;;  %v11391_v3 = vld [vmem:[%s27435_s1 + $0x388] sm:$0xf] }
  0x84   : > { %v16966_v6 = vld [vmem:[%s27435_s1 + $0xac4] sm:$0xf]  ;;  %1504 = vmatpush.bf16.msra.mxu0 %v11484_v60  ;;  %v11724_v10 = vor.u32 %v16934_v4, %v11721_v5  ;;  %v16921_v60 = vld [vmem:[%s27435_s1 + $0x7e4] sm:$0xf0] }
  0x85   : > { %v11849_v7 = vld [vmem:[%s27435_s1 + $0xae0] sm:$0xf0]  ;;  %1543 = vmatpush.bf16.msra.mxu3 %v11868_v2  ;;  %v16821_v2 = vld [vmem:[%s27435_s1 + $0x1a4] sm:$0xf0]  ;;  %v11664_v4 = vor.u32 %v16921_v60, %v11663_v59 }
  0x86   : > { %1517 = vmatpush.bf16.msra.mxu1 %v11612_v61  ;;  %v16866_v11 = vld [vmem:[%s27435_s1 + $0x484] sm:$0xf]  ;;  %v11852_v14 = vor.u32 %v16966_v6, %v11849_v7  ;;  %v16853_v5 = vld [vmem:[%s27435_s1 + $0x3a4] sm:$0xf0] }
  0x87   : > { %v11449_v12 = vld [vmem:[%s27435_s1 + $0x4a0] sm:$0xf0]  ;;  %1531 = vmatpush.bf16.msra.mxu2 %v11724_v10  ;;  %v11519_v6 = vld [vmem:[%s27435_s1 + $0x588] sm:$0xf]  ;;  %v11264_v10 = vor.u32 %v16821_v2, %v11263_v1 }
  0x88   : > { %v16898_v13 = vld [vmem:[%s27435_s1 + $0x684] sm:$0xf]  ;;  %1505 = vmatpush.bf16.msra.mxu0 %v11468_v8  ;;  %v11452_v20 = vor.u32 %v16866_v11, %v11449_v12  ;;  %v16885_v7 = vld [vmem:[%s27435_s1 + $0x5a4] sm:$0xf0]  ;;  %v11392_v11 = vor.u32 %v16853_v5, %v11391_v3 }
  0x89   : > { %v11577_v15 = vld [vmem:[%s27435_s1 + $0x6a0] sm:$0xf0]  ;;  %1544 = vmatpush.bf16.msra.mxu3 %v11852_v14  ;;  %v11647_v8 = vld [vmem:[%s27435_s1 + $0x788] sm:$0xf]  ;;  %v11520_v12 = vor.u32 %v16885_v7, %v11519_v6 }
  0x8a   : > { %v16930_v16 = vld [vmem:[%s27435_s1 + $0x884] sm:$0xf]  ;;  %1518 = vmatpush.bf16.msra.mxu1 %v11596_v9  ;;  %v11580_v21 = vor.u32 %v16898_v13, %v11577_v15  ;;  %v16917_v9 = vld [vmem:[%s27435_s1 + $0x7a4] sm:$0xf0] }
  0x8b   : > { %v11705_v17 = vld [vmem:[%s27435_s1 + $0x8a0] sm:$0xf0]  ;;  %v11247_v13 = vld [vmem:[%s27435_s1 + $0x148] sm:$0xf] }
  0x8c   : > { %v16962_v18 = vld [vmem:[%s27435_s1 + $0xa84] sm:$0xf]  ;;  %v11708_v22 = vor.u32 %v16930_v16, %v11705_v17  ;;  %1506 = vmatpush.bf16.msra.mxu0 %v11452_v20  ;;  %v16817_v14 = vld [vmem:[%s27435_s1 + $0x164] sm:$0xf0]  ;;  %v11648_v16 = vor.u32 %v16917_v9, %v11647_v8 }
  0x8d   : > { %v11833_v19 = vld [vmem:[%s27435_s1 + $0xaa0] sm:$0xf0]  ;;  %v11375_v15 = vld [vmem:[%s27435_s1 + $0x348] sm:$0xf] }
  0x8e   : > { %v16862_v23 = vld [vmem:[%s27435_s1 + $0x444] sm:$0xf]  ;;  %v11836_v26 = vor.u32 %v16962_v18, %v11833_v19  ;;  %1519 = vmatpush.bf16.msra.mxu1 %v11580_v21  ;;  %1532 = vmatpush.bf16.msra.mxu2 %v11708_v22  ;;  %v16849_v17 = vld [vmem:[%s27435_s1 + $0x364] sm:$0xf0]  ;;  %v11248_v22 = vor.u32 %v16817_v14, %v11247_v13 }
  0x8f   : > { %v11433_v24 = vld [vmem:[%s27435_s1 + $0x460] sm:$0xf0]  ;;  %v11503_v18 = vld [vmem:[%s27435_s1 + $0x548] sm:$0xf] }
  0x90   : > { %v16894_v25 = vld [vmem:[%s27435_s1 + $0x644] sm:$0xf]  ;;  %v11436_v38 = vor.u32 %v16862_v23, %v11433_v24  ;;  %1545 = vmatpush.bf16.msra.mxu3 %v11836_v26  ;;  %v16881_v19 = vld [vmem:[%s27435_s1 + $0x564] sm:$0xf0]  ;;  %v11376_v23 = vor.u32 %v16849_v17, %v11375_v15 }
  0x91   : > { %v11561_v27 = vld [vmem:[%s27435_s1 + $0x660] sm:$0xf0]  ;;  %v11631_v20 = vld [vmem:[%s27435_s1 + $0x748] sm:$0xf]  ;;  %v11504_v24 = vor.u32 %v16881_v19, %v11503_v18 }
  0x92   : > { %v16926_v32 = vld [vmem:[%s27435_s1 + $0x844] sm:$0xf]  ;;  %v11564_v41 = vor.u32 %v16894_v25, %v11561_v27  ;;  %1507 = vmatpush.bf16.msra.mxu0 %v11436_v38  ;;  %v16913_v21 = vld [vmem:[%s27435_s1 + $0x764] sm:$0xf0] }
  0x93   : > { %v11689_v33 = vld [vmem:[%s27435_s1 + $0x860] sm:$0xf0]  ;;  %v11231_v25 = vld [vmem:[%s27435_s1 + $0x108] sm:$0xf] }
  0x94   : > { %v16958_v35 = vld [vmem:[%s27435_s1 + $0xa44] sm:$0xf]  ;;  %v11692_v42 = vor.u32 %v16926_v32, %v11689_v33  ;;  %1520 = vmatpush.bf16.msra.mxu1 %v11564_v41  ;;  %v16813_v26 = vld [vmem:[%s27435_s1 + $0x124] sm:$0xf0]  ;;  %v11632_v32 = vor.u32 %v16913_v21, %v11631_v20 }
  0x95   : > { %v11817_v36 = vld [vmem:[%s27435_s1 + $0xa60] sm:$0xf0]  ;;  %v11359_v27 = vld [vmem:[%s27435_s1 + $0x308] sm:$0xf] }
  0x96   : > { %v16858_v39 = vld [vmem:[%s27435_s1 + $0x404] sm:$0xf]  ;;  %v11820_v46 = vor.u32 %v16958_v35, %v11817_v36  ;;  %1533 = vmatpush.bf16.msra.mxu2 %v11692_v42  ;;  %v16845_v33 = vld [vmem:[%s27435_s1 + $0x324] sm:$0xf0] }
  0x97   : > { %v11417_v40 = vld [vmem:[%s27435_s1 + $0x420] sm:$0xf0]  ;;  %v11487_v35 = vld [vmem:[%s27435_s1 + $0x508] sm:$0xf]  ;;  %v11360_v41 = vor.u32 %v16845_v33, %v11359_v27  ;;  %v16823_v33 = vld [vmem:[%s27435_s1 + $0x1cc] sm:$0xf] }
  0x98   : > { %v16890_v43 = vld [vmem:[%s27435_s1 + $0x604] sm:$0xf]  ;;  %v11420_v53 = vor.u32 %v16858_v39, %v11417_v40  ;;  %1546 = vmatpush.bf16.msra.mxu3 %v11820_v46  ;;  %v16877_v36 = vld [vmem:[%s27435_s1 + $0x524] sm:$0xf0]  ;;  %v11232_v40 = vor.u32 %v16813_v26, %v11231_v25 }
  0x99   : > { %v11545_v44 = vld [vmem:[%s27435_s1 + $0x620] sm:$0xf0]  ;;  %v11615_v38 = vld [vmem:[%s27435_s1 + $0x708] sm:$0xf]  ;;  %v11488_v42 = vor.u32 %v16877_v36, %v11487_v35  ;;  %v11281_v35 = vld [vmem:[%s27435_s1 + $0x1e8] sm:$0xf0] }
  0x9a   : > { %v16922_v45 = vld [vmem:[%s27435_s1 + $0x804] sm:$0xf]  ;;  %v11548_v57 = vor.u32 %v16890_v43, %v11545_v44  ;;  %1508 = vmatpush.bf16.msra.mxu0 %v11420_v53  ;;  %v16909_v39 = vld [vmem:[%s27435_s1 + $0x724] sm:$0xf0] }
  0x9b   : > { %v11673_v47 = vld [vmem:[%s27435_s1 + $0x820] sm:$0xf0]  ;;  %v11215_v43 = vld [vmem:[%s27435_s1 + $0xc8] sm:$0xf]  ;;  %v11616_v46 = vor.u32 %v16909_v39, %v11615_v38  ;;  %v16855_v39 = vld [vmem:[%s27435_s1 + $0x3cc] sm:$0xf] }
  0x9c   : > { %v16954_v48 = vld [vmem:[%s27435_s1 + $0xa04] sm:$0xf]  ;;  %v11676_v58 = vor.u32 %v16922_v45, %v11673_v47  ;;  %1521 = vmatpush.bf16.msra.mxu1 %v11548_v57  ;;  %v16809_v44 = vld [vmem:[%s27435_s1 + $0xe4] sm:$0xf0] }
  0x9d   : > { %v11801_v49 = vld [vmem:[%s27435_s1 + $0xa20] sm:$0xf0]  ;;  %1509 = vmatmul.bf16.vlgmr.msra.gmra.mxu0 %v18709_v28  ;;  %v11343_v45 = vld [vmem:[%s27435_s1 + $0x2c8] sm:$0xf]  ;;  %v11216_v52 = vor.u32 %v16809_v44, %v11215_v43  ;;  %v11284_v44 = vor.u32 %v16823_v33, %v11281_v35 }
  0x9e   : > { %v11804_v61 = vor.u32 %v16954_v48, %v11801_v49  ;;  %1534 = vmatpush.bf16.msra.mxu2 %v11676_v58  ;;  %1553 = vmatpush.bf16.msrb.mxu0 %v11280_v62  ;;  %v16841_v47 = vld [vmem:[%s27435_s1 + $0x2e4] sm:$0xf0] }
  0x9f   : > { %1522 = vmatmul.bf16.vlgmr.msra.gmra.mxu1 %v18713_v30  ;;  %v11471_v48 = vld [vmem:[%s27435_s1 + $0x4c8] sm:$0xf]  ;;  %v11344_v53 = vor.u32 %v16841_v47, %v11343_v45 }
  0xa0   : > { %1547 = vmatpush.bf16.msra.mxu3 %v11804_v61  ;;  %1566 = vmatpush.bf16.msrb.mxu1 %v11408_v63  ;;  %v16873_v49 = vld [vmem:[%s27435_s1 + $0x4e4] sm:$0xf0] }
  0xa1   : > { %1535 = vmatmul.bf16.vlgmr.msra.gmra.mxu2 %v18838_v31  ;;  %v11599_v50 = vld [vmem:[%s27435_s1 + $0x6c8] sm:$0xf]  ;;  %v11472_v54 = vor.u32 %v16873_v49, %v11471_v48 }
  0xa2   : > { %1579 = vmatpush.bf16.msrb.mxu2 %v11536_v0  ;;  %1554 = vmatpush.bf16.msrb.mxu0 %v11264_v10  ;;  %v16905_v51 = vld [vmem:[%s27435_s1 + $0x6e4] sm:$0xf0] }
  0xa3   : > { %1548 = vmatmul.bf16.vlgmr.msra.gmra.mxu3 %v18846_v34  ;;  %v16805_v56 = vld [vmem:[%s27435_s1 + $0xa4] sm:$0xf0]  ;;  %v11600_v58 = vor.u32 %v16905_v51, %v11599_v50  ;;  %v16819_v50 = vld [vmem:[%s27435_s1 + $0x18c] sm:$0xf] }
  0xa4   : > { %1592 = vmatpush.bf16.msrb.mxu3 %v11664_v4  ;;  %1567 = vmatpush.bf16.msrb.mxu1 %v11392_v11  ;;  %v11327_v57 = vld [vmem:[%s27435_s1 + $0x288] sm:$0xf]  ;;  %v11200_v0 = vor.u32 %v16805_v56, %v11199_v55  ;;  %v11265_v51 = vld [vmem:[%s27435_s1 + $0x1a8] sm:$0xf0] }
  0xa5   : > { %v16837_v59 = vld [vmem:[%s27435_s1 + $0x2a4] sm:$0xf0]  ;;  %v11268_v56 = vor.u32 %v16819_v50, %v11265_v51 }
  0xa6   : > { %1580 = vmatpush.bf16.msrb.mxu2 %v11520_v12  ;;  %1555 = vmatpush.bf16.msrb.mxu0 %v11248_v22  ;;  %v11455_v60 = vld [vmem:[%s27435_s1 + $0x488] sm:$0xf]  ;;  %v11328_v1 = vor.u32 %v16837_v59, %v11327_v57 }
  0xa7   : > { %v16869_v61 = vld [vmem:[%s27435_s1 + $0x4a4] sm:$0xf0] }
  0xa8   : > { %1593 = vmatpush.bf16.msrb.mxu3 %v11648_v16  ;;  %1568 = vmatpush.bf16.msrb.mxu1 %v11376_v23  ;;  %v11583_v62 = vld [vmem:[%s27435_s1 + $0x688] sm:$0xf]  ;;  %v11456_v2 = vor.u32 %v16869_v61, %v11455_v60 }
  0xa9   : > { %v16901_v63 = vld [vmem:[%s27435_s1 + $0x6a4] sm:$0xf0] }
  0xaa   : > { %1581 = vmatpush.bf16.msrb.mxu2 %v11504_v24  ;;  %1556 = vmatpush.bf16.msrb.mxu0 %v11232_v40  ;;  %v11183_v3 = vld [vmem:[%s27435_s1 + $0x48] sm:$0xf]  ;;  %v11584_v6 = vor.u32 %v16901_v63, %v11583_v62  ;;  %v11409_v40 = vld [vmem:[%s27435_s1 + $0x3e8] sm:$0xf0] }
  0xab   : > { %v16801_v4 = vld [vmem:[%s27435_s1 + $0x64] sm:$0xf0]  ;;  %v11412_v48 = vor.u32 %v16855_v39, %v11409_v40  ;;  %v16815_v62 = vld [vmem:[%s27435_s1 + $0x14c] sm:$0xf] }
  0xac   : > { %1594 = vmatpush.bf16.msrb.mxu3 %v11632_v32  ;;  %1569 = vmatpush.bf16.msrb.mxu1 %v11360_v41  ;;  %v11311_v5 = vld [vmem:[%s27435_s1 + $0x248] sm:$0xf]  ;;  %v11184_v12 = vor.u32 %v16801_v4, %v11183_v3  ;;  %v11249_v63 = vld [vmem:[%s27435_s1 + $0x168] sm:$0xf0] }
  0xad   : > { %v16833_v7 = vld [vmem:[%s27435_s1 + $0x264] sm:$0xf0]  ;;  %v11252_v4 = vor.u32 %v16815_v62, %v11249_v63  ;;  %v16803_v40 = vld [vmem:[%s27435_s1 + $0x8c] sm:$0xf] }
  0xae   : > { %1582 = vmatpush.bf16.msrb.mxu2 %v11488_v42  ;;  %1557 = vmatpush.bf16.msrb.mxu0 %v11216_v52  ;;  %v11439_v8 = vld [vmem:[%s27435_s1 + $0x448] sm:$0xf]  ;;  %v11312_v15 = vor.u32 %v16833_v7, %v11311_v5  ;;  %v16851_v52 = vld [vmem:[%s27435_s1 + $0x38c] sm:$0xf] }
  0xaf   : > { %v16865_v9 = vld [vmem:[%s27435_s1 + $0x464] sm:$0xf0]  ;;  %v16795_v63 = vld [vmem:[%s27435_s1 + $0xc] sm:$0xf] }
  0xb0   : > { %1595 = vmatpush.bf16.msrb.mxu3 %v11616_v46  ;;  %1570 = vmatpush.bf16.msrb.mxu1 %v11344_v53  ;;  %v11567_v10 = vld [vmem:[%s27435_s1 + $0x648] sm:$0xf]  ;;  %v11440_v16 = vor.u32 %v16865_v9, %v11439_v8  ;;  %v11393_v53 = vld [vmem:[%s27435_s1 + $0x3a8] sm:$0xf0] }
  0xb1   : > { %v16897_v11 = vld [vmem:[%s27435_s1 + $0x664] sm:$0xf0]  ;;  %v11396_v60 = vor.u32 %v16851_v52, %v11393_v53  ;;  %v16799_v52 = vld [vmem:[%s27435_s1 + $0x4c] sm:$0xf] }
  0xb2   : > { %1583 = vmatpush.bf16.msrb.mxu2 %v11472_v54  ;;  %1558 = vmatpush.bf16.msrb.mxu0 %v11200_v0  ;;  %v11167_v13 = vld [vmem:[%s27435_s1 + $0x8] sm:$0xf]  ;;  %v11568_v20 = vor.u32 %v16897_v11, %v11567_v10  ;;  %v16847_v0 = vld [vmem:[%s27435_s1 + $0x34c] sm:$0xf] }
  0xb3   : > { %v16797_v14 = vld [vmem:[%s27435_s1 + $0x24] sm:$0xf0]  ;;  %v16811_v10 = vld [vmem:[%s27435_s1 + $0x10c] sm:$0xf] }
  0xb4   : > { %1596 = vmatpush.bf16.msrb.mxu3 %v11600_v58  ;;  %1571 = vmatpush.bf16.msrb.mxu1 %v11328_v1  ;;  %v11295_v17 = vld [vmem:[%s27435_s1 + $0x208] sm:$0xf]  ;;  %v11168_v27 = vor.u32 %v16797_v14, %v11167_v13  ;;  %v11377_v1 = vld [vmem:[%s27435_s1 + $0x368] sm:$0xf0] }
  0xb5   : > { %v16829_v18 = vld [vmem:[%s27435_s1 + $0x224] sm:$0xf0]  ;;  %v11380_v8 = vor.u32 %v16847_v0, %v11377_v1  ;;  %v11233_v11 = vld [vmem:[%s27435_s1 + $0x128] sm:$0xf0] }
  0xb6   : > { %1584 = vmatpush.bf16.msrb.mxu2 %v11456_v2  ;;  %v11423_v19 = vld [vmem:[%s27435_s1 + $0x408] sm:$0xf]  ;;  %1559 = vmatpush.bf16.msrb.mxu0 %v11184_v12  ;;  %v11296_v36 = vor.u32 %v16829_v18, %v11295_v17  ;;  %v16843_v12 = vld [vmem:[%s27435_s1 + $0x30c] sm:$0xf] }
  0xb7   : > { %v16861_v21 = vld [vmem:[%s27435_s1 + $0x424] sm:$0xf0]  ;;  %v11361_v13 = vld [vmem:[%s27435_s1 + $0x328] sm:$0xf0] }
  0xb8   : > { %1597 = vmatpush.bf16.msrb.mxu3 %v11584_v6  ;;  %v11551_v22 = vld [vmem:[%s27435_s1 + $0x608] sm:$0xf]  ;;  %1572 = vmatpush.bf16.msrb.mxu1 %v11312_v15  ;;  %v11424_v38 = vor.u32 %v16861_v21, %v11423_v19  ;;  %v11185_v53 = vld [vmem:[%s27435_s1 + $0x68] sm:$0xf0] }
  0xb9   : > { %v16893_v23 = vld [vmem:[%s27435_s1 + $0x624] sm:$0xf0]  ;;  %v11169_v1 = vld [vmem:[%s27435_s1 + $0x28] sm:$0xf0] }
  0xba   : > { %v11791_v24 = vld [vmem:[%s27435_s1 + $0x9c8] sm:$0xf]  ;;  %1585 = vmatpush.bf16.msrb.mxu2 %v11440_v16  ;;  %v11552_v41 = vor.u32 %v16893_v23, %v11551_v22  ;;  %1560 = vmatpush.bf16.msrb.mxu0 %v11168_v27  ;;  %v11236_v16 = vor.u32 %v16811_v10, %v11233_v11  ;;  %v16807_v22 = vld [vmem:[%s27435_s1 + $0xcc] sm:$0xf] }
  0xbb   : > { %v16953_v25 = vld [vmem:[%s27435_s1 + $0x9e4] sm:$0xf0]  ;;  %v11217_v23 = vld [vmem:[%s27435_s1 + $0xe8] sm:$0xf0] }
  0xbc   : > { %v11919_v26 = vld [vmem:[%s27435_s1 + $0xbc8] sm:$0xf]  ;;  %1598 = vmatpush.bf16.msrb.mxu3 %v11568_v20  ;;  %v11792_v42 = vor.u32 %v16953_v25, %v11791_v24  ;;  %1573 = vmatpush.bf16.msrb.mxu1 %v11296_v36  ;;  %v11364_v20 = vor.u32 %v16843_v12, %v11361_v13  ;;  %v16839_v24 = vld [vmem:[%s27435_s1 + $0x2cc] sm:$0xf]  ;;  %v11172_v12 = vor.u32 %v16795_v63, %v11169_v1 }
  0xbd   : > { %v16985_v32 = vld [vmem:[%s27435_s1 + $0xbe4] sm:$0xf0]  ;;  %1561 = vmatmul.bf16.vlgmr.msrb.gmra.mxu0 %v18711_v29  ;;  %v11345_v25 = vld [vmem:[%s27435_s1 + $0x2e8] sm:$0xf0] }
  0xbe   : > { %v11920_v43 = vor.u32 %v16985_v32, %v11919_v26  ;;  %v11775_v45 = vld [vmem:[%s27435_s1 + $0x988] sm:$0xf]  ;;  %1586 = vmatpush.bf16.msrb.mxu2 %v11424_v38  ;;  %1605 = vmatpush.bf16.msra.mxu0 %v11792_v42  ;;  %v11220_v32 = vor.u32 %v16807_v22, %v11217_v23  ;;  %v11348_v38 = vor.u32 %v16839_v24, %v11345_v25  ;;  %v16835_v42 = vld [vmem:[%s27435_s1 + $0x28c] sm:$0xf] }
  0xbf   : > { %v16949_v46 = vld [vmem:[%s27435_s1 + $0x9a4] sm:$0xf0]  ;;  %1574 = vmatmul.bf16.vlgmr.msrb.gmra.mxu1 %v18725_v37  ;;  %v11793_v10 = vld [vmem:[%s27435_s1 + $0x9e8] sm:$0xf0] }
  0xc0   : > { %v11903_v47 = vld [vmem:[%s27435_s1 + $0xb88] sm:$0xf]  ;;  %1599 = vmatpush.bf16.msrb.mxu3 %v11552_v41  ;;  %v11776_v54 = vor.u32 %v16949_v46, %v11775_v45  ;;  %1618 = vmatpush.bf16.msra.mxu1 %v11920_v43  ;;  %v11201_v41 = vld [vmem:[%s27435_s1 + $0xa8] sm:$0xf0] }
  0xc1   : > { %v16981_v49 = vld [vmem:[%s27435_s1 + $0xba4] sm:$0xf0]  ;;  %1587 = vmatmul.bf16.vlgmr.msrb.gmra.mxu2 %v18709_v28  ;;  %v11329_v43 = vld [vmem:[%s27435_s1 + $0x2a8] sm:$0xf0]  ;;  %v11204_v46 = vor.u32 %v16803_v40, %v11201_v41 }
  0xc2   : > { %1631 = vmatpush.bf16.msra.mxu2 %v11284_v44  ;;  %v11904_v55 = vor.u32 %v16981_v49, %v11903_v47  ;;  %v11759_v57 = vld [vmem:[%s27435_s1 + $0x948] sm:$0xf]  ;;  %1606 = vmatpush.bf16.msra.mxu0 %v11776_v54  ;;  %v11332_v50 = vor.u32 %v16835_v42, %v11329_v43  ;;  %v16831_v54 = vld [vmem:[%s27435_s1 + $0x24c] sm:$0xf] }
  0xc3   : > { %v16945_v58 = vld [vmem:[%s27435_s1 + $0x964] sm:$0xf0]  ;;  %1600 = vmatmul.bf16.vlgmr.msrb.gmra.mxu3 %v18713_v30  ;;  %v16983_v13 = vld [vmem:[%s27435_s1 + $0xbcc] sm:$0xf] }
  0xc4   : > { %v11887_v59 = vld [vmem:[%s27435_s1 + $0xb48] sm:$0xf]  ;;  %1644 = vmatpush.bf16.msra.mxu3 %v11412_v48  ;;  %v11760_v2 = vor.u32 %v16945_v58, %v11759_v57  ;;  %1619 = vmatpush.bf16.msra.mxu1 %v11904_v55  ;;  %v11313_v55 = vld [vmem:[%s27435_s1 + $0x268] sm:$0xf0] }
  0xc5   : > { %v16977_v61 = vld [vmem:[%s27435_s1 + $0xb64] sm:$0xf0]  ;;  %v11316_v0 = vor.u32 %v16831_v54, %v11313_v55  ;;  %v11649_v23 = vld [vmem:[%s27435_s1 + $0x7a8] sm:$0xf0] }
  0xc6   : > { %1632 = vmatpush.bf16.msra.mxu2 %v11268_v56  ;;  %v11888_v3 = vor.u32 %v16977_v61, %v11887_v59  ;;  %v11743_v5 = vld [vmem:[%s27435_s1 + $0x908] sm:$0xf]  ;;  %1607 = vmatpush.bf16.msra.mxu0 %v11760_v2  ;;  %v16827_v2 = vld [vmem:[%s27435_s1 + $0x20c] sm:$0xf] }
  0xc7   : > { %v16941_v6 = vld [vmem:[%s27435_s1 + $0x924] sm:$0xf0]  ;;  %v16947_v24 = vld [vmem:[%s27435_s1 + $0x98c] sm:$0xf] }
  0xc8   : > { %v11871_v7 = vld [vmem:[%s27435_s1 + $0xb08] sm:$0xf]  ;;  %1645 = vmatpush.bf16.msra.mxu3 %v11396_v60  ;;  %v11744_v14 = vor.u32 %v16941_v6, %v11743_v5  ;;  %1620 = vmatpush.bf16.msra.mxu1 %v11888_v3  ;;  %v11188_v60 = vor.u32 %v16799_v52, %v11185_v53  ;;  %v11297_v3 = vld [vmem:[%s27435_s1 + $0x228] sm:$0xf0] }
  0xc9   : > { %v16973_v9 = vld [vmem:[%s27435_s1 + $0xb24] sm:$0xf0]  ;;  %v11537_v5 = vld [vmem:[%s27435_s1 + $0x5e8] sm:$0xf0] }
  0xca   : > { %1633 = vmatpush.bf16.msra.mxu2 %v11252_v4  ;;  %v11872_v15 = vor.u32 %v16973_v9, %v11871_v7  ;;  %v11727_v17 = vld [vmem:[%s27435_s1 + $0x8c8] sm:$0xf]  ;;  %1608 = vmatpush.bf16.msra.mxu0 %v11744_v14  ;;  %v16887_v4 = vld [vmem:[%s27435_s1 + $0x5cc] sm:$0xf] }
  0xcb   : > { %v16937_v18 = vld [vmem:[%s27435_s1 + $0x8e4] sm:$0xf0]  ;;  %v16919_v6 = vld [vmem:[%s27435_s1 + $0x7cc] sm:$0xf] }
  0xcc   : > { %v11855_v19 = vld [vmem:[%s27435_s1 + $0xac8] sm:$0xf]  ;;  %1646 = vmatpush.bf16.msra.mxu3 %v11380_v8  ;;  %v11728_v26 = vor.u32 %v16937_v18, %v11727_v17  ;;  %1621 = vmatpush.bf16.msra.mxu1 %v11872_v15  ;;  %v11665_v8 = vld [vmem:[%s27435_s1 + $0x7e8] sm:$0xf0]  ;;  %v11300_v15 = vor.u32 %v16827_v2, %v11297_v3 }
  0xcd   : > { %v16969_v21 = vld [vmem:[%s27435_s1 + $0xae4] sm:$0xf0]  ;;  %v16951_v9 = vld [vmem:[%s27435_s1 + $0x9cc] sm:$0xf]  ;;  %v11668_v17 = vor.u32 %v16919_v6, %v11665_v8 }
  0xce   : > { %1634 = vmatpush.bf16.msra.mxu2 %v11236_v16  ;;  %v11856_v27 = vor.u32 %v16969_v21, %v11855_v19  ;;  %v11711_v33 = vld [vmem:[%s27435_s1 + $0x888] sm:$0xf]  ;;  %1609 = vmatpush.bf16.msra.mxu0 %v11728_v26  ;;  %v11921_v14 = vld [vmem:[%s27435_s1 + $0xbe8] sm:$0xf0]  ;;  %v11540_v16 = vor.u32 %v16887_v4, %v11537_v5  ;;  %v11796_v18 = vor.u32 %v16951_v9, %v11793_v10 }
  0xcf   : > { %v16933_v35 = vld [vmem:[%s27435_s1 + $0x8a4] sm:$0xf0]  ;;  %v16883_v19 = vld [vmem:[%s27435_s1 + $0x58c] sm:$0xf]  ;;  %v11924_v22 = vor.u32 %v16983_v13, %v11921_v14 }
  0xd0   : > { %v11839_v36 = vld [vmem:[%s27435_s1 + $0xa88] sm:$0xf]  ;;  %1647 = vmatpush.bf16.msra.mxu3 %v11364_v20  ;;  %v11712_v44 = vor.u32 %v16933_v35, %v11711_v33  ;;  %1622 = vmatpush.bf16.msra.mxu1 %v11856_v27  ;;  %v11521_v20 = vld [vmem:[%s27435_s1 + $0x5a8] sm:$0xf0] }
  0xd1   : > { %v16965_v39 = vld [vmem:[%s27435_s1 + $0xaa4] sm:$0xf0]  ;;  %v16915_v21 = vld [vmem:[%s27435_s1 + $0x78c] sm:$0xf] }
  0xd2   : > { %1635 = vmatpush.bf16.msra.mxu2 %v11220_v32  ;;  %v11840_v45 = vor.u32 %v16965_v39, %v11839_v36  ;;  %v11695_v47 = vld [vmem:[%s27435_s1 + $0x848] sm:$0xf]  ;;  %1610 = vmatpush.bf16.msra.mxu0 %v11712_v44  ;;  %v11777_v25 = vld [vmem:[%s27435_s1 + $0x9a8] sm:$0xf0]  ;;  %v11524_v32 = vor.u32 %v16883_v19, %v11521_v20  ;;  %v11652_v33 = vor.u32 %v16915_v21, %v11649_v23 }
  0xd3   : > { %v16929_v48 = vld [vmem:[%s27435_s1 + $0x864] sm:$0xf0]  ;;  %v16979_v26 = vld [vmem:[%s27435_s1 + $0xb8c] sm:$0xf]  ;;  %v11780_v35 = vor.u32 %v16947_v24, %v11777_v25 }
  0xd4   : > { %v11823_v49 = vld [vmem:[%s27435_s1 + $0xa48] sm:$0xf]  ;;  %1648 = vmatpush.bf16.msra.mxu3 %v11348_v38  ;;  %v11696_v56 = vor.u32 %v16929_v48, %v11695_v47  ;;  %1623 = vmatpush.bf16.msra.mxu1 %v11840_v45  ;;  %v11905_v27 = vld [vmem:[%s27435_s1 + $0xba8] sm:$0xf0] }
  0xd5   : > { %v16961_v51 = vld [vmem:[%s27435_s1 + $0xa64] sm:$0xf0]  ;;  %v16879_v36 = vld [vmem:[%s27435_s1 + $0x54c] sm:$0xf]  ;;  %v11908_v40 = vor.u32 %v16979_v26, %v11905_v27 }
  0xd6   : > { %v11679_v57 = vld [vmem:[%s27435_s1 + $0x808] sm:$0xf]  ;;  %1636 = vmatpush.bf16.msra.mxu2 %v11204_v46  ;;  %v11824_v59 = vor.u32 %v16961_v51, %v11823_v49  ;;  %1611 = vmatpush.bf16.msra.mxu0 %v11696_v56  ;;  %v11505_v38 = vld [vmem:[%s27435_s1 + $0x568] sm:$0xf0] }
  0xd7   : > { %v16925_v58 = vld [vmem:[%s27435_s1 + $0x824] sm:$0xf0]  ;;  %v16911_v39 = vld [vmem:[%s27435_s1 + $0x74c] sm:$0xf]  ;;  %v11508_v46 = vor.u32 %v16879_v36, %v11505_v38 }
  0xd8   : > { %v11807_v61 = vld [vmem:[%s27435_s1 + $0xa08] sm:$0xf]  ;;  %1649 = vmatpush.bf16.msra.mxu3 %v11332_v50  ;;  %v11680_v7 = vor.u32 %v16925_v58, %v11679_v57  ;;  %1624 = vmatpush.bf16.msra.mxu1 %v11824_v59  ;;  %v11633_v41 = vld [vmem:[%s27435_s1 + $0x768] sm:$0xf0] }
  0xd9   : > { %v16957_v62 = vld [vmem:[%s27435_s1 + $0xa24] sm:$0xf0]  ;;  %v16943_v42 = vld [vmem:[%s27435_s1 + $0x94c] sm:$0xf]  ;;  %v11636_v47 = vor.u32 %v16911_v39, %v11633_v41 }
  0xda   : > { %1637 = vmatpush.bf16.msra.mxu2 %v11188_v60  ;;  %v11808_v11 = vor.u32 %v16957_v62, %v11807_v61  ;;  %1612 = vmatpush.bf16.msra.mxu0 %v11680_v7  ;;  %v11761_v43 = vld [vmem:[%s27435_s1 + $0x968] sm:$0xf0] }
  0xdb   : > { %v16975_v44 = vld [vmem:[%s27435_s1 + $0xb4c] sm:$0xf]  ;;  %v11764_v48 = vor.u32 %v16943_v42, %v11761_v43 }
  0xdc   : > { %1650 = vmatpush.bf16.msra.mxu3 %v11316_v0  ;;  %1625 = vmatpush.bf16.msra.mxu1 %v11808_v11  ;;  %v11889_v45 = vld [vmem:[%s27435_s1 + $0xb68] sm:$0xf0] }
  0xdd   : > { %1613 = vmatmul.bf16.vlgmr.msra.gmra.mxu0 %v18838_v31  ;;  %v16875_v49 = vld [vmem:[%s27435_s1 + $0x50c] sm:$0xf]  ;;  %v11892_v52 = vor.u32 %v16975_v44, %v11889_v45 }
  0xde   : > { %1638 = vmatpush.bf16.msra.mxu2 %v11172_v12  ;;  %1657 = vmatpush.bf16.msrb.mxu0 %v11540_v16  ;;  %v11489_v50 = vld [vmem:[%s27435_s1 + $0x528] sm:$0xf0]  ;;  %v19533_v16 = vld [vmem:[%s27436_s2] sm:$0xf] }
  0xdf   : > { %1626 = vmatmul.bf16.vlgmr.msra.gmra.mxu1 %v18846_v34  ;;  %v16907_v51 = vld [vmem:[%s27435_s1 + $0x70c] sm:$0xf]  ;;  %v11492_v58 = vor.u32 %v16875_v49, %v11489_v50  ;;  %v429_v25 = vperm.slane %v19533_v16, 0 }
  0xe0   : > { %1651 = vmatpush.bf16.msra.mxu3 %v11300_v15  ;;  %1670 = vmatpush.bf16.msrb.mxu1 %v11668_v17  ;;  %v11617_v53 = vld [vmem:[%s27435_s1 + $0x728] sm:$0xf0] }
  0xe1   : > { %1639 = vmatmul.bf16.vlgmr.msra.gmra.mxu2 %v18711_v29  ;;  %v16939_v54 = vld [vmem:[%s27435_s1 + $0x90c] sm:$0xf]  ;;  %v11620_v59 = vor.u32 %v16907_v51, %v11617_v53  ;;  %v12039_v53 = vld [vmem:[%s27435_s1 + $0x1d0] sm:$0xf] }
  0xe2   : > { %1683 = vmatpush.bf16.msrb.mxu2 %v11796_v18  ;;  %1658 = vmatpush.bf16.msrb.mxu0 %v11524_v32  ;;  %v11745_v55 = vld [vmem:[%s27435_s1 + $0x928] sm:$0xf0] }
  0xe3   : > { %1652 = vmatmul.bf16.vlgmr.msra.gmra.mxu3 %v18725_v37  ;;  %v16971_v56 = vld [vmem:[%s27435_s1 + $0xb0c] sm:$0xf]  ;;  %v11748_v60 = vor.u32 %v16939_v54, %v11745_v55  ;;  %v17528_v54 = vld [vmem:[%s27435_s1 + $0x1ec] sm:$0xf0] }
  0xe4   : > { %1696 = vmatpush.bf16.msrb.mxu3 %v11924_v22  ;;  %1671 = vmatpush.bf16.msrb.mxu1 %v11652_v33  ;;  %v11873_v57 = vld [vmem:[%s27435_s1 + $0xb28] sm:$0xf0]  ;;  %v12167_v55 = vld [vmem:[%s27435_s1 + $0x3d0] sm:$0xf] }
  0xe5   : > { %v16871_v61 = vld [vmem:[%s27435_s1 + $0x4cc] sm:$0xf]  ;;  %v11876_v0 = vor.u32 %v16971_v56, %v11873_v57 }
  0xe6   : > { %1684 = vmatpush.bf16.msrb.mxu2 %v11780_v35  ;;  %1659 = vmatpush.bf16.msrb.mxu0 %v11508_v46  ;;  %v11473_v62 = vld [vmem:[%s27435_s1 + $0x4e8] sm:$0xf0] }
  0xe7   : > { %v16903_v63 = vld [vmem:[%s27435_s1 + $0x6cc] sm:$0xf]  ;;  %v11476_v6 = vor.u32 %v16871_v61, %v11473_v62  ;;  %v1406_v41 = vpop.f32.mrf.mxu0 }
  0xe8   : > { %1697 = vmatpush.bf16.msrb.mxu3 %v11908_v40  ;;  %1672 = vmatpush.bf16.msrb.mxu1 %v11636_v47  ;;  %v11601_v1 = vld [vmem:[%s27435_s1 + $0x6e8] sm:$0xf0]  ;;  %v1407_v47 = vadd.f32 %v1406_v41, %v429_v25  ;;  %v17520_v25 = vld [vmem:[%s27435_s1 + $0x16c] sm:$0xf0] }
  0xe9   : > { %v16935_v2 = vld [vmem:[%s27435_s1 + $0x8cc] sm:$0xf]  ;;  %v11604_v8 = vor.u32 %v16903_v63, %v11601_v1  ;;  %v12423_v63 = vld [vmem:[%s27435_s1 + $0x7d0] sm:$0xf]  ;;  %v1432_v1 = vpop.f32.mrf.mxu2 }
  0xea   : > { %1685 = vmatpush.bf16.msrb.mxu2 %v11764_v48  ;;  %v11729_v3 = vld [vmem:[%s27435_s1 + $0x8e8] sm:$0xf0]  ;;  %1660 = vmatpush.bf16.msrb.mxu0 %v11492_v58  ;;  %v1419_v48 = vpop.f32.mrf.mxu1  ;;  %v17560_v58 = vld [vmem:[%s27435_s1 + $0x3ec] sm:$0xf0] }
  0xeb   : > { %v16967_v4 = vld [vmem:[%s27435_s1 + $0xacc] sm:$0xf]  ;;  %v11732_v9 = vor.u32 %v16935_v2, %v11729_v3  ;;  %v1420_v56 = vadd.f32 %v1419_v48, %v1407_v47  ;;  %v12040_v3 = vor.u32 %v17528_v54, %v12039_v53  ;;  %v17548_v48 = vld [vmem:[%s27435_s1 + $0x32c] sm:$0xf0] }
  0xec   : > { %1698 = vmatpush.bf16.msrb.mxu3 %v11892_v52  ;;  %v11857_v5 = vld [vmem:[%s27435_s1 + $0xae8] sm:$0xf0]  ;;  %1673 = vmatpush.bf16.msrb.mxu1 %v11620_v59  ;;  %v12295_v59 = vld [vmem:[%s27435_s1 + $0x5d0] sm:$0xf] }
  0xed   : > { %v16867_v7 = vld [vmem:[%s27435_s1 + $0x48c] sm:$0xf]  ;;  %v11860_v13 = vor.u32 %v16967_v4, %v11857_v5  ;;  %v1433_v4 = vadd.f32 %v1432_v1, %v1420_v56  ;;  %v1445_v5 = vpop.f32.mrf.mxu3  ;;  %v17576_v1 = vld [vmem:[%s27435_s1 + $0x4ec] sm:$0xf0] }
  0xee   : > { %1686 = vmatpush.bf16.msrb.mxu2 %v11748_v60  ;;  %v11457_v10 = vld [vmem:[%s27435_s1 + $0x4a8] sm:$0xf0]  ;;  %1661 = vmatpush.bf16.msrb.mxu0 %v11476_v6  ;;  %v17592_v60 = vld [vmem:[%s27435_s1 + $0x5ec] sm:$0xf0]  ;;  %v12168_v6 = vor.u32 %v17560_v58, %v12167_v55 }
  0xef   : > { %v16899_v11 = vld [vmem:[%s27435_s1 + $0x68c] sm:$0xf]  ;;  %v11460_v19 = vor.u32 %v16867_v7, %v11457_v10  ;;  %v12296_v7 = vor.u32 %v17592_v60, %v12295_v59  ;;  %v12151_v10 = vld [vmem:[%s27435_s1 + $0x390] sm:$0xf] }
  0xf0   : > { %v11585_v12 = vld [vmem:[%s27435_s1 + $0x6a8] sm:$0xf0]  ;;  %1699 = vmatpush.bf16.msrb.mxu3 %v11876_v0  ;;  %1674 = vmatpush.bf16.msrb.mxu1 %v11604_v8  ;;  %v17624_v0 = vld [vmem:[%s27435_s1 + $0x7ec] sm:$0xf0] }
  0xf1   : > { %v16931_v14 = vld [vmem:[%s27435_s1 + $0x88c] sm:$0xf]  ;;  %v11588_v21 = vor.u32 %v16899_v11, %v11585_v12  ;;  %v12023_v8 = vld [vmem:[%s27435_s1 + $0x190] sm:$0xf]  ;;  %v12424_v11 = vor.u32 %v17624_v0, %v12423_v63 }
  0xf2   : > { %v11713_v15 = vld [vmem:[%s27435_s1 + $0x8a8] sm:$0xf0]  ;;  %1687 = vmatpush.bf16.msrb.mxu2 %v11732_v9  ;;  %1662 = vmatpush.bf16.msrb.mxu0 %v11460_v19  ;;  %v17524_v9 = vld [vmem:[%s27435_s1 + $0x1ac] sm:$0xf0] }
  0xf3   : > { %v16963_v17 = vld [vmem:[%s27435_s1 + $0xa8c] sm:$0xf]  ;;  %v11716_v22 = vor.u32 %v16931_v14, %v11713_v15  ;;  %v17556_v12 = vld [vmem:[%s27435_s1 + $0x3ac] sm:$0xf0]  ;;  %v1446_v15 = vadd.f32 %v1445_v5, %v1433_v4  ;;  %v430_v5 = vperm.slane %v19533_v16, 1 }
  0xf4   : > { %v11841_v18 = vld [vmem:[%s27435_s1 + $0xaa8] sm:$0xf0]  ;;  %1700 = vmatpush.bf16.msrb.mxu3 %v11860_v13  ;;  %1675 = vmatpush.bf16.msrb.mxu1 %v11588_v21  ;;  %v12279_v13 = vld [vmem:[%s27435_s1 + $0x590] sm:$0xf]  ;;  %v12024_v21 = vor.u32 %v17524_v9, %v12023_v8 }
  0xf5   : > { %v16863_v20 = vld [vmem:[%s27435_s1 + $0x44c] sm:$0xf]  ;;  %v11844_v26 = vor.u32 %v16963_v17, %v11841_v18  ;;  %v17588_v14 = vld [vmem:[%s27435_s1 + $0x5ac] sm:$0xf0]  ;;  %v1408_v17 = vpop.f32.mrf.mxu0  ;;  %v1447_v41 = vpop.f32.mrf.mxu3 }
  0xf6   : > { %v11441_v23 = vld [vmem:[%s27435_s1 + $0x468] sm:$0xf0]  ;;  %1688 = vmatpush.bf16.msrb.mxu2 %v11716_v22  ;;  %v12407_v18 = vld [vmem:[%s27435_s1 + $0x790] sm:$0xf]  ;;  %v12152_v22 = vor.u32 %v17556_v12, %v12151_v10 }
  0xf7   : > { %v16895_v24 = vld [vmem:[%s27435_s1 + $0x64c] sm:$0xf]  ;;  %v11444_v38 = vor.u32 %v16863_v20, %v11441_v23  ;;  %v17620_v19 = vld [vmem:[%s27435_s1 + $0x7ac] sm:$0xf0]  ;;  %v1421_v20 = vpop.f32.mrf.mxu1  ;;  %v12280_v23 = vor.u32 %v17588_v14, %v12279_v13 }
  0xf8   : > { %v11569_v27 = vld [vmem:[%s27435_s1 + $0x668] sm:$0xf0]  ;;  %1701 = vmatpush.bf16.msrb.mxu3 %v11844_v26  ;;  %v12135_v26 = vld [vmem:[%s27435_s1 + $0x350] sm:$0xf] }
  0xf9   : > { %v16927_v32 = vld [vmem:[%s27435_s1 + $0x84c] sm:$0xf]  ;;  %v11572_v42 = vor.u32 %v16895_v24, %v11569_v27  ;;  %1663 = vmatpush.bf16.msrb.mxu0 %v11444_v38  ;;  %v12007_v24 = vld [vmem:[%s27435_s1 + $0x150] sm:$0xf]  ;;  %v12408_v27 = vor.u32 %v17620_v19, %v12407_v18 }
  0xfa   : > { %v11697_v33 = vld [vmem:[%s27435_s1 + $0x868] sm:$0xf0]  ;;  %v17616_v38 = vld [vmem:[%s27435_s1 + $0x76c] sm:$0xf0] }
  0xfb   : > { %v16959_v35 = vld [vmem:[%s27435_s1 + $0xa4c] sm:$0xf]  ;;  %v11700_v43 = vor.u32 %v16927_v32, %v11697_v33  ;;  %1676 = vmatpush.bf16.msrb.mxu1 %v11572_v42  ;;  %v17552_v32 = vld [vmem:[%s27435_s1 + $0x36c] sm:$0xf0] }
  0xfc   : > { %v11825_v36 = vld [vmem:[%s27435_s1 + $0xa68] sm:$0xf0]  ;;  %v12263_v33 = vld [vmem:[%s27435_s1 + $0x550] sm:$0xf]  ;;  %v12136_v42 = vor.u32 %v17552_v32, %v12135_v26 }
  0xfd   : > { %v16859_v39 = vld [vmem:[%s27435_s1 + $0x40c] sm:$0xf]  ;;  %v11828_v49 = vor.u32 %v16959_v35, %v11825_v36  ;;  %1689 = vmatpush.bf16.msrb.mxu2 %v11700_v43  ;;  %v17584_v35 = vld [vmem:[%s27435_s1 + $0x56c] sm:$0xf0]  ;;  %v1458_v53 = vpop.f32.mrf.mxu0 }
  0xfe   : > { %v11425_v40 = vld [vmem:[%s27435_s1 + $0x428] sm:$0xf0]  ;;  %v12391_v36 = vld [vmem:[%s27435_s1 + $0x750] sm:$0xf]  ;;  %v12264_v43 = vor.u32 %v17584_v35, %v12263_v33  ;;  %v1459_v55 = vadd.f32 %v1458_v53, %v1446_v15 }
  0xff   : > { %v16891_v44 = vld [vmem:[%s27435_s1 + $0x60c] sm:$0xf]  ;;  %v11428_v57 = vor.u32 %v16859_v39, %v11425_v40  ;;  %1702 = vmatpush.bf16.msrb.mxu3 %v11828_v49  ;;  %v1434_v39 = vpop.f32.mrf.mxu2  ;;  %v12008_v40 = vor.u32 %v17520_v25, %v12007_v24  ;;  %v12392_v47 = vor.u32 %v17616_v38, %v12391_v36  ;;  %v12247_v49 = vld [vmem:[%s27435_s1 + $0x510] sm:$0xf]  ;;  %v1471_v56 = vpop.f32.mrf.mxu1 }
 0x100   : > { %v11553_v45 = vld [vmem:[%s27435_s1 + $0x628] sm:$0xf0]  ;;  %v11975_v59 = vld [vmem:[%s27435_s1 + $0xd0] sm:$0xf] }
 0x101   : > { %v16923_v46 = vld [vmem:[%s27435_s1 + $0x80c] sm:$0xf]  ;;  %v11556_v61 = vor.u32 %v16891_v44, %v11553_v45  ;;  %1664 = vmatpush.bf16.msrb.mxu0 %v11428_v57  ;;  %v11991_v44 = vld [vmem:[%s27435_s1 + $0x110] sm:$0xf] }
 0x102   : > { %v11681_v50 = vld [vmem:[%s27435_s1 + $0x828] sm:$0xf0]  ;;  %v17516_v45 = vld [vmem:[%s27435_s1 + $0x12c] sm:$0xf0] }
 0x103   : > { %v16955_v51 = vld [vmem:[%s27435_s1 + $0xa0c] sm:$0xf]  ;;  %v11684_v62 = vor.u32 %v16923_v46, %v11681_v50  ;;  %1677 = vmatpush.bf16.msrb.mxu1 %v11556_v61  ;;  %v12119_v46 = vld [vmem:[%s27435_s1 + $0x310] sm:$0xf]  ;;  %v11992_v54 = vor.u32 %v17516_v45, %v11991_v44 }
 0x104   : > { %v11809_v52 = vld [vmem:[%s27435_s1 + $0xa28] sm:$0xf0]  ;;  %1665 = vmatmul.bf16.vlgmr.msrb.gmra.mxu0 %v18709_v28  ;;  %v17580_v50 = vld [vmem:[%s27435_s1 + $0x52c] sm:$0xf0]  ;;  %v12120_v57 = vor.u32 %v17548_v48, %v12119_v46 }
 0x105   : > { %v11812_v2 = vor.u32 %v16955_v51, %v11809_v52  ;;  %1690 = vmatpush.bf16.msrb.mxu2 %v11684_v62  ;;  %3391 = vmatpush.bf16.msra.mxu0 %v12040_v3  ;;  %v12375_v51 = vld [vmem:[%s27435_s1 + $0x710] sm:$0xf]  ;;  %v12248_v58 = vor.u32 %v17580_v50, %v12247_v49 }
 0x106   : > { %1678 = vmatmul.bf16.vlgmr.msrb.gmra.mxu1 %v18713_v30  ;;  %v17612_v52 = vld [vmem:[%s27435_s1 + $0x72c] sm:$0xf0] }
 0x107   : > { %1703 = vmatpush.bf16.msrb.mxu3 %v11812_v2  ;;  %3404 = vmatpush.bf16.msra.mxu1 %v12168_v6  ;;  %v17512_v60 = vld [vmem:[%s27435_s1 + $0xec] sm:$0xf0]  ;;  %v12376_v62 = vor.u32 %v17612_v52, %v12375_v51  ;;  %v19708_v2 = vadd.f32 %v1471_v56, %v1459_v55  ;;  %v1484_v17 = vpop.f32.mrf.mxu2  ;;  %v1473_v24 = vpop.f32.mrf.mxu1 }
 0x108   : > { %1691 = vmatmul.bf16.vlgmr.msrb.gmra.mxu2 %v18838_v31  ;;  %v12103_v61 = vld [vmem:[%s27435_s1 + $0x2d0] sm:$0xf]  ;;  %v11976_v6 = vor.u32 %v17512_v60, %v11975_v59  ;;  %v1485_v20 = vadd.f32 %v1484_v17, %v430_v5  ;;  %v17554_v17 = vld [vmem:[%s27435_s1 + $0x394] sm:$0xf] }
 0x109   : > { %3417 = vmatpush.bf16.msra.mxu2 %v12296_v7  ;;  %3392 = vmatpush.bf16.msra.mxu0 %v12024_v21  ;;  %v17544_v63 = vld [vmem:[%s27435_s1 + $0x2ec] sm:$0xf0]  ;;  %v1497_v21 = vpop.f32.mrf.mxu3 }
 0x10a   : > { %1704 = vmatmul.bf16.vlgmr.msrb.gmra.mxu3 %v18846_v34  ;;  %v12231_v0 = vld [vmem:[%s27435_s1 + $0x4d0] sm:$0xf]  ;;  %v12104_v7 = vor.u32 %v17544_v63, %v12103_v61  ;;  %v19750_v35 = vadd.f32 %v1497_v21, %v1485_v20  ;;  %v12041_v63 = vld [vmem:[%s27435_s1 + $0x1f0] sm:$0xf0] }
 0x10b   : > { %3430 = vmatpush.bf16.msra.mxu3 %v12424_v11  ;;  %3405 = vmatpush.bf16.msra.mxu1 %v12152_v22  ;;  %v12359_v3 = vld [vmem:[%s27435_s1 + $0x6d0] sm:$0xf]  ;;  %v12232_v8 = vor.u32 %v17576_v1, %v12231_v0  ;;  %v1460_v22 = vpop.f32.mrf.mxu0 }
 0x10c   : > { %v17608_v4 = vld [vmem:[%s27435_s1 + $0x6ec] sm:$0xf0] }
 0x10d   : > { %3418 = vmatpush.bf16.msra.mxu2 %v12280_v23  ;;  %3393 = vmatpush.bf16.msra.mxu0 %v12008_v40  ;;  %v11959_v9 = vld [vmem:[%s27435_s1 + $0x90] sm:$0xf]  ;;  %v12360_v12 = vor.u32 %v17608_v4, %v12359_v3  ;;  %v17558_v3 = vld [vmem:[%s27435_s1 + $0x3d4] sm:$0xf] }
 0x10e   : > { %v17508_v10 = vld [vmem:[%s27435_s1 + $0xac] sm:$0xf0]  ;;  %v12169_v4 = vld [vmem:[%s27435_s1 + $0x3f0] sm:$0xf0] }
 0x10f   : > { %3431 = vmatpush.bf16.msra.mxu3 %v12408_v27  ;;  %3406 = vmatpush.bf16.msra.mxu1 %v12136_v42  ;;  %v12087_v11 = vld [vmem:[%s27435_s1 + $0x290] sm:$0xf]  ;;  %v11960_v23 = vor.u32 %v17508_v10, %v11959_v9  ;;  %v1486_v55 = vpop.f32.mrf.mxu2 }
 0x110   : > { %v17540_v13 = vld [vmem:[%s27435_s1 + $0x2ac] sm:$0xf0] }
 0x111   : > { %3419 = vmatpush.bf16.msra.mxu2 %v12264_v43  ;;  %3394 = vmatpush.bf16.msra.mxu0 %v11992_v54  ;;  %v12215_v14 = vld [vmem:[%s27435_s1 + $0x490] sm:$0xf]  ;;  %v12088_v25 = vor.u32 %v17540_v13, %v12087_v11  ;;  %v1499_v59 = vpop.f32.mrf.mxu3 }
 0x112   : > { %v17572_v15 = vld [vmem:[%s27435_s1 + $0x4ac] sm:$0xf0] }
 0x113   : > { %3432 = vmatpush.bf16.msra.mxu3 %v12392_v47  ;;  %3407 = vmatpush.bf16.msra.mxu1 %v12120_v57  ;;  %v12343_v18 = vld [vmem:[%s27435_s1 + $0x690] sm:$0xf]  ;;  %v12216_v26 = vor.u32 %v17572_v15, %v12215_v14  ;;  %v17522_v14 = vld [vmem:[%s27435_s1 + $0x194] sm:$0xf] }
 0x114   : > { %v17604_v19 = vld [vmem:[%s27435_s1 + $0x6ac] sm:$0xf0]  ;;  %v12025_v15 = vld [vmem:[%s27435_s1 + $0x1b0] sm:$0xf0] }
 0x115   : > { %3420 = vmatpush.bf16.msra.mxu2 %v12248_v58  ;;  %3395 = vmatpush.bf16.msra.mxu0 %v11976_v6  ;;  %v11943_v27 = vld [vmem:[%s27435_s1 + $0x50] sm:$0xf]  ;;  %v12344_v36 = vor.u32 %v17604_v19, %v12343_v18  ;;  %v12153_v18 = vld [vmem:[%s27435_s1 + $0x3b0] sm:$0xf0]  ;;  %v12028_v21 = vor.u32 %v17522_v14, %v12025_v15 }
 0x116   : > { %v17504_v32 = vld [vmem:[%s27435_s1 + $0x6c] sm:$0xf0]  ;;  %v17538_v15 = vld [vmem:[%s27435_s1 + $0x294] sm:$0xf] }
 0x117   : > { %3433 = vmatpush.bf16.msra.mxu3 %v12376_v62  ;;  %3408 = vmatpush.bf16.msra.mxu1 %v12104_v7  ;;  %v12071_v33 = vld [vmem:[%s27435_s1 + $0x250] sm:$0xf]  ;;  %v11944_v43 = vor.u32 %v17504_v32, %v11943_v27  ;;  %v17526_v62 = vld [vmem:[%s27435_s1 + $0x1d4] sm:$0xf] }
 0x118   : > { %v17536_v38 = vld [vmem:[%s27435_s1 + $0x26c] sm:$0xf0]  ;;  %v17518_v27 = vld [vmem:[%s27435_s1 + $0x154] sm:$0xf] }
 0x119   : > { %3421 = vmatpush.bf16.msra.mxu2 %v12232_v8  ;;  %v12199_v39 = vld [vmem:[%s27435_s1 + $0x450] sm:$0xf]  ;;  %3396 = vmatpush.bf16.msra.mxu0 %v11960_v23  ;;  %v12072_v46 = vor.u32 %v17536_v38, %v12071_v33  ;;  %v12044_v8 = vor.u32 %v17526_v62, %v12041_v63  ;;  %v12009_v32 = vld [vmem:[%s27435_s1 + $0x170] sm:$0xf0] }
 0x11a   : > { %v17568_v40 = vld [vmem:[%s27435_s1 + $0x46c] sm:$0xf0]  ;;  %v17550_v33 = vld [vmem:[%s27435_s1 + $0x354] sm:$0xf] }
 0x11b   : > { %3434 = vmatpush.bf16.msra.mxu3 %v12360_v12  ;;  %v12327_v41 = vld [vmem:[%s27435_s1 + $0x650] sm:$0xf]  ;;  %3409 = vmatpush.bf16.msra.mxu1 %v12088_v25  ;;  %v12200_v47 = vor.u32 %v17568_v40, %v12199_v39  ;;  %v12172_v12 = vor.u32 %v17558_v3, %v12169_v4  ;;  %v12156_v25 = vor.u32 %v17554_v17, %v12153_v18  ;;  %v11977_v62 = vld [vmem:[%s27435_s1 + $0xf0] sm:$0xf0] }
 0x11c   : > { %v17600_v42 = vld [vmem:[%s27435_s1 + $0x66c] sm:$0xf0]  ;;  %v12012_v40 = vor.u32 %v17518_v27, %v12009_v32  ;;  %v17542_v63 = vld [vmem:[%s27435_s1 + $0x2d4] sm:$0xf] }
 0x11d   : > { %v11927_v44 = vld [vmem:[%s27435_s1 + $0x10] sm:$0xf]  ;;  %3422 = vmatpush.bf16.msra.mxu2 %v12216_v26  ;;  %v12328_v51 = vor.u32 %v17600_v42, %v12327_v41  ;;  %3397 = vmatpush.bf16.msra.mxu0 %v11944_v43  ;;  %v12089_v17 = vld [vmem:[%s27435_s1 + $0x2b0] sm:$0xf0] }
 0x11e   : > { %v17500_v45 = vld [vmem:[%s27435_s1 + $0x2c] sm:$0xf0]  ;;  %v12092_v27 = vor.u32 %v17538_v15, %v12089_v17 }
 0x11f   : > { %v12055_v48 = vld [vmem:[%s27435_s1 + $0x210] sm:$0xf]  ;;  %3435 = vmatpush.bf16.msra.mxu3 %v12344_v36  ;;  %v11928_v60 = vor.u32 %v17500_v45, %v11927_v44  ;;  %3410 = vmatpush.bf16.msra.mxu1 %v12072_v46  ;;  %v12137_v36 = vld [vmem:[%s27435_s1 + $0x370] sm:$0xf0] }
 0x120   : > { %v17532_v49 = vld [vmem:[%s27435_s1 + $0x22c] sm:$0xf0]  ;;  %v12140_v44 = vor.u32 %v17550_v33, %v12137_v36  ;;  %v17514_v46 = vld [vmem:[%s27435_s1 + $0x114] sm:$0xf] }
 0x121   : > { %v12183_v50 = vld [vmem:[%s27435_s1 + $0x410] sm:$0xf]  ;;  %3423 = vmatpush.bf16.msra.mxu2 %v12200_v47  ;;  %v12056_v0 = vor.u32 %v17532_v49, %v12055_v48  ;;  %3398 = vmatpush.bf16.msra.mxu0 %v11928_v60  ;;  %v11993_v47 = vld [vmem:[%s27435_s1 + $0x130] sm:$0xf0] }
 0x122   : > { %v17564_v52 = vld [vmem:[%s27435_s1 + $0x42c] sm:$0xf0]  ;;  %v17546_v48 = vld [vmem:[%s27435_s1 + $0x314] sm:$0xf] }
 0x123   : > { %v12311_v53 = vld [vmem:[%s27435_s1 + $0x610] sm:$0xf]  ;;  %v12184_v1 = vor.u32 %v17564_v52, %v12183_v50  ;;  %3436 = vmatpush.bf16.msra.mxu3 %v12328_v51  ;;  %3411 = vmatpush.bf16.msra.mxu1 %v12056_v0  ;;  %v12121_v49 = vld [vmem:[%s27435_s1 + $0x330] sm:$0xf0]  ;;  %v1510_v51 = vpop.f32.mrf.mxu0 }
 0x124   : > { %v17596_v54 = vld [vmem:[%s27435_s1 + $0x62c] sm:$0xf0]  ;;  %3399 = vmatmul.bf16.vlgmr.msra.gmra.mxu0 %v18711_v29  ;;  %v12124_v59 = vor.u32 %v17546_v48, %v12121_v49  ;;  %v17502_v33 = vld [vmem:[%s27435_s1 + $0x54] sm:$0xf] }
 0x125   : > { %v12551_v56 = vld [vmem:[%s27435_s1 + $0x9d0] sm:$0xf]  ;;  %v12312_v5 = vor.u32 %v17596_v54, %v12311_v53  ;;  %3424 = vmatpush.bf16.msra.mxu2 %v12184_v1  ;;  %v11996_v53 = vor.u32 %v17514_v46, %v11993_v47  ;;  %v11945_v36 = vld [vmem:[%s27435_s1 + $0x70] sm:$0xf0] }
 0x126   : > { %v17656_v57 = vld [vmem:[%s27435_s1 + $0x9ec] sm:$0xf0]  ;;  %3412 = vmatmul.bf16.vlgmr.msra.gmra.mxu1 %v18725_v37  ;;  %v1549_v14 = vpop.f32.mrf.mxu3  ;;  %v17498_v47 = vld [vmem:[%s27435_s1 + $0x14] sm:$0xf] }
 0x127   : > { %v12679_v58 = vld [vmem:[%s27435_s1 + $0xbd0] sm:$0xf]  ;;  %v12552_v6 = vor.u32 %v17656_v57, %v12551_v56  ;;  %3437 = vmatpush.bf16.msra.mxu3 %v12312_v5  ;;  %v1511_v57 = vadd.f32 %v1510_v51, %v19750_v35  ;;  %v12105_v35 = vld [vmem:[%s27435_s1 + $0x2f0] sm:$0xf0] }
 0x128   : > { %v17688_v61 = vld [vmem:[%s27435_s1 + $0xbec] sm:$0xf0]  ;;  %3425 = vmatmul.bf16.vlgmr.msra.gmra.mxu2 %v18709_v28  ;;  %v17530_v51 = vld [vmem:[%s27435_s1 + $0x214] sm:$0xf] }
 0x129   : > { %v12680_v7 = vor.u32 %v17688_v61, %v12679_v58  ;;  %v12535_v9 = vld [vmem:[%s27435_s1 + $0x990] sm:$0xf]  ;;  %3443 = vmatpush.bf16.msrb.mxu0 %v12552_v6  ;;  %3469 = vmatpush.bf16.msrb.mxu2 %v12044_v8  ;;  %v1523_v58 = vpop.f32.mrf.mxu1  ;;  %v17510_v61 = vld [vmem:[%s27435_s1 + $0xd4] sm:$0xf]  ;;  %v1536_v8 = vpop.f32.mrf.mxu2 }
 0x12a   : > { %v17652_v10 = vld [vmem:[%s27435_s1 + $0x9ac] sm:$0xf0]  ;;  %3438 = vmatmul.bf16.vlgmr.msra.gmra.mxu3 %v18713_v30  ;;  %v1524_v0 = vadd.f32 %v1523_v58, %v1511_v57  ;;  %v11980_v4 = vor.u32 %v17510_v61, %v11977_v62  ;;  %v12425_v58 = vld [vmem:[%s27435_s1 + $0x7f0] sm:$0xf0] }
 0x12b   : > { %v12663_v11 = vld [vmem:[%s27435_s1 + $0xb90] sm:$0xf]  ;;  %v12536_v19 = vor.u32 %v17652_v10, %v12535_v9  ;;  %3456 = vmatpush.bf16.msrb.mxu1 %v12680_v7  ;;  %3482 = vmatpush.bf16.msrb.mxu3 %v12172_v12  ;;  %v12108_v9 = vor.u32 %v17542_v63, %v12105_v35  ;;  %v11961_v12 = vld [vmem:[%s27435_s1 + $0xb0] sm:$0xf0] }
 0x12c   : > { %v17684_v13 = vld [vmem:[%s27435_s1 + $0xbac] sm:$0xf0]  ;;  %v17686_v63 = vld [vmem:[%s27435_s1 + $0xbd4] sm:$0xf] }
 0x12d   : > { %v12664_v20 = vor.u32 %v17684_v13, %v12663_v11  ;;  %v12519_v22 = vld [vmem:[%s27435_s1 + $0x950] sm:$0xf]  ;;  %3444 = vmatpush.bf16.msrb.mxu0 %v12536_v19  ;;  %3470 = vmatpush.bf16.msrb.mxu2 %v12028_v21  ;;  %v17506_v11 = vld [vmem:[%s27435_s1 + $0x94] sm:$0xf]  ;;  %v1537_v13 = vadd.f32 %v1536_v8, %v1524_v0 }
 0x12e   : > { %v17648_v23 = vld [vmem:[%s27435_s1 + $0x96c] sm:$0xf0]  ;;  %v12681_v35 = vld [vmem:[%s27435_s1 + $0xbf0] sm:$0xf0] }
 0x12f   : > { %v12647_v24 = vld [vmem:[%s27435_s1 + $0xb50] sm:$0xf]  ;;  %v12520_v38 = vor.u32 %v17648_v23, %v12519_v22  ;;  %3457 = vmatpush.bf16.msrb.mxu1 %v12664_v20  ;;  %3483 = vmatpush.bf16.msrb.mxu3 %v12156_v25  ;;  %v19940_v19 = vadd.f32 %v1549_v14, %v1537_v13  ;;  %v1512_v20 = vpop.f32.mrf.mxu0  ;;  %v11964_v22 = vor.u32 %v17506_v11, %v11961_v12  ;;  %v12537_v11 = vld [vmem:[%s27435_s1 + $0x9b0] sm:$0xf0] }
 0x130   : > { %v17680_v26 = vld [vmem:[%s27435_s1 + $0xb6c] sm:$0xf0]  ;;  %v12684_v8 = vor.u32 %v17686_v63, %v12681_v35  ;;  %v17682_v12 = vld [vmem:[%s27435_s1 + $0xb94] sm:$0xf] }
 0x131   : > { %v12648_v39 = vor.u32 %v17680_v26, %v12647_v24  ;;  %v12503_v41 = vld [vmem:[%s27435_s1 + $0x910] sm:$0xf]  ;;  %3445 = vmatpush.bf16.msrb.mxu0 %v12520_v38  ;;  %3471 = vmatpush.bf16.msrb.mxu2 %v12012_v40  ;;  %v1525_v26 = vpop.f32.mrf.mxu1  ;;  %v17534_v38 = vld [vmem:[%s27435_s1 + $0x254] sm:$0xf]  ;;  %v1538_v48 = vpop.f32.mrf.mxu2 }
 0x132   : > { %v17644_v42 = vld [vmem:[%s27435_s1 + $0x92c] sm:$0xf0]  ;;  %v12665_v13 = vld [vmem:[%s27435_s1 + $0xbb0] sm:$0xf0] }
 0x133   : > { %v12631_v43 = vld [vmem:[%s27435_s1 + $0xb10] sm:$0xf]  ;;  %v12504_v50 = vor.u32 %v17644_v42, %v12503_v41  ;;  %3458 = vmatpush.bf16.msrb.mxu1 %v12648_v39  ;;  %3484 = vmatpush.bf16.msrb.mxu3 %v12140_v44  ;;  %v12073_v39 = vld [vmem:[%s27435_s1 + $0x270] sm:$0xf0]  ;;  %v11948_v44 = vor.u32 %v17502_v33, %v11945_v36 }
 0x134   : > { %v17676_v45 = vld [vmem:[%s27435_s1 + $0xb2c] sm:$0xf0]  ;;  %v12076_v49 = vor.u32 %v17534_v38, %v12073_v39  ;;  %v12265_v20 = vld [vmem:[%s27435_s1 + $0x570] sm:$0xf0] }
 0x135   : > { %v12632_v52 = vor.u32 %v17676_v45, %v12631_v43  ;;  %v12487_v54 = vld [vmem:[%s27435_s1 + $0x8d0] sm:$0xf]  ;;  %3446 = vmatpush.bf16.msrb.mxu0 %v12504_v50  ;;  %3472 = vmatpush.bf16.msrb.mxu2 %v11996_v53  ;;  %v11929_v50 = vld [vmem:[%s27435_s1 + $0x30] sm:$0xf0]  ;;  %v1551_v53 = vpop.f32.mrf.mxu3 }
 0x136   : > { %v17640_v55 = vld [vmem:[%s27435_s1 + $0x8ec] sm:$0xf0]  ;;  %v11932_v62 = vor.u32 %v17498_v47, %v11929_v50  ;;  %v17678_v26 = vld [vmem:[%s27435_s1 + $0xb54] sm:$0xf] }
 0x137   : > { %v12615_v56 = vld [vmem:[%s27435_s1 + $0xad0] sm:$0xf]  ;;  %v12488_v1 = vor.u32 %v17640_v55, %v12487_v54  ;;  %3459 = vmatpush.bf16.msrb.mxu1 %v12632_v52  ;;  %3485 = vmatpush.bf16.msrb.mxu3 %v12124_v59  ;;  %v12057_v52 = vld [vmem:[%s27435_s1 + $0x230] sm:$0xf0] }
 0x138   : > { %v17672_v60 = vld [vmem:[%s27435_s1 + $0xaec] sm:$0xf0]  ;;  %v17590_v54 = vld [vmem:[%s27435_s1 + $0x5d4] sm:$0xf]  ;;  %v12060_v0 = vor.u32 %v17530_v51, %v12057_v52 }
 0x139   : > { %v12616_v3 = vor.u32 %v17672_v60, %v12615_v56  ;;  %v12471_v5 = vld [vmem:[%s27435_s1 + $0x890] sm:$0xf]  ;;  %3447 = vmatpush.bf16.msrb.mxu0 %v12488_v1  ;;  %3473 = vmatpush.bf16.msrb.mxu2 %v11980_v4  ;;  %v12297_v55 = vld [vmem:[%s27435_s1 + $0x5f0] sm:$0xf0] }
 0x13a   : > { %v17636_v6 = vld [vmem:[%s27435_s1 + $0x8ac] sm:$0xf0]  ;;  %v17622_v56 = vld [vmem:[%s27435_s1 + $0x7d4] sm:$0xf]  ;;  %v12300_v1 = vor.u32 %v17590_v54, %v12297_v55  ;;  %v1562_v48 = vpop.f32.mrf.mxu0 }
 0x13b   : > { %v12599_v7 = vld [vmem:[%s27435_s1 + $0xa90] sm:$0xf]  ;;  %v12472_v18 = vor.u32 %v17636_v6, %v12471_v5  ;;  %3460 = vmatpush.bf16.msrb.mxu1 %v12616_v3  ;;  %3486 = vmatpush.bf16.msrb.mxu3 %v12108_v9  ;;  %v17654_v59 = vld [vmem:[%s27435_s1 + $0x9d4] sm:$0xf]  ;;  %v12428_v3 = vor.u32 %v17622_v56, %v12425_v58 }
 0x13c   : > { %v17668_v10 = vld [vmem:[%s27435_s1 + $0xaac] sm:$0xf0]  ;;  %v12553_v60 = vld [vmem:[%s27435_s1 + $0x9f0] sm:$0xf0]  ;;  %v1575_v55 = vpop.f32.mrf.mxu1 }
 0x13d   : > { %v12600_v21 = vor.u32 %v17668_v10, %v12599_v7  ;;  %v12455_v23 = vld [vmem:[%s27435_s1 + $0x850] sm:$0xf]  ;;  %3448 = vmatpush.bf16.msrb.mxu0 %v12472_v18  ;;  %3474 = vmatpush.bf16.msrb.mxu2 %v11964_v22  ;;  %v12556_v4 = vor.u32 %v17654_v59, %v12553_v60  ;;  %v17586_v5 = vld [vmem:[%s27435_s1 + $0x594] sm:$0xf]  ;;  %v12668_v22 = vor.u32 %v17682_v12, %v12665_v13 }
 0x13e   : > { %v17632_v24 = vld [vmem:[%s27435_s1 + $0x86c] sm:$0xf0]  ;;  %v12281_v6 = vld [vmem:[%s27435_s1 + $0x5b0] sm:$0xf0] }
 0x13f   : > { %v12583_v25 = vld [vmem:[%s27435_s1 + $0xa50] sm:$0xf]  ;;  %v12456_v40 = vor.u32 %v17632_v24, %v12455_v23  ;;  %3461 = vmatpush.bf16.msrb.mxu1 %v12600_v21  ;;  %3487 = vmatpush.bf16.msrb.mxu3 %v12092_v27  ;;  %v17618_v7 = vld [vmem:[%s27435_s1 + $0x794] sm:$0xf]  ;;  %v12284_v14 = vor.u32 %v17586_v5, %v12281_v6 }
 0x140   : > { %v17664_v32 = vld [vmem:[%s27435_s1 + $0xa6c] sm:$0xf0]  ;;  %v12409_v9 = vld [vmem:[%s27435_s1 + $0x7b0] sm:$0xf0] }
 0x141   : > { %v12439_v41 = vld [vmem:[%s27435_s1 + $0x810] sm:$0xf]  ;;  %v12584_v43 = vor.u32 %v17664_v32, %v12583_v25  ;;  %3449 = vmatpush.bf16.msrb.mxu0 %v12456_v40  ;;  %3475 = vmatpush.bf16.msrb.mxu2 %v11948_v44  ;;  %v17650_v10 = vld [vmem:[%s27435_s1 + $0x994] sm:$0xf]  ;;  %v12412_v15 = vor.u32 %v17618_v7, %v12409_v9 }
 0x142   : > { %v17628_v42 = vld [vmem:[%s27435_s1 + $0x82c] sm:$0xf0]  ;;  %v12540_v17 = vor.u32 %v17650_v10, %v12537_v11  ;;  %v17582_v18 = vld [vmem:[%s27435_s1 + $0x554] sm:$0xf] }
 0x143   : > { %v12567_v45 = vld [vmem:[%s27435_s1 + $0xa10] sm:$0xf]  ;;  %v12440_v57 = vor.u32 %v17628_v42, %v12439_v41  ;;  %3462 = vmatpush.bf16.msrb.mxu1 %v12584_v43  ;;  %3488 = vmatpush.bf16.msrb.mxu3 %v12076_v49  ;;  %v17614_v21 = vld [vmem:[%s27435_s1 + $0x754] sm:$0xf]  ;;  %v12268_v32 = vor.u32 %v17582_v18, %v12265_v20  ;;  %v431_v41 = vperm.slane %v19533_v16, 2 }
 0x144   : > { %v17660_v46 = vld [vmem:[%s27435_s1 + $0xa2c] sm:$0xf0]  ;;  %v12393_v23 = vld [vmem:[%s27435_s1 + $0x770] sm:$0xf0]  ;;  %v1588_v5 = vpop.f32.mrf.mxu2 }
 0x145   : > { %v12568_v61 = vor.u32 %v17660_v46, %v12567_v45  ;;  %3450 = vmatpush.bf16.msrb.mxu0 %v12440_v57  ;;  %3476 = vmatpush.bf16.msrb.mxu2 %v11932_v62  ;;  %v17646_v24 = vld [vmem:[%s27435_s1 + $0x954] sm:$0xf]  ;;  %v12396_v36 = vor.u32 %v17614_v21, %v12393_v23  ;;  %v1563_v54 = vadd.f32 %v1562_v48, %v431_v41 }
 0x146   : > { %v12521_v25 = vld [vmem:[%s27435_s1 + $0x970] sm:$0xf0]  ;;  %v1601_v11 = vpop.f32.mrf.mxu3 }
 0x147   : > { %3463 = vmatpush.bf16.msrb.mxu1 %v12568_v61  ;;  %3489 = vmatpush.bf16.msrb.mxu3 %v12060_v0  ;;  %v12649_v27 = vld [vmem:[%s27435_s1 + $0xb70] sm:$0xf0]  ;;  %v12524_v38 = vor.u32 %v17646_v24, %v12521_v25  ;;  %v1576_v62 = vadd.f32 %v1575_v55, %v1563_v54  ;;  %v1577_v24 = vpop.f32.mrf.mxu1  ;;  %v17561_v55 = vld [vmem:[%s27435_s1 + $0x3f4] sm:$0xf0] }
 0x148   : > { %3451 = vmatmul.bf16.vlgmr.msrb.gmra.mxu0 %v18838_v31  ;;  %3477 = vmatmul.bf16.vlgmr.msrb.gmra.mxu2 %v18711_v29  ;;  %v17578_v33 = vld [vmem:[%s27435_s1 + $0x514] sm:$0xf]  ;;  %v12652_v42 = vor.u32 %v17678_v26, %v12649_v27  ;;  %v12399_v24 = vld [vmem:[%s27435_s1 + $0x758] sm:$0xf] }
 0x149   : > { %3495 = vmatpush.bf16.msra.mxu0 %v12300_v1  ;;  %3521 = vmatpush.bf16.msra.mxu2 %v12556_v4  ;;  %v12249_v39 = vld [vmem:[%s27435_s1 + $0x530] sm:$0xf0]  ;;  %v1589_v10 = vadd.f32 %v1588_v5, %v1576_v62 }
 0x14a   : > { %3464 = vmatmul.bf16.vlgmr.msrb.gmra.mxu1 %v18846_v34  ;;  %3490 = vmatmul.bf16.vlgmr.msrb.gmra.mxu3 %v18725_v37  ;;  %v17610_v40 = vld [vmem:[%s27435_s1 + $0x714] sm:$0xf]  ;;  %v12252_v47 = vor.u32 %v17578_v33, %v12249_v39 }
 0x14b   : > { %3508 = vmatpush.bf16.msra.mxu1 %v12428_v3  ;;  %3534 = vmatpush.bf16.msra.mxu3 %v12684_v8  ;;  %v12377_v43 = vld [vmem:[%s27435_s1 + $0x730] sm:$0xf0] }
 0x14c   : > { %v17642_v44 = vld [vmem:[%s27435_s1 + $0x914] sm:$0xf]  ;;  %v12380_v49 = vor.u32 %v17610_v40, %v12377_v43 }
 0x14d   : > { %3496 = vmatpush.bf16.msra.mxu0 %v12284_v14  ;;  %3522 = vmatpush.bf16.msra.mxu2 %v12540_v17  ;;  %v12505_v45 = vld [vmem:[%s27435_s1 + $0x930] sm:$0xf0]  ;;  %v1564_v17 = vpop.f32.mrf.mxu0 }
 0x14e   : > { %v17674_v46 = vld [vmem:[%s27435_s1 + $0xb14] sm:$0xf]  ;;  %v12508_v50 = vor.u32 %v17642_v44, %v12505_v45  ;;  %v17521_v17 = vld [vmem:[%s27435_s1 + $0x174] sm:$0xf0] }
 0x14f   : > { %3509 = vmatpush.bf16.msra.mxu1 %v12412_v15  ;;  %3535 = vmatpush.bf16.msra.mxu3 %v12668_v22  ;;  %v12633_v16 = vld [vmem:[%s27435_s1 + $0xb30] sm:$0xf0]  ;;  %v20139_v15 = vadd.f32 %v1601_v11, %v1589_v10  ;;  %v17621_v10 = vld [vmem:[%s27435_s1 + $0x7b4] sm:$0xf0] }
 0x150   : > { %v17574_v51 = vld [vmem:[%s27435_s1 + $0x4d4] sm:$0xf]  ;;  %v12636_v56 = vor.u32 %v17674_v46, %v12633_v16  ;;  %v1590_v46 = vpop.f32.mrf.mxu2 }
 0x151   : > { %3497 = vmatpush.bf16.msra.mxu0 %v12268_v32  ;;  %3523 = vmatpush.bf16.msra.mxu2 %v12524_v38  ;;  %v12233_v52 = vld [vmem:[%s27435_s1 + $0x4f0] sm:$0xf0] }
 0x152   : > { %v17606_v53 = vld [vmem:[%s27435_s1 + $0x6d4] sm:$0xf]  ;;  %v12236_v63 = vor.u32 %v17574_v51, %v12233_v52  ;;  %v12047_v51 = vld [vmem:[%s27435_s1 + $0x1d8] sm:$0xf] }
 0x153   : > { %3510 = vmatpush.bf16.msra.mxu1 %v12396_v36  ;;  %3536 = vmatpush.bf16.msra.mxu3 %v12652_v42  ;;  %v12361_v57 = vld [vmem:[%s27435_s1 + $0x6f0] sm:$0xf0]  ;;  %v17529_v52 = vld [vmem:[%s27435_s1 + $0x1f4] sm:$0xf0] }
 0x154   : > { %v17638_v58 = vld [vmem:[%s27435_s1 + $0x8d4] sm:$0xf]  ;;  %v12364_v35 = vor.u32 %v17606_v53, %v12361_v57  ;;  %v12175_v53 = vld [vmem:[%s27435_s1 + $0x3d8] sm:$0xf] }
 0x155   : > { %v12489_v59 = vld [vmem:[%s27435_s1 + $0x8f0] sm:$0xf0]  ;;  %3498 = vmatpush.bf16.msra.mxu0 %v12252_v47  ;;  %3524 = vmatpush.bf16.msra.mxu2 %v12508_v50  ;;  %v1603_v50 = vpop.f32.mrf.mxu3  ;;  %v17593_v57 = vld [vmem:[%s27435_s1 + $0x5f4] sm:$0xf0] }
 0x156   : > { %v17670_v60 = vld [vmem:[%s27435_s1 + $0xad4] sm:$0xf]  ;;  %v12492_v0 = vor.u32 %v17638_v58, %v12489_v59  ;;  %v11983_v50 = vld [vmem:[%s27435_s1 + $0xd8] sm:$0xf] }
 0x157   : > { %v12617_v61 = vld [vmem:[%s27435_s1 + $0xaf0] sm:$0xf0]  ;;  %3511 = vmatpush.bf16.msra.mxu1 %v12380_v49  ;;  %3537 = vmatpush.bf16.msra.mxu3 %v12636_v56  ;;  %v12303_v56 = vld [vmem:[%s27435_s1 + $0x5d8] sm:$0xf] }
 0x158   : > { %v17570_v1 = vld [vmem:[%s27435_s1 + $0x494] sm:$0xf]  ;;  %v12620_v6 = vor.u32 %v17670_v60, %v12617_v61  ;;  %v12431_v60 = vld [vmem:[%s27435_s1 + $0x7d8] sm:$0xf] }
 0x159   : > { %v12217_v3 = vld [vmem:[%s27435_s1 + $0x4b0] sm:$0xf0]  ;;  %3499 = vmatpush.bf16.msra.mxu0 %v12236_v63  ;;  %3525 = vmatpush.bf16.msra.mxu2 %v12492_v0  ;;  %v17625_v61 = vld [vmem:[%s27435_s1 + $0x7f4] sm:$0xf0]  ;;  %v12048_v63 = vor.u32 %v17529_v52, %v12047_v51  ;;  %v12304_v0 = vor.u32 %v17593_v57, %v12303_v56 }
 0x15a   : > { %v17602_v4 = vld [vmem:[%s27435_s1 + $0x694] sm:$0xf]  ;;  %v12220_v14 = vor.u32 %v17570_v1, %v12217_v3  ;;  %v12031_v1 = vld [vmem:[%s27435_s1 + $0x198] sm:$0xf]  ;;  %v12432_v5 = vor.u32 %v17625_v61, %v12431_v60 }
 0x15b   : > { %v12345_v7 = vld [vmem:[%s27435_s1 + $0x6b0] sm:$0xf0]  ;;  %3512 = vmatpush.bf16.msra.mxu1 %v12364_v35  ;;  %3538 = vmatpush.bf16.msra.mxu3 %v12620_v6  ;;  %v12176_v35 = vor.u32 %v17561_v55, %v12175_v53  ;;  %v17525_v3 = vld [vmem:[%s27435_s1 + $0x1b4] sm:$0xf0] }
 0x15c   : > { %v17634_v8 = vld [vmem:[%s27435_s1 + $0x894] sm:$0xf]  ;;  %v12348_v18 = vor.u32 %v17602_v4, %v12345_v7  ;;  %v12159_v4 = vld [vmem:[%s27435_s1 + $0x398] sm:$0xf]  ;;  %v12032_v11 = vor.u32 %v17525_v3, %v12031_v1 }
 0x15d   : > { %v12473_v9 = vld [vmem:[%s27435_s1 + $0x8b0] sm:$0xf0]  ;;  %3500 = vmatpush.bf16.msra.mxu0 %v12220_v14  ;;  %v17557_v6 = vld [vmem:[%s27435_s1 + $0x3b4] sm:$0xf0] }
 0x15e   : > { %v17666_v12 = vld [vmem:[%s27435_s1 + $0xa94] sm:$0xf]  ;;  %v12476_v20 = vor.u32 %v17634_v8, %v12473_v9  ;;  %v12287_v7 = vld [vmem:[%s27435_s1 + $0x598] sm:$0xf] }
 0x15f   : > { %v12601_v13 = vld [vmem:[%s27435_s1 + $0xab0] sm:$0xf0]  ;;  %3513 = vmatpush.bf16.msra.mxu1 %v12348_v18  ;;  %v17589_v8 = vld [vmem:[%s27435_s1 + $0x5b4] sm:$0xf0] }
 0x160   : > { %v17566_v21 = vld [vmem:[%s27435_s1 + $0x454] sm:$0xf]  ;;  %v12604_v25 = vor.u32 %v17666_v12, %v12601_v13  ;;  %3526 = vmatpush.bf16.msra.mxu2 %v12476_v20  ;;  %v12415_v9 = vld [vmem:[%s27435_s1 + $0x798] sm:$0xf]  ;;  %v12160_v12 = vor.u32 %v17557_v6, %v12159_v4  ;;  %v12288_v13 = vor.u32 %v17589_v8, %v12287_v7 }
 0x161   : > { %v12201_v22 = vld [vmem:[%s27435_s1 + $0x470] sm:$0xf0]  ;;  %v12015_v14 = vld [vmem:[%s27435_s1 + $0x158] sm:$0xf]  ;;  %v12416_v20 = vor.u32 %v17621_v10, %v12415_v9 }
 0x162   : > { %v17598_v23 = vld [vmem:[%s27435_s1 + $0x654] sm:$0xf]  ;;  %v12204_v38 = vor.u32 %v17566_v21, %v12201_v22  ;;  %3539 = vmatpush.bf16.msra.mxu3 %v12604_v25  ;;  %v12143_v18 = vld [vmem:[%s27435_s1 + $0x358] sm:$0xf] }
 0x163   : > { %v12329_v26 = vld [vmem:[%s27435_s1 + $0x670] sm:$0xf0]  ;;  %v17553_v21 = vld [vmem:[%s27435_s1 + $0x374] sm:$0xf0] }
 0x164   : > { %v17630_v27 = vld [vmem:[%s27435_s1 + $0x854] sm:$0xf]  ;;  %v12332_v41 = vor.u32 %v17598_v23, %v12329_v26  ;;  %3501 = vmatpush.bf16.msra.mxu0 %v12204_v38  ;;  %v12271_v22 = vld [vmem:[%s27435_s1 + $0x558] sm:$0xf]  ;;  %v12016_v26 = vor.u32 %v17521_v17, %v12015_v14  ;;  %v1640_v7 = vpop.f32.mrf.mxu2 }
 0x165   : > { %v12457_v32 = vld [vmem:[%s27435_s1 + $0x870] sm:$0xf0]  ;;  %v17585_v23 = vld [vmem:[%s27435_s1 + $0x574] sm:$0xf0] }
 0x166   : > { %v17662_v33 = vld [vmem:[%s27435_s1 + $0xa54] sm:$0xf]  ;;  %v12460_v42 = vor.u32 %v17630_v27, %v12457_v32  ;;  %3514 = vmatpush.bf16.msra.mxu1 %v12332_v41  ;;  %v17617_v25 = vld [vmem:[%s27435_s1 + $0x774] sm:$0xf0]  ;;  %v12144_v27 = vor.u32 %v17553_v21, %v12143_v18  ;;  %v12272_v32 = vor.u32 %v17585_v23, %v12271_v22 }
 0x167   : > { %v12585_v36 = vld [vmem:[%s27435_s1 + $0xa70] sm:$0xf0]  ;;  %v12127_v38 = vld [vmem:[%s27435_s1 + $0x318] sm:$0xf] }
 0x168   : > { %v17562_v39 = vld [vmem:[%s27435_s1 + $0x414] sm:$0xf]  ;;  %v12588_v16 = vor.u32 %v17662_v33, %v12585_v36  ;;  %3527 = vmatpush.bf16.msra.mxu2 %v12460_v42  ;;  %v11999_v33 = vld [vmem:[%s27435_s1 + $0x118] sm:$0xf] }
 0x169   : > { %v12185_v40 = vld [vmem:[%s27435_s1 + $0x430] sm:$0xf0]  ;;  %v17517_v36 = vld [vmem:[%s27435_s1 + $0x134] sm:$0xf0] }
 0x16a   : > { %v17594_v43 = vld [vmem:[%s27435_s1 + $0x614] sm:$0xf]  ;;  %v12188_v54 = vor.u32 %v17562_v39, %v12185_v40  ;;  %3540 = vmatpush.bf16.msra.mxu3 %v12588_v16  ;;  %v12400_v39 = vor.u32 %v17617_v25, %v12399_v24  ;;  %v17549_v40 = vld [vmem:[%s27435_s1 + $0x334] sm:$0xf0]  ;;  %v12000_v46 = vor.u32 %v17517_v36, %v11999_v33 }
 0x16b   : > { %v12313_v44 = vld [vmem:[%s27435_s1 + $0x630] sm:$0xf0]  ;;  %v12255_v41 = vld [vmem:[%s27435_s1 + $0x518] sm:$0xf] }
 0x16c   : > { %v17626_v45 = vld [vmem:[%s27435_s1 + $0x814] sm:$0xf]  ;;  %v12316_v58 = vor.u32 %v17594_v43, %v12313_v44  ;;  %3502 = vmatpush.bf16.msra.mxu0 %v12188_v54  ;;  %v17581_v42 = vld [vmem:[%s27435_s1 + $0x534] sm:$0xf0] }
 0x16d   : > { %v12441_v47 = vld [vmem:[%s27435_s1 + $0x830] sm:$0xf0]  ;;  %v12383_v43 = vld [vmem:[%s27435_s1 + $0x718] sm:$0xf] }
 0x16e   : > { %v17658_v48 = vld [vmem:[%s27435_s1 + $0xa14] sm:$0xf]  ;;  %v12444_v59 = vor.u32 %v17626_v45, %v12441_v47  ;;  %3515 = vmatpush.bf16.msra.mxu1 %v12316_v58  ;;  %v17613_v44 = vld [vmem:[%s27435_s1 + $0x734] sm:$0xf0]  ;;  %v1614_v45 = vpop.f32.mrf.mxu0  ;;  %v1627_v47 = vpop.f32.mrf.mxu1 }
 0x16f   : > { %v12569_v49 = vld [vmem:[%s27435_s1 + $0xa30] sm:$0xf0]  ;;  %3503 = vmatmul.bf16.vlgmr.msra.gmra.mxu0 %v18709_v28  ;;  %v1615_v16 = vadd.f32 %v1614_v45, %v20139_v15  ;;  %v17513_v51 = vld [vmem:[%s27435_s1 + $0xf4] sm:$0xf0]  ;;  %v12384_v53 = vor.u32 %v17613_v44, %v12383_v43 }
 0x170   : > { %v12572_v62 = vor.u32 %v17658_v48, %v12569_v49  ;;  %3528 = vmatpush.bf16.msra.mxu2 %v12444_v59  ;;  %3547 = vmatpush.bf16.msrb.mxu0 %v12048_v63  ;;  %v12128_v48 = vor.u32 %v17549_v40, %v12127_v38  ;;  %v12256_v49 = vor.u32 %v17581_v42, %v12255_v41  ;;  %v12111_v52 = vld [vmem:[%s27435_s1 + $0x2d8] sm:$0xf]  ;;  %v18243_v59 = vld [vmem:[%s27436_s2] sm:$0xf] }
 0x171   : > { %3516 = vmatmul.bf16.vlgmr.msra.gmra.mxu1 %v18713_v30  ;;  %v17545_v15 = vld [vmem:[%s27435_s1 + $0x2f4] sm:$0xf0]  ;;  %v20308_v56 = vadd.f32 %v1627_v47, %v1615_v16  ;;  %v432_v60 = vperm.slane %v18243_v59, 3  ;;  %v11984_v61 = vor.u32 %v17513_v51, %v11983_v50  ;;  %v17559_v59 = vld [vmem:[%s27435_s1 + $0x3dc] sm:$0xf] }
 0x172   : > { %3541 = vmatpush.bf16.msra.mxu3 %v12572_v62  ;;  %3560 = vmatpush.bf16.msrb.mxu1 %v12176_v35  ;;  %v12239_v54 = vld [vmem:[%s27435_s1 + $0x4d8] sm:$0xf]  ;;  %v12112_v62 = vor.u32 %v17545_v15, %v12111_v52 }
 0x173   : > { %3529 = vmatmul.bf16.vlgmr.msra.gmra.mxu2 %v18838_v31  ;;  %v17577_v55 = vld [vmem:[%s27435_s1 + $0x4f4] sm:$0xf0]  ;;  %v1641_v10 = vadd.f32 %v1640_v7, %v432_v60  ;;  %v12177_v60 = vld [vmem:[%s27435_s1 + $0x3f8] sm:$0xf0] }
 0x174   : > { %3573 = vmatpush.bf16.msrb.mxu2 %v12304_v0  ;;  %3548 = vmatpush.bf16.msrb.mxu0 %v12032_v11  ;;  %v12367_v57 = vld [vmem:[%s27435_s1 + $0x6d8] sm:$0xf]  ;;  %v12240_v63 = vor.u32 %v17577_v55, %v12239_v54  ;;  %v1653_v11 = vpop.f32.mrf.mxu3  ;;  %v17527_v54 = vld [vmem:[%s27435_s1 + $0x1dc] sm:$0xf] }
 0x175   : > { %3542 = vmatmul.bf16.vlgmr.msra.gmra.mxu3 %v18846_v34  ;;  %v17609_v58 = vld [vmem:[%s27435_s1 + $0x6f4] sm:$0xf0]  ;;  %v20352_v23 = vadd.f32 %v1653_v11, %v1641_v10  ;;  %v12049_v55 = vld [vmem:[%s27435_s1 + $0x1f8] sm:$0xf0] }
 0x176   : > { %3586 = vmatpush.bf16.msrb.mxu3 %v12432_v5  ;;  %3561 = vmatpush.bf16.msrb.mxu1 %v12160_v12  ;;  %v11967_v35 = vld [vmem:[%s27435_s1 + $0x98] sm:$0xf]  ;;  %v12368_v3 = vor.u32 %v17609_v58, %v12367_v57  ;;  %v1616_v12 = vpop.f32.mrf.mxu0  ;;  %v1629_v14 = vpop.f32.mrf.mxu1  ;;  %v12033_v7 = vld [vmem:[%s27435_s1 + $0x1b8] sm:$0xf0] }
 0x177   : > { %v17509_v0 = vld [vmem:[%s27435_s1 + $0xb4] sm:$0xf0] }
 0x178   : > { %3574 = vmatpush.bf16.msrb.mxu2 %v12288_v13  ;;  %3549 = vmatpush.bf16.msrb.mxu0 %v12016_v26  ;;  %v12095_v1 = vld [vmem:[%s27435_s1 + $0x298] sm:$0xf]  ;;  %v11968_v13 = vor.u32 %v17509_v0, %v11967_v35  ;;  %v12052_v35 = vor.u32 %v17527_v54, %v12049_v55  ;;  %v17511_v54 = vld [vmem:[%s27435_s1 + $0xdc] sm:$0xf] }
 0x179   : > { %v17541_v4 = vld [vmem:[%s27435_s1 + $0x2b4] sm:$0xf0]  ;;  %v11985_v55 = vld [vmem:[%s27435_s1 + $0xf8] sm:$0xf0] }
 0x17a   : > { %3587 = vmatpush.bf16.msrb.mxu3 %v12416_v20  ;;  %3562 = vmatpush.bf16.msrb.mxu1 %v12144_v27  ;;  %v12223_v5 = vld [vmem:[%s27435_s1 + $0x498] sm:$0xf]  ;;  %v12096_v17 = vor.u32 %v17541_v4, %v12095_v1  ;;  %v12180_v4 = vor.u32 %v17559_v59, %v12177_v60 }
 0x17b   : > { %v17573_v6 = vld [vmem:[%s27435_s1 + $0x4b4] sm:$0xf0] }
 0x17c   : > { %3575 = vmatpush.bf16.msrb.mxu2 %v12272_v32  ;;  %3550 = vmatpush.bf16.msrb.mxu0 %v12000_v46  ;;  %v12351_v8 = vld [vmem:[%s27435_s1 + $0x698] sm:$0xf]  ;;  %v12224_v18 = vor.u32 %v17573_v6, %v12223_v5  ;;  %v1655_v52 = vpop.f32.mrf.mxu3  ;;  %v17523_v6 = vld [vmem:[%s27435_s1 + $0x19c] sm:$0xf] }
 0x17d   : > { %v17605_v9 = vld [vmem:[%s27435_s1 + $0x6b4] sm:$0xf0]  ;;  %v12036_v12 = vor.u32 %v17523_v6, %v12033_v7 }
 0x17e   : > { %3588 = vmatpush.bf16.msrb.mxu3 %v12400_v39  ;;  %3563 = vmatpush.bf16.msrb.mxu1 %v12128_v48  ;;  %v11951_v20 = vld [vmem:[%s27435_s1 + $0x58] sm:$0xf]  ;;  %v12352_v24 = vor.u32 %v17605_v9, %v12351_v8  ;;  %v1642_v48 = vpop.f32.mrf.mxu2  ;;  %v17555_v8 = vld [vmem:[%s27435_s1 + $0x39c] sm:$0xf] }
 0x17f   : > { %v17505_v21 = vld [vmem:[%s27435_s1 + $0x74] sm:$0xf0]  ;;  %v12161_v9 = vld [vmem:[%s27435_s1 + $0x3b8] sm:$0xf0] }
 0x180   : > { %3576 = vmatpush.bf16.msrb.mxu2 %v12256_v49  ;;  %3551 = vmatpush.bf16.msrb.mxu0 %v11984_v61  ;;  %v12079_v22 = vld [vmem:[%s27435_s1 + $0x258] sm:$0xf]  ;;  %v11952_v36 = vor.u32 %v17505_v21, %v11951_v20  ;;  %v17519_v21 = vld [vmem:[%s27435_s1 + $0x15c] sm:$0xf] }
 0x181   : > { %v17537_v25 = vld [vmem:[%s27435_s1 + $0x274] sm:$0xf0] }
 0x182   : > { %3589 = vmatpush.bf16.msrb.mxu3 %v12384_v53  ;;  %3564 = vmatpush.bf16.msrb.mxu1 %v12112_v62  ;;  %v12207_v26 = vld [vmem:[%s27435_s1 + $0x458] sm:$0xf]  ;;  %v12080_v40 = vor.u32 %v17537_v25, %v12079_v22  ;;  %v12017_v22 = vld [vmem:[%s27435_s1 + $0x178] sm:$0xf0] }
 0x183   : > { %v17569_v27 = vld [vmem:[%s27435_s1 + $0x474] sm:$0xf0]  ;;  %v12145_v25 = vld [vmem:[%s27435_s1 + $0x378] sm:$0xf0]  ;;  %v1679_v52 = vpop.f32.mrf.mxu1 }
 0x184   : > { %3577 = vmatpush.bf16.msrb.mxu2 %v12240_v63  ;;  %v12335_v32 = vld [vmem:[%s27435_s1 + $0x658] sm:$0xf]  ;;  %3552 = vmatpush.bf16.msrb.mxu0 %v11968_v13  ;;  %v12208_v41 = vor.u32 %v17569_v27, %v12207_v26 }
 0x185   : > { %v17601_v33 = vld [vmem:[%s27435_s1 + $0x674] sm:$0xf0] }
 0x186   : > { %3590 = vmatpush.bf16.msrb.mxu3 %v12368_v3  ;;  %v11935_v38 = vld [vmem:[%s27435_s1 + $0x18] sm:$0xf]  ;;  %3565 = vmatpush.bf16.msrb.mxu1 %v12096_v17  ;;  %v12336_v45 = vor.u32 %v17601_v33, %v12335_v32  ;;  %v12020_v32 = vor.u32 %v17519_v21, %v12017_v22 }
 0x187   : > { %v17501_v39 = vld [vmem:[%s27435_s1 + $0x34] sm:$0xf0] }
 0x188   : > { %3578 = vmatpush.bf16.msrb.mxu2 %v12224_v18  ;;  %v12063_v42 = vld [vmem:[%s27435_s1 + $0x218] sm:$0xf]  ;;  %3553 = vmatpush.bf16.msrb.mxu0 %v11952_v36  ;;  %v11936_v53 = vor.u32 %v17501_v39, %v11935_v38  ;;  %v12164_v18 = vor.u32 %v17555_v8, %v12161_v9  ;;  %v17539_v8 = vld [vmem:[%s27435_s1 + $0x29c] sm:$0xf] }
 0x189   : > { %v17533_v43 = vld [vmem:[%s27435_s1 + $0x234] sm:$0xf0]  ;;  %v12097_v9 = vld [vmem:[%s27435_s1 + $0x2b8] sm:$0xf0] }
 0x18a   : > { %v12191_v44 = vld [vmem:[%s27435_s1 + $0x418] sm:$0xf]  ;;  %3591 = vmatpush.bf16.msrb.mxu3 %v12352_v24  ;;  %3566 = vmatpush.bf16.msrb.mxu1 %v12080_v40  ;;  %v12064_v57 = vor.u32 %v17533_v43, %v12063_v42  ;;  %v17551_v24 = vld [vmem:[%s27435_s1 + $0x35c] sm:$0xf]  ;;  %v12100_v22 = vor.u32 %v17539_v8, %v12097_v9 }
 0x18b   : > { %v17565_v46 = vld [vmem:[%s27435_s1 + $0x434] sm:$0xf0]  ;;  %v12148_v39 = vor.u32 %v17551_v24, %v12145_v25  ;;  %v12001_v42 = vld [vmem:[%s27435_s1 + $0x138] sm:$0xf0]  ;;  %v1681_v21 = vpop.f32.mrf.mxu1 }
 0x18c   : > { %v12319_v16 = vld [vmem:[%s27435_s1 + $0x618] sm:$0xf]  ;;  %3579 = vmatpush.bf16.msrb.mxu2 %v12208_v41  ;;  %v12192_v58 = vor.u32 %v17565_v46, %v12191_v44  ;;  %3554 = vmatpush.bf16.msrb.mxu0 %v11936_v53  ;;  %v17515_v41 = vld [vmem:[%s27435_s1 + $0x11c] sm:$0xf]  ;;  %v1666_v46 = vpop.f32.mrf.mxu0 }
 0x18d   : > { %v17597_v47 = vld [vmem:[%s27435_s1 + $0x634] sm:$0xf0]  ;;  %v17547_v43 = vld [vmem:[%s27435_s1 + $0x31c] sm:$0xf]  ;;  %v1705_v7 = vpop.f32.mrf.mxu3 }
 0x18e   : > { %v12559_v49 = vld [vmem:[%s27435_s1 + $0x9d8] sm:$0xf]  ;;  %3592 = vmatpush.bf16.msrb.mxu3 %v12336_v45  ;;  %v12320_v61 = vor.u32 %v17597_v47, %v12319_v16  ;;  %3567 = vmatpush.bf16.msrb.mxu1 %v12064_v57  ;;  %v12129_v44 = vld [vmem:[%s27435_s1 + $0x338] sm:$0xf0]  ;;  %v12004_v47 = vor.u32 %v17515_v41, %v12001_v42 }
 0x18f   : > { %v17657_v50 = vld [vmem:[%s27435_s1 + $0x9f4] sm:$0xf0]  ;;  %3555 = vmatmul.bf16.vlgmr.msrb.gmra.mxu0 %v18711_v29  ;;  %v12132_v53 = vor.u32 %v17547_v43, %v12129_v44  ;;  %v17543_v57 = vld [vmem:[%s27435_s1 + $0x2dc] sm:$0xf] }
 0x190   : > { %v12687_v51 = vld [vmem:[%s27435_s1 + $0xbd8] sm:$0xf]  ;;  %v12560_v62 = vor.u32 %v17657_v50, %v12559_v49  ;;  %3580 = vmatpush.bf16.msrb.mxu2 %v12192_v58  ;;  %v17503_v25 = vld [vmem:[%s27435_s1 + $0x5c] sm:$0xf] }
 0x191   : > { %v17689_v15 = vld [vmem:[%s27435_s1 + $0xbf4] sm:$0xf0]  ;;  %3568 = vmatmul.bf16.vlgmr.msrb.gmra.mxu1 %v18725_v37  ;;  %v17499_v43 = vld [vmem:[%s27435_s1 + $0x1c] sm:$0xf] }
 0x192   : > { %v12688_v63 = vor.u32 %v17689_v15, %v12687_v51  ;;  %v12543_v0 = vld [vmem:[%s27435_s1 + $0x998] sm:$0xf]  ;;  %3593 = vmatpush.bf16.msrb.mxu3 %v12320_v61  ;;  %3599 = vmatpush.bf16.msra.mxu0 %v12560_v62  ;;  %v1667_v51 = vadd.f32 %v1666_v46, %v20352_v23  ;;  %v12113_v23 = vld [vmem:[%s27435_s1 + $0x2f8] sm:$0xf0]  ;;  %v11988_v61 = vor.u32 %v17511_v54, %v11985_v55 }
 0x193   : > { %v17653_v1 = vld [vmem:[%s27435_s1 + $0x9b4] sm:$0xf0]  ;;  %3581 = vmatmul.bf16.vlgmr.msrb.gmra.mxu2 %v18709_v28  ;;  %v11937_v46 = vld [vmem:[%s27435_s1 + $0x38] sm:$0xf0] }
 0x194   : > { %v12671_v3 = vld [vmem:[%s27435_s1 + $0xb98] sm:$0xf]  ;;  %v12544_v10 = vor.u32 %v17653_v1, %v12543_v0  ;;  %3612 = vmatpush.bf16.msra.mxu1 %v12688_v63  ;;  %3625 = vmatpush.bf16.msra.mxu2 %v12052_v35  ;;  %v1680_v58 = vadd.f32 %v1679_v52, %v1667_v51  ;;  %v1692_v0 = vpop.f32.mrf.mxu2  ;;  %v12116_v1 = vor.u32 %v17543_v57, %v12113_v23  ;;  %v17623_v51 = vld [vmem:[%s27435_s1 + $0x7dc] sm:$0xf] }
 0x195   : > { %v17685_v5 = vld [vmem:[%s27435_s1 + $0xbb4] sm:$0xf0]  ;;  %3594 = vmatmul.bf16.vlgmr.msrb.gmra.mxu3 %v18713_v30  ;;  %v12561_v54 = vld [vmem:[%s27435_s1 + $0x9f8] sm:$0xf0]  ;;  %v11940_v57 = vor.u32 %v17499_v43, %v11937_v46 }
 0x196   : > { %v12672_v11 = vor.u32 %v17685_v5, %v12671_v3  ;;  %v12527_v13 = vld [vmem:[%s27435_s1 + $0x958] sm:$0xf]  ;;  %3638 = vmatpush.bf16.msra.mxu3 %v12180_v4  ;;  %3600 = vmatpush.bf16.msra.mxu0 %v12544_v10  ;;  %v17507_v4 = vld [vmem:[%s27435_s1 + $0x9c] sm:$0xf]  ;;  %v1693_v6 = vadd.f32 %v1692_v0, %v1680_v58 }
 0x197   : > { %v17649_v14 = vld [vmem:[%s27435_s1 + $0x974] sm:$0xf0]  ;;  %v11969_v5 = vld [vmem:[%s27435_s1 + $0xb8] sm:$0xf0] }
 0x198   : > { %v12655_v17 = vld [vmem:[%s27435_s1 + $0xb58] sm:$0xf]  ;;  %v12528_v26 = vor.u32 %v17649_v14, %v12527_v13  ;;  %3613 = vmatpush.bf16.msra.mxu1 %v12672_v11  ;;  %3626 = vmatpush.bf16.msra.mxu2 %v12036_v12  ;;  %v20542_v11 = vadd.f32 %v1705_v7, %v1693_v6  ;;  %v1668_v12 = vpop.f32.mrf.mxu0  ;;  %v11972_v14 = vor.u32 %v17507_v4, %v11969_v5  ;;  %v17687_v23 = vld [vmem:[%s27435_s1 + $0xbdc] sm:$0xf] }
 0x199   : > { %v17681_v20 = vld [vmem:[%s27435_s1 + $0xb74] sm:$0xf0]  ;;  %v12689_v58 = vld [vmem:[%s27435_s1 + $0xbf8] sm:$0xf0] }
 0x19a   : > { %v12656_v27 = vor.u32 %v17681_v20, %v12655_v17  ;;  %v12511_v33 = vld [vmem:[%s27435_s1 + $0x918] sm:$0xf]  ;;  %3639 = vmatpush.bf16.msra.mxu3 %v12164_v18  ;;  %3601 = vmatpush.bf16.msra.mxu0 %v12528_v26  ;;  %v11953_v26 = vld [vmem:[%s27435_s1 + $0x78] sm:$0xf0] }
 0x19b   : > { %v17645_v36 = vld [vmem:[%s27435_s1 + $0x934] sm:$0xf0]  ;;  %v17619_v0 = vld [vmem:[%s27435_s1 + $0x79c] sm:$0xf] }
 0x19c   : > { %v12639_v38 = vld [vmem:[%s27435_s1 + $0xb18] sm:$0xf]  ;;  %v12512_v45 = vor.u32 %v17645_v36, %v12511_v33  ;;  %3614 = vmatpush.bf16.msra.mxu1 %v12656_v27  ;;  %3627 = vmatpush.bf16.msra.mxu2 %v12020_v32  ;;  %v17535_v27 = vld [vmem:[%s27435_s1 + $0x25c] sm:$0xf]  ;;  %v1694_v44 = vpop.f32.mrf.mxu2 }
 0x19d   : > { %v17677_v40 = vld [vmem:[%s27435_s1 + $0xb34] sm:$0xf0]  ;;  %v12081_v32 = vld [vmem:[%s27435_s1 + $0x278] sm:$0xf0] }
 0x19e   : > { %v12640_v16 = vor.u32 %v17677_v40, %v12639_v38  ;;  %v12495_v48 = vld [vmem:[%s27435_s1 + $0x8d8] sm:$0xf]  ;;  %3640 = vmatpush.bf16.msra.mxu3 %v12148_v39  ;;  %3602 = vmatpush.bf16.msra.mxu0 %v12512_v45  ;;  %v11956_v40 = vor.u32 %v17503_v25, %v11953_v26  ;;  %v12084_v45 = vor.u32 %v17535_v27, %v12081_v32  ;;  %v17651_v4 = vld [vmem:[%s27435_s1 + $0x99c] sm:$0xf] }
 0x19f   : > { %v17641_v49 = vld [vmem:[%s27435_s1 + $0x8f4] sm:$0xf0]  ;;  %v12545_v5 = vld [vmem:[%s27435_s1 + $0x9b8] sm:$0xf0] }
 0x1a0   : > { %v12623_v50 = vld [vmem:[%s27435_s1 + $0xad8] sm:$0xf]  ;;  %v12496_v59 = vor.u32 %v17641_v49, %v12495_v48  ;;  %3615 = vmatpush.bf16.msra.mxu1 %v12640_v16  ;;  %3628 = vmatpush.bf16.msra.mxu2 %v12004_v47  ;;  %v17531_v16 = vld [vmem:[%s27435_s1 + $0x21c] sm:$0xf]  ;;  %v1707_v48 = vpop.f32.mrf.mxu3 }
 0x1a1   : > { %v17673_v15 = vld [vmem:[%s27435_s1 + $0xaf4] sm:$0xf0]  ;;  %v12065_v47 = vld [vmem:[%s27435_s1 + $0x238] sm:$0xf0]  ;;  %v20692_v43 = vpop.f32.mrf.mxu0 }
 0x1a2   : > { %v12624_v60 = vor.u32 %v17673_v15, %v12623_v50  ;;  %v12479_v62 = vld [vmem:[%s27435_s1 + $0x898] sm:$0xf]  ;;  %3641 = vmatpush.bf16.msra.mxu3 %v12132_v53  ;;  %3603 = vmatpush.bf16.msra.mxu0 %v12496_v59  ;;  %v17591_v49 = vld [vmem:[%s27435_s1 + $0x5dc] sm:$0xf]  ;;  %v12068_v59 = vor.u32 %v17531_v16, %v12065_v47 }
 0x1a3   : > { %v17637_v63 = vld [vmem:[%s27435_s1 + $0x8b4] sm:$0xf0]  ;;  %v12305_v50 = vld [vmem:[%s27435_s1 + $0x5f8] sm:$0xf0]  ;;  %v20703_v48 = vpop.f32.mrf.mxu1 }
 0x1a4   : > { %v12607_v35 = vld [vmem:[%s27435_s1 + $0xa98] sm:$0xf]  ;;  %v12480_v10 = vor.u32 %v17637_v63, %v12479_v62  ;;  %3616 = vmatpush.bf16.msra.mxu1 %v12624_v60  ;;  %3629 = vmatpush.bf16.msra.mxu2 %v11988_v61  ;;  %v12433_v53 = vld [vmem:[%s27435_s1 + $0x7f8] sm:$0xf0]  ;;  %v12308_v60 = vor.u32 %v17591_v49, %v12305_v50 }
 0x1a5   : > { %v17669_v3 = vld [vmem:[%s27435_s1 + $0xab4] sm:$0xf0]  ;;  %v17655_v15 = vld [vmem:[%s27435_s1 + $0x9dc] sm:$0xf]  ;;  %v12436_v61 = vor.u32 %v17623_v51, %v12433_v53 }
 0x1a6   : > { %v12608_v13 = vor.u32 %v17669_v3, %v12607_v35  ;;  %v12463_v17 = vld [vmem:[%s27435_s1 + $0x858] sm:$0xf]  ;;  %3642 = vmatpush.bf16.msra.mxu3 %v12116_v1  ;;  %3604 = vmatpush.bf16.msra.mxu0 %v12480_v10  ;;  %v12564_v62 = vor.u32 %v17655_v15, %v12561_v54  ;;  %v17587_v63 = vld [vmem:[%s27435_s1 + $0x59c] sm:$0xf]  ;;  %v12692_v1 = vor.u32 %v17687_v23, %v12689_v58 }
 0x1a7   : > { %v17633_v18 = vld [vmem:[%s27435_s1 + $0x874] sm:$0xf0]  ;;  %v12289_v35 = vld [vmem:[%s27435_s1 + $0x5b8] sm:$0xf0]  ;;  %v12548_v10 = vor.u32 %v17651_v4, %v12545_v5 }
 0x1a8   : > { %v12591_v20 = vld [vmem:[%s27435_s1 + $0xa58] sm:$0xf]  ;;  %v12464_v33 = vor.u32 %v17633_v18, %v12463_v17  ;;  %3617 = vmatpush.bf16.msra.mxu1 %v12608_v13  ;;  %3630 = vmatpush.bf16.msra.mxu2 %v11972_v14  ;;  %v12417_v3 = vld [vmem:[%s27435_s1 + $0x7b8] sm:$0xf0]  ;;  %v12292_v8 = vor.u32 %v17587_v63, %v12289_v35 }
 0x1a9   : > { %v17665_v24 = vld [vmem:[%s27435_s1 + $0xa74] sm:$0xf0]  ;;  %v17683_v6 = vld [vmem:[%s27435_s1 + $0xb9c] sm:$0xf]  ;;  %v12420_v9 = vor.u32 %v17619_v0, %v12417_v3  ;;  %v3402_v5 = vpop.f32.mrf.mxu0 }
 0x1aa   : > { %v12447_v36 = vld [vmem:[%s27435_s1 + $0x818] sm:$0xf]  ;;  %v12592_v39 = vor.u32 %v17665_v24, %v12591_v20  ;;  %3643 = vmatpush.bf16.msra.mxu3 %v12100_v22  ;;  %3605 = vmatpush.bf16.msra.mxu0 %v12464_v33  ;;  %v12673_v7 = vld [vmem:[%s27435_s1 + $0xbb8] sm:$0xf0] }
 0x1ab   : > { %v17629_v38 = vld [vmem:[%s27435_s1 + $0x834] sm:$0xf0]  ;;  %v17583_v12 = vld [vmem:[%s27435_s1 + $0x55c] sm:$0xf]  ;;  %v12676_v17 = vor.u32 %v17683_v6, %v12673_v7 }
 0x1ac   : > { %v12575_v41 = vld [vmem:[%s27435_s1 + $0xa18] sm:$0xf]  ;;  %v12448_v52 = vor.u32 %v17629_v38, %v12447_v36  ;;  %3618 = vmatpush.bf16.msra.mxu1 %v12592_v39  ;;  %3631 = vmatpush.bf16.msra.mxu2 %v11956_v40  ;;  %v12273_v13 = vld [vmem:[%s27435_s1 + $0x578] sm:$0xf0] }
 0x1ad   : > { %v17661_v42 = vld [vmem:[%s27435_s1 + $0xa34] sm:$0xf0]  ;;  %v17615_v14 = vld [vmem:[%s27435_s1 + $0x75c] sm:$0xf]  ;;  %v12276_v25 = vor.u32 %v17583_v12, %v12273_v13  ;;  %v20740_v0 = vpop.f32.mrf.mxu3  ;;  %v3415_v12 = vpop.f32.mrf.mxu1 }
 0x1ae   : > { %v12576_v55 = vor.u32 %v17661_v42, %v12575_v41  ;;  %3644 = vmatpush.bf16.msra.mxu3 %v12084_v45  ;;  %3606 = vmatpush.bf16.msra.mxu0 %v12448_v52  ;;  %v12401_v18 = vld [vmem:[%s27435_s1 + $0x778] sm:$0xf0]  ;;  %v13399_v12 = vld [vmem:[%s27437_s3 + $0x1580] sm:$0xf] }
 0x1af   : > { %v17647_v20 = vld [vmem:[%s27435_s1 + $0x95c] sm:$0xf]  ;;  %v12404_v26 = vor.u32 %v17615_v14, %v12401_v18 }
 0x1b0   : > { %3619 = vmatpush.bf16.msra.mxu1 %v12576_v55  ;;  %3632 = vmatpush.bf16.msra.mxu2 %v11940_v57  ;;  %v12529_v21 = vld [vmem:[%s27435_s1 + $0x978] sm:$0xf0] }
 0x1b1   : > { %3607 = vmatmul.bf16.vlgmr.msra.gmra.mxu0 %v18838_v31  ;;  %v17679_v22 = vld [vmem:[%s27435_s1 + $0xb5c] sm:$0xf]  ;;  %v12532_v27 = vor.u32 %v17647_v20, %v12529_v21 }
 0x1b2   : > { %3645 = vmatpush.bf16.msra.mxu3 %v12068_v59  ;;  %3651 = vmatpush.bf16.msrb.mxu0 %v12308_v60  ;;  %v12657_v24 = vld [vmem:[%s27435_s1 + $0xb78] sm:$0xf0]  ;;  %v20729_v60 = vpop.f32.mrf.mxu2 }
 0x1b3   : > { %3620 = vmatmul.bf16.vlgmr.msra.gmra.mxu1 %v18846_v34  ;;  %3633 = vmatmul.bf16.vlgmr.msra.gmra.mxu2 %v18711_v29  ;;  %v17579_v29 = vld [vmem:[%s27435_s1 + $0x51c] sm:$0xf]  ;;  %v12660_v36 = vor.u32 %v17679_v22, %v12657_v24 }
 0x1b4   : > { %3664 = vmatpush.bf16.msrb.mxu1 %v12436_v61  ;;  %3677 = vmatpush.bf16.msrb.mxu2 %v12564_v62  ;;  %v12257_v32 = vld [vmem:[%s27435_s1 + $0x538] sm:$0xf0] }
 0x1b5   : > { %3646 = vmatmul.bf16.vlgmr.msra.gmra.mxu3 %v18725_v37  ;;  %v17611_v33 = vld [vmem:[%s27435_s1 + $0x71c] sm:$0xf]  ;;  %v12260_v42 = vor.u32 %v17579_v29, %v12257_v32 }
 0x1b6   : > { %3690 = vmatpush.bf16.msrb.mxu3 %v12692_v1  ;;  %3652 = vmatpush.bf16.msrb.mxu0 %v12292_v8  ;;  %v12385_v37 = vld [vmem:[%s27435_s1 + $0x738] sm:$0xf0] }
 0x1b7   : > { %v17643_v38 = vld [vmem:[%s27435_s1 + $0x91c] sm:$0xf]  ;;  %v12388_v44 = vor.u32 %v17611_v33, %v12385_v37 }
 0x1b8   : > { %3665 = vmatpush.bf16.msrb.mxu1 %v12420_v9  ;;  %3678 = vmatpush.bf16.msrb.mxu2 %v12548_v10  ;;  %v12513_v39 = vld [vmem:[%s27435_s1 + $0x938] sm:$0xf0] }
 0x1b9   : > { %v17675_v40 = vld [vmem:[%s27435_s1 + $0xb1c] sm:$0xf]  ;;  %v12516_v45 = vor.u32 %v17643_v38, %v12513_v39 }
 0x1ba   : > { %3691 = vmatpush.bf16.msrb.mxu3 %v12676_v17  ;;  %v12641_v41 = vld [vmem:[%s27435_s1 + $0xb38] sm:$0xf0]  ;;  %3653 = vmatpush.bf16.msrb.mxu0 %v12276_v25  ;;  %v3428_v33 = vpop.f32.mrf.mxu2 }
 0x1bb   : > { %v17575_v46 = vld [vmem:[%s27435_s1 + $0x4dc] sm:$0xf]  ;;  %v12644_v49 = vor.u32 %v17675_v40, %v12641_v41  ;;  %v3441_v40 = vpop.f32.mrf.mxu3 }
 0x1bc   : > { %3666 = vmatpush.bf16.msrb.mxu1 %v12404_v26  ;;  %3679 = vmatpush.bf16.msrb.mxu2 %v12532_v27  ;;  %v12241_v16 = vld [vmem:[%s27435_s1 + $0x4f8] sm:$0xf0]  ;;  %v13271_v40 = vld [vmem:[%s27437_s3 + $0x1480] sm:$0xf] }
 0x1bd   : > { %v17607_v47 = vld [vmem:[%s27435_s1 + $0x6dc] sm:$0xf]  ;;  %v12244_v54 = vor.u32 %v17575_v46, %v12241_v16  ;;  %v13655_v46 = vld [vmem:[%s27437_s3 + $0x1780] sm:$0xf] }
 0x1be   : > { %3692 = vmatpush.bf16.msrb.mxu3 %v12660_v36  ;;  %v12369_v50 = vld [vmem:[%s27435_s1 + $0x6f8] sm:$0xf0]  ;;  %3654 = vmatpush.bf16.msrb.mxu0 %v12260_v42  ;;  %v13143_v42 = vld [vmem:[%s27437_s3 + $0x1380] sm:$0xf] }
 0x1bf   : > { %v17639_v51 = vld [vmem:[%s27435_s1 + $0x8dc] sm:$0xf]  ;;  %v12372_v55 = vor.u32 %v17607_v47, %v12369_v50  ;;  %v17938_v16 = vld [vmem:[%s27437_s3 + $0x17bc] sm:$0xf0]  ;;  %v20811_v47 = vld [vmem:[%s27436_s2 + $0x4] sm:$0xf] }
 0x1c0   : > { %v12497_v52 = vld [vmem:[%s27435_s1 + $0x8f8] sm:$0xf0]  ;;  %3667 = vmatpush.bf16.msrb.mxu1 %v12388_v44  ;;  %3680 = vmatpush.bf16.msrb.mxu2 %v12516_v45  ;;  %v17810_v44 = vld [vmem:[%s27437_s3 + $0x13bc] sm:$0xf0] }
 0x1c1   : > { %v17671_v53 = vld [vmem:[%s27435_s1 + $0xadc] sm:$0xf]  ;;  %v12500_v57 = vor.u32 %v17639_v51, %v12497_v52  ;;  %v13144_v52 = vor.u32 %v17810_v44, %v13143_v42  ;;  %v14103_v42 = vld [vmem:[%s27437_s3 + $0x1b00] sm:$0xf] }
 0x1c2   : > { %v12625_v15 = vld [vmem:[%s27435_s1 + $0xaf8] sm:$0xf0]  ;;  %3693 = vmatpush.bf16.msrb.mxu3 %v12644_v49  ;;  %3655 = vmatpush.bf16.msrb.mxu0 %v12244_v54  ;;  %v13079_v54 = vld [vmem:[%s27437_s3 + $0x1300] sm:$0xf] }
 0x1c3   : > { %v17571_v23 = vld [vmem:[%s27435_s1 + $0x49c] sm:$0xf]  ;;  %v12628_v61 = vor.u32 %v17671_v53, %v12625_v15  ;;  %v13656_v53 = vor.u32 %v17938_v16, %v13655_v46  ;;  %v2423_v15 = vperm.slane %v20811_v47, 0  ;;  %v18050_v44 = vld [vmem:[%s27437_s3 + $0x1b3c] sm:$0xf0] }
 0x1c4   : > { %v12225_v58 = vld [vmem:[%s27435_s1 + $0x4b8] sm:$0xf0]  ;;  %3668 = vmatpush.bf16.msrb.mxu1 %v12372_v55  ;;  %3681 = vmatpush.bf16.msrb.mxu2 %v12500_v57  ;;  %v17794_v55 = vld [vmem:[%s27437_s3 + $0x133c] sm:$0xf0] }
 0x1c5   : > { %v17603_v59 = vld [vmem:[%s27435_s1 + $0x69c] sm:$0xf]  ;;  %v12228_v4 = vor.u32 %v17571_v23, %v12225_v58  ;;  %v13591_v57 = vld [vmem:[%s27437_s3 + $0x1700] sm:$0xf]  ;;  %v13080_v58 = vor.u32 %v17794_v55, %v13079_v54  ;;  %v3452_v5 = vpop.f32.mrf.mxu0  ;;  %v13145_v54 = vld [vmem:[%s27437_s3 + $0x13c0] sm:$0xf0] }
 0x1c6   : > { %v12353_v62 = vld [vmem:[%s27435_s1 + $0x6b8] sm:$0xf0]  ;;  %3694 = vmatpush.bf16.msrb.mxu3 %v12628_v61  ;;  %v17922_v23 = vld [vmem:[%s27437_s3 + $0x173c] sm:$0xf0] }
 0x1c7   : > { %v17635_v63 = vld [vmem:[%s27435_s1 + $0x89c] sm:$0xf]  ;;  %v12356_v6 = vor.u32 %v17603_v59, %v12353_v62  ;;  %3656 = vmatpush.bf16.msrb.mxu0 %v12228_v4  ;;  %v3401_v59 = vadd.f32 %v20692_v43, %v2423_v15  ;;  %v13592_v61 = vor.u32 %v17922_v23, %v13591_v57  ;;  %v13015_v62 = vld [vmem:[%s27437_s3 + $0x1280] sm:$0xf]  ;;  %v17802_v15 = vld [vmem:[%s27437_s3 + $0x1384] sm:$0xf] }
 0x1c8   : > { %v12481_v35 = vld [vmem:[%s27435_s1 + $0x8b8] sm:$0xf0]  ;;  %v13463_v4 = vld [vmem:[%s27437_s3 + $0x1600] sm:$0xf] }
 0x1c9   : > { %v17667_v1 = vld [vmem:[%s27435_s1 + $0xa9c] sm:$0xf]  ;;  %v12484_v7 = vor.u32 %v17635_v63, %v12481_v35  ;;  %3669 = vmatpush.bf16.msrb.mxu1 %v12356_v6  ;;  %v17778_v63 = vld [vmem:[%s27437_s3 + $0x12bc] sm:$0xf0]  ;;  %v3465_v6 = vpop.f32.mrf.mxu1 }
 0x1ca   : > { %v12609_v3 = vld [vmem:[%s27435_s1 + $0xab8] sm:$0xf0]  ;;  %v13527_v35 = vld [vmem:[%s27437_s3 + $0x1680] sm:$0xf]  ;;  %v13016_v43 = vor.u32 %v17778_v63, %v13015_v62 }
 0x1cb   : > { %v17567_v8 = vld [vmem:[%s27435_s1 + $0x45c] sm:$0xf]  ;;  %v12612_v13 = vor.u32 %v17667_v1, %v12609_v3  ;;  %3682 = vmatpush.bf16.msrb.mxu2 %v12484_v7  ;;  %v3414_v1 = vadd.f32 %v20703_v48, %v3401_v59  ;;  %v12695_v16 = vld [vmem:[%s27437_s3 + $0x1000] sm:$0xf]  ;;  %v13657_v59 = vld [vmem:[%s27437_s3 + $0x17c0] sm:$0xf0] }
 0x1cc   : > { %v12209_v9 = vld [vmem:[%s27435_s1 + $0x478] sm:$0xf0]  ;;  %v14039_v57 = vld [vmem:[%s27437_s3 + $0x1a80] sm:$0xf] }
 0x1cd   : > { %v17599_v10 = vld [vmem:[%s27435_s1 + $0x65c] sm:$0xf]  ;;  %v12212_v22 = vor.u32 %v17567_v8, %v12209_v9  ;;  %3695 = vmatpush.bf16.msrb.mxu3 %v12612_v13  ;;  %v3427_v7 = vadd.f32 %v20729_v60, %v3414_v1  ;;  %v12887_v9 = vld [vmem:[%s27437_s3 + $0x1180] sm:$0xf]  ;;  %v2424_v1 = vperm.slane %v20811_v47, 1 }
 0x1ce   : > { %v12337_v14 = vld [vmem:[%s27435_s1 + $0x678] sm:$0xf0]  ;;  %v17874_v13 = vld [vmem:[%s27437_s3 + $0x15bc] sm:$0xf0] }
 0x1cf   : > { %v17631_v17 = vld [vmem:[%s27435_s1 + $0x85c] sm:$0xf]  ;;  %v12340_v25 = vor.u32 %v17599_v10, %v12337_v14  ;;  %3657 = vmatpush.bf16.msrb.mxu0 %v12212_v22  ;;  %v17746_v10 = vld [vmem:[%s27437_s3 + $0x11bc] sm:$0xf0]  ;;  %v3440_v14 = vadd.f32 %v20740_v0, %v3427_v7  ;;  %v20884_v0 = vpop.f32.mrf.mxu3 }
 0x1d0   : > { %v12465_v18 = vld [vmem:[%s27435_s1 + $0x878] sm:$0xf0]  ;;  %v12888_v60 = vor.u32 %v17746_v10, %v12887_v9  ;;  %v17858_v22 = vld [vmem:[%s27437_s3 + $0x153c] sm:$0xf0]  ;;  %v17770_v10 = vld [vmem:[%s27437_s3 + $0x1284] sm:$0xf] }
 0x1d1   : > { %v17663_v20 = vld [vmem:[%s27435_s1 + $0xa5c] sm:$0xf]  ;;  %v12468_v26 = vor.u32 %v17631_v17, %v12465_v18  ;;  %3670 = vmatpush.bf16.msrb.mxu1 %v12340_v25  ;;  %v13400_v17 = vor.u32 %v17874_v13, %v13399_v12  ;;  %v12823_v18 = vld [vmem:[%s27437_s3 + $0x1100] sm:$0xf]  ;;  %v3454_v25 = vpop.f32.mrf.mxu0  ;;  %v13017_v12 = vld [vmem:[%s27437_s3 + $0x12c0] sm:$0xf0] }
 0x1d2   : > { %v12593_v21 = vld [vmem:[%s27435_s1 + $0xa78] sm:$0xf0]  ;;  %v18034_v23 = vld [vmem:[%s27437_s3 + $0x1abc] sm:$0xf0]  ;;  %v17898_v13 = vld [vmem:[%s27437_s3 + $0x1684] sm:$0xf] }
 0x1d3   : > { %v17563_v24 = vld [vmem:[%s27435_s1 + $0x41c] sm:$0xf]  ;;  %v12596_v36 = vor.u32 %v17663_v20, %v12593_v21  ;;  %3683 = vmatpush.bf16.msrb.mxu2 %v12468_v26  ;;  %v17730_v20 = vld [vmem:[%s27437_s3 + $0x113c] sm:$0xf0]  ;;  %v14040_v62 = vor.u32 %v18034_v23, %v14039_v57  ;;  %v12953_v25 = vld [vmem:[%s27437_s3 + $0x1240] sm:$0xf0] }
 0x1d4   : > { %v12193_v27 = vld [vmem:[%s27435_s1 + $0x438] sm:$0xf0]  ;;  %v13335_v21 = vld [vmem:[%s27437_s3 + $0x1500] sm:$0xf] }
 0x1d5   : > { %v17595_v29 = vld [vmem:[%s27435_s1 + $0x61c] sm:$0xf]  ;;  %v12196_v45 = vor.u32 %v17563_v24, %v12193_v27  ;;  %3696 = vmatpush.bf16.msrb.mxu3 %v12596_v36  ;;  %v20882_v24 = vpop.f32.mrf.mxu2  ;;  %v14167_v26 = vld [vmem:[%s27437_s3 + $0x1b80] sm:$0xf]  ;;  %v3453_v36 = vadd.f32 %v3452_v5, %v3440_v14  ;;  %v13529_v14 = vld [vmem:[%s27437_s3 + $0x16c0] sm:$0xf0] }
 0x1d6   : > { %v12321_v32 = vld [vmem:[%s27435_s1 + $0x638] sm:$0xf0]  ;;  %v18066_v27 = vld [vmem:[%s27437_s3 + $0x1bbc] sm:$0xf0] }
 0x1d7   : > { %v17627_v37 = vld [vmem:[%s27435_s1 + $0x81c] sm:$0xf]  ;;  %v12324_v49 = vor.u32 %v17595_v29, %v12321_v32  ;;  %3658 = vmatpush.bf16.msrb.mxu0 %v12196_v45  ;;  %v12824_v29 = vor.u32 %v17730_v20, %v12823_v18  ;;  %v3467_v32 = vpop.f32.mrf.mxu1  ;;  %v14168_v33 = vor.u32 %v18066_v27, %v14167_v26  ;;  %v14104_v45 = vor.u32 %v18050_v44, %v14103_v42  ;;  %v13975_v5 = vld [vmem:[%s27437_s3 + $0x1a00] sm:$0xf]  ;;  %v17882_v26 = vld [vmem:[%s27437_s3 + $0x1604] sm:$0xf] }
 0x1d8   : > { %v12449_v38 = vld [vmem:[%s27435_s1 + $0x838] sm:$0xf0]  ;;  %v18002_v18 = vld [vmem:[%s27437_s3 + $0x19bc] sm:$0xf0] }
 0x1d9   : > { %v17659_v39 = vld [vmem:[%s27435_s1 + $0xa1c] sm:$0xf]  ;;  %v12452_v50 = vor.u32 %v17627_v37, %v12449_v38  ;;  %3671 = vmatpush.bf16.msrb.mxu1 %v12324_v49  ;;  %v13336_v37 = vor.u32 %v17858_v22, %v13335_v21  ;;  %v12759_v38 = vld [vmem:[%s27437_s3 + $0x1080] sm:$0xf]  ;;  %v13020_v21 = vor.u32 %v17770_v10, %v13017_v12  ;;  %v13532_v22 = vor.u32 %v17898_v13, %v13529_v14  ;;  %v17690_v10 = vld [vmem:[%s27437_s3 + $0x1004] sm:$0xf] }
 0x1da   : > { %v12577_v41 = vld [vmem:[%s27435_s1 + $0xa38] sm:$0xf0]  ;;  %3659 = vmatmul.bf16.vlgmr.msrb.gmra.mxu0 %v18709_v28  ;;  %v17906_v28 = vld [vmem:[%s27437_s3 + $0x16bc] sm:$0xf0]  ;;  %v17818_v14 = vld [vmem:[%s27437_s3 + $0x1404] sm:$0xf] }
 0x1db   : > { %v12580_v51 = vor.u32 %v17659_v39, %v12577_v41  ;;  %3684 = vmatpush.bf16.msrb.mxu2 %v12452_v50  ;;  %6783 = vmatpush.bf16.msra.mxu0 %v13144_v52  ;;  %v13528_v3 = vor.u32 %v17906_v28, %v13527_v35  ;;  %v17714_v39 = vld [vmem:[%s27437_s3 + $0x10bc] sm:$0xf0]  ;;  %v3466_v50 = vadd.f32 %v3465_v6, %v3453_v36 }
 0x1dc   : > { %3672 = vmatmul.bf16.vlgmr.msrb.gmra.mxu1 %v18713_v30  ;;  %v12951_v30 = vld [vmem:[%s27437_s3 + $0x1200] sm:$0xf]  ;;  %v12760_v46 = vor.u32 %v17714_v39, %v12759_v38 }
 0x1dd   : > { %3697 = vmatpush.bf16.msrb.mxu3 %v12580_v51  ;;  %6796 = vmatpush.bf16.msra.mxu1 %v13656_v53  ;;  %v17842_v41 = vld [vmem:[%s27437_s3 + $0x14bc] sm:$0xf0]  ;;  %v3480_v55 = vpop.f32.mrf.mxu2  ;;  %v3703_v35 = vmax.f32 %v3466_v50, 0.0 }
 0x1de   : > { %3685 = vmatmul.bf16.vlgmr.msrb.gmra.mxu2 %v18838_v31  ;;  %v17762_v31 = vld [vmem:[%s27437_s3 + $0x123c] sm:$0xf0]  ;;  %v13272_v51 = vor.u32 %v17842_v41, %v13271_v40  ;;  %v12889_v40 = vld [vmem:[%s27437_s3 + $0x11c0] sm:$0xf0] }
 0x1df   : > { %6784 = vmatpush.bf16.msra.mxu0 %v13080_v58  ;;  %v12952_v48 = vor.u32 %v17762_v31, %v12951_v30  ;;  %6809 = vmatpush.bf16.msra.mxu2 %v14168_v33  ;;  %v17698_v49 = vld [vmem:[%s27437_s3 + $0x103c] sm:$0xf0]  ;;  %v17930_v58 = vld [vmem:[%s27437_s3 + $0x1784] sm:$0xf]  ;;  %v20959_v7 = vpack.c.bf16 %v3703_v35, %v3703_v35 }
 0x1e0   : > { %3698 = vmatmul.bf16.vlgmr.msrb.gmra.mxu3 %v18846_v34  ;;  %v17890_v34 = vld [vmem:[%s27437_s3 + $0x163c] sm:$0xf0]  ;;  %v12696_v63 = vor.u32 %v17698_v49, %v12695_v16  ;;  %v17786_v30 = vld [vmem:[%s27437_s3 + $0x1304] sm:$0xf] }
 0x1e1   : > { %6797 = vmatpush.bf16.msra.mxu1 %v13592_v61  ;;  %v13464_v8 = vor.u32 %v17890_v34, %v13463_v4  ;;  %v13207_v52 = vld [vmem:[%s27437_s3 + $0x1400] sm:$0xf]  ;;  %v3493_v61 = vpop.f32.mrf.mxu3  ;;  %v13081_v31 = vld [vmem:[%s27437_s3 + $0x1340] sm:$0xf0] }
 0x1e2   : > { %v17826_v53 = vld [vmem:[%s27437_s3 + $0x143c] sm:$0xf0]  ;;  %v17914_v4 = vld [vmem:[%s27437_s3 + $0x1704] sm:$0xf] }
 0x1e3   : > { %6785 = vmatpush.bf16.msra.mxu0 %v13016_v43  ;;  %6810 = vmatpush.bf16.msra.mxu2 %v14104_v45  ;;  %v13208_v28 = vor.u32 %v17826_v53, %v13207_v52  ;;  %v13148_v43 = vor.u32 %v17802_v15, %v13145_v54  ;;  %v13593_v34 = vld [vmem:[%s27437_s3 + $0x1740] sm:$0xf0]  ;;  %v13847_v32 = vld [vmem:[%s27437_s3 + $0x1900] sm:$0xf] }
 0x1e4   : > { %v13596_v9 = vor.u32 %v17914_v4, %v13593_v34  ;;  %v17986_v33 = vld [vmem:[%s27437_s3 + $0x193c] sm:$0xf0]  ;;  %v17866_v41 = vld [vmem:[%s27437_s3 + $0x1584] sm:$0xf] }
 0x1e5   : > { %6798 = vmatpush.bf16.msra.mxu1 %v13528_v3  ;;  %v13660_v3 = vor.u32 %v17930_v58, %v13657_v59  ;;  %v13848_v36 = vor.u32 %v17986_v33, %v13847_v32  ;;  %v13401_v45 = vld [vmem:[%s27437_s3 + $0x15c0] sm:$0xf0]  ;;  %v17970_v16 = vld [vmem:[%s27437_s3 + $0x18bc] sm:$0xf0]  ;;  %v13663_v33 = vld [vmem:[%s27437_s3 + $0x1788] sm:$0xf] }
 0x1e6   : > { %v17722_v52 = vld [vmem:[%s27437_s3 + $0x1104] sm:$0xf]  ;;  %v13404_v53 = vor.u32 %v17866_v41, %v13401_v45  ;;  %v13719_v23 = vld [vmem:[%s27437_s3 + $0x1800] sm:$0xf]  ;;  %v13087_v45 = vld [vmem:[%s27437_s3 + $0x1308] sm:$0xf] }
 0x1e7   : > { %6786 = vmatpush.bf16.msra.mxu0 %v12952_v48  ;;  %6811 = vmatpush.bf16.msra.mxu2 %v14040_v62  ;;  %v18018_v48 = vld [vmem:[%s27437_s3 + $0x1a3c] sm:$0xf0]  ;;  %v12825_v15 = vld [vmem:[%s27437_s3 + $0x1140] sm:$0xf0] }
 0x1e8   : > { %v13976_v6 = vor.u32 %v18018_v48, %v13975_v5  ;;  %v17850_v54 = vld [vmem:[%s27437_s3 + $0x1504] sm:$0xf]  ;;  %v17954_v58 = vld [vmem:[%s27437_s3 + $0x183c] sm:$0xf0] }
 0x1e9   : > { %6799 = vmatpush.bf16.msra.mxu1 %v13464_v8  ;;  %v13084_v8 = vor.u32 %v17786_v30, %v13081_v31  ;;  %v13337_v55 = vld [vmem:[%s27437_s3 + $0x1540] sm:$0xf0]  ;;  %v14615_v41 = vld [vmem:[%s27437_s3 + $0x1f00] sm:$0xf] }
 0x1ea   : > { %v18058_v59 = vld [vmem:[%s27437_s3 + $0x1b84] sm:$0xf] }
 0x1eb   : > { %6787 = vmatpush.bf16.msra.mxu0 %v12888_v60  ;;  %6812 = vmatpush.bf16.msra.mxu2 %v13976_v6  ;;  %v3479_v60 = vadd.f32 %v20882_v24, %v2424_v1  ;;  %v17754_v24 = vld [vmem:[%s27437_s3 + $0x1204] sm:$0xf] }
 0x1ec   : > { %v3504_v39 = vpop.f32.mrf.mxu0  ;;  %v14169_v35 = vld [vmem:[%s27437_s3 + $0x1bc0] sm:$0xf0] }
 0x1ed   : > { %6800 = vmatpush.bf16.msra.mxu1 %v13400_v17  ;;  %v13911_v17 = vld [vmem:[%s27437_s3 + $0x1980] sm:$0xf]  ;;  %v3492_v27 = vadd.f32 %v20884_v0, %v3479_v60  ;;  %v17738_v0 = vld [vmem:[%s27437_s3 + $0x1184] sm:$0xf] }
 0x1ee   : > { %v13912_v20 = vor.u32 %v18002_v18, %v13911_v17  ;;  %v3517_v44 = vpop.f32.mrf.mxu1  ;;  %v17706_v30 = vld [vmem:[%s27437_s3 + $0x1084] sm:$0xf] }
 0x1ef   : > { %6788 = vmatpush.bf16.msra.mxu0 %v12824_v29  ;;  %v13465_v29 = vld [vmem:[%s27437_s3 + $0x1640] sm:$0xf0]  ;;  %v3505_v42 = vadd.f32 %v3504_v39, %v3492_v27 }
 0x1f0   : > { %6813 = vmatpush.bf16.msra.mxu2 %v13912_v20  ;;  %v13468_v38 = vor.u32 %v17882_v26, %v13465_v29  ;;  %v12761_v31 = vld [vmem:[%s27437_s3 + $0x10c0] sm:$0xf0] }
 0x1f1   : > { %6801 = vmatpush.bf16.msra.mxu1 %v13336_v37  ;;  %v12956_v37 = vor.u32 %v17754_v24, %v12953_v25  ;;  %v3518_v50 = vadd.f32 %v3517_v44, %v3505_v42  ;;  %v17834_v4 = vld [vmem:[%s27437_s3 + $0x1484] sm:$0xf]  ;;  %v12764_v13 = vor.u32 %v17706_v30, %v12761_v31  ;;  %v18194_v24 = vld [vmem:[%s27437_s3 + $0x1fbc] sm:$0xf0]  ;;  %v17811_v25 = vld [vmem:[%s27437_s3 + $0x13c4] sm:$0xf0] }
 0x1f2   : > { %v13273_v5 = vld [vmem:[%s27437_s3 + $0x14c0] sm:$0xf0]  ;;  %v18178_v42 = vld [vmem:[%s27437_s3 + $0x1f3c] sm:$0xf0]  ;;  %v12959_v31 = vld [vmem:[%s27437_s3 + $0x1208] sm:$0xf] }
 0x1f3   : > { %6789 = vmatpush.bf16.msra.mxu0 %v12760_v46  ;;  %v13783_v46 = vld [vmem:[%s27437_s3 + $0x1880] sm:$0xf]  ;;  %v18042_v6 = vld [vmem:[%s27437_s3 + $0x1b04] sm:$0xf]  ;;  %v13276_v20 = vor.u32 %v17834_v4, %v13273_v5  ;;  %v17763_v4 = vld [vmem:[%s27437_s3 + $0x1244] sm:$0xf0] }
 0x1f4   : > { %6814 = vmatpush.bf16.msra.mxu2 %v13848_v36  ;;  %v13784_v49 = vor.u32 %v17970_v16, %v13783_v46  ;;  %v3506_v34 = vpop.f32.mrf.mxu0  ;;  %v12697_v60 = vld [vmem:[%s27437_s3 + $0x1040] sm:$0xf0]  ;;  %v17939_v36 = vld [vmem:[%s27437_s3 + $0x17c4] sm:$0xf0] }
 0x1f5   : > { %6802 = vmatpush.bf16.msra.mxu1 %v13272_v51  ;;  %v12892_v51 = vor.u32 %v17738_v0, %v12889_v40  ;;  %v13209_v17 = vld [vmem:[%s27437_s3 + $0x1440] sm:$0xf0]  ;;  %v12700_v39 = vor.u32 %v17690_v10, %v12697_v60  ;;  %v13664_v44 = vor.u32 %v17939_v36, %v13663_v33  ;;  %v17795_v46 = vld [vmem:[%s27437_s3 + $0x1344] sm:$0xf0]  ;;  %v12960_v10 = vor.u32 %v17763_v4, %v12959_v31  ;;  %v14359_v33 = vld [vmem:[%s27437_s3 + $0x1d00] sm:$0xf] }
 0x1f6   : > { %v3530_v57 = vpop.f32.mrf.mxu2  ;;  %v3519_v48 = vpop.f32.mrf.mxu1  ;;  %v18026_v29 = vld [vmem:[%s27437_s3 + $0x1a84] sm:$0xf]  ;;  %v13212_v0 = vor.u32 %v17818_v14, %v13209_v17  ;;  %v13599_v16 = vld [vmem:[%s27437_s3 + $0x1708] sm:$0xf]  ;;  %v18114_v36 = vld [vmem:[%s27437_s3 + $0x1d3c] sm:$0xf0] }
 0x1f7   : > { %6790 = vmatpush.bf16.msra.mxu0 %v12696_v63  ;;  %v3531_v61 = vadd.f32 %v3530_v57, %v3518_v50  ;;  %v13720_v63 = vor.u32 %v17954_v58, %v13719_v23  ;;  %v14041_v32 = vld [vmem:[%s27437_s3 + $0x1ac0] sm:$0xf0]  ;;  %v17923_v50 = vld [vmem:[%s27437_s3 + $0x1744] sm:$0xf0] }
 0x1f8   : > { %6815 = vmatpush.bf16.msra.mxu2 %v13784_v49  ;;  %v3543_v62 = vpop.f32.mrf.mxu3  ;;  %v14616_v49 = vor.u32 %v18178_v42, %v14615_v41  ;;  %v13600_v57 = vor.u32 %v17923_v50, %v13599_v16  ;;  %v13023_v23 = vld [vmem:[%s27437_s3 + $0x1288] sm:$0xf]  ;;  %v17946_v42 = vld [vmem:[%s27437_s3 + $0x1804] sm:$0xf] }
 0x1f9   : > { %6803 = vmatpush.bf16.msra.mxu1 %v13208_v28  ;;  %v12828_v28 = vor.u32 %v17722_v52, %v12825_v15  ;;  %v3544_v1 = vadd.f32 %v3543_v62, %v3531_v61  ;;  %v13977_v52 = vld [vmem:[%s27437_s3 + $0x1a40] sm:$0xf0]  ;;  %v13088_v15 = vor.u32 %v17795_v46, %v13087_v45  ;;  %v17779_v58 = vld [vmem:[%s27437_s3 + $0x12c4] sm:$0xf0] }
 0x1fa   : > { %6791 = vmatmul.bf16.vlgmr.msra.gmra.mxu0 %v20959_v7  ;;  %v17907_v62 = vld [vmem:[%s27437_s3 + $0x16c4] sm:$0xf0]  ;;  %v14681_v31 = vld [vmem:[%s27437_s3 + $0x1fc0] sm:$0xf0] }
 0x1fb   : > { %6835 = vmatpush.bf16.msrb.mxu0 %v13148_v43  ;;  %v14172_v43 = vor.u32 %v18058_v59, %v14169_v35  ;;  %v13535_v59 = vld [vmem:[%s27437_s3 + $0x1688] sm:$0xf]  ;;  %v13913_v35 = vld [vmem:[%s27437_s3 + $0x19c0] sm:$0xf0] }
 0x1fc   : > { %6816 = vmatpush.bf16.msra.mxu2 %v13720_v63  ;;  %v17994_v63 = vld [vmem:[%s27437_s3 + $0x1984] sm:$0xf]  ;;  %v13536_v30 = vor.u32 %v17907_v62, %v13535_v59  ;;  %v13471_v34 = vld [vmem:[%s27437_s3 + $0x1608] sm:$0xf]  ;;  %v2425_v59 = vperm.slane %v20811_v47, 2 }
 0x1fd   : > { %6848 = vmatpush.bf16.msrb.mxu1 %v13660_v3  ;;  %v13340_v3 = vor.u32 %v17850_v54, %v13337_v55  ;;  %v14551_v54 = vld [vmem:[%s27437_s3 + $0x1e80] sm:$0xf]  ;;  %v17891_v48 = vld [vmem:[%s27437_s3 + $0x1644] sm:$0xf0] }
 0x1fe   : > { %v3532_v26 = vpop.f32.mrf.mxu2  ;;  %v18162_v55 = vld [vmem:[%s27437_s3 + $0x1ebc] sm:$0xf0]  ;;  %v13472_v60 = vor.u32 %v17891_v48, %v13471_v34  ;;  %v12895_v14 = vld [vmem:[%s27437_s3 + $0x1188] sm:$0xf]  ;;  %v17803_v34 = vld [vmem:[%s27437_s3 + $0x138c] sm:$0xf] }
 0x1ff   : > { %6836 = vmatpush.bf16.msrb.mxu0 %v13084_v8  ;;  %v14105_v8 = vld [vmem:[%s27437_s3 + $0x1b40] sm:$0xf0]  ;;  %v14552_v61 = vor.u32 %v18162_v55, %v14551_v54  ;;  %v17747_v17 = vld [vmem:[%s27437_s3 + $0x11c4] sm:$0xf0]  ;;  %v18098_v54 = vld [vmem:[%s27437_s3 + $0x1cbc] sm:$0xf0] }
 0x200   : > { %6861 = vmatpush.bf16.msrb.mxu2 %v14172_v43  ;;  %v14108_v12 = vor.u32 %v18042_v6, %v14105_v8  ;;  %v13024_v43 = vor.u32 %v17779_v58, %v13023_v23  ;;  %v17978_v6 = vld [vmem:[%s27437_s3 + $0x1904] sm:$0xf]  ;;  %v17859_v41 = vld [vmem:[%s27437_s3 + $0x1544] sm:$0xf0] }
 0x201   : > { %6849 = vmatpush.bf16.msrb.mxu1 %v13596_v9  ;;  %v3704_v9 = vmax.f32 %v3544_v1, 0.0  ;;  %v14487_v1 = vld [vmem:[%s27437_s3 + $0x1e00] sm:$0xf]  ;;  %v13849_v8 = vld [vmem:[%s27437_s3 + $0x1940] sm:$0xf0] }
 0x202   : > { %v17962_v26 = vld [vmem:[%s27437_s3 + $0x1884] sm:$0xf]  ;;  %v12767_v16 = vld [vmem:[%s27437_s3 + $0x1088] sm:$0xf] }
 0x203   : > { %6837 = vmatpush.bf16.msrb.mxu0 %v13020_v21  ;;  %v21072_v18 = vpack.c.bf16 %v3704_v9, %v3704_v9  ;;  %v13151_v21 = vld [vmem:[%s27437_s3 + $0x1388] sm:$0xf]  ;;  %v13852_v9 = vor.u32 %v17978_v6, %v13849_v8  ;;  %v17931_v6 = vld [vmem:[%s27437_s3 + $0x178c] sm:$0xf] }
 0x204   : > { %6862 = vmatpush.bf16.msrb.mxu2 %v14108_v12  ;;  %v13152_v40 = vor.u32 %v17811_v25, %v13151_v21  ;;  %v14423_v12 = vld [vmem:[%s27437_s3 + $0x1d80] sm:$0xf]  ;;  %v13279_v55 = vld [vmem:[%s27437_s3 + $0x1488] sm:$0xf]  ;;  %v13665_v8 = vld [vmem:[%s27437_s3 + $0x17c8] sm:$0xf0] }
 0x205   : > { %6850 = vmatpush.bf16.msrb.mxu1 %v13532_v22  ;;  %v14679_v22 = vld [vmem:[%s27437_s3 + $0x1f80] sm:$0xf]  ;;  %v17827_v4 = vld [vmem:[%s27437_s3 + $0x1444] sm:$0xf0] }
 0x206   : > { %v14680_v27 = vor.u32 %v18194_v24, %v14679_v22  ;;  %6804 = vmatmul.bf16.vlgmr.msra.gmra.mxu1 %v21072_v18  ;;  %v17875_v24 = vld [vmem:[%s27437_s3 + $0x15c4] sm:$0xf0] }
 0x207   : > { %6838 = vmatpush.bf16.msrb.mxu0 %v12956_v37  ;;  %v3545_v37 = vpop.f32.mrf.mxu3 }
 0x208   : > { %6822 = vmatpush.bf16.msra.mxu3 %v14680_v27  ;;  %v13785_v27 = vld [vmem:[%s27437_s3 + $0x18c0] sm:$0xf0] }
 0x209   : > { %6851 = vmatpush.bf16.msrb.mxu1 %v13468_v38  ;;  %v14044_v38 = vor.u32 %v18026_v29, %v14041_v32  ;;  %v13788_v29 = vor.u32 %v17962_v26, %v13785_v27  ;;  %v12896_v32 = vor.u32 %v17747_v17, %v12895_v14  ;;  %v18170_v17 = vld [vmem:[%s27437_s3 + $0x1f04] sm:$0xf]  ;;  %v17915_v26 = vld [vmem:[%s27437_s3 + $0x170c] sm:$0xf] }
 0x20a   : > { %v13601_v27 = vld [vmem:[%s27437_s3 + $0x1748] sm:$0xf0] }
 0x20b   : > { %6839 = vmatpush.bf16.msrb.mxu0 %v12892_v51  ;;  %6863 = vmatpush.bf16.msrb.mxu2 %v14044_v38  ;;  %v18010_v51 = vld [vmem:[%s27437_s3 + $0x1a04] sm:$0xf]  ;;  %v12831_v38 = vld [vmem:[%s27437_s3 + $0x1108] sm:$0xf] }
 0x20c   : > { %6823 = vmatpush.bf16.msra.mxu3 %v14616_v49  ;;  %v3556_v21 = vpop.f32.mrf.mxu0 }
 0x20d   : > { %6852 = vmatpush.bf16.msrb.mxu1 %v13404_v53  ;;  %v13980_v53 = vor.u32 %v18010_v51, %v13977_v52  ;;  %v17715_v51 = vld [vmem:[%s27437_s3 + $0x10c4] sm:$0xf0] }
 0x20e   : > { %v21191_v25 = vpop.f32.mrf.mxu1  ;;  %v12768_v62 = vor.u32 %v17715_v51, %v12767_v16 }
 0x20f   : > { %6840 = vmatpush.bf16.msrb.mxu0 %v12828_v28  ;;  %6864 = vmatpush.bf16.msrb.mxu2 %v13980_v53  ;;  %v13916_v28 = vor.u32 %v17994_v63, %v13913_v35  ;;  %v17699_v63 = vld [vmem:[%s27437_s3 + $0x1044] sm:$0xf0]  ;;  %v14231_v35 = vld [vmem:[%s27437_s3 + $0x1c00] sm:$0xf] }
 0x210   : > { %6824 = vmatpush.bf16.msra.mxu3 %v14552_v61  ;;  %v12703_v61 = vld [vmem:[%s27437_s3 + $0x1008] sm:$0xf] }
 0x211   : > { %6853 = vmatpush.bf16.msrb.mxu1 %v13340_v3  ;;  %v18146_v3 = vld [vmem:[%s27437_s3 + $0x1e3c] sm:$0xf0] }
 0x212   : > { %v14488_v5 = vor.u32 %v18146_v3, %v14487_v1  ;;  %v13215_v1 = vld [vmem:[%s27437_s3 + $0x1408] sm:$0xf] }
 0x213   : > { %6841 = vmatpush.bf16.msrb.mxu0 %v12764_v13  ;;  %6865 = vmatpush.bf16.msrb.mxu2 %v13916_v28  ;;  %v18130_v13 = vld [vmem:[%s27437_s3 + $0x1dbc] sm:$0xf0] }
 0x214   : > { %6825 = vmatpush.bf16.msra.mxu3 %v14488_v5  ;;  %v14424_v22 = vor.u32 %v18130_v13, %v14423_v12  ;;  %v3558_v52 = vpop.f32.mrf.mxu0  ;;  %v18082_v28 = vld [vmem:[%s27437_s3 + $0x1c3c] sm:$0xf0]  ;;  %v13153_v5 = vld [vmem:[%s27437_s3 + $0x13c8] sm:$0xf0]  ;;  %v13216_v13 = vor.u32 %v17827_v4, %v13215_v1 }
 0x215   : > { %6854 = vmatpush.bf16.msrb.mxu1 %v13276_v20  ;;  %v13407_v20 = vld [vmem:[%s27437_s3 + $0x1588] sm:$0xf]  ;;  %v14232_v3 = vor.u32 %v18082_v28, %v14231_v35  ;;  %v17883_v52 = vld [vmem:[%s27437_s3 + $0x160c] sm:$0xf] }
 0x216   : > { %v13408_v37 = vor.u32 %v17875_v24, %v13407_v20  ;;  %v21226_v49 = vpop.f32.mrf.mxu2  ;;  %v3571_v23 = vpop.f32.mrf.mxu1  ;;  %v13668_v20 = vor.u32 %v17931_v6, %v13665_v8  ;;  %v14617_v24 = vld [vmem:[%s27437_s3 + $0x1f40] sm:$0xf0]  ;;  %v13409_v35 = vld [vmem:[%s27437_s3 + $0x15c8] sm:$0xf0] }
 0x217   : > { %6842 = vmatpush.bf16.msrb.mxu0 %v12700_v39  ;;  %6866 = vmatpush.bf16.msrb.mxu2 %v13852_v9  ;;  %v17731_v39 = vld [vmem:[%s27437_s3 + $0x1144] sm:$0xf0]  ;;  %v3557_v9 = vadd.f32 %v3556_v21, %v2425_v59  ;;  %v13089_v21 = vld [vmem:[%s27437_s3 + $0x1348] sm:$0xf0]  ;;  %v14425_v23 = vld [vmem:[%s27437_s3 + $0x1dc0] sm:$0xf0] }
 0x218   : > { %6826 = vmatpush.bf16.msra.mxu3 %v14424_v22  ;;  %v12832_v46 = vor.u32 %v17731_v39, %v12831_v38  ;;  %v21231_v53 = vpop.f32.mrf.mxu3  ;;  %v17787_v22 = vld [vmem:[%s27437_s3 + $0x130c] sm:$0xf]  ;;  %v13604_v38 = vor.u32 %v17915_v26, %v13601_v27  ;;  %v18090_v27 = vld [vmem:[%s27437_s3 + $0x1c84] sm:$0xf] }
 0x219   : > { %6855 = vmatpush.bf16.msrb.mxu1 %v13212_v0  ;;  %v13343_v0 = vld [vmem:[%s27437_s3 + $0x1508] sm:$0xf]  ;;  %v17771_v39 = vld [vmem:[%s27437_s3 + $0x128c] sm:$0xf] }
 0x21a   : > { %6843 = vmatmul.bf16.vlgmr.msrb.gmra.mxu0 %v20959_v7  ;;  %v13344_v50 = vor.u32 %v17859_v41, %v13343_v0  ;;  %v13537_v41 = vld [vmem:[%s27437_s3 + $0x16c8] sm:$0xf0] }
 0x21b   : > { %6887 = vmatpush.bf16.msra.mxu0 %v13152_v40  ;;  %6867 = vmatpush.bf16.msrb.mxu2 %v13788_v29  ;;  %v14360_v40 = vor.u32 %v18114_v36, %v14359_v33  ;;  %v14620_v29 = vor.u32 %v18170_v17, %v14617_v24  ;;  %v13092_v33 = vor.u32 %v17787_v22, %v13089_v21  ;;  %v18154_v36 = vld [vmem:[%s27437_s3 + $0x1e84] sm:$0xf]  ;;  %v17739_v59 = vld [vmem:[%s27437_s3 + $0x118c] sm:$0xf]  ;;  %v18051_v17 = vld [vmem:[%s27437_s3 + $0x1b44] sm:$0xf0] }
 0x21c   : > { %6856 = vmatmul.bf16.vlgmr.msrb.gmra.mxu1 %v21072_v18  ;;  %v12833_v6 = vld [vmem:[%s27437_s3 + $0x1148] sm:$0xf0] }
 0x21d   : > { %6900 = vmatpush.bf16.msra.mxu1 %v13664_v44  ;;  %v13721_v44 = vld [vmem:[%s27437_s3 + $0x1840] sm:$0xf0]  ;;  %6827 = vmatpush.bf16.msra.mxu3 %v14360_v40  ;;  %v17899_v40 = vld [vmem:[%s27437_s3 + $0x168c] sm:$0xf] }
 0x21e   : > { %v13724_v45 = vor.u32 %v17946_v42, %v13721_v44  ;;  %v3584_v12 = vpop.f32.mrf.mxu2  ;;  %v13540_v16 = vor.u32 %v17899_v40, %v13537_v41  ;;  %v12769_v26 = vld [vmem:[%s27437_s3 + $0x10c8] sm:$0xf0]  ;;  %v18035_v41 = vld [vmem:[%s27437_s3 + $0x1ac4] sm:$0xf0] }
 0x21f   : > { %6888 = vmatpush.bf16.msra.mxu0 %v13088_v15  ;;  %v14295_v15 = vld [vmem:[%s27437_s3 + $0x1c80] sm:$0xf] }
 0x220   : > { %6868 = vmatpush.bf16.msrb.mxu2 %v13724_v45  ;;  %v14296_v58 = vor.u32 %v18098_v54, %v14295_v15  ;;  %v3597_v14 = vpop.f32.mrf.mxu3  ;;  %v18138_v45 = vld [vmem:[%s27437_s3 + $0x1e04] sm:$0xf]  ;;  %v13473_v15 = vld [vmem:[%s27437_s3 + $0x1648] sm:$0xf0] }
 0x221   : > { %6901 = vmatpush.bf16.msra.mxu1 %v13600_v57  ;;  %v17843_v57 = vld [vmem:[%s27437_s3 + $0x14c4] sm:$0xf0] }
 0x222   : > { %6828 = vmatpush.bf16.msra.mxu3 %v14296_v58  ;;  %v13476_v58 = vor.u32 %v17883_v52, %v13473_v15  ;;  %v14111_v14 = vld [vmem:[%s27437_s3 + $0x1b08] sm:$0xf]  ;;  %v17812_v52 = vld [vmem:[%s27437_s3 + $0x13cc] sm:$0xf0] }
 0x223   : > { %6889 = vmatpush.bf16.msra.mxu0 %v13024_v43  ;;  %v13280_v43 = vor.u32 %v17843_v57, %v13279_v55  ;;  %v18122_v57 = vld [vmem:[%s27437_s3 + $0x1d84] sm:$0xf] }
 0x225   : > { %6902 = vmatpush.bf16.msra.mxu1 %v13536_v30  ;;  %v18186_v30 = vld [vmem:[%s27437_s3 + $0x1f84] sm:$0xf] }
 0x226   : > { %v14684_v48 = vor.u32 %v18186_v30, %v14681_v31  ;;  %6829 = vmatpush.bf16.msra.mxu3 %v14232_v3  ;;  %v14175_v3 = vld [vmem:[%s27437_s3 + $0x1b88] sm:$0xf]  ;;  %v18106_v30 = vld [vmem:[%s27437_s3 + $0x1d04] sm:$0xf] }
 0x227   : > { %6890 = vmatpush.bf16.msra.mxu0 %v12960_v10  ;;  %v12704_v10 = vor.u32 %v17699_v63, %v12703_v61  ;;  %v14428_v61 = vor.u32 %v18122_v57, %v14425_v23  ;;  %v17867_v63 = vld [vmem:[%s27437_s3 + $0x158c] sm:$0xf]  ;;  %v14361_v31 = vld [vmem:[%s27437_s3 + $0x1d40] sm:$0xf0] }
 0x228   : > { %v14364_v8 = vor.u32 %v18106_v30, %v14361_v31 }
 0x229   : > { %6903 = vmatpush.bf16.msra.mxu1 %v13472_v60  ;;  %v13156_v60 = vor.u32 %v17803_v34, %v13153_v5  ;;  %v13412_v34 = vor.u32 %v17867_v63, %v13409_v35  ;;  %v18067_v5 = vld [vmem:[%s27437_s3 + $0x1bc4] sm:$0xf0] }
 0x22a   : > { %6874 = vmatpush.bf16.msrb.mxu3 %v14684_v48  ;;  %v17723_v48 = vld [vmem:[%s27437_s3 + $0x110c] sm:$0xf] }
 0x22b   : > { %6891 = vmatpush.bf16.msra.mxu0 %v12896_v32  ;;  %v3570_v32 = vadd.f32 %v21191_v25, %v3557_v9  ;;  %v13025_v25 = vld [vmem:[%s27437_s3 + $0x12c8] sm:$0xf0] }
 0x22c   : > { %v13028_v44 = vor.u32 %v17771_v39, %v13025_v25  ;;  %v17851_v9 = vld [vmem:[%s27437_s3 + $0x150c] sm:$0xf]  ;;  %v14047_v25 = vld [vmem:[%s27437_s3 + $0x1a88] sm:$0xf] }
 0x22d   : > { %6904 = vmatpush.bf16.msra.mxu1 %v13408_v37  ;;  %v14553_v37 = vld [vmem:[%s27437_s3 + $0x1ec0] sm:$0xf0]  ;;  %v3583_v42 = vadd.f32 %v21226_v49, %v3570_v32  ;;  %v12961_v49 = vld [vmem:[%s27437_s3 + $0x1248] sm:$0xf0]  ;;  %v14048_v57 = vor.u32 %v18035_v41, %v14047_v25  ;;  %v17876_v41 = vld [vmem:[%s27437_s3 + $0x15cc] sm:$0xf0] }
 0x22e   : > { %6875 = vmatpush.bf16.msrb.mxu3 %v14620_v29  ;;  %v14556_v0 = vor.u32 %v18154_v36, %v14553_v37  ;;  %v14297_v29 = vld [vmem:[%s27437_s3 + $0x1cc0] sm:$0xf0]  ;;  %v13281_v36 = vld [vmem:[%s27437_s3 + $0x14c8] sm:$0xf0] }
 0x22f   : > { %6892 = vmatpush.bf16.msra.mxu0 %v12832_v46  ;;  %v14489_v46 = vld [vmem:[%s27437_s3 + $0x1e40] sm:$0xf0]  ;;  %v3596_v54 = vadd.f32 %v21231_v53, %v3583_v42  ;;  %v12897_v53 = vld [vmem:[%s27437_s3 + $0x11c8] sm:$0xf0] }
 0x230   : > { %v14492_v51 = vor.u32 %v18138_v45, %v14489_v46  ;;  %v12900_v1 = vor.u32 %v17739_v59, %v12897_v53  ;;  %v17691_v42 = vld [vmem:[%s27437_s3 + $0x100c] sm:$0xf] }
 0x231   : > { %6905 = vmatpush.bf16.msra.mxu1 %v13344_v50  ;;  %v17755_v50 = vld [vmem:[%s27437_s3 + $0x120c] sm:$0xf] }
 0x232   : > { %6876 = vmatpush.bf16.msrb.mxu3 %v14556_v0  ;;  %v12964_v55 = vor.u32 %v17755_v50, %v12961_v49  ;;  %v14112_v0 = vor.u32 %v18051_v17, %v14111_v14  ;;  %v17819_v46 = vld [vmem:[%s27437_s3 + $0x140c] sm:$0xf]  ;;  %v14233_v50 = vld [vmem:[%s27437_s3 + $0x1c40] sm:$0xf0]  ;;  %v12967_v17 = vld [vmem:[%s27437_s3 + $0x1210] sm:$0xf] }
 0x233   : > { %6893 = vmatpush.bf16.msra.mxu0 %v12768_v62  ;;  %v3608_v62 = vpop.f32.mrf.mxu0  ;;  %v13217_v49 = vld [vmem:[%s27437_s3 + $0x1448] sm:$0xf0] }
 0x234   : > { %v3609_v28 = vadd.f32 %v3608_v62, %v3596_v54  ;;  %v13671_v54 = vld [vmem:[%s27437_s3 + $0x1790] sm:$0xf]  ;;  %v18019_v62 = vld [vmem:[%s27437_s3 + $0x1a44] sm:$0xf0] }
 0x235   : > { %6906 = vmatpush.bf16.msra.mxu1 %v13280_v43  ;;  %v3621_v43 = vpop.f32.mrf.mxu1 }
 0x236   : > { %6877 = vmatpush.bf16.msrb.mxu3 %v14492_v51  ;;  %v3622_v4 = vadd.f32 %v3621_v43, %v3609_v28  ;;  %v21394_v24 = vpop.f32.mrf.mxu2  ;;  %v13159_v51 = vld [vmem:[%s27437_s3 + $0x1390] sm:$0xf] }
 0x237   : > { %6894 = vmatpush.bf16.msra.mxu0 %v12704_v10  ;;  %v13345_v10 = vld [vmem:[%s27437_s3 + $0x1548] sm:$0xf0]  ;;  %v13160_v59 = vor.u32 %v17812_v52, %v13159_v51  ;;  %v13095_v28 = vld [vmem:[%s27437_s3 + $0x1310] sm:$0xf] }
 0x238   : > { %v3705_v12 = vmax.f32 %v3622_v4, 0.0  ;;  %v13348_v21 = vor.u32 %v17851_v9, %v13345_v10  ;;  %v21405_v32 = vpop.f32.mrf.mxu3  ;;  %v17796_v43 = vld [vmem:[%s27437_s3 + $0x134c] sm:$0xf0]  ;;  %v13919_v4 = vld [vmem:[%s27437_s3 + $0x1988] sm:$0xf] }
 0x239   : > { %6907 = vmatpush.bf16.msra.mxu1 %v13216_v13  ;;  %v14176_v13 = vor.u32 %v18067_v5, %v14175_v3  ;;  %v17924_v3 = vld [vmem:[%s27437_s3 + $0x174c] sm:$0xf0]  ;;  %v13096_v31 = vor.u32 %v17796_v43, %v13095_v28  ;;  %v14177_v51 = vld [vmem:[%s27437_s3 + $0x1bc8] sm:$0xf0] }
 0x23a   : > { %6895 = vmatmul.bf16.vlgmr.msra.gmra.mxu0 %v20959_v7  ;;  %6878 = vmatpush.bf16.msrb.mxu3 %v14428_v61  ;;  %v21392_v22 = vpack.c.bf16 %v3705_v12, %v3705_v12  ;;  %v13983_v61 = vld [vmem:[%s27437_s3 + $0x1a08] sm:$0xf]  ;;  %v13543_v9 = vld [vmem:[%s27437_s3 + $0x1690] sm:$0xf] }
 0x23b   : > { %6939 = vmatpush.bf16.msrb.mxu0 %v13156_v60  ;;  %v12836_v60 = vor.u32 %v17723_v48, %v12833_v6  ;;  %v3610_v37 = vpop.f32.mrf.mxu0  ;;  %v13984_v30 = vor.u32 %v18019_v62, %v13983_v61  ;;  %v13031_v48 = vld [vmem:[%s27437_s3 + $0x1290] sm:$0xf] }
 0x23c   : > { %6908 = vmatmul.bf16.vlgmr.msra.gmra.mxu1 %v21072_v18  ;;  %6817 = vmatmul.bf16.vlgmr.msra.gmra.mxu2 %v21392_v22  ;;  %v17780_v6 = vld [vmem:[%s27437_s3 + $0x12cc] sm:$0xf0] }
 0x23d   : > { %6952 = vmatpush.bf16.msrb.mxu1 %v13668_v20  ;;  %v17707_v20 = vld [vmem:[%s27437_s3 + $0x108c] sm:$0xf]  ;;  %v3623_v39 = vpop.f32.mrf.mxu1  ;;  %6913 = vmatpush.bf16.msra.mxu2 %v14176_v13  ;;  %v17908_v10 = vld [vmem:[%s27437_s3 + $0x16cc] sm:$0xf0]  ;;  %v13032_v13 = vor.u32 %v17780_v6, %v13031_v48 }
 0x23e   : > { %6879 = vmatpush.bf16.msrb.mxu3 %v14364_v8  ;;  %v12772_v40 = vor.u32 %v17707_v20, %v12769_v26  ;;  %v3636_v53 = vpop.f32.mrf.mxu2  ;;  %v2426_v8 = vperm.slane %v20811_v47, 3  ;;  %v13855_v47 = vld [vmem:[%s27437_s3 + $0x1908] sm:$0xf]  ;;  %v13544_v14 = vor.u32 %v17908_v10, %v13543_v9  ;;  %v17764_v20 = vld [vmem:[%s27437_s3 + $0x124c] sm:$0xf0] }
 0x23f   : > { %6940 = vmatpush.bf16.msrb.mxu0 %v13092_v33  ;;  %v17835_v33 = vld [vmem:[%s27437_s3 + $0x148c] sm:$0xf]  ;;  %v13479_v26 = vld [vmem:[%s27437_s3 + $0x1610] sm:$0xf] }
 0x240   : > { %v13284_v45 = vor.u32 %v17835_v33, %v13281_v36  ;;  %v3649_v35 = vpop.f32.mrf.mxu3  ;;  %v12968_v33 = vor.u32 %v17764_v20, %v12967_v17  ;;  %v13791_v36 = vld [vmem:[%s27437_s3 + $0x1888] sm:$0xf]  ;;  %v17748_v39 = vld [vmem:[%s27437_s3 + $0x11cc] sm:$0xf0]  ;;  %v18043_v53 = vld [vmem:[%s27437_s3 + $0x1b0c] sm:$0xf] }
 0x241   : > { %6953 = vmatpush.bf16.msrb.mxu1 %v13604_v38  ;;  %v14300_v38 = vor.u32 %v18090_v27, %v14297_v29  ;;  %6914 = vmatpush.bf16.msra.mxu2 %v14112_v0  ;;  %v17892_v27 = vld [vmem:[%s27437_s3 + $0x164c] sm:$0xf0]  ;;  %v18027_v9 = vld [vmem:[%s27437_s3 + $0x1a8c] sm:$0xf]  ;;  %v17804_v20 = vld [vmem:[%s27437_s3 + $0x1394] sm:$0xf] }
 0x242   : > { %v13480_v37 = vor.u32 %v17892_v27, %v13479_v26  ;;  %v12839_v52 = vld [vmem:[%s27437_s3 + $0x1110] sm:$0xf]  ;;  %v14049_v10 = vld [vmem:[%s27437_s3 + $0x1ac8] sm:$0xf0]  ;;  %v17932_v27 = vld [vmem:[%s27437_s3 + $0x1794] sm:$0xf] }
 0x243   : > { %6941 = vmatpush.bf16.msrb.mxu0 %v13028_v44  ;;  %v12705_v44 = vld [vmem:[%s27437_s3 + $0x1048] sm:$0xf0]  ;;  %6880 = vmatpush.bf16.msrb.mxu3 %v14300_v38  ;;  %v12903_v38 = vld [vmem:[%s27437_s3 + $0x1190] sm:$0xf] }
 0x244   : > { %v12708_v23 = vor.u32 %v17691_v42, %v12705_v44  ;;  %v12775_v35 = vld [vmem:[%s27437_s3 + $0x1090] sm:$0xf] }
 0x245   : > { %6954 = vmatpush.bf16.msrb.mxu1 %v13540_v16  ;;  %v18074_v16 = vld [vmem:[%s27437_s3 + $0x1c04] sm:$0xf]  ;;  %6915 = vmatpush.bf16.msra.mxu2 %v14048_v57  ;;  %v17716_v28 = vld [vmem:[%s27437_s3 + $0x10cc] sm:$0xf0] }
 0x246   : > { %v14236_v15 = vor.u32 %v18074_v16, %v14233_v50  ;;  %v13727_v16 = vld [vmem:[%s27437_s3 + $0x1808] sm:$0xf]  ;;  %v18059_v50 = vld [vmem:[%s27437_s3 + $0x1b8c] sm:$0xf] }
 0x247   : > { %6942 = vmatpush.bf16.msrb.mxu0 %v12964_v55  ;;  %v17940_v55 = vld [vmem:[%s27437_s3 + $0x17cc] sm:$0xf0] }
 0x248   : > { %6881 = vmatpush.bf16.msrb.mxu3 %v14236_v15  ;;  %v13672_v63 = vor.u32 %v17940_v55, %v13671_v54  ;;  %v17732_v15 = vld [vmem:[%s27437_s3 + $0x114c] sm:$0xf0] }
 0x249   : > { %6955 = vmatpush.bf16.msrb.mxu1 %v13476_v58  ;;  %v13220_v58 = vor.u32 %v17819_v46, %v13217_v49  ;;  %6916 = vmatpush.bf16.msra.mxu2 %v13984_v30  ;;  %v12904_v46 = vor.u32 %v17748_v39, %v12903_v38  ;;  %v13351_v54 = vld [vmem:[%s27437_s3 + $0x1510] sm:$0xf]  ;;  %v18179_v38 = vld [vmem:[%s27437_s3 + $0x1f44] sm:$0xf0] }
 0x24a   : > { %v17860_v55 = vld [vmem:[%s27437_s3 + $0x154c] sm:$0xf0] }
 0x24b   : > { %6943 = vmatpush.bf16.msrb.mxu0 %v12900_v1  ;;  %v13607_v1 = vld [vmem:[%s27437_s3 + $0x1710] sm:$0xf]  ;;  %v13352_v62 = vor.u32 %v17860_v55, %v13351_v54  ;;  %v17995_v54 = vld [vmem:[%s27437_s3 + $0x198c] sm:$0xf] }
 0x24c   : > { %v13608_v5 = vor.u32 %v17924_v3, %v13607_v1  ;;  %6869 = vmatmul.bf16.vlgmr.msrb.gmra.mxu2 %v21392_v22  ;;  %v13287_v30 = vld [vmem:[%s27437_s3 + $0x1490] sm:$0xf]  ;;  %v13921_v55 = vld [vmem:[%s27437_s3 + $0x19c8] sm:$0xf0] }
 0x24d   : > { %6956 = vmatpush.bf16.msrb.mxu1 %v13412_v34  ;;  %v18003_v34 = vld [vmem:[%s27437_s3 + $0x19c4] sm:$0xf0] }
 0x24e   : > { %v13920_v12 = vor.u32 %v18003_v34, %v13919_v4  ;;  %v14687_v34 = vld [vmem:[%s27437_s3 + $0x1f88] sm:$0xf] }
 0x24f   : > { %6944 = vmatpush.bf16.msrb.mxu0 %v12836_v60  ;;  %v17987_v60 = vld [vmem:[%s27437_s3 + $0x1944] sm:$0xf0] }
 0x250   : > { %6917 = vmatpush.bf16.msra.mxu2 %v13920_v12  ;;  %v13856_v29 = vor.u32 %v17987_v60, %v13855_v47  ;;  %v12711_v12 = vld [vmem:[%s27437_s3 + $0x1010] sm:$0xf] }
 0x251   : > { %6957 = vmatpush.bf16.msrb.mxu1 %v13348_v21  ;;  %v3635_v21 = vadd.f32 %v21394_v24, %v2426_v8  ;;  %v17971_v24 = vld [vmem:[%s27437_s3 + $0x18c4] sm:$0xf0]  ;;  %v12776_v8 = vor.u32 %v17716_v28, %v12775_v35  ;;  %v17700_v47 = vld [vmem:[%s27437_s3 + $0x104c] sm:$0xf0] }
 0x252   : > { %v13792_v44 = vor.u32 %v17971_v24, %v13791_v36  ;;  %v13223_v60 = vld [vmem:[%s27437_s3 + $0x1410] sm:$0xf]  ;;  %v14052_v36 = vor.u32 %v18027_v9, %v14049_v10  ;;  %v12712_v24 = vor.u32 %v17700_v47, %v12711_v12  ;;  %v18147_v35 = vld [vmem:[%s27437_s3 + $0x1e44] sm:$0xf0]  ;;  %v17963_v10 = vld [vmem:[%s27437_s3 + $0x188c] sm:$0xf] }
 0x253   : > { %6945 = vmatpush.bf16.msrb.mxu0 %v12772_v40  ;;  %v3648_v25 = vadd.f32 %v21405_v32, %v3635_v21  ;;  %v13415_v40 = vld [vmem:[%s27437_s3 + $0x1590] sm:$0xf]  ;;  %v17955_v32 = vld [vmem:[%s27437_s3 + $0x1844] sm:$0xf0]  ;;  %v13161_v21 = vld [vmem:[%s27437_s3 + $0x13d0] sm:$0xf0] }
 0x254   : > { %6918 = vmatpush.bf16.msra.mxu2 %v13856_v29  ;;  %v13416_v49 = vor.u32 %v17876_v41, %v13415_v40  ;;  %v13728_v57 = vor.u32 %v17955_v32, %v13727_v16  ;;  %v13673_v29 = vld [vmem:[%s27437_s3 + $0x17d0] sm:$0xf0]  ;;  %v18011_v40 = vld [vmem:[%s27437_s3 + $0x1a0c] sm:$0xf] }
 0x255   : > { %6958 = vmatpush.bf16.msrb.mxu1 %v13284_v45  ;;  %v13985_v41 = vld [vmem:[%s27437_s3 + $0x1a48] sm:$0xf0]  ;;  %v17916_v32 = vld [vmem:[%s27437_s3 + $0x1714] sm:$0xf] }
 0x256   : > { %v13793_v12 = vld [vmem:[%s27437_s3 + $0x18c8] sm:$0xf0]  ;;  %v17740_v47 = vld [vmem:[%s27437_s3 + $0x1194] sm:$0xf] }
 0x257   : > { %6946 = vmatpush.bf16.msrb.mxu0 %v12708_v23  ;;  %v3660_v0 = vpop.f32.mrf.mxu0 }
 0x258   : > { %v3661_v45 = vadd.f32 %v3660_v0, %v3648_v25  ;;  %6919 = vmatpush.bf16.msra.mxu2 %v13792_v44  ;;  %v13164_v0 = vor.u32 %v17804_v20, %v13161_v21  ;;  %v13676_v44 = vor.u32 %v17932_v27, %v13673_v29  ;;  %v13417_v20 = vld [vmem:[%s27437_s3 + $0x15d0] sm:$0xf0]  ;;  %v14367_v27 = vld [vmem:[%s27437_s3 + $0x1d08] sm:$0xf] }
 0x259   : > { %6959 = vmatpush.bf16.msrb.mxu1 %v13220_v58  ;;  %v3673_v42 = vpop.f32.mrf.mxu1  ;;  %v14180_v58 = vor.u32 %v18059_v50, %v14177_v51  ;;  %v13609_v50 = vld [vmem:[%s27437_s3 + $0x1750] sm:$0xf0]  ;;  %v14559_v51 = vld [vmem:[%s27437_s3 + $0x1e88] sm:$0xf] }
 0x25a   : > { %6947 = vmatmul.bf16.vlgmr.msrb.gmra.mxu0 %v20959_v7  ;;  %v3674_v23 = vadd.f32 %v3673_v42, %v3661_v45  ;;  %v17788_v45 = vld [vmem:[%s27437_s3 + $0x1314] sm:$0xf]  ;;  %v18115_v29 = vld [vmem:[%s27437_s3 + $0x1d44] sm:$0xf0] }
 0x25b   : > { %6991 = vmatpush.bf16.msra.mxu0 %v13160_v59  ;;  %v12840_v59 = vor.u32 %v17732_v15, %v12839_v52  ;;  %v18163_v52 = vld [vmem:[%s27437_s3 + $0x1ec4] sm:$0xf0] }
 0x25c   : > { %6960 = vmatmul.bf16.vlgmr.msrb.gmra.mxu1 %v21072_v18  ;;  %6920 = vmatpush.bf16.msra.mxu2 %v13728_v57  ;;  %v13612_v57 = vor.u32 %v17916_v32, %v13609_v50 }
 0x25d   : > { %7004 = vmatpush.bf16.msra.mxu1 %v13672_v63  ;;  %v14113_v63 = vld [vmem:[%s27437_s3 + $0x1b48] sm:$0xf0] }
 0x25e   : > { %v14116_v6 = vor.u32 %v18043_v53, %v14113_v63  ;;  %v17900_v53 = vld [vmem:[%s27437_s3 + $0x1694] sm:$0xf]  ;;  %v14495_v63 = vld [vmem:[%s27437_s3 + $0x1e08] sm:$0xf] }
 0x25f   : > { %6992 = vmatpush.bf16.msra.mxu0 %v13096_v31  ;;  %v3662_v3 = vpop.f32.mrf.mxu0  ;;  %v17844_v31 = vld [vmem:[%s27437_s3 + $0x14cc] sm:$0xf0]  ;;  %6921 = vmatmul.bf16.vlgmr.msra.gmra.mxu2 %v21392_v22 }
 0x260   : > { %6965 = vmatpush.bf16.msrb.mxu2 %v14180_v58  ;;  %v13033_v58 = vld [vmem:[%s27437_s3 + $0x12d0] sm:$0xf0] }
 0x261   : > { %7005 = vmatpush.bf16.msra.mxu1 %v13608_v5  ;;  %v3686_v61 = vpop.f32.mrf.mxu2  ;;  %v3675_v4 = vpop.f32.mrf.mxu1  ;;  %v18195_v5 = vld [vmem:[%s27437_s3 + $0x1fc4] sm:$0xf0] }
 0x262   : > { %v3687_v43 = vadd.f32 %v3686_v61, %v3674_v23  ;;  %v14688_v26 = vor.u32 %v18195_v5, %v14687_v34  ;;  %v17772_v23 = vld [vmem:[%s27437_s3 + $0x1294] sm:$0xf]  ;;  %v14496_v4 = vor.u32 %v18147_v35, %v14495_v63  ;;  %v18187_v63 = vld [vmem:[%s27437_s3 + $0x1f8c] sm:$0xf] }
 0x263   : > { %6993 = vmatpush.bf16.msra.mxu0 %v13032_v13  ;;  %v3699_v1 = vpop.f32.mrf.mxu3  ;;  %v13288_v13 = vor.u32 %v17844_v31, %v13287_v30  ;;  %v13545_v61 = vld [vmem:[%s27437_s3 + $0x16d0] sm:$0xf0]  ;;  %v13036_v28 = vor.u32 %v17772_v23, %v13033_v58  ;;  %v14689_v35 = vld [vmem:[%s27437_s3 + $0x1fc8] sm:$0xf0] }
 0x264   : > { %v3700_v48 = vadd.f32 %v3699_v1, %v3687_v43  ;;  %6966 = vmatpush.bf16.msrb.mxu2 %v14116_v6  ;;  %v17979_v43 = vld [vmem:[%s27437_s3 + $0x190c] sm:$0xf]  ;;  %v13548_v3 = vor.u32 %v17900_v53, %v13545_v61  ;;  %v17756_v30 = vld [vmem:[%s27437_s3 + $0x1214] sm:$0xf]  ;;  %v14431_v6 = vld [vmem:[%s27437_s3 + $0x1d88] sm:$0xf] }
 0x265   : > { %7006 = vmatpush.bf16.msra.mxu1 %v13544_v14  ;;  %v17828_v14 = vld [vmem:[%s27437_s3 + $0x144c] sm:$0xf0]  ;;  %v13857_v1 = vld [vmem:[%s27437_s3 + $0x1948] sm:$0xf0]  ;;  %v12969_v31 = vld [vmem:[%s27437_s3 + $0x1250] sm:$0xf0] }
 0x266   : > { %v3706_v17 = vmax.f32 %v3700_v48, 0.0  ;;  %v13224_v25 = vor.u32 %v17828_v14, %v13223_v60  ;;  %v17884_v34 = vld [vmem:[%s27437_s3 + $0x1614] sm:$0xf]  ;;  %v13860_v48 = vor.u32 %v17979_v43, %v13857_v1  ;;  %v12972_v9 = vor.u32 %v17756_v30, %v12969_v31  ;;  %v18083_v53 = vld [vmem:[%s27437_s3 + $0x1c44] sm:$0xf0] }
 0x267   : > { %6994 = vmatpush.bf16.msra.mxu0 %v12968_v33  ;;  %v13481_v5 = vld [vmem:[%s27437_s3 + $0x1650] sm:$0xf0]  ;;  %v18036_v1 = vld [vmem:[%s27437_s3 + $0x1acc] sm:$0xf0] }
 0x268   : > { %v21607_v33 = vpack.c.bf16 %v3706_v17, %v3706_v17  ;;  %6967 = vmatpush.bf16.msrb.mxu2 %v14052_v36  ;;  %v12905_v60 = vld [vmem:[%s27437_s3 + $0x11d0] sm:$0xf0] }
 0x269   : > { %7007 = vmatpush.bf16.msra.mxu1 %v13480_v37  ;;  %v14623_v37 = vld [vmem:[%s27437_s3 + $0x1f08] sm:$0xf]  ;;  %v3688_v39 = vpop.f32.mrf.mxu2  ;;  %v17868_v17 = vld [vmem:[%s27437_s3 + $0x1594] sm:$0xf]  ;;  %v12908_v36 = vor.u32 %v17740_v47, %v12905_v60  ;;  %v14625_v47 = vld [vmem:[%s27437_s3 + $0x1f48] sm:$0xf0] }
 0x26a   : > { %6830 = vmatmul.bf16.vlgmr.msra.gmra.mxu3 %v21607_v33  ;;  %v14624_v16 = vor.u32 %v18179_v38, %v14623_v37  ;;  %v13729_v37 = vld [vmem:[%s27437_s3 + $0x1848] sm:$0xf0]  ;;  %v14183_v38 = vld [vmem:[%s27437_s3 + $0x1b90] sm:$0xf]  ;;  %v13420_v39 = vor.u32 %v17868_v17, %v13417_v20  ;;  %v13289_v23 = vld [vmem:[%s27437_s3 + $0x14d0] sm:$0xf0] }
 0x26b   : > { %6995 = vmatpush.bf16.msra.mxu0 %v12904_v46  ;;  %v3701_v42 = vpop.f32.mrf.mxu3  ;;  %v13097_v46 = vld [vmem:[%s27437_s3 + $0x1350] sm:$0xf0]  ;;  %6926 = vmatpush.bf16.msra.mxu3 %v14688_v26  ;;  %v13796_v26 = vor.u32 %v17963_v10, %v13793_v12  ;;  %v18020_v17 = vld [vmem:[%s27437_s3 + $0x1a4c] sm:$0xf0] }
 0x26c   : > { %v13100_v15 = vor.u32 %v17788_v45, %v13097_v46  ;;  %v17852_v42 = vld [vmem:[%s27437_s3 + $0x1514] sm:$0xf]  ;;  %v14303_v46 = vld [vmem:[%s27437_s3 + $0x1c88] sm:$0xf] }
 0x26d   : > { %7008 = vmatpush.bf16.msra.mxu1 %v13416_v49  ;;  %v13988_v49 = vor.u32 %v18011_v40, %v13985_v41  ;;  %v12841_v40 = vld [vmem:[%s27437_s3 + $0x1150] sm:$0xf0]  ;;  %v14368_v41 = vor.u32 %v18115_v29, %v14367_v27  ;;  %v13103_v27 = vld [vmem:[%s27437_s3 + $0x1318] sm:$0xf] }
 0x26e   : > { %v12713_v30 = vld [vmem:[%s27437_s3 + $0x1050] sm:$0xf0] }
 0x26f   : > { %6996 = vmatpush.bf16.msra.mxu0 %v12840_v59  ;;  %6927 = vmatpush.bf16.msra.mxu3 %v14624_v16  ;;  %v14560_v59 = vor.u32 %v18163_v52, %v14559_v51  ;;  %v18099_v16 = vld [vmem:[%s27437_s3 + $0x1cc4] sm:$0xf0]  ;;  %v18052_v52 = vld [vmem:[%s27437_s3 + $0x1b4c] sm:$0xf0] }
 0x270   : > { %6968 = vmatpush.bf16.msrb.mxu2 %v13988_v49  ;;  %v14119_v49 = vld [vmem:[%s27437_s3 + $0x1b10] sm:$0xf] }
 0x271   : > { %7009 = vmatpush.bf16.msra.mxu1 %v13352_v62  ;;  %v13924_v62 = vor.u32 %v17995_v54, %v13921_v55  ;;  %v12777_v54 = vld [vmem:[%s27437_s3 + $0x10d0] sm:$0xf0]  ;;  %v14304_v55 = vor.u32 %v18099_v16, %v14303_v46  ;;  %v14120_v61 = vor.u32 %v18052_v52, %v14119_v49  ;;  %v17781_v46 = vld [vmem:[%s27437_s3 + $0x12d4] sm:$0xf0]  ;;  %v14497_v52 = vld [vmem:[%s27437_s3 + $0x1e48] sm:$0xf0] }
 0x272   : > { %v13551_v16 = vld [vmem:[%s27437_s3 + $0x1698] sm:$0xf] }
 0x273   : > { %6997 = vmatpush.bf16.msra.mxu0 %v12776_v8  ;;  %6928 = vmatpush.bf16.msra.mxu3 %v14560_v59  ;;  %v18131_v8 = vld [vmem:[%s27437_s3 + $0x1dc4] sm:$0xf0] }
 0x274   : > { %6969 = vmatpush.bf16.msrb.mxu2 %v13924_v62  ;;  %v14432_v14 = vor.u32 %v18131_v8, %v14431_v6  ;;  %v14239_v59 = vld [vmem:[%s27437_s3 + $0x1c08] sm:$0xf]  ;;  %v17813_v6 = vld [vmem:[%s27437_s3 + $0x13d4] sm:$0xf0] }
 0x275   : > { %7010 = vmatpush.bf16.msra.mxu1 %v13288_v13  ;;  %v13484_v13 = vor.u32 %v17884_v34, %v13481_v5  ;;  %v14240_v31 = vor.u32 %v18083_v53, %v14239_v59  ;;  %v13225_v34 = vld [vmem:[%s27437_s3 + $0x1450] sm:$0xf0]  ;;  %v13167_v5 = vld [vmem:[%s27437_s3 + $0x1398] sm:$0xf] }
 0x276   : > { %v13679_v8 = vld [vmem:[%s27437_s3 + $0x1798] sm:$0xf]  ;;  %v13168_v20 = vor.u32 %v17813_v6, %v13167_v5 }
 0x277   : > { %6998 = vmatpush.bf16.msra.mxu0 %v12712_v24  ;;  %6929 = vmatpush.bf16.msra.mxu3 %v14496_v4  ;;  %v21708_v21 = vpop.f32.mrf.mxu0  ;;  %v17947_v24 = vld [vmem:[%s27437_s3 + $0x180c] sm:$0xf]  ;;  %v17820_v4 = vld [vmem:[%s27437_s3 + $0x1414] sm:$0xf]  ;;  %v13487_v53 = vld [vmem:[%s27437_s3 + $0x1618] sm:$0xf] }
 0x278   : > { %6970 = vmatpush.bf16.msrb.mxu2 %v13860_v48  ;;  %v13732_v45 = vor.u32 %v17947_v24, %v13729_v37  ;;  %v14692_v48 = vor.u32 %v18187_v63, %v14689_v35  ;;  %v13228_v60 = vor.u32 %v17820_v4, %v13225_v34  ;;  %v13615_v24 = vld [vmem:[%s27437_s3 + $0x1718] sm:$0xf]  ;;  %v18123_v63 = vld [vmem:[%s27437_s3 + $0x1d8c] sm:$0xf] }
 0x279   : > { %7011 = vmatpush.bf16.msra.mxu1 %v13224_v25  ;;  %v18068_v25 = vld [vmem:[%s27437_s3 + $0x1bcc] sm:$0xf0]  ;;  %v17925_v37 = vld [vmem:[%s27437_s3 + $0x1754] sm:$0xf0]  ;;  %v14433_v35 = vld [vmem:[%s27437_s3 + $0x1dc8] sm:$0xf0] }
 0x27a   : > { %6999 = vmatmul.bf16.vlgmr.msra.gmra.mxu0 %v20959_v7  ;;  %6882 = vmatmul.bf16.vlgmr.msrb.gmra.mxu3 %v21607_v33  ;;  %v14184_v32 = vor.u32 %v18068_v25, %v14183_v38  ;;  %v14561_v25 = vld [vmem:[%s27437_s3 + $0x1ec8] sm:$0xf0]  ;;  %v17749_v4 = vld [vmem:[%s27437_s3 + $0x11d4] sm:$0xf0] }
 0x27b   : > { %7043 = vmatpush.bf16.msrb.mxu0 %v13164_v0  ;;  %v17724_v0 = vld [vmem:[%s27437_s3 + $0x1114] sm:$0xf]  ;;  %6930 = vmatpush.bf16.msra.mxu3 %v14432_v14  ;;  %v13991_v14 = vld [vmem:[%s27437_s3 + $0x1a10] sm:$0xf]  ;;  %v13423_v34 = vld [vmem:[%s27437_s3 + $0x1598] sm:$0xf] }
 0x27c   : > { %7012 = vmatmul.bf16.vlgmr.msra.gmra.mxu1 %v21072_v18  ;;  %6971 = vmatpush.bf16.msrb.mxu2 %v13796_v26  ;;  %v12844_v50 = vor.u32 %v17724_v0, %v12841_v40  ;;  %v13992_v38 = vor.u32 %v18020_v17, %v13991_v14  ;;  %v13927_v0 = vld [vmem:[%s27437_s3 + $0x1990] sm:$0xf]  ;;  %v17877_v5 = vld [vmem:[%s27437_s3 + $0x15d4] sm:$0xf0]  ;;  %v18060_v14 = vld [vmem:[%s27437_s3 + $0x1b94] sm:$0xf] }
 0x27d   : > { %7056 = vmatpush.bf16.msrb.mxu1 %v13676_v44  ;;  %v13353_v44 = vld [vmem:[%s27437_s3 + $0x1550] sm:$0xf0]  ;;  %v18004_v40 = vld [vmem:[%s27437_s3 + $0x19cc] sm:$0xf0] }
 0x27e   : > { %v13356_v51 = vor.u32 %v17852_v42, %v13353_v44  ;;  %v13616_v42 = vor.u32 %v17925_v37, %v13615_v24  ;;  %v13039_v44 = vld [vmem:[%s27437_s3 + $0x1298] sm:$0xf]  ;;  %v13928_v49 = vor.u32 %v18004_v40, %v13927_v0  ;;  %v14185_v17 = vld [vmem:[%s27437_s3 + $0x1bd0] sm:$0xf0]  ;;  %v18091_v37 = vld [vmem:[%s27437_s3 + $0x1c8c] sm:$0xf] }
 0x27f   : > { %7044 = vmatpush.bf16.msrb.mxu0 %v13100_v15  ;;  %v17708_v15 = vld [vmem:[%s27437_s3 + $0x1094] sm:$0xf]  ;;  %6931 = vmatpush.bf16.msra.mxu3 %v14368_v41  ;;  %v6794_v58 = vpop.f32.mrf.mxu0 }
 0x280   : > { %6972 = vmatpush.bf16.msrb.mxu2 %v13732_v45  ;;  %v12780_v62 = vor.u32 %v17708_v15, %v12777_v54  ;;  %v13863_v54 = vld [vmem:[%s27437_s3 + $0x1910] sm:$0xf]  ;;  %v12975_v58 = vld [vmem:[%s27437_s3 + $0x1218] sm:$0xf]  ;;  %v18044_v40 = vld [vmem:[%s27437_s3 + $0x1b14] sm:$0xf] }
 0x281   : > { %7057 = vmatpush.bf16.msrb.mxu1 %v13612_v57  ;;  %v17836_v57 = vld [vmem:[%s27437_s3 + $0x1494] sm:$0xf] }
 0x282   : > { %v13292_v43 = vor.u32 %v17836_v57, %v13289_v23  ;;  %v13040_v57 = vor.u32 %v17781_v46, %v13039_v44  ;;  %v13295_v46 = vld [vmem:[%s27437_s3 + $0x1498] sm:$0xf] }
 0x283   : > { %7045 = vmatpush.bf16.msrb.mxu0 %v13036_v28  ;;  %v14055_v28 = vld [vmem:[%s27437_s3 + $0x1a90] sm:$0xf]  ;;  %6932 = vmatpush.bf16.msra.mxu3 %v14304_v55 }
 0x284   : > { %7017 = vmatpush.bf16.msra.mxu2 %v14184_v32  ;;  %v14056_v10 = vor.u32 %v18036_v1, %v14055_v28  ;;  %v17909_v32 = vld [vmem:[%s27437_s3 + $0x16d4] sm:$0xf0]  ;;  %v17988_v55 = vld [vmem:[%s27437_s3 + $0x194c] sm:$0xf0] }
 0x285   : > { %7058 = vmatpush.bf16.msrb.mxu1 %v13548_v3  ;;  %v17692_v3 = vld [vmem:[%s27437_s3 + $0x1014] sm:$0xf]  ;;  %6973 = vmatmul.bf16.vlgmr.msrb.gmra.mxu2 %v21392_v22  ;;  %v13552_v23 = vor.u32 %v17909_v32, %v13551_v16  ;;  %v13799_v28 = vld [vmem:[%s27437_s3 + $0x1890] sm:$0xf]  ;;  %v17845_v16 = vld [vmem:[%s27437_s3 + $0x14d4] sm:$0xf0] }
 0x286   : > { %v12716_v12 = vor.u32 %v17692_v3, %v12713_v30  ;;  %v12911_v30 = vld [vmem:[%s27437_s3 + $0x1198] sm:$0xf] }
 0x287   : > { %7046 = vmatpush.bf16.msrb.mxu0 %v12972_v9  ;;  %v17941_v9 = vld [vmem:[%s27437_s3 + $0x17d4] sm:$0xf0]  ;;  %6933 = vmatpush.bf16.msra.mxu3 %v14240_v31  ;;  %v14436_v31 = vor.u32 %v18123_v63, %v14433_v35 }
 0x288   : > { %7018 = vmatpush.bf16.msra.mxu2 %v14120_v61  ;;  %v13680_v26 = vor.u32 %v17941_v9, %v13679_v8  ;;  %v17893_v61 = vld [vmem:[%s27437_s3 + $0x1654] sm:$0xf0]  ;;  %v18107_v9 = vld [vmem:[%s27437_s3 + $0x1d0c] sm:$0xf] }
 0x289   : > { %7059 = vmatpush.bf16.msrb.mxu1 %v13484_v13  ;;  %v18171_v13 = vld [vmem:[%s27437_s3 + $0x1f0c] sm:$0xf]  ;;  %v13488_v3 = vor.u32 %v17893_v61, %v13487_v53  ;;  %v12719_v53 = vld [vmem:[%s27437_s3 + $0x1018] sm:$0xf] }
 0x28a   : > { %v14628_v29 = vor.u32 %v18171_v13, %v14625_v47  ;;  %6934 = vmatmul.bf16.vlgmr.msra.gmra.mxu3 %v21607_v33  ;;  %v17956_v13 = vld [vmem:[%s27437_s3 + $0x184c] sm:$0xf0]  ;;  %v12912_v47 = vor.u32 %v17749_v4, %v12911_v30  ;;  %v13231_v63 = vld [vmem:[%s27437_s3 + $0x1418] sm:$0xf] }
 0x28b   : > { %7047 = vmatpush.bf16.msrb.mxu0 %v12908_v36  ;;  %6978 = vmatpush.bf16.msrb.mxu3 %v14692_v48  ;;  %v17797_v36 = vld [vmem:[%s27437_s3 + $0x1354] sm:$0xf0]  ;;  %v14631_v4 = vld [vmem:[%s27437_s3 + $0x1f10] sm:$0xf] }
 0x28c   : > { %7019 = vmatpush.bf16.msra.mxu2 %v14056_v10  ;;  %v13104_v41 = vor.u32 %v17797_v36, %v13103_v27  ;;  %v14369_v10 = vld [vmem:[%s27437_s3 + $0x1d48] sm:$0xf0]  ;;  %v17733_v27 = vld [vmem:[%s27437_s3 + $0x1154] sm:$0xf0] }
 0x28d   : > { %7060 = vmatpush.bf16.msrb.mxu1 %v13420_v39  ;;  %v18155_v39 = vld [vmem:[%s27437_s3 + $0x1e8c] sm:$0xf]  ;;  %v17861_v36 = vld [vmem:[%s27437_s3 + $0x1554] sm:$0xf0] }
 0x28e   : > { %v14564_v45 = vor.u32 %v18155_v39, %v14561_v25  ;;  %v14188_v39 = vor.u32 %v18060_v14, %v14185_v17  ;;  %v17829_v35 = vld [vmem:[%s27437_s3 + $0x1454] sm:$0xf0]  ;;  %v17917_v14 = vld [vmem:[%s27437_s3 + $0x171c] sm:$0xf] }
 0x28f   : > { %7048 = vmatpush.bf16.msrb.mxu0 %v12844_v50  ;;  %6979 = vmatpush.bf16.msrb.mxu3 %v14628_v29  ;;  %v6805_v50 = vpop.f32.mrf.mxu1  ;;  %v13359_v29 = vld [vmem:[%s27437_s3 + $0x1518] sm:$0xf] }
 0x290   : > { %7020 = vmatpush.bf16.msra.mxu2 %v13992_v38  ;;  %v21866_v15 = vadd.f32 %v6805_v50, %v21708_v21  ;;  %v17765_v21 = vld [vmem:[%s27437_s3 + $0x1254] sm:$0xf0]  ;;  %v14305_v38 = vld [vmem:[%s27437_s3 + $0x1cc8] sm:$0xf0]  ;;  %v13360_v0 = vor.u32 %v17861_v36, %v13359_v29  ;;  %v17996_v29 = vld [vmem:[%s27437_s3 + $0x1994] sm:$0xf] }
 0x291   : > { %7061 = vmatpush.bf16.msrb.mxu1 %v13356_v51  ;;  %v18139_v51 = vld [vmem:[%s27437_s3 + $0x1e0c] sm:$0xf]  ;;  %v12976_v1 = vor.u32 %v17765_v21, %v12975_v58  ;;  %v14308_v44 = vor.u32 %v18091_v37, %v14305_v38  ;;  %v13296_v58 = vor.u32 %v17845_v16, %v13295_v46  ;;  %v14057_v21 = vld [vmem:[%s27437_s3 + $0x1ad0] sm:$0xf0] }
 0x292   : > { %v14500_v59 = vor.u32 %v18139_v51, %v14497_v52  ;;  %v14241_v51 = vld [vmem:[%s27437_s3 + $0x1c48] sm:$0xf0]  ;;  %v13929_v36 = vld [vmem:[%s27437_s3 + $0x19d0] sm:$0xf0] }
 0x293   : > { %7049 = vmatpush.bf16.msrb.mxu0 %v12780_v62  ;;  %6980 = vmatpush.bf16.msrb.mxu3 %v14564_v45  ;;  %v13864_v62 = vor.u32 %v17988_v55, %v13863_v54  ;;  %v17717_v45 = vld [vmem:[%s27437_s3 + $0x10d4] sm:$0xf0]  ;;  %v14695_v55 = vld [vmem:[%s27437_s3 + $0x1f90] sm:$0xf]  ;;  %v13865_v46 = vld [vmem:[%s27437_s3 + $0x1950] sm:$0xf0] }
 0x294   : > { %7021 = vmatpush.bf16.msra.mxu2 %v13928_v49  ;;  %v18075_v49 = vld [vmem:[%s27437_s3 + $0x1c0c] sm:$0xf] }
 0x295   : > { %7062 = vmatpush.bf16.msrb.mxu1 %v13292_v43  ;;  %v17972_v43 = vld [vmem:[%s27437_s3 + $0x18cc] sm:$0xf0]  ;;  %v14244_v61 = vor.u32 %v18075_v49, %v14241_v51  ;;  %v17757_v49 = vld [vmem:[%s27437_s3 + $0x121c] sm:$0xf] }
 0x296   : > { %v13800_v8 = vor.u32 %v17972_v43, %v13799_v28  ;;  %v17805_v43 = vld [vmem:[%s27437_s3 + $0x139c] sm:$0xf] }
 0x297   : > { %7050 = vmatpush.bf16.msrb.mxu0 %v12716_v12  ;;  %6981 = vmatpush.bf16.msrb.mxu3 %v14500_v59  ;;  %v6844_v48 = vpop.f32.mrf.mxu0  ;;  %v6807_v6 = vpop.f32.mrf.mxu1  ;;  %v13735_v12 = vld [vmem:[%s27437_s3 + $0x1810] sm:$0xf]  ;;  %v18028_v59 = vld [vmem:[%s27437_s3 + $0x1a94] sm:$0xf]  ;;  %v12977_v51 = vld [vmem:[%s27437_s3 + $0x1258] sm:$0xf0] }
 0x298   : > { %7022 = vmatpush.bf16.msra.mxu2 %v13864_v62  ;;  %v13736_v24 = vor.u32 %v17956_v13, %v13735_v12  ;;  %v17701_v62 = vld [vmem:[%s27437_s3 + $0x1054] sm:$0xf0]  ;;  %v14060_v30 = vor.u32 %v18028_v59, %v14057_v21  ;;  %v13993_v6 = vld [vmem:[%s27437_s3 + $0x1a50] sm:$0xf0] }
 0x299   : > { %7063 = vmatpush.bf16.msrb.mxu1 %v13228_v60  ;;  %v13424_v60 = vor.u32 %v17877_v5, %v13423_v34  ;;  %v18180_v34 = vld [vmem:[%s27437_s3 + $0x1f4c] sm:$0xf0]  ;;  %v12720_v5 = vor.u32 %v17701_v62, %v12719_v53  ;;  %v17964_v59 = vld [vmem:[%s27437_s3 + $0x1894] sm:$0xf]  ;;  %v12980_v53 = vor.u32 %v17757_v49, %v12977_v51  ;;  %v14063_v49 = vld [vmem:[%s27437_s3 + $0x1a98] sm:$0xf] }
 0x29a   : > { %7051 = vmatmul.bf16.vlgmr.msrb.gmra.mxu0 %v20959_v7  ;;  %v14632_v13 = vor.u32 %v18180_v34, %v14631_v4  ;;  %v13801_v21 = vld [vmem:[%s27437_s3 + $0x18d0] sm:$0xf0]  ;;  %v18037_v51 = vld [vmem:[%s27437_s3 + $0x1ad4] sm:$0xf0] }
 0x29b   : > { %7095 = vmatpush.bf16.msra.mxu0 %v13168_v20  ;;  %v12847_v20 = vld [vmem:[%s27437_s3 + $0x1118] sm:$0xf]  ;;  %6982 = vmatpush.bf16.msrb.mxu3 %v14436_v31  ;;  %v13681_v31 = vld [vmem:[%s27437_s3 + $0x17d8] sm:$0xf0]  ;;  %v17948_v34 = vld [vmem:[%s27437_s3 + $0x1814] sm:$0xf] }
 0x29c   : > { %7064 = vmatmul.bf16.vlgmr.msrb.gmra.mxu1 %v21072_v18  ;;  %7023 = vmatpush.bf16.msra.mxu2 %v13800_v8  ;;  %v12848_v25 = vor.u32 %v17733_v27, %v12847_v20  ;;  %v13232_v8 = vor.u32 %v17829_v35, %v13231_v63  ;;  %v13617_v20 = vld [vmem:[%s27437_s3 + $0x1758] sm:$0xf0]  ;;  %v18164_v27 = vld [vmem:[%s27437_s3 + $0x1ecc] sm:$0xf0] }
 0x29d   : > { %7108 = vmatpush.bf16.msra.mxu1 %v13680_v26  ;;  %v14372_v26 = vor.u32 %v18107_v9, %v14369_v10  ;;  %v13620_v37 = vor.u32 %v17917_v14, %v13617_v20  ;;  %v17741_v63 = vld [vmem:[%s27437_s3 + $0x119c] sm:$0xf]  ;;  %v14311_v20 = vld [vmem:[%s27437_s3 + $0x1c90] sm:$0xf] }
 0x29e   : > { %v12913_v35 = vld [vmem:[%s27437_s3 + $0x11d8] sm:$0xf0] }
 0x29f   : > { %7096 = vmatpush.bf16.msra.mxu0 %v13104_v41  ;;  %v14121_v41 = vld [vmem:[%s27437_s3 + $0x1b50] sm:$0xf0]  ;;  %6983 = vmatpush.bf16.msrb.mxu3 %v14372_v26  ;;  %v6846_v32 = vpop.f32.mrf.mxu0  ;;  %v6857_v50 = vpop.f32.mrf.mxu1  ;;  %v14567_v26 = vld [vmem:[%s27437_s3 + $0x1e90] sm:$0xf] }
 0x2a0   : > { %7024 = vmatpush.bf16.msra.mxu2 %v13736_v24  ;;  %v21970_v52 = vadd.f32 %v6857_v50, %v6844_v48  ;;  %v14124_v54 = vor.u32 %v18044_v40, %v14121_v41  ;;  %v18012_v48 = vld [vmem:[%s27437_s3 + $0x1a14] sm:$0xf]  ;;  %v14568_v38 = vor.u32 %v18164_v27, %v14567_v26  ;;  %v13932_v40 = vor.u32 %v17996_v29, %v13929_v36  ;;  %v13553_v41 = vld [vmem:[%s27437_s3 + $0x16d8] sm:$0xf0]  ;;  %v18100_v26 = vld [vmem:[%s27437_s3 + $0x1ccc] sm:$0xf0] }
 0x2a1   : > { %7109 = vmatpush.bf16.msra.mxu1 %v13616_v42  ;;  %v12783_v42 = vld [vmem:[%s27437_s3 + $0x1098] sm:$0xf]  ;;  %v13996_v17 = vor.u32 %v18012_v48, %v13993_v6  ;;  %v12916_v6 = vor.u32 %v17741_v63, %v12913_v35  ;;  %v14064_v63 = vor.u32 %v18037_v51, %v14063_v49  ;;  %v17942_v35 = vld [vmem:[%s27437_s3 + $0x17dc] sm:$0xf0]  ;;  %v18124_v49 = vld [vmem:[%s27437_s3 + $0x1d94] sm:$0xf] }
 0x2a2   : > { %v14127_v36 = vld [vmem:[%s27437_s3 + $0x1b18] sm:$0xf]  ;;  %v14441_v51 = vld [vmem:[%s27437_s3 + $0x1dd0] sm:$0xf0] }
 0x2a3   : > { %7097 = vmatpush.bf16.msra.mxu0 %v13040_v57  ;;  %v18196_v57 = vld [vmem:[%s27437_s3 + $0x1fcc] sm:$0xf0]  ;;  %6984 = vmatpush.bf16.msrb.mxu3 %v14308_v44 }
 0x2a4   : > { %7069 = vmatpush.bf16.msrb.mxu2 %v14188_v39  ;;  %v14696_v28 = vor.u32 %v18196_v57, %v14695_v55  ;;  %v17773_v39 = vld [vmem:[%s27437_s3 + $0x129c] sm:$0xf]  ;;  %v18148_v44 = vld [vmem:[%s27437_s3 + $0x1e4c] sm:$0xf0] }
 0x2a5   : > { %7110 = vmatpush.bf16.msra.mxu1 %v13552_v23  ;;  %v12784_v23 = vor.u32 %v17717_v45, %v12783_v42  ;;  %7025 = vmatmul.bf16.vlgmr.msra.gmra.mxu2 %v21392_v22  ;;  %v14503_v42 = vld [vmem:[%s27437_s3 + $0x1e10] sm:$0xf]  ;;  %v17980_v45 = vld [vmem:[%s27437_s3 + $0x1914] sm:$0xf]  ;;  %v13489_v57 = vld [vmem:[%s27437_s3 + $0x1658] sm:$0xf0] }
 0x2a6   : > { %v14504_v50 = vor.u32 %v18148_v44, %v14503_v42  ;;  %v13868_v55 = vor.u32 %v17980_v45, %v13865_v46  ;;  %v14247_v42 = vld [vmem:[%s27437_s3 + $0x1c10] sm:$0xf] }
 0x2a7   : > { %7098 = vmatpush.bf16.msra.mxu0 %v12976_v1  ;;  %v13169_v1 = vld [vmem:[%s27437_s3 + $0x13d8] sm:$0xf0]  ;;  %6985 = vmatpush.bf16.msrb.mxu3 %v14244_v61  ;;  %v6859_v12 = vpop.f32.mrf.mxu1  ;;  %v18084_v44 = vld [vmem:[%s27437_s3 + $0x1c4c] sm:$0xf0] }
 0x2a8   : > { %7070 = vmatpush.bf16.msrb.mxu2 %v14124_v54  ;;  %v13172_v9 = vor.u32 %v17805_v43, %v13169_v1  ;;  %v17885_v54 = vld [vmem:[%s27437_s3 + $0x161c] sm:$0xf]  ;;  %v13804_v1 = vor.u32 %v17964_v59, %v13801_v21 }
 0x2a9   : > { %7111 = vmatpush.bf16.msra.mxu1 %v13488_v3  ;;  %v17933_v3 = vld [vmem:[%s27437_s3 + $0x179c] sm:$0xf]  ;;  %v13492_v61 = vor.u32 %v17885_v54, %v13489_v57  ;;  %v14248_v57 = vor.u32 %v18084_v44, %v14247_v42 }
 0x2aa   : > { %v13684_v10 = vor.u32 %v17933_v3, %v13681_v31  ;;  %6986 = vmatmul.bf16.vlgmr.msrb.gmra.mxu3 %v21607_v33  ;;  %v13425_v3 = vld [vmem:[%s27437_s3 + $0x15d8] sm:$0xf0]  ;;  %v18116_v31 = vld [vmem:[%s27437_s3 + $0x1d4c] sm:$0xf0] }
 0x2ab   : > { %7099 = vmatpush.bf16.msra.mxu0 %v12912_v47  ;;  %7030 = vmatpush.bf16.msra.mxu3 %v14696_v28  ;;  %v17789_v47 = vld [vmem:[%s27437_s3 + $0x131c] sm:$0xf] }
 0x2ac   : > { %7071 = vmatpush.bf16.msrb.mxu2 %v14060_v30  ;;  %v17869_v28 = vld [vmem:[%s27437_s3 + $0x159c] sm:$0xf]  ;;  %v14375_v30 = vld [vmem:[%s27437_s3 + $0x1d10] sm:$0xf] }
 0x2ad   : > { %7112 = vmatpush.bf16.msra.mxu1 %v13424_v60  ;;  %v13105_v60 = vld [vmem:[%s27437_s3 + $0x1358] sm:$0xf0]  ;;  %v14376_v12 = vor.u32 %v18116_v31, %v14375_v30  ;;  %v18021_v30 = vld [vmem:[%s27437_s3 + $0x1a54] sm:$0xf0] }
 0x2ae   : > { %v13108_v24 = vor.u32 %v17789_v47, %v13105_v60  ;;  %v12849_v47 = vld [vmem:[%s27437_s3 + $0x1158] sm:$0xf0] }
 0x2af   : > { %7100 = vmatpush.bf16.msra.mxu0 %v12848_v25  ;;  %7031 = vmatpush.bf16.msra.mxu3 %v14632_v13  ;;  %v13041_v25 = vld [vmem:[%s27437_s3 + $0x12d8] sm:$0xf0] }
 0x2b0   : > { %7072 = vmatpush.bf16.msrb.mxu2 %v13996_v17  ;;  %v13044_v16 = vor.u32 %v17773_v39, %v13041_v25  ;;  %v17725_v13 = vld [vmem:[%s27437_s3 + $0x111c] sm:$0xf] }
 0x2b1   : > { %7113 = vmatpush.bf16.msra.mxu1 %v13360_v0  ;;  %v17901_v0 = vld [vmem:[%s27437_s3 + $0x169c] sm:$0xf]  ;;  %v12852_v29 = vor.u32 %v17725_v13, %v12849_v47  ;;  %v18156_v13 = vld [vmem:[%s27437_s3 + $0x1e94] sm:$0xf] }
 0x2b2   : > { %v13556_v32 = vor.u32 %v17901_v0, %v13553_v41  ;;  %v17853_v60 = vld [vmem:[%s27437_s3 + $0x151c] sm:$0xf]  ;;  %v14569_v47 = vld [vmem:[%s27437_s3 + $0x1ed0] sm:$0xf0] }
 0x2b3   : > { %7101 = vmatpush.bf16.msra.mxu0 %v12784_v23  ;;  %7032 = vmatpush.bf16.msra.mxu3 %v14568_v38  ;;  %v14439_v23 = vld [vmem:[%s27437_s3 + $0x1d90] sm:$0xf]  ;;  %v13361_v17 = vld [vmem:[%s27437_s3 + $0x1558] sm:$0xf0]  ;;  %v14312_v38 = vor.u32 %v18100_v26, %v14311_v20  ;;  %v14572_v26 = vor.u32 %v18156_v13, %v14569_v47  ;;  %v17862_v47 = vld [vmem:[%s27437_s3 + $0x155c] sm:$0xf0] }
 0x2b4   : > { %7073 = vmatpush.bf16.msrb.mxu2 %v13932_v40  ;;  %v17709_v39 = vld [vmem:[%s27437_s3 + $0x109c] sm:$0xf] }
 0x2b5   : > { %7114 = vmatpush.bf16.msra.mxu1 %v13296_v58  ;;  %v18132_v58 = vld [vmem:[%s27437_s3 + $0x1dcc] sm:$0xf0]  ;;  %v12785_v25 = vld [vmem:[%s27437_s3 + $0x10d8] sm:$0xf0] }
 0x2b6   : > { %v14440_v62 = vor.u32 %v18132_v58, %v14439_v23  ;;  %v17837_v0 = vld [vmem:[%s27437_s3 + $0x149c] sm:$0xf] }
 0x2b7   : > { %7102 = vmatpush.bf16.msra.mxu0 %v12720_v5  ;;  %7033 = vmatpush.bf16.msra.mxu3 %v14504_v50  ;;  %v6896_v43 = vpop.f32.mrf.mxu0  ;;  %v13737_v5 = vld [vmem:[%s27437_s3 + $0x1850] sm:$0xf0]  ;;  %v13297_v41 = vld [vmem:[%s27437_s3 + $0x14d8] sm:$0xf0]  ;;  %v12788_v50 = vor.u32 %v17709_v39, %v12785_v25  ;;  %v13871_v25 = vld [vmem:[%s27437_s3 + $0x1918] sm:$0xf] }
 0x2b8   : > { %7074 = vmatpush.bf16.msrb.mxu2 %v13868_v55  ;;  %v13740_v14 = vor.u32 %v17948_v34, %v13737_v5  ;;  %v17693_v54 = vld [vmem:[%s27437_s3 + $0x101c] sm:$0xf]  ;;  %v13300_v55 = vor.u32 %v17837_v0, %v13297_v41  ;;  %v14505_v39 = vld [vmem:[%s27437_s3 + $0x1e50] sm:$0xf0]  ;;  %v17989_v0 = vld [vmem:[%s27437_s3 + $0x1954] sm:$0xf0] }
 0x2b9   : > { %7115 = vmatpush.bf16.msra.mxu1 %v13232_v8  ;;  %v6909_v4 = vpop.f32.mrf.mxu1  ;;  %v14191_v8 = vld [vmem:[%s27437_s3 + $0x1b98] sm:$0xf]  ;;  %v12721_v23 = vld [vmem:[%s27437_s3 + $0x1058] sm:$0xf0] }
 0x2ba   : > { %7103 = vmatmul.bf16.vlgmr.msra.gmra.mxu0 %v20959_v7  ;;  %v22120_v48 = vadd.f32 %v6909_v4, %v6896_v43  ;;  %v17821_v58 = vld [vmem:[%s27437_s3 + $0x141c] sm:$0xf]  ;;  %v14633_v43 = vld [vmem:[%s27437_s3 + $0x1f50] sm:$0xf0] }
 0x2bb   : > { %7147 = vmatpush.bf16.msrb.mxu0 %v13172_v9  ;;  %v18069_v9 = vld [vmem:[%s27437_s3 + $0x1bd4] sm:$0xf0]  ;;  %7034 = vmatpush.bf16.msra.mxu3 %v14440_v62  ;;  %v13233_v59 = vld [vmem:[%s27437_s3 + $0x1458] sm:$0xf0]  ;;  %v13687_v62 = vld [vmem:[%s27437_s3 + $0x17a0] sm:$0xf] }
 0x2bc   : > { %7116 = vmatmul.bf16.vlgmr.msra.gmra.mxu1 %v21072_v18  ;;  %7075 = vmatpush.bf16.msrb.mxu2 %v13804_v1  ;;  %v14192_v27 = vor.u32 %v18069_v9, %v14191_v8  ;;  %v12724_v1 = vor.u32 %v17693_v54, %v12721_v23  ;;  %v13236_v31 = vor.u32 %v17821_v58, %v13233_v59  ;;  %v17798_v8 = vld [vmem:[%s27437_s3 + $0x135c] sm:$0xf0]  ;;  %v13807_v54 = vld [vmem:[%s27437_s3 + $0x1898] sm:$0xf] }
 0x2bd   : > { %7160 = vmatpush.bf16.msrb.mxu1 %v13684_v10  ;;  %v13428_v10 = vor.u32 %v17869_v28, %v13425_v3  ;;  %v18172_v28 = vld [vmem:[%s27437_s3 + $0x1f14] sm:$0xf]  ;;  %v13999_v3 = vld [vmem:[%s27437_s3 + $0x1a18] sm:$0xf]  ;;  %v13688_v34 = vor.u32 %v17942_v35, %v13687_v62  ;;  %v13623_v9 = vld [vmem:[%s27437_s3 + $0x1720] sm:$0xf]  ;;  %v14444_v58 = vor.u32 %v18124_v49, %v14441_v51 }
 0x2be   : > { %v14636_v5 = vor.u32 %v18172_v28, %v14633_v43  ;;  %v12919_v59 = vld [vmem:[%s27437_s3 + $0x11a0] sm:$0xf]  ;;  %v18108_v35 = vld [vmem:[%s27437_s3 + $0x1d14] sm:$0xf] }
 0x2bf   : > { %7148 = vmatpush.bf16.msrb.mxu0 %v13108_v24  ;;  %v18053_v24 = vld [vmem:[%s27437_s3 + $0x1b54] sm:$0xf0]  ;;  %7035 = vmatpush.bf16.msra.mxu3 %v14376_v12  ;;  %v6898_v40 = vpop.f32.mrf.mxu0  ;;  %v17926_v12 = vld [vmem:[%s27437_s3 + $0x175c] sm:$0xf0]  ;;  %v14377_v28 = vld [vmem:[%s27437_s3 + $0x1d50] sm:$0xf0] }
 0x2c0   : > { %7076 = vmatpush.bf16.msrb.mxu2 %v13740_v14  ;;  %v14128_v46 = vor.u32 %v18053_v24, %v14127_v36  ;;  %v18005_v14 = vld [vmem:[%s27437_s3 + $0x19d4] sm:$0xf0]  ;;  %v13624_v20 = vor.u32 %v17926_v12, %v13623_v9  ;;  %v13559_v36 = vld [vmem:[%s27437_s3 + $0x16a0] sm:$0xf]  ;;  %v6818_v40 = vpop.f32.mrf.mxu2 }
 0x2c1   : > { %7161 = vmatpush.bf16.msrb.mxu1 %v13620_v37  ;;  %v13364_v37 = vor.u32 %v17853_v60, %v13361_v17  ;;  %v6911_v45 = vpop.f32.mrf.mxu1  ;;  %v13935_v60 = vld [vmem:[%s27437_s3 + $0x1998] sm:$0xf]  ;;  %v22271_v42 = vadd.f32 %v6818_v40, %v21866_v15  ;;  %v17894_v15 = vld [vmem:[%s27437_s3 + $0x165c] sm:$0xf0]  ;;  %v14249_v40 = vld [vmem:[%s27437_s3 + $0x1c50] sm:$0xf0] }
 0x2c2   : > { %v13936_v24 = vor.u32 %v18005_v14, %v13935_v60  ;;  %v12855_v9 = vld [vmem:[%s27437_s3 + $0x1120] sm:$0xf]  ;;  %v18092_v60 = vld [vmem:[%s27437_s3 + $0x1c94] sm:$0xf] }
 0x2c3   : > { %7149 = vmatpush.bf16.msrb.mxu0 %v13044_v16  ;;  %v18188_v16 = vld [vmem:[%s27437_s3 + $0x1f94] sm:$0xf]  ;;  %7036 = vmatpush.bf16.msra.mxu3 %v14312_v38  ;;  %v13367_v12 = vld [vmem:[%s27437_s3 + $0x1520] sm:$0xf] }
 0x2c4   : > { %7121 = vmatpush.bf16.msra.mxu2 %v14192_v27  ;;  %v13047_v27 = vld [vmem:[%s27437_s3 + $0x12a0] sm:$0xf]  ;;  %v18140_v38 = vld [vmem:[%s27437_s3 + $0x1e14] sm:$0xf] }
 0x2c5   : > { %7162 = vmatpush.bf16.msrb.mxu1 %v13556_v32  ;;  %v14697_v32 = vld [vmem:[%s27437_s3 + $0x1fd0] sm:$0xf0]  ;;  %7077 = vmatmul.bf16.vlgmr.msrb.gmra.mxu2 %v21392_v22  ;;  %v14508_v45 = vor.u32 %v18140_v38, %v14505_v39  ;;  %v13303_v38 = vld [vmem:[%s27437_s3 + $0x14a0] sm:$0xf] }
 0x2c6   : > { %v14700_v21 = vor.u32 %v18188_v16, %v14697_v32  ;;  %v17766_v16 = vld [vmem:[%s27437_s3 + $0x125c] sm:$0xf0]  ;;  %v14313_v14 = vld [vmem:[%s27437_s3 + $0x1cd0] sm:$0xf0] }
 0x2c7   : > { %7150 = vmatpush.bf16.msrb.mxu0 %v12980_v53  ;;  %v13175_v53 = vld [vmem:[%s27437_s3 + $0x13a0] sm:$0xf]  ;;  %7037 = vmatpush.bf16.msra.mxu3 %v14248_v57 }
 0x2c8   : > { %7122 = vmatpush.bf16.msra.mxu2 %v14128_v46  ;;  %v12983_v46 = vld [vmem:[%s27437_s3 + $0x1220] sm:$0xf] }
 0x2c9   : > { %7163 = vmatpush.bf16.msrb.mxu1 %v13492_v61  ;;  %v17814_v61 = vld [vmem:[%s27437_s3 + $0x13dc] sm:$0xf0]  ;;  %v12984_v57 = vor.u32 %v17766_v16, %v12983_v46  ;;  %v18197_v46 = vld [vmem:[%s27437_s3 + $0x1fd4] sm:$0xf0] }
 0x2ca   : > { %v13176_v4 = vor.u32 %v17814_v61, %v13175_v53  ;;  %7038 = vmatmul.bf16.vlgmr.msra.gmra.mxu3 %v21607_v33  ;;  %v13495_v32 = vld [vmem:[%s27437_s3 + $0x1620] sm:$0xf] }
 0x2cb   : > { %7151 = vmatpush.bf16.msrb.mxu0 %v12916_v6  ;;  %7082 = vmatpush.bf16.msrb.mxu3 %v14700_v21  ;;  %v13111_v6 = vld [vmem:[%s27437_s3 + $0x1320] sm:$0xf]  ;;  %v13496_v23 = vor.u32 %v17894_v15, %v13495_v32  ;;  %v14065_v15 = vld [vmem:[%s27437_s3 + $0x1ad8] sm:$0xf0] }
 0x2cc   : > { %7123 = vmatpush.bf16.msra.mxu2 %v14064_v63  ;;  %v13112_v17 = vor.u32 %v17798_v8, %v13111_v6  ;;  %v17750_v21 = vld [vmem:[%s27437_s3 + $0x11dc] sm:$0xf0]  ;;  %v14380_v8 = vor.u32 %v18108_v35, %v14377_v28  ;;  %v18181_v35 = vld [vmem:[%s27437_s3 + $0x1f54] sm:$0xf0] }
 0x2cd   : > { %7164 = vmatpush.bf16.msrb.mxu1 %v13428_v10  ;;  %v14000_v10 = vor.u32 %v18021_v30, %v13999_v3  ;;  %v13431_v53 = vld [vmem:[%s27437_s3 + $0x15a0] sm:$0xf]  ;;  %v17957_v3 = vld [vmem:[%s27437_s3 + $0x1854] sm:$0xf0] }
 0x2ce   : > { %v17878_v63 = vld [vmem:[%s27437_s3 + $0x15dc] sm:$0xf0] }
 0x2cf   : > { %7152 = vmatpush.bf16.msrb.mxu0 %v12852_v29  ;;  %7083 = vmatpush.bf16.msrb.mxu3 %v14636_v5  ;;  %v17782_v29 = vld [vmem:[%s27437_s3 + $0x12dc] sm:$0xf0]  ;;  %v14193_v5 = vld [vmem:[%s27437_s3 + $0x1bd8] sm:$0xf0]  ;;  %v13432_v6 = vor.u32 %v17878_v63, %v13431_v53  ;;  %v17934_v53 = vld [vmem:[%s27437_s3 + $0x17a4] sm:$0xf] }
 0x2d0   : > { %7124 = vmatpush.bf16.msra.mxu2 %v14000_v10  ;;  %v13048_v41 = vor.u32 %v17782_v29, %v13047_v27  ;;  %v17734_v10 = vld [vmem:[%s27437_s3 + $0x115c] sm:$0xf0]  ;;  %v14129_v27 = vld [vmem:[%s27437_s3 + $0x1b58] sm:$0xf0]  ;;  %v13368_v29 = vor.u32 %v17862_v47, %v13367_v12  ;;  %v14639_v63 = vld [vmem:[%s27437_s3 + $0x1f18] sm:$0xf] }
 0x2d1   : > { %7165 = vmatpush.bf16.msrb.mxu1 %v13364_v37  ;;  %v17910_v37 = vld [vmem:[%s27437_s3 + $0x16dc] sm:$0xf0]  ;;  %v14575_v12 = vld [vmem:[%s27437_s3 + $0x1e98] sm:$0xf] }
 0x2d2   : > { %v13560_v44 = vor.u32 %v17910_v37, %v13559_v36  ;;  %v14316_v36 = vor.u32 %v18092_v60, %v14313_v14  ;;  %v17718_v37 = vld [vmem:[%s27437_s3 + $0x10dc] sm:$0xf0]  ;;  %v17997_v60 = vld [vmem:[%s27437_s3 + $0x199c] sm:$0xf] }
 0x2d3   : > { %7153 = vmatpush.bf16.msrb.mxu0 %v12788_v50  ;;  %7084 = vmatpush.bf16.msrb.mxu3 %v14572_v26  ;;  %v13872_v50 = vor.u32 %v17989_v0, %v13871_v25  ;;  %v18045_v26 = vld [vmem:[%s27437_s3 + $0x1b1c] sm:$0xf]  ;;  %v17846_v25 = vld [vmem:[%s27437_s3 + $0x14dc] sm:$0xf0]  ;;  %v18076_v0 = vld [vmem:[%s27437_s3 + $0x1c14] sm:$0xf] }
 0x2d4   : > { %7125 = vmatpush.bf16.msra.mxu2 %v13936_v24  ;;  %v12791_v24 = vld [vmem:[%s27437_s3 + $0x10a0] sm:$0xf]  ;;  %v13937_v14 = vld [vmem:[%s27437_s3 + $0x19d8] sm:$0xf0] }
 0x2d5   : > { %7166 = vmatpush.bf16.msrb.mxu1 %v13300_v55  ;;  %v17973_v55 = vld [vmem:[%s27437_s3 + $0x18d4] sm:$0xf0]  ;;  %v12792_v32 = vor.u32 %v17718_v37, %v12791_v24  ;;  %v12727_v49 = vld [vmem:[%s27437_s3 + $0x1020] sm:$0xf]  ;;  %v13940_v24 = vor.u32 %v17997_v60, %v13937_v14  ;;  %v13561_v37 = vld [vmem:[%s27437_s3 + $0x16e0] sm:$0xf0] }
 0x2d6   : > { %v13808_v62 = vor.u32 %v17973_v55, %v13807_v54  ;;  %v13304_v54 = vor.u32 %v17846_v25, %v13303_v38  ;;  %v14252_v55 = vor.u32 %v18076_v0, %v14249_v40  ;;  %v14511_v38 = vld [vmem:[%s27437_s3 + $0x1e18] sm:$0xf]  ;;  %v17981_v25 = vld [vmem:[%s27437_s3 + $0x191c] sm:$0xf]  ;;  %v13369_v60 = vld [vmem:[%s27437_s3 + $0x1560] sm:$0xf0] }
 0x2d7   : > { %7154 = vmatpush.bf16.msrb.mxu0 %v12724_v1  ;;  %7085 = vmatpush.bf16.msrb.mxu3 %v14508_v45  ;;  %v6948_v61 = vpop.f32.mrf.mxu0  ;;  %v13743_v1 = vld [vmem:[%s27437_s3 + $0x1818] sm:$0xf]  ;;  %v13873_v0 = vld [vmem:[%s27437_s3 + $0x1958] sm:$0xf0] }
 0x2d8   : > { %7126 = vmatpush.bf16.msra.mxu2 %v13872_v50  ;;  %v13744_v13 = vor.u32 %v17957_v3, %v13743_v1  ;;  %v14703_v45 = vld [vmem:[%s27437_s3 + $0x1f98] sm:$0xf]  ;;  %v18029_v50 = vld [vmem:[%s27437_s3 + $0x1a9c] sm:$0xf] }
 0x2d9   : > { %7167 = vmatpush.bf16.msrb.mxu1 %v13236_v31  ;;  %v6961_v43 = vpop.f32.mrf.mxu1  ;;  %v6820_v31 = vpop.f32.mrf.mxu2  ;;  %v14001_v1 = vld [vmem:[%s27437_s3 + $0x1a58] sm:$0xf0]  ;;  %v14319_v14 = vld [vmem:[%s27437_s3 + $0x1c98] sm:$0xf] }
 0x2da   : > { %7155 = vmatmul.bf16.vlgmr.msrb.gmra.mxu0 %v20959_v7  ;;  %v22321_v30 = vadd.f32 %v6961_v43, %v6948_v61  ;;  %v14068_v61 = vor.u32 %v18029_v50, %v14065_v15  ;;  %v18013_v43 = vld [vmem:[%s27437_s3 + $0x1a1c] sm:$0xf]  ;;  %v13497_v50 = vld [vmem:[%s27437_s3 + $0x1660] sm:$0xf0]  ;;  %v14447_v15 = vld [vmem:[%s27437_s3 + $0x1d98] sm:$0xf] }
 0x2db   : > { %7199 = vmatpush.bf16.msra.mxu0 %v13176_v4  ;;  %v12920_v4 = vor.u32 %v17750_v21, %v12919_v59  ;;  %7086 = vmatpush.bf16.msrb.mxu3 %v14444_v58  ;;  %v17830_v58 = vld [vmem:[%s27437_s3 + $0x145c] sm:$0xf0]  ;;  %v14704_v59 = vor.u32 %v18197_v46, %v14703_v45  ;;  %v13177_v21 = vld [vmem:[%s27437_s3 + $0x13e0] sm:$0xf0] }
 0x2dc   : > { %7168 = vmatmul.bf16.vlgmr.msrb.gmra.mxu1 %v21072_v18  ;;  %7127 = vmatpush.bf16.msra.mxu2 %v13808_v62  ;;  %v13689_v62 = vld [vmem:[%s27437_s3 + $0x17e0] sm:$0xf0] }
 0x2dd   : > { %7212 = vmatpush.bf16.msra.mxu1 %v13688_v34  ;;  %v18061_v34 = vld [vmem:[%s27437_s3 + $0x1b9c] sm:$0xf]  ;;  %v17758_v45 = vld [vmem:[%s27437_s3 + $0x1224] sm:$0xf] }
 0x2de   : > { %v12985_v46 = vld [vmem:[%s27437_s3 + $0x1260] sm:$0xf0] }
 0x2df   : > { %7200 = vmatpush.bf16.msra.mxu0 %v13112_v17  ;;  %v14196_v17 = vor.u32 %v18061_v34, %v14193_v5  ;;  %7087 = vmatpush.bf16.msrb.mxu3 %v14380_v8  ;;  %v6950_v39 = vpop.f32.mrf.mxu0  ;;  %v14640_v34 = vor.u32 %v18181_v35, %v14639_v63  ;;  %v17790_v5 = vld [vmem:[%s27437_s3 + $0x1324] sm:$0xf]  ;;  %v14383_v35 = vld [vmem:[%s27437_s3 + $0x1d18] sm:$0xf] }
 0x2e0   : > { %7128 = vmatpush.bf16.msra.mxu2 %v13744_v13  ;;  %v17918_v8 = vld [vmem:[%s27437_s3 + $0x1724] sm:$0xf]  ;;  %v18165_v13 = vld [vmem:[%s27437_s3 + $0x1ed4] sm:$0xf0] }
 0x2e1   : > { %7213 = vmatpush.bf16.msra.mxu1 %v13624_v20  ;;  %v12856_v20 = vor.u32 %v17734_v10, %v12855_v9  ;;  %v6870_v16 = vpop.f32.mrf.mxu2  ;;  %v14004_v9 = vor.u32 %v18013_v43, %v14001_v1  ;;  %v13625_v10 = vld [vmem:[%s27437_s3 + $0x1760] sm:$0xf0]  ;;  %v18149_v39 = vld [vmem:[%s27437_s3 + $0x1e54] sm:$0xf0] }
 0x2e2   : > { %v22387_v51 = vadd.f32 %v6870_v16, %v21970_v52  ;;  %v17806_v52 = vld [vmem:[%s27437_s3 + $0x13a4] sm:$0xf] }
 0x2e3   : > { %7201 = vmatpush.bf16.msra.mxu0 %v13048_v41  ;;  %v6963_v41 = vpop.f32.mrf.mxu1  ;;  %7088 = vmatpush.bf16.msrb.mxu3 %v14316_v36  ;;  %v13180_v31 = vor.u32 %v17806_v52, %v13177_v21  ;;  %v17902_v36 = vld [vmem:[%s27437_s3 + $0x16a4] sm:$0xf] }
 0x2e4   : > { %7173 = vmatpush.bf16.msrb.mxu2 %v14196_v17  ;;  %v13564_v41 = vor.u32 %v17902_v36, %v13561_v37  ;;  %v17886_v16 = vld [vmem:[%s27437_s3 + $0x1624] sm:$0xf]  ;;  %v18054_v36 = vld [vmem:[%s27437_s3 + $0x1b5c] sm:$0xf0] }
 0x2e5   : > { %7214 = vmatpush.bf16.msra.mxu1 %v13560_v44  ;;  %v14132_v44 = vor.u32 %v18045_v26, %v14129_v27  ;;  %7129 = vmatmul.bf16.vlgmr.msra.gmra.mxu2 %v21392_v22  ;;  %v14576_v26 = vor.u32 %v18165_v13, %v14575_v12  ;;  %v17774_v27 = vld [vmem:[%s27437_s3 + $0x12a4] sm:$0xf] }
 0x2e6   : > { %v17742_v21 = vld [vmem:[%s27437_s3 + $0x11a4] sm:$0xf] }
 0x2e7   : > { %7202 = vmatpush.bf16.msra.mxu0 %v12984_v57  ;;  %v17702_v57 = vld [vmem:[%s27437_s3 + $0x105c] sm:$0xf0]  ;;  %7089 = vmatpush.bf16.msrb.mxu3 %v14252_v55  ;;  %v17965_v55 = vld [vmem:[%s27437_s3 + $0x189c] sm:$0xf]  ;;  %v13433_v63 = vld [vmem:[%s27437_s3 + $0x15e0] sm:$0xf0] }
 0x2e8   : > { %7174 = vmatpush.bf16.msrb.mxu2 %v14132_v44  ;;  %v12728_v28 = vor.u32 %v17702_v57, %v12727_v49  ;;  %v14512_v44 = vor.u32 %v18149_v39, %v14511_v38  ;;  %v18133_v49 = vld [vmem:[%s27437_s3 + $0x1dd4] sm:$0xf0]  ;;  %v13809_v57 = vld [vmem:[%s27437_s3 + $0x18d8] sm:$0xf0]  ;;  %v17726_v12 = vld [vmem:[%s27437_s3 + $0x1124] sm:$0xf] }
 0x2e9   : > { %7215 = vmatpush.bf16.msra.mxu1 %v13496_v23  ;;  %v13239_v23 = vld [vmem:[%s27437_s3 + $0x1420] sm:$0xf]  ;;  %v6872_v47 = vpop.f32.mrf.mxu2  ;;  %v14448_v52 = vor.u32 %v18133_v49, %v14447_v15  ;;  %v17854_v13 = vld [vmem:[%s27437_s3 + $0x1524] sm:$0xf] }
 0x2ea   : > { %v13240_v3 = vor.u32 %v17830_v58, %v13239_v23  ;;  %7090 = vmatmul.bf16.vlgmr.msrb.gmra.mxu3 %v21607_v33  ;;  %v12988_v58 = vor.u32 %v17758_v45, %v12985_v46  ;;  %v17710_v38 = vld [vmem:[%s27437_s3 + $0x10a4] sm:$0xf]  ;;  %v14071_v49 = vld [vmem:[%s27437_s3 + $0x1aa0] sm:$0xf] }
 0x2eb   : > { %7203 = vmatpush.bf16.msra.mxu0 %v12920_v4  ;;  %7134 = vmatpush.bf16.msra.mxu3 %v14704_v59  ;;  %v13692_v4 = vor.u32 %v17934_v53, %v13689_v62  ;;  %v13500_v59 = vor.u32 %v17886_v16, %v13497_v50  ;;  %v12921_v53 = vld [vmem:[%s27437_s3 + $0x11e0] sm:$0xf0]  ;;  %v14705_v50 = vld [vmem:[%s27437_s3 + $0x1fd8] sm:$0xf0] }
 0x2ec   : > { %7175 = vmatpush.bf16.msrb.mxu2 %v14068_v61  ;;  %v17870_v61 = vld [vmem:[%s27437_s3 + $0x15a4] sm:$0xf] }
 0x2ed   : > { %7216 = vmatpush.bf16.msra.mxu1 %v13432_v6  ;;  %v13113_v6 = vld [vmem:[%s27437_s3 + $0x1360] sm:$0xf0]  ;;  %v6831_v1 = vpop.f32.mrf.mxu3 }
 0x2ee   : > { %v13116_v17 = vor.u32 %v17790_v5, %v13113_v6  ;;  %v12924_v5 = vor.u32 %v17742_v21, %v12921_v53  ;;  %v14199_v6 = vld [vmem:[%s27437_s3 + $0x1ba0] sm:$0xf]  ;;  %v12793_v39 = vld [vmem:[%s27437_s3 + $0x10e0] sm:$0xf0] }
 0x2ef   : > { %7204 = vmatpush.bf16.msra.mxu0 %v12856_v20  ;;  %7135 = vmatpush.bf16.msra.mxu3 %v14640_v34  ;;  %v13628_v20 = vor.u32 %v17918_v8, %v13625_v10  ;;  %v22528_v34 = vadd.f32 %v6831_v1, %v22271_v42  ;;  %v18070_v8 = vld [vmem:[%s27437_s3 + $0x1bdc] sm:$0xf0]  ;;  %v12857_v42 = vld [vmem:[%s27437_s3 + $0x1160] sm:$0xf0]  ;;  %v12796_v15 = vor.u32 %v17710_v38, %v12793_v39  ;;  %v13567_v38 = vld [vmem:[%s27437_s3 + $0x16a8] sm:$0xf] }
 0x2f0   : > { %7176 = vmatpush.bf16.msrb.mxu2 %v14004_v9  ;;  %v13436_v9 = vor.u32 %v17870_v61, %v13433_v63  ;;  %v13241_v21 = vld [vmem:[%s27437_s3 + $0x1460] sm:$0xf0]  ;;  %v13183_v61 = vld [vmem:[%s27437_s3 + $0x13a8] sm:$0xf] }
 0x2f1   : > { %7217 = vmatpush.bf16.msra.mxu1 %v13368_v29  ;;  %v13049_v29 = vld [vmem:[%s27437_s3 + $0x12e0] sm:$0xf0] }
 0x2f2   : > { %v13052_v40 = vor.u32 %v17774_v27, %v13049_v29  ;;  %v12860_v27 = vor.u32 %v17726_v12, %v12857_v42  ;;  %v14135_v29 = vld [vmem:[%s27437_s3 + $0x1b20] sm:$0xf]  ;;  %v17799_v12 = vld [vmem:[%s27437_s3 + $0x1364] sm:$0xf0] }
 0x2f3   : > { %7205 = vmatpush.bf16.msra.mxu0 %v12792_v32  ;;  %7136 = vmatpush.bf16.msra.mxu3 %v14576_v26  ;;  %v13876_v32 = vor.u32 %v17981_v25, %v13873_v0  ;;  %v14200_v26 = vor.u32 %v18070_v8, %v14199_v6  ;;  %v17838_v25 = vld [vmem:[%s27437_s3 + $0x14a4] sm:$0xf]  ;;  %v14136_v16 = vor.u32 %v18054_v36, %v14135_v29  ;;  %v13631_v42 = vld [vmem:[%s27437_s3 + $0x1728] sm:$0xf] }
 0x2f4   : > { %7177 = vmatpush.bf16.msrb.mxu2 %v13940_v24  ;;  %v13372_v24 = vor.u32 %v17854_v13, %v13369_v60  ;;  %v17927_v60 = vld [vmem:[%s27437_s3 + $0x1764] sm:$0xf0] }
 0x2f5   : > { %7218 = vmatpush.bf16.msra.mxu1 %v13304_v54  ;;  %v6922_v54 = vpop.f32.mrf.mxu2  ;;  %v6833_v46 = vpop.f32.mrf.mxu3  ;;  %v13632_v36 = vor.u32 %v17927_v60, %v13631_v42  ;;  %v14201_v42 = vld [vmem:[%s27437_s3 + $0x1be0] sm:$0xf0]  ;;  %v12863_v60 = vld [vmem:[%s27437_s3 + $0x1128] sm:$0xf] }
 0x2f6   : > { %v22499_v23 = vadd.f32 %v6922_v54, %v22120_v48  ;;  %v13812_v48 = vor.u32 %v17965_v55, %v13809_v57  ;;  %v18038_v54 = vld [vmem:[%s27437_s3 + $0x1adc] sm:$0xf0]  ;;  %v17694_v55 = vld [vmem:[%s27437_s3 + $0x1024] sm:$0xf] }
 0x2f7   : > { %7206 = vmatpush.bf16.msra.mxu0 %v12728_v28  ;;  %7137 = vmatpush.bf16.msra.mxu3 %v14512_v44  ;;  %v7000_v62 = vpop.f32.mrf.mxu0  ;;  %v18117_v28 = vld [vmem:[%s27437_s3 + $0x1d54] sm:$0xf0]  ;;  %v14072_v63 = vor.u32 %v18038_v54, %v14071_v49 }
 0x2f8   : > { %7178 = vmatpush.bf16.msrb.mxu2 %v13876_v32  ;;  %v14384_v10 = vor.u32 %v18117_v28, %v14383_v35  ;;  %v18085_v44 = vld [vmem:[%s27437_s3 + $0x1c54] sm:$0xf0]  ;;  %v18189_v32 = vld [vmem:[%s27437_s3 + $0x1f9c] sm:$0xf]  ;;  %v17943_v35 = vld [vmem:[%s27437_s3 + $0x17e4] sm:$0xf0] }
 0x2f9   : > { %7219 = vmatpush.bf16.msra.mxu1 %v13240_v3  ;;  %v7013_v43 = vpop.f32.mrf.mxu1  ;;  %v17949_v3 = vld [vmem:[%s27437_s3 + $0x181c] sm:$0xf]  ;;  %v14708_v53 = vor.u32 %v18189_v32, %v14705_v50  ;;  %v12991_v32 = vld [vmem:[%s27437_s3 + $0x1228] sm:$0xf] }
 0x2fa   : > { %7207 = vmatmul.bf16.vlgmr.msra.gmra.mxu0 %v20959_v7  ;;  %v18173_v28 = vld [vmem:[%s27437_s3 + $0x1f1c] sm:$0xf]  ;;  %v17767_v50 = vld [vmem:[%s27437_s3 + $0x1264] sm:$0xf0] }
 0x2fb   : > { %7251 = vmatpush.bf16.msrb.mxu0 %v13180_v31  ;;  %v13745_v31 = vld [vmem:[%s27437_s3 + $0x1858] sm:$0xf0]  ;;  %7138 = vmatpush.bf16.msra.mxu3 %v14448_v52  ;;  %v17822_v52 = vld [vmem:[%s27437_s3 + $0x1424] sm:$0xf] }
 0x2fc   : > { %7220 = vmatmul.bf16.vlgmr.msra.gmra.mxu1 %v21072_v18  ;;  %7179 = vmatpush.bf16.msrb.mxu2 %v13812_v48  ;;  %v13748_v47 = vor.u32 %v17949_v3, %v13745_v31  ;;  %v13695_v48 = vld [vmem:[%s27437_s3 + $0x17a8] sm:$0xf]  ;;  %v14007_v3 = vld [vmem:[%s27437_s3 + $0x1a20] sm:$0xf] }
 0x2fd   : > { %7264 = vmatpush.bf16.msrb.mxu1 %v13692_v4  ;;  %v22525_v4 = vadd.f32 %v7013_v43, %v7000_v62  ;;  %v17815_v62 = vld [vmem:[%s27437_s3 + $0x13e4] sm:$0xf0]  ;;  %v14641_v43 = vld [vmem:[%s27437_s3 + $0x1f58] sm:$0xf0]  ;;  %v18022_v31 = vld [vmem:[%s27437_s3 + $0x1a5c] sm:$0xf0]  ;;  %v13696_v8 = vor.u32 %v17943_v35, %v13695_v48  ;;  %v6883_v13 = vpop.f32.mrf.mxu3 }
 0x2fe   : > { %v13184_v6 = vor.u32 %v17815_v62, %v13183_v61  ;;  %v12992_v61 = vor.u32 %v17767_v50, %v12991_v32  ;;  %v17751_v35 = vld [vmem:[%s27437_s3 + $0x11e4] sm:$0xf0]  ;;  %v18077_v32 = vld [vmem:[%s27437_s3 + $0x1c1c] sm:$0xf] }
 0x2ff   : > { %7252 = vmatpush.bf16.msrb.mxu0 %v13116_v17  ;;  %v18101_v17 = vld [vmem:[%s27437_s3 + $0x1cd4] sm:$0xf0]  ;;  %7139 = vmatpush.bf16.msra.mxu3 %v14384_v10  ;;  %v7002_v0 = vpop.f32.mrf.mxu0  ;;  %v13119_v10 = vld [vmem:[%s27437_s3 + $0x1328] sm:$0xf]  ;;  %v14257_v50 = vld [vmem:[%s27437_s3 + $0x1c58] sm:$0xf0] }
 0x300   : > { %v14320_v37 = vor.u32 %v18101_v17, %v14319_v14  ;;  %7180 = vmatpush.bf16.msrb.mxu2 %v13748_v47  ;;  %v14008_v47 = vor.u32 %v18022_v31, %v14007_v3  ;;  %v18157_v14 = vld [vmem:[%s27437_s3 + $0x1e9c] sm:$0xf]  ;;  %v13120_v29 = vor.u32 %v17799_v12, %v13119_v10  ;;  %v18062_v12 = vld [vmem:[%s27437_s3 + $0x1ba4] sm:$0xf] }
 0x301   : > { %7265 = vmatpush.bf16.msrb.mxu1 %v13628_v20  ;;  %v6924_v20 = vpop.f32.mrf.mxu2  ;;  %v7015_v45 = vpop.f32.mrf.mxu1  ;;  %v14577_v17 = vld [vmem:[%s27437_s3 + $0x1ed8] sm:$0xf0] }
 0x302   : > { %v22646_v20 = vadd.f32 %v6883_v13, %v22387_v51  ;;  %v13055_v51 = vld [vmem:[%s27437_s3 + $0x12a8] sm:$0xf]  ;;  %v18141_v0 = vld [vmem:[%s27437_s3 + $0x1e1c] sm:$0xf] }
 0x303   : > { %7253 = vmatpush.bf16.msrb.mxu0 %v13052_v40  ;;  %v13305_v40 = vld [vmem:[%s27437_s3 + $0x14e0] sm:$0xf0]  ;;  %7140 = vmatpush.bf16.msra.mxu3 %v14320_v37  ;;  %v17783_v37 = vld [vmem:[%s27437_s3 + $0x12e4] sm:$0xf0]  ;;  %v18109_v3 = vld [vmem:[%s27437_s3 + $0x1d1c] sm:$0xf] }
 0x304   : > { %7225 = vmatpush.bf16.msra.mxu2 %v14200_v26  ;;  %v13308_v57 = vor.u32 %v17838_v25, %v13305_v40  ;;  %v13943_v26 = vld [vmem:[%s27437_s3 + $0x19a0] sm:$0xf]  ;;  %v17911_v25 = vld [vmem:[%s27437_s3 + $0x16e4] sm:$0xf0]  ;;  %v14513_v40 = vld [vmem:[%s27437_s3 + $0x1e58] sm:$0xf0]  ;;  %v13056_v45 = vor.u32 %v17783_v37, %v13055_v51 }
 0x305   : > { %7266 = vmatpush.bf16.msrb.mxu1 %v13564_v41  ;;  %v14255_v41 = vld [vmem:[%s27437_s3 + $0x1c18] sm:$0xf]  ;;  %7181 = vmatmul.bf16.vlgmr.msrb.gmra.mxu2 %v21392_v22  ;;  %v13568_v46 = vor.u32 %v17911_v25, %v13567_v38  ;;  %v6885_v49 = vpop.f32.mrf.mxu3  ;;  %v14385_v31 = vld [vmem:[%s27437_s3 + $0x1d58] sm:$0xf0]  ;;  %v14204_v38 = vor.u32 %v18062_v12, %v14201_v42  ;;  %v18046_v25 = vld [vmem:[%s27437_s3 + $0x1b24] sm:$0xf] }
 0x306   : > { %v14009_v12 = vld [vmem:[%s27437_s3 + $0x1a60] sm:$0xf0] }
 0x307   : > { %7254 = vmatpush.bf16.msrb.mxu0 %v12988_v58  ;;  %v14256_v58 = vor.u32 %v18085_v44, %v14255_v41  ;;  %v13879_v41 = vld [vmem:[%s27437_s3 + $0x1920] sm:$0xf] }
 0x308   : > { %7226 = vmatpush.bf16.msra.mxu2 %v14136_v16  ;;  %v17990_v44 = vld [vmem:[%s27437_s3 + $0x195c] sm:$0xf0]  ;;  %v14516_v16 = vor.u32 %v18141_v0, %v14513_v40  ;;  %v14137_v0 = vld [vmem:[%s27437_s3 + $0x1b60] sm:$0xf0] }
 0x309   : > { %7267 = vmatpush.bf16.msrb.mxu1 %v13500_v59  ;;  %v12729_v59 = vld [vmem:[%s27437_s3 + $0x1060] sm:$0xf0]  ;;  %7141 = vmatpush.bf16.msra.mxu3 %v14256_v58  ;;  %v13880_v54 = vor.u32 %v17990_v44, %v13879_v41  ;;  %v14449_v58 = vld [vmem:[%s27437_s3 + $0x1dd8] sm:$0xf0]  ;;  %v17719_v44 = vld [vmem:[%s27437_s3 + $0x10e4] sm:$0xf0]  ;;  %v14140_v49 = vor.u32 %v18046_v25, %v14137_v0 }
 0x30a   : > { %v12732_v1 = vor.u32 %v17694_v55, %v12729_v59  ;;  %v17895_v55 = vld [vmem:[%s27437_s3 + $0x1664] sm:$0xf0]  ;;  %v6974_v59 = vpop.f32.mrf.mxu2 }
 0x30b   : > { %7255 = vmatpush.bf16.msrb.mxu0 %v12924_v5  ;;  %v13244_v5 = vor.u32 %v17822_v52, %v13241_v21  ;;  %v13815_v52 = vld [vmem:[%s27437_s3 + $0x18a0] sm:$0xf] }
 0x30c   : > { %7227 = vmatpush.bf16.msra.mxu2 %v14072_v63  ;;  %7142 = vmatmul.bf16.vlgmr.msra.gmra.mxu3 %v21607_v33  ;;  %v17974_v21 = vld [vmem:[%s27437_s3 + $0x18dc] sm:$0xf0]  ;;  %v12927_v63 = vld [vmem:[%s27437_s3 + $0x11a8] sm:$0xf] }
 0x30d   : > { %7268 = vmatpush.bf16.msrb.mxu1 %v13436_v9  ;;  %7186 = vmatpush.bf16.msrb.mxu3 %v14708_v53  ;;  %v14644_v9 = vor.u32 %v18173_v28, %v14641_v43  ;;  %v22706_v53 = vadd.f32 %v6974_v59, %v22321_v30  ;;  %v13439_v28 = vld [vmem:[%s27437_s3 + $0x15a8] sm:$0xf]  ;;  %v13816_v43 = vor.u32 %v17974_v21, %v13815_v52  ;;  %v14073_v59 = vld [vmem:[%s27437_s3 + $0x1ae0] sm:$0xf0] }
 0x30e   : > { %v12928_v10 = vor.u32 %v17751_v35, %v12927_v63  ;;  %v12735_v52 = vld [vmem:[%s27437_s3 + $0x1028] sm:$0xf] }
 0x30f   : > { %7256 = vmatpush.bf16.msrb.mxu0 %v12860_v27  ;;  %v18006_v27 = vld [vmem:[%s27437_s3 + $0x19dc] sm:$0xf0]  ;;  %v17831_v63 = vld [vmem:[%s27437_s3 + $0x1464] sm:$0xf0] }
 0x310   : > { %7228 = vmatpush.bf16.msra.mxu2 %v14008_v47  ;;  %v13944_v39 = vor.u32 %v18006_v27, %v13943_v26  ;;  %v14388_v47 = vor.u32 %v18109_v3, %v14385_v31  ;;  %v6935_v26 = vpop.f32.mrf.mxu3  ;;  %v13697_v31 = vld [vmem:[%s27437_s3 + $0x17e8] sm:$0xf0] }
 0x311   : > { %7269 = vmatpush.bf16.msrb.mxu1 %v13372_v24  ;;  %7187 = vmatpush.bf16.msrb.mxu3 %v14644_v9  ;;  %v14580_v24 = vor.u32 %v18157_v14, %v14577_v17  ;;  %v17735_v14 = vld [vmem:[%s27437_s3 + $0x1164] sm:$0xf0]  ;;  %v22759_v51 = vadd.f32 %v6935_v26, %v22499_v23  ;;  %v17919_v26 = vld [vmem:[%s27437_s3 + $0x172c] sm:$0xf] }
 0x312   : > { %v13375_v17 = vld [vmem:[%s27437_s3 + $0x1528] sm:$0xf]  ;;  %v6976_v37 = vpop.f32.mrf.mxu2 }
 0x313   : > { %7257 = vmatpush.bf16.msrb.mxu0 %v12796_v15  ;;  %v13503_v15 = vld [vmem:[%s27437_s3 + $0x1628] sm:$0xf]  ;;  %v17998_v37 = vld [vmem:[%s27437_s3 + $0x19a4] sm:$0xf] }
 0x314   : > { %7229 = vmatpush.bf16.msra.mxu2 %v13944_v39  ;;  %v13504_v62 = vor.u32 %v17895_v55, %v13503_v15  ;;  %v12864_v39 = vor.u32 %v17735_v14, %v12863_v60  ;;  %v12799_v23 = vld [vmem:[%s27437_s3 + $0x10a8] sm:$0xf]  ;;  %v18198_v55 = vld [vmem:[%s27437_s3 + $0x1fdc] sm:$0xf0]  ;;  %v17791_v14 = vld [vmem:[%s27437_s3 + $0x132c] sm:$0xf] }
 0x315   : > { %7270 = vmatpush.bf16.msrb.mxu1 %v13308_v57  ;;  %7188 = vmatpush.bf16.msrb.mxu3 %v14580_v24  ;;  %v18125_v57 = vld [vmem:[%s27437_s3 + $0x1d9c] sm:$0xf] }
 0x316   : > { %v14452_v48 = vor.u32 %v18125_v57, %v14449_v58  ;;  %v14321_v24 = vld [vmem:[%s27437_s3 + $0x1cd8] sm:$0xf0]  ;;  %v12800_v57 = vor.u32 %v17719_v44, %v12799_v23  ;;  %v18030_v58 = vld [vmem:[%s27437_s3 + $0x1aa4] sm:$0xf]  ;;  %v17903_v23 = vld [vmem:[%s27437_s3 + $0x16ac] sm:$0xf] }
 0x317   : > { %7258 = vmatpush.bf16.msrb.mxu0 %v12732_v1  ;;  %v7052_v30 = vpop.f32.mrf.mxu0  ;;  %v17879_v1 = vld [vmem:[%s27437_s3 + $0x15e4] sm:$0xf0]  ;;  %v14076_v3 = vor.u32 %v18030_v58, %v14073_v59  ;;  %v17887_v58 = vld [vmem:[%s27437_s3 + $0x162c] sm:$0xf] }
 0x318   : > { %7230 = vmatpush.bf16.msra.mxu2 %v13880_v54  ;;  %v13440_v13 = vor.u32 %v17879_v1, %v13439_v28  ;;  %v14711_v54 = vld [vmem:[%s27437_s3 + $0x1fa0] sm:$0xf]  ;;  %v6937_v35 = vpop.f32.mrf.mxu3  ;;  %v17935_v1 = vld [vmem:[%s27437_s3 + $0x17ac] sm:$0xf] }
 0x319   : > { %7271 = vmatpush.bf16.msrb.mxu1 %v13244_v5  ;;  %7189 = vmatpush.bf16.msrb.mxu3 %v14516_v16  ;;  %v7065_v5 = vpop.f32.mrf.mxu1  ;;  %v17847_v16 = vld [vmem:[%s27437_s3 + $0x14e4] sm:$0xf0]  ;;  %v14712_v28 = vor.u32 %v18198_v55, %v14711_v54  ;;  %v17759_v55 = vld [vmem:[%s27437_s3 + $0x122c] sm:$0xf] }
 0x31a   : > { %7259 = vmatmul.bf16.vlgmr.msrb.gmra.mxu0 %v20959_v7  ;;  %v22732_v9 = vadd.f32 %v7065_v5, %v7052_v30  ;;  %v17807_v30 = vld [vmem:[%s27437_s3 + $0x13ac] sm:$0xf]  ;;  %v14647_v5 = vld [vmem:[%s27437_s3 + $0x1f20] sm:$0xf] }
 0x31b   : > { %7303 = vmatpush.bf16.msra.mxu0 %v13184_v6  ;;  %v13751_v6 = vld [vmem:[%s27437_s3 + $0x1820] sm:$0xf] }
 0x31c   : > { %7272 = vmatmul.bf16.vlgmr.msrb.gmra.mxu1 %v21072_v18  ;;  %7231 = vmatpush.bf16.msra.mxu2 %v13816_v43  ;;  %v13185_v43 = vld [vmem:[%s27437_s3 + $0x13e8] sm:$0xf0] }
 0x31d   : > { %7316 = vmatpush.bf16.msra.mxu1 %v13696_v8  ;;  %v17958_v8 = vld [vmem:[%s27437_s3 + $0x185c] sm:$0xf0]  ;;  %7190 = vmatpush.bf16.msrb.mxu3 %v14452_v48  ;;  %v13247_v48 = vld [vmem:[%s27437_s3 + $0x1428] sm:$0xf] }
 0x31e   : > { %v13752_v27 = vor.u32 %v17958_v8, %v13751_v6  ;;  %v18182_v6 = vld [vmem:[%s27437_s3 + $0x1f5c] sm:$0xf0]  ;;  %v13248_v42 = vor.u32 %v17831_v63, %v13247_v48  ;;  %v17966_v48 = vld [vmem:[%s27437_s3 + $0x18a4] sm:$0xf] }
 0x31f   : > { %7304 = vmatpush.bf16.msra.mxu0 %v13120_v29  ;;  %v17863_v29 = vld [vmem:[%s27437_s3 + $0x1564] sm:$0xf0]  ;;  %v14648_v60 = vor.u32 %v18182_v6, %v14647_v5  ;;  %v13817_v63 = vld [vmem:[%s27437_s3 + $0x18e0] sm:$0xf0]  ;;  %v13441_v5 = vld [vmem:[%s27437_s3 + $0x15e8] sm:$0xf0] }
 0x320   : > { %v13376_v40 = vor.u32 %v17863_v29, %v13375_v17  ;;  %7232 = vmatpush.bf16.msra.mxu2 %v13752_v27  ;;  %v13121_v17 = vld [vmem:[%s27437_s3 + $0x1368] sm:$0xf0]  ;;  %v14391_v6 = vld [vmem:[%s27437_s3 + $0x1d20] sm:$0xf] }
 0x321   : > { %7317 = vmatpush.bf16.msra.mxu1 %v13632_v36  ;;  %v18093_v36 = vld [vmem:[%s27437_s3 + $0x1c9c] sm:$0xf]  ;;  %7191 = vmatpush.bf16.msrb.mxu3 %v14388_v47  ;;  %v7067_v15 = vpop.f32.mrf.mxu1  ;;  %v13700_v47 = vor.u32 %v17935_v1, %v13697_v31  ;;  %v13633_v29 = vld [vmem:[%s27437_s3 + $0x1768] sm:$0xf0] }
 0x322   : > { %v14324_v41 = vor.u32 %v18093_v36, %v14321_v24  ;;  %v14583_v36 = vld [vmem:[%s27437_s3 + $0x1ea0] sm:$0xf]  ;;  %v13636_v25 = vor.u32 %v17919_v26, %v13633_v29  ;;  %v17743_v1 = vld [vmem:[%s27437_s3 + $0x11ac] sm:$0xf] }
 0x323   : > { %7305 = vmatpush.bf16.msra.mxu0 %v13056_v45  ;;  %v13311_v45 = vld [vmem:[%s27437_s3 + $0x14a8] sm:$0xf]  ;;  %7233 = vmatmul.bf16.vlgmr.msra.gmra.mxu2 %v21392_v22  ;;  %v18166_v24 = vld [vmem:[%s27437_s3 + $0x1edc] sm:$0xf0]  ;;  %v17871_v31 = vld [vmem:[%s27437_s3 + $0x15ac] sm:$0xf] }
 0x324   : > { %7277 = vmatpush.bf16.msrb.mxu2 %v14204_v38  ;;  %v13312_v21 = vor.u32 %v17847_v16, %v13311_v45  ;;  %v13945_v38 = vld [vmem:[%s27437_s3 + $0x19e0] sm:$0xf0]  ;;  %v14584_v0 = vor.u32 %v18166_v24, %v14583_v36  ;;  %v13569_v45 = vld [vmem:[%s27437_s3 + $0x16e8] sm:$0xf0]  ;;  %v18150_v16 = vld [vmem:[%s27437_s3 + $0x1e5c] sm:$0xf0]  ;;  %v13444_v26 = vor.u32 %v17871_v31, %v13441_v5 }
 0x325   : > { %7318 = vmatpush.bf16.msra.mxu1 %v13568_v46  ;;  %v7054_v46 = vpop.f32.mrf.mxu0  ;;  %7192 = vmatpush.bf16.msrb.mxu3 %v14324_v41  ;;  %v13057_v41 = vld [vmem:[%s27437_s3 + $0x12e8] sm:$0xf0]  ;;  %v13948_v44 = vor.u32 %v17998_v37, %v13945_v38  ;;  %v13191_v5 = vld [vmem:[%s27437_s3 + $0x13b0] sm:$0xf] }
 0x326   : > { %v14519_v46 = vld [vmem:[%s27437_s3 + $0x1e20] sm:$0xf]  ;;  %v17727_v29 = vld [vmem:[%s27437_s3 + $0x112c] sm:$0xf] }
 0x327   : > { %7306 = vmatpush.bf16.msra.mxu0 %v12992_v61  ;;  %v14260_v61 = vor.u32 %v18077_v32, %v14257_v50  ;;  %v17982_v32 = vld [vmem:[%s27437_s3 + $0x1924] sm:$0xf]  ;;  %v14520_v54 = vor.u32 %v18150_v16, %v14519_v46  ;;  %v12865_v36 = vld [vmem:[%s27437_s3 + $0x1168] sm:$0xf0]  ;;  %v18055_v46 = vld [vmem:[%s27437_s3 + $0x1b64] sm:$0xf0] }
 0x328   : > { %7278 = vmatpush.bf16.msrb.mxu2 %v14140_v49  ;;  %v13881_v50 = vld [vmem:[%s27437_s3 + $0x1960] sm:$0xf0]  ;;  %v13572_v49 = vor.u32 %v17903_v23, %v13569_v45  ;;  %v17855_v24 = vld [vmem:[%s27437_s3 + $0x152c] sm:$0xf]  ;;  %v14143_v45 = vld [vmem:[%s27437_s3 + $0x1b28] sm:$0xf] }
 0x329   : > { %7319 = vmatpush.bf16.msra.mxu1 %v13504_v62  ;;  %v17703_v62 = vld [vmem:[%s27437_s3 + $0x1064] sm:$0xf0]  ;;  %7193 = vmatpush.bf16.msrb.mxu3 %v14260_v61  ;;  %v13884_v59 = vor.u32 %v17982_v32, %v13881_v50  ;;  %v18134_v61 = vld [vmem:[%s27437_s3 + $0x1ddc] sm:$0xf0]  ;;  %v12801_v50 = vld [vmem:[%s27437_s3 + $0x10e8] sm:$0xf0] }
 0x32a   : > { %v12736_v8 = vor.u32 %v17703_v62, %v12735_v52  ;;  %v13505_v52 = vld [vmem:[%s27437_s3 + $0x1668] sm:$0xf0]  ;;  %v7026_v62 = vpop.f32.mrf.mxu2 }
 0x32b   : > { %7307 = vmatpush.bf16.msra.mxu0 %v12928_v10  ;;  %v18014_v10 = vld [vmem:[%s27437_s3 + $0x1a24] sm:$0xf]  ;;  %v22910_v35 = vadd.f32 %v7026_v62, %v22525_v4  ;;  %v13820_v4 = vor.u32 %v17966_v48, %v13817_v63  ;;  %v14079_v62 = vld [vmem:[%s27437_s3 + $0x1aa8] sm:$0xf]  ;;  %v17695_v63 = vld [vmem:[%s27437_s3 + $0x102c] sm:$0xf] }
 0x32c   : > { %7279 = vmatpush.bf16.msrb.mxu2 %v14076_v3  ;;  %v14012_v27 = vor.u32 %v18014_v10, %v14009_v12  ;;  %7194 = vmatmul.bf16.vlgmr.msrb.gmra.mxu3 %v21607_v33  ;;  %v12929_v3 = vld [vmem:[%s27437_s3 + $0x11e8] sm:$0xf0]  ;;  %v17950_v12 = vld [vmem:[%s27437_s3 + $0x1824] sm:$0xf]  ;;  %v18039_v48 = vld [vmem:[%s27437_s3 + $0x1ae4] sm:$0xf0] }
 0x32d   : > { %7320 = vmatpush.bf16.msra.mxu1 %v13440_v13  ;;  %v13188_v13 = vor.u32 %v17807_v30, %v13185_v43  ;;  %7238 = vmatpush.bf16.msra.mxu3 %v14712_v28  ;;  %v13508_v30 = vor.u32 %v17887_v58, %v13505_v52  ;;  %v6987_v37 = vpop.f32.mrf.mxu3  ;;  %v14144_v58 = vor.u32 %v18055_v46, %v14143_v45  ;;  %v14713_v52 = vld [vmem:[%s27437_s3 + $0x1fe0] sm:$0xf0] }
 0x32f   : > { %7308 = vmatpush.bf16.msra.mxu0 %v12864_v39  ;;  %v13124_v39 = vor.u32 %v17791_v14, %v13121_v17  ;;  %v18071_v14 = vld [vmem:[%s27437_s3 + $0x1be4] sm:$0xf0] }
 0x330   : > { %7280 = vmatpush.bf16.msrb.mxu2 %v14012_v27 }
 0x331   : > { %7321 = vmatpush.bf16.msra.mxu1 %v13376_v40  ;;  %7239 = vmatpush.bf16.msra.mxu3 %v14648_v60  ;;  %v17775_v40 = vld [vmem:[%s27437_s3 + $0x12ac] sm:$0xf]  ;;  %v14207_v60 = vld [vmem:[%s27437_s3 + $0x1ba8] sm:$0xf] }
 0x332   : > { %v13060_v15 = vor.u32 %v17775_v40, %v13057_v41  ;;  %v22963_v40 = vadd.f32 %v6987_v37, %v22706_v53  ;;  %v7028_v41 = vpop.f32.mrf.mxu2  ;;  %v14208_v23 = vor.u32 %v18071_v14, %v14207_v60  ;;  %v17711_v53 = vld [vmem:[%s27437_s3 + $0x10ac] sm:$0xf]  ;;  %v14015_v60 = vld [vmem:[%s27437_s3 + $0x1a28] sm:$0xf]  ;;  %v17800_v37 = vld [vmem:[%s27437_s3 + $0x136c] sm:$0xf0] }
 0x333   : > { %7309 = vmatpush.bf16.msra.mxu0 %v12800_v57  ;;  %v12993_v57 = vld [vmem:[%s27437_s3 + $0x1268] sm:$0xf0]  ;;  %v18023_v14 = vld [vmem:[%s27437_s3 + $0x1a64] sm:$0xf0]  ;;  %v14585_v41 = vld [vmem:[%s27437_s3 + $0x1ee0] sm:$0xf0] }
 0x334   : > { %7281 = vmatpush.bf16.msrb.mxu2 %v13948_v44  ;;  %v12996_v28 = vor.u32 %v17759_v55, %v12993_v57  ;;  %v12868_v44 = vor.u32 %v17727_v29, %v12865_v36  ;;  %v18086_v55 = vld [vmem:[%s27437_s3 + $0x1c5c] sm:$0xf0] }
 0x335   : > { %7322 = vmatpush.bf16.msra.mxu1 %v13312_v21  ;;  %7240 = vmatpush.bf16.msra.mxu3 %v14584_v0  ;;  %v14455_v21 = vld [vmem:[%s27437_s3 + $0x1da0] sm:$0xf]  ;;  %v6989_v31 = vpop.f32.mrf.mxu3 }
 0x336   : > { %v14456_v43 = vor.u32 %v18134_v61, %v14455_v21  ;;  %v18102_v0 = vld [vmem:[%s27437_s3 + $0x1cdc] sm:$0xf0]  ;;  %v12804_v61 = vor.u32 %v17711_v53, %v12801_v50  ;;  %v17784_v53 = vld [vmem:[%s27437_s3 + $0x12ec] sm:$0xf0] }
 0x337   : > { %7310 = vmatpush.bf16.msra.mxu0 %v12736_v8  ;;  %v18118_v8 = vld [vmem:[%s27437_s3 + $0x1d5c] sm:$0xf0]  ;;  %v7104_v10 = vpop.f32.mrf.mxu0  ;;  %v13575_v50 = vld [vmem:[%s27437_s3 + $0x16b0] sm:$0xf] }
 0x338   : > { %7282 = vmatpush.bf16.msrb.mxu2 %v13884_v59  ;;  %v14392_v27 = vor.u32 %v18118_v8, %v14391_v6  ;;  %v18190_v59 = vld [vmem:[%s27437_s3 + $0x1fa4] sm:$0xf]  ;;  %v17816_v6 = vld [vmem:[%s27437_s3 + $0x13ec] sm:$0xf0] }
 0x339   : > { %7323 = vmatpush.bf16.msra.mxu1 %v13248_v42  ;;  %7241 = vmatpush.bf16.msra.mxu3 %v14520_v54  ;;  %v13753_v42 = vld [vmem:[%s27437_s3 + $0x1860] sm:$0xf0]  ;;  %v14263_v54 = vld [vmem:[%s27437_s3 + $0x1c20] sm:$0xf]  ;;  %v13703_v8 = vld [vmem:[%s27437_s3 + $0x17b0] sm:$0xf] }
 0x33a   : > { %7311 = vmatmul.bf16.vlgmr.msra.gmra.mxu0 %v20959_v7  ;;  %v13756_v38 = vor.u32 %v17950_v12, %v13753_v42  ;;  %v17944_v12 = vld [vmem:[%s27437_s3 + $0x17ec] sm:$0xf0]  ;;  %v18174_v42 = vld [vmem:[%s27437_s3 + $0x1f24] sm:$0xf] }
 0x33b   : > { %7355 = vmatpush.bf16.msrb.mxu0 %v13188_v13  ;;  %v7117_v13 = vpop.f32.mrf.mxu1  ;;  %v13704_v29 = vor.u32 %v17944_v12, %v13703_v8  ;;  %v17752_v12 = vld [vmem:[%s27437_s3 + $0x11ec] sm:$0xf0] }
 0x33c   : > { %7324 = vmatmul.bf16.vlgmr.msra.gmra.mxu1 %v21072_v18  ;;  %v22942_v17 = vadd.f32 %v7117_v13, %v7104_v10  ;;  %7283 = vmatpush.bf16.msrb.mxu2 %v13820_v4  ;;  %v14716_v4 = vor.u32 %v18190_v59, %v14713_v52  ;;  %v14080_v10 = vor.u32 %v18039_v48, %v14079_v62  ;;  %v14649_v13 = vld [vmem:[%s27437_s3 + $0x1f60] sm:$0xf0]  ;;  %v17768_v62 = vld [vmem:[%s27437_s3 + $0x126c] sm:$0xf0] }
 0x33d   : > { %7368 = vmatpush.bf16.msrb.mxu1 %v13700_v47  ;;  %v12932_v47 = vor.u32 %v17743_v1, %v12929_v3  ;;  %7242 = vmatpush.bf16.msra.mxu3 %v14456_v43  ;;  %v12737_v43 = vld [vmem:[%s27437_s3 + $0x1068] sm:$0xf0]  ;;  %v14652_v36 = vor.u32 %v18174_v42, %v14649_v13  ;;  %v13511_v48 = vld [vmem:[%s27437_s3 + $0x1630] sm:$0xf] }
 0x33e   : > { %v17823_v1 = vld [vmem:[%s27437_s3 + $0x142c] sm:$0xf]  ;;  %v13447_v42 = vld [vmem:[%s27437_s3 + $0x15b0] sm:$0xf] }
 0x33f   : > { %7356 = vmatpush.bf16.msrb.mxu0 %v13124_v39  ;;  %v13377_v39 = vld [vmem:[%s27437_s3 + $0x1568] sm:$0xf0]  ;;  %v7106_v57 = vpop.f32.mrf.mxu0 }
 0x340   : > { %v13380_v16 = vor.u32 %v17855_v24, %v13377_v39  ;;  %7284 = vmatpush.bf16.msrb.mxu2 %v13756_v38  ;;  %v13249_v3 = vld [vmem:[%s27437_s3 + $0x1468] sm:$0xf0]  ;;  %v13127_v24 = vld [vmem:[%s27437_s3 + $0x1330] sm:$0xf]  ;;  %v14016_v39 = vor.u32 %v18023_v14, %v14015_v60  ;;  %v13887_v57 = vld [vmem:[%s27437_s3 + $0x1928] sm:$0xf] }
 0x341   : > { %7369 = vmatpush.bf16.msrb.mxu1 %v13636_v25  ;;  %v14327_v25 = vld [vmem:[%s27437_s3 + $0x1ca0] sm:$0xf]  ;;  %7243 = vmatpush.bf16.msra.mxu3 %v14392_v27  ;;  %v13192_v27 = vor.u32 %v17816_v6, %v13191_v5  ;;  %v13639_v38 = vld [vmem:[%s27437_s3 + $0x1730] sm:$0xf]  ;;  %v13128_v45 = vor.u32 %v17800_v37, %v13127_v24  ;;  %v14393_v60 = vld [vmem:[%s27437_s3 + $0x1d60] sm:$0xf0] }
 0x342   : > { %v14328_v32 = vor.u32 %v18102_v0, %v14327_v25  ;;  %v17928_v25 = vld [vmem:[%s27437_s3 + $0x176c] sm:$0xf0]  ;;  %v18158_v0 = vld [vmem:[%s27437_s3 + $0x1ea4] sm:$0xf]  ;;  %v18063_v24 = vld [vmem:[%s27437_s3 + $0x1bac] sm:$0xf] }
 0x343   : > { %7357 = vmatpush.bf16.msrb.mxu0 %v13060_v15  ;;  %v17839_v15 = vld [vmem:[%s27437_s3 + $0x14ac] sm:$0xf]  ;;  %v7119_v21 = vpop.f32.mrf.mxu1  ;;  %7285 = vmatmul.bf16.vlgmr.msrb.gmra.mxu2 %v21392_v22  ;;  %v13640_v46 = vor.u32 %v17928_v25, %v13639_v38 }
 0x344   : > { %7329 = vmatpush.bf16.msra.mxu2 %v14208_v23  ;;  %v13951_v23 = vld [vmem:[%s27437_s3 + $0x19a8] sm:$0xf]  ;;  %v14209_v37 = vld [vmem:[%s27437_s3 + $0x1be8] sm:$0xf0] }
 0x345   : > { %7370 = vmatpush.bf16.msrb.mxu1 %v13572_v49  ;;  %v13313_v49 = vld [vmem:[%s27437_s3 + $0x14e8] sm:$0xf0]  ;;  %7244 = vmatpush.bf16.msra.mxu3 %v14328_v32  ;;  %v13063_v32 = vld [vmem:[%s27437_s3 + $0x12b0] sm:$0xf] }
 0x346   : > { %v13064_v59 = vor.u32 %v17784_v53, %v13063_v32  ;;  %v14329_v32 = vld [vmem:[%s27437_s3 + $0x1ce0] sm:$0xf0] }
 0x347   : > { %7358 = vmatpush.bf16.msrb.mxu0 %v12996_v28  ;;  %v13316_v28 = vor.u32 %v17839_v15, %v13313_v49  ;;  %v17912_v49 = vld [vmem:[%s27437_s3 + $0x16ec] sm:$0xf0] }
 0x348   : > { %7330 = vmatpush.bf16.msra.mxu2 %v14144_v58  ;;  %v17991_v58 = vld [vmem:[%s27437_s3 + $0x1964] sm:$0xf0]  ;;  %v13576_v52 = vor.u32 %v17912_v49, %v13575_v50  ;;  %v7078_v31 = vpop.f32.mrf.mxu2  ;;  %v14212_v50 = vor.u32 %v18063_v24, %v14209_v37  ;;  %v18015_v37 = vld [vmem:[%s27437_s3 + $0x1a2c] sm:$0xf] }
 0x349   : > { %7371 = vmatpush.bf16.msrb.mxu1 %v13508_v30  ;;  %v14264_v30 = vor.u32 %v18086_v55, %v14263_v54  ;;  %v18142_v54 = vld [vmem:[%s27437_s3 + $0x1e24] sm:$0xf]  ;;  %v23114_v5 = vadd.f32 %v7078_v31, %v22732_v9  ;;  %v17880_v9 = vld [vmem:[%s27437_s3 + $0x15ec] sm:$0xf0]  ;;  %v14081_v31 = vld [vmem:[%s27437_s3 + $0x1ae8] sm:$0xf0] }
 0x34a   : > { %v14521_v55 = vld [vmem:[%s27437_s3 + $0x1e60] sm:$0xf0] }
 0x34b   : > { %7359 = vmatpush.bf16.msrb.mxu0 %v12932_v47  ;;  %v12740_v47 = vor.u32 %v17695_v63, %v12737_v43  ;;  %7245 = vmatpush.bf16.msra.mxu3 %v14264_v30  ;;  %v14524_v21 = vor.u32 %v18142_v54, %v14521_v55  ;;  %v13888_v63 = vor.u32 %v17991_v58, %v13887_v57  ;;  %v18126_v30 = vld [vmem:[%s27437_s3 + $0x1da4] sm:$0xf]  ;;  %v18047_v54 = vld [vmem:[%s27437_s3 + $0x1b2c] sm:$0xf] }
 0x34c   : > { %7331 = vmatpush.bf16.msra.mxu2 %v14080_v10  ;;  %v14457_v43 = vld [vmem:[%s27437_s3 + $0x1de0] sm:$0xf0]  ;;  %v12935_v10 = vld [vmem:[%s27437_s3 + $0x11b0] sm:$0xf]  ;;  %v14145_v55 = vld [vmem:[%s27437_s3 + $0x1b68] sm:$0xf0] }
 0x34d   : > { %7372 = vmatpush.bf16.msrb.mxu1 %v13444_v26  ;;  %v13252_v26 = vor.u32 %v17823_v1, %v13249_v3  ;;  %v13823_v1 = vld [vmem:[%s27437_s3 + $0x18a8] sm:$0xf]  ;;  %v14460_v8 = vor.u32 %v18126_v30, %v14457_v43 }
 0x34e   : > { %7246 = vmatmul.bf16.vlgmr.msra.gmra.mxu3 %v21607_v33  ;;  %v17975_v3 = vld [vmem:[%s27437_s3 + $0x18e4] sm:$0xf0] }
 0x34f   : > { %7360 = vmatpush.bf16.msrb.mxu0 %v12868_v44  ;;  %7290 = vmatpush.bf16.msrb.mxu3 %v14716_v4  ;;  %v18007_v44 = vld [vmem:[%s27437_s3 + $0x19e4] sm:$0xf0]  ;;  %v13824_v13 = vor.u32 %v17975_v3, %v13823_v1  ;;  %v18031_v3 = vld [vmem:[%s27437_s3 + $0x1aac] sm:$0xf] }
 0x350   : > { %7332 = vmatpush.bf16.msra.mxu2 %v14016_v39  ;;  %v13952_v15 = vor.u32 %v18007_v44, %v13951_v23  ;;  %v13448_v39 = vor.u32 %v17880_v9, %v13447_v42  ;;  %v13383_v23 = vld [vmem:[%s27437_s3 + $0x1530] sm:$0xf]  ;;  %v7039_v44 = vpop.f32.mrf.mxu3  ;;  %v18199_v30 = vld [vmem:[%s27437_s3 + $0x1fe4] sm:$0xf0] }
 0x351   : > { %7373 = vmatpush.bf16.msrb.mxu1 %v13380_v16  ;;  %v14588_v16 = vor.u32 %v18158_v0, %v14585_v41  ;;  %v12871_v0 = vld [vmem:[%s27437_s3 + $0x1130] sm:$0xf]  ;;  %v23167_v53 = vadd.f32 %v7039_v44, %v22910_v35  ;;  %v17792_v44 = vld [vmem:[%s27437_s3 + $0x1334] sm:$0xf] }
 0x352   : > { %v17736_v41 = vld [vmem:[%s27437_s3 + $0x116c] sm:$0xf0] }
 0x353   : > { %7361 = vmatpush.bf16.msrb.mxu0 %v12804_v61  ;;  %7291 = vmatpush.bf16.msrb.mxu3 %v14652_v36  ;;  %v12999_v61 = vld [vmem:[%s27437_s3 + $0x1230] sm:$0xf]  ;;  %v12936_v36 = vor.u32 %v17752_v12, %v12935_v10  ;;  %v12872_v49 = vor.u32 %v17736_v41, %v12871_v0 }
 0x354   : > { %7333 = vmatpush.bf16.msra.mxu2 %v13952_v15  ;;  %v13000_v4 = vor.u32 %v17768_v62, %v12999_v61  ;;  %v7080_v15 = vpop.f32.mrf.mxu2  ;;  %v12807_v35 = vld [vmem:[%s27437_s3 + $0x10b0] sm:$0xf]  ;;  %v18078_v61 = vld [vmem:[%s27437_s3 + $0x1c24] sm:$0xf] }
 0x355   : > { %7374 = vmatpush.bf16.msrb.mxu1 %v13316_v28  ;;  %v17896_v28 = vld [vmem:[%s27437_s3 + $0x166c] sm:$0xf0]  ;;  %v14265_v62 = vld [vmem:[%s27437_s3 + $0x1c60] sm:$0xf0]  ;;  %v18167_v15 = vld [vmem:[%s27437_s3 + $0x1ee4] sm:$0xf0] }
 0x356   : > { %v13512_v6 = vor.u32 %v17896_v28, %v13511_v48  ;;  %v14719_v28 = vld [vmem:[%s27437_s3 + $0x1fa8] sm:$0xf]  ;;  %v17704_v10 = vld [vmem:[%s27437_s3 + $0x106c] sm:$0xf0] }
 0x357   : > { %7362 = vmatpush.bf16.msrb.mxu0 %v12740_v47  ;;  %7292 = vmatpush.bf16.msrb.mxu3 %v14588_v16  ;;  %v18110_v47 = vld [vmem:[%s27437_s3 + $0x1d24] sm:$0xf]  ;;  %v7156_v14 = vpop.f32.mrf.mxu0  ;;  %v13255_v12 = vld [vmem:[%s27437_s3 + $0x1430] sm:$0xf]  ;;  %v14720_v9 = vor.u32 %v18199_v30, %v14719_v28  ;;  %v13889_v28 = vld [vmem:[%s27437_s3 + $0x1968] sm:$0xf0] }
 0x358   : > { %7334 = vmatpush.bf16.msra.mxu2 %v13888_v63  ;;  %v14396_v25 = vor.u32 %v18110_v47, %v14393_v60  ;;  %v18094_v16 = vld [vmem:[%s27437_s3 + $0x1ca4] sm:$0xf]  ;;  %v14148_v63 = vor.u32 %v18047_v54, %v14145_v55  ;;  %v17832_v42 = vld [vmem:[%s27437_s3 + $0x146c] sm:$0xf0]  ;;  %v17808_v47 = vld [vmem:[%s27437_s3 + $0x13b4] sm:$0xf] }
 0x359   : > { %7375 = vmatpush.bf16.msrb.mxu1 %v13252_v26  ;;  %v13759_v26 = vld [vmem:[%s27437_s3 + $0x1828] sm:$0xf]  ;;  %v14332_v58 = vor.u32 %v18094_v16, %v14329_v32  ;;  %v13193_v60 = vld [vmem:[%s27437_s3 + $0x13f0] sm:$0xf0]  ;;  %v13953_v54 = vld [vmem:[%s27437_s3 + $0x19e8] sm:$0xf0] }
 0x35a   : > { %7363 = vmatmul.bf16.vlgmr.msrb.gmra.mxu0 %v20959_v7  ;;  %v13196_v0 = vor.u32 %v17808_v47, %v13193_v60  ;;  %v13641_v32 = vld [vmem:[%s27437_s3 + $0x1770] sm:$0xf0] }
 0x35b   : > { %7407 = vmatpush.bf16.msra.mxu0 %v13192_v27  ;;  %7293 = vmatpush.bf16.msrb.mxu3 %v14524_v21  ;;  %v17959_v27 = vld [vmem:[%s27437_s3 + $0x1864] sm:$0xf0]  ;;  %v17848_v21 = vld [vmem:[%s27437_s3 + $0x14ec] sm:$0xf0] }
 0x35c   : > { %7376 = vmatmul.bf16.vlgmr.msrb.gmra.mxu1 %v21072_v18  ;;  %7335 = vmatpush.bf16.msra.mxu2 %v13824_v13  ;;  %v7041_v13 = vpop.f32.mrf.mxu3 }
 0x35d   : > { %7420 = vmatpush.bf16.msra.mxu1 %v13704_v29  ;;  %v7169_v29 = vpop.f32.mrf.mxu1  ;;  %v13825_v13 = vld [vmem:[%s27437_s3 + $0x18e8] sm:$0xf0] }
 0x35e   : > { %v23146_v38 = vadd.f32 %v7169_v29, %v7156_v14  ;;  %v17936_v14 = vld [vmem:[%s27437_s3 + $0x17b4] sm:$0xf]  ;;  %v14655_v29 = vld [vmem:[%s27437_s3 + $0x1f28] sm:$0xf] }
 0x35f   : > { %7408 = vmatpush.bf16.msra.mxu0 %v13128_v45  ;;  %7294 = vmatpush.bf16.msrb.mxu3 %v14460_v8  ;;  %v13760_v45 = vor.u32 %v17959_v27, %v13759_v26  ;;  %v7158_v48 = vpop.f32.mrf.mxu0  ;;  %v14268_v8 = vor.u32 %v18078_v61, %v14265_v62  ;;  %v14084_v26 = vor.u32 %v18031_v3, %v14081_v31  ;;  %v13705_v27 = vld [vmem:[%s27437_s3 + $0x17f0] sm:$0xf0]  ;;  %v14527_v62 = vld [vmem:[%s27437_s3 + $0x1e28] sm:$0xf] }
 0x360   : > { %v13708_v41 = vor.u32 %v17936_v14, %v13705_v27  ;;  %v13577_v61 = vld [vmem:[%s27437_s3 + $0x16f0] sm:$0xf0]  ;;  %v18151_v48 = vld [vmem:[%s27437_s3 + $0x1e64] sm:$0xf0] }
 0x361   : > { %7421 = vmatpush.bf16.msra.mxu1 %v13640_v46  ;;  %v17864_v46 = vld [vmem:[%s27437_s3 + $0x156c] sm:$0xf0]  ;;  %7336 = vmatpush.bf16.msra.mxu2 %v13760_v45  ;;  %v13129_v45 = vld [vmem:[%s27437_s3 + $0x1370] sm:$0xf0] }
 0x362   : > { %v13384_v57 = vor.u32 %v17864_v46, %v13383_v23  ;;  %v17920_v46 = vld [vmem:[%s27437_s3 + $0x1734] sm:$0xf]  ;;  %v13132_v55 = vor.u32 %v17792_v44, %v13129_v45  ;;  %v14215_v45 = vld [vmem:[%s27437_s3 + $0x1bb0] sm:$0xf] }
 0x363   : > { %7409 = vmatpush.bf16.msra.mxu0 %v13064_v59  ;;  %7295 = vmatpush.bf16.msrb.mxu3 %v14396_v25  ;;  %v17720_v59 = vld [vmem:[%s27437_s3 + $0x10ec] sm:$0xf0]  ;;  %v13256_v25 = vor.u32 %v17832_v42, %v13255_v12  ;;  %v17760_v3 = vld [vmem:[%s27437_s3 + $0x1234] sm:$0xf]  ;;  %v18135_v12 = vld [vmem:[%s27437_s3 + $0x1de4] sm:$0xf0] }
 0x364   : > { %v12808_v1 = vor.u32 %v17720_v59, %v12807_v35  ;;  %7337 = vmatmul.bf16.vlgmr.msra.gmra.mxu2 %v21392_v22  ;;  %v17776_v35 = vld [vmem:[%s27437_s3 + $0x12b4] sm:$0xf]  ;;  %v17967_v42 = vld [vmem:[%s27437_s3 + $0x18ac] sm:$0xf] }
 0x365   : > { %7422 = vmatpush.bf16.msra.mxu1 %v13576_v52  ;;  %v13319_v52 = vld [vmem:[%s27437_s3 + $0x14b0] sm:$0xf]  ;;  %7381 = vmatpush.bf16.msrb.mxu2 %v14212_v50  ;;  %v7171_v43 = vpop.f32.mrf.mxu1  ;;  %v14591_v50 = vld [vmem:[%s27437_s3 + $0x1ea8] sm:$0xf]  ;;  %v13065_v59 = vld [vmem:[%s27437_s3 + $0x12f0] sm:$0xf0] }
 0x366   : > { %v13068_v30 = vor.u32 %v17776_v35, %v13065_v59  ;;  %v13001_v31 = vld [vmem:[%s27437_s3 + $0x1270] sm:$0xf0]  ;;  %v14335_v35 = vld [vmem:[%s27437_s3 + $0x1ca8] sm:$0xf] }
 0x367   : > { %7410 = vmatpush.bf16.msra.mxu0 %v13000_v4  ;;  %v12743_v4 = vld [vmem:[%s27437_s3 + $0x1030] sm:$0xf]  ;;  %7296 = vmatpush.bf16.msrb.mxu3 %v14332_v58  ;;  %v14592_v58 = vor.u32 %v18167_v15, %v14591_v50  ;;  %v13004_v47 = vor.u32 %v17760_v3, %v13001_v31  ;;  %v17744_v27 = vld [vmem:[%s27437_s3 + $0x11b4] sm:$0xf]  ;;  %v18103_v59 = vld [vmem:[%s27437_s3 + $0x1ce4] sm:$0xf0] }
 0x368   : > { %v12744_v24 = vor.u32 %v17704_v10, %v12743_v4  ;;  %v17888_v4 = vld [vmem:[%s27437_s3 + $0x1634] sm:$0xf]  ;;  %v14463_v10 = vld [vmem:[%s27437_s3 + $0x1da8] sm:$0xf] }
 0x369   : > { %7423 = vmatpush.bf16.msra.mxu1 %v13512_v6  ;;  %v13320_v6 = vor.u32 %v17848_v21, %v13319_v52  ;;  %7382 = vmatpush.bf16.msrb.mxu2 %v14148_v63  ;;  %v17904_v52 = vld [vmem:[%s27437_s3 + $0x16b4] sm:$0xf]  ;;  %v17983_v63 = vld [vmem:[%s27437_s3 + $0x192c] sm:$0xf]  ;;  %v14271_v31 = vld [vmem:[%s27437_s3 + $0x1c28] sm:$0xf] }
 0x36a   : > { %v13580_v43 = vor.u32 %v17904_v52, %v13577_v61  ;;  %v17728_v15 = vld [vmem:[%s27437_s3 + $0x1134] sm:$0xf] }
 0x36b   : > { %7411 = vmatpush.bf16.msra.mxu0 %v12936_v36  ;;  %v18183_v36 = vld [vmem:[%s27437_s3 + $0x1f64] sm:$0xf0]  ;;  %7297 = vmatpush.bf16.msrb.mxu3 %v14268_v8  ;;  %v13513_v8 = vld [vmem:[%s27437_s3 + $0x1670] sm:$0xf0] }
 0x36c   : > { %v14656_v23 = vor.u32 %v18183_v36, %v14655_v29  ;;  %v13516_v14 = vor.u32 %v17888_v4, %v13513_v8  ;;  %v12937_v29 = vld [vmem:[%s27437_s3 + $0x11f0] sm:$0xf0]  ;;  %v18087_v4 = vld [vmem:[%s27437_s3 + $0x1c64] sm:$0xf0] }
 0x36d   : > { %7424 = vmatpush.bf16.msra.mxu1 %v13448_v39  ;;  %v14017_v39 = vld [vmem:[%s27437_s3 + $0x1a68] sm:$0xf0]  ;;  %7383 = vmatpush.bf16.msrb.mxu2 %v14084_v26  ;;  %v14464_v26 = vor.u32 %v18135_v12, %v14463_v10  ;;  %v17872_v36 = vld [vmem:[%s27437_s3 + $0x15b4] sm:$0xf]  ;;  %v12940_v44 = vor.u32 %v17744_v27, %v12937_v29  ;;  %v14272_v27 = vor.u32 %v18087_v4, %v14271_v31  ;;  %v17913_v4 = vld [vmem:[%s27437_s3 + $0x16f4] sm:$0xf0] }
 0x36e   : > { %v14020_v16 = vor.u32 %v18015_v37, %v14017_v39  ;;  %7298 = vmatmul.bf16.vlgmr.msrb.gmra.mxu3 %v21607_v33  ;;  %v14399_v37 = vld [vmem:[%s27437_s3 + $0x1d28] sm:$0xf]  ;;  %v13321_v3 = vld [vmem:[%s27437_s3 + $0x14f0] sm:$0xf0]  ;;  %v18191_v10 = vld [vmem:[%s27437_s3 + $0x1fac] sm:$0xf] }
 0x36f   : > { %7412 = vmatpush.bf16.msra.mxu0 %v12872_v49  ;;  %7342 = vmatpush.bf16.msra.mxu3 %v14720_v9  ;;  %v17999_v49 = vld [vmem:[%s27437_s3 + $0x19ac] sm:$0xf]  ;;  %v7130_v9 = vpop.f32.mrf.mxu2  ;;  %v18119_v39 = vld [vmem:[%s27437_s3 + $0x1d64] sm:$0xf0]  ;;  %v12745_v29 = vld [vmem:[%s27437_s3 + $0x1070] sm:$0xf0] }
 0x370   : > { %v13956_v21 = vor.u32 %v17999_v49, %v13953_v54  ;;  %v23318_v60 = vadd.f32 %v7130_v9, %v22942_v17  ;;  %v13449_v17 = vld [vmem:[%s27437_s3 + $0x15f0] sm:$0xf0]  ;;  %v14400_v50 = vor.u32 %v18119_v39, %v14399_v37  ;;  %v14721_v12 = vld [vmem:[%s27437_s3 + $0x1fe8] sm:$0xf0]  ;;  %v14087_v9 = vld [vmem:[%s27437_s3 + $0x1ab0] sm:$0xf] }
 0x371   : > { %7425 = vmatpush.bf16.msra.mxu1 %v13384_v57  ;;  %v13644_v57 = vor.u32 %v17920_v46, %v13641_v32  ;;  %7384 = vmatpush.bf16.msrb.mxu2 %v14020_v16  ;;  %v18072_v46 = vld [vmem:[%s27437_s3 + $0x1bec] sm:$0xf0]  ;;  %v13452_v32 = vor.u32 %v17872_v36, %v13449_v17  ;;  %v12873_v49 = vld [vmem:[%s27437_s3 + $0x1170] sm:$0xf0]  ;;  %v14724_v37 = vor.u32 %v18191_v10, %v14721_v12  ;;  %v13199_v39 = vld [vmem:[%s27437_s3 + $0x13b8] sm:$0xf] }
 0x372   : > { %v17856_v54 = vld [vmem:[%s27437_s3 + $0x1534] sm:$0xf]  ;;  %v13895_v10 = vld [vmem:[%s27437_s3 + $0x1930] sm:$0xf] }
 0x373   : > { %7413 = vmatpush.bf16.msra.mxu0 %v12808_v1  ;;  %7343 = vmatpush.bf16.msra.mxu3 %v14656_v23  ;;  %v14528_v1 = vor.u32 %v18151_v48, %v14527_v62  ;;  %v12876_v62 = vor.u32 %v17728_v15, %v12873_v49  ;;  %v14151_v48 = vld [vmem:[%s27437_s3 + $0x1b30] sm:$0xf]  ;;  %v17824_v36 = vld [vmem:[%s27437_s3 + $0x1434] sm:$0xf] }
 0x374   : > { %v17992_v12 = vld [vmem:[%s27437_s3 + $0x196c] sm:$0xf0] }
 0x375   : > { %7426 = vmatpush.bf16.msra.mxu1 %v13320_v6  ;;  %7385 = vmatpush.bf16.msrb.mxu2 %v13956_v21  ;;  %v13892_v6 = vor.u32 %v17983_v63, %v13889_v28  ;;  %v14216_v21 = vor.u32 %v18072_v46, %v14215_v45  ;;  %v18056_v63 = vld [vmem:[%s27437_s3 + $0x1b6c] sm:$0xf0]  ;;  %v14657_v45 = vld [vmem:[%s27437_s3 + $0x1f68] sm:$0xf0] }
 0x376   : > { %v14152_v8 = vor.u32 %v18056_v63, %v14151_v48  ;;  %v13959_v48 = vld [vmem:[%s27437_s3 + $0x19b0] sm:$0xf] }
 0x377   : > { %7414 = vmatpush.bf16.msra.mxu0 %v12744_v24  ;;  %7344 = vmatpush.bf16.msra.mxu3 %v14592_v58  ;;  %v13828_v24 = vor.u32 %v17967_v42, %v13825_v13  ;;  %v13385_v58 = vld [vmem:[%s27437_s3 + $0x1570] sm:$0xf0]  ;;  %v7132_v61 = vpop.f32.mrf.mxu2  ;;  %v18008_v63 = vld [vmem:[%s27437_s3 + $0x19ec] sm:$0xf0] }
 0x378   : > { %v13388_v28 = vor.u32 %v17856_v54, %v13385_v58  ;;  %v17801_v58 = vld [vmem:[%s27437_s3 + $0x1374] sm:$0xf0]  ;;  %v18159_v61 = vld [vmem:[%s27437_s3 + $0x1eac] sm:$0xf]  ;;  %v13960_v31 = vor.u32 %v18008_v63, %v13959_v48 }
 0x379   : > { %7427 = vmatpush.bf16.msra.mxu1 %v13256_v25  ;;  %7386 = vmatpush.bf16.msrb.mxu2 %v13892_v6  ;;  %v7208_v25 = vpop.f32.mrf.mxu0  ;;  %v7221_v23 = vpop.f32.mrf.mxu1  ;;  %v12879_v48 = vld [vmem:[%s27437_s3 + $0x1138] sm:$0xf] }
 0x37a   : > { %7415 = vmatmul.bf16.vlgmr.msra.gmra.mxu0 %v20959_v7  ;;  %v23350_v16 = vadd.f32 %v7221_v23, %v7208_v25  ;;  %v17817_v25 = vld [vmem:[%s27437_s3 + $0x13f4] sm:$0xf0] }
 0x37b   : > { %7459 = vmatpush.bf16.msrb.mxu0 %v13196_v0  ;;  %7345 = vmatpush.bf16.msra.mxu3 %v14528_v1  ;;  %v17951_v0 = vld [vmem:[%s27437_s3 + $0x182c] sm:$0xf]  ;;  %v17840_v1 = vld [vmem:[%s27437_s3 + $0x14b4] sm:$0xf]  ;;  %v17945_v23 = vld [vmem:[%s27437_s3 + $0x17f4] sm:$0xf0]  ;;  %v13200_v49 = vor.u32 %v17817_v25, %v13199_v39 }
 0x37c   : > { %7428 = vmatmul.bf16.vlgmr.msra.gmra.mxu1 %v21072_v18  ;;  %v17737_v63 = vld [vmem:[%s27437_s3 + $0x1174] sm:$0xf0] }
 0x37d   : > { %7472 = vmatpush.bf16.msrb.mxu1 %v13708_v41  ;;  %v13761_v41 = vld [vmem:[%s27437_s3 + $0x1868] sm:$0xf0]  ;;  %7387 = vmatpush.bf16.msrb.mxu2 %v13828_v24  ;;  %v13257_v24 = vld [vmem:[%s27437_s3 + $0x1470] sm:$0xf0] }
 0x37e   : > { %v13260_v15 = vor.u32 %v17824_v36, %v13257_v24  ;;  %v18127_v36 = vld [vmem:[%s27437_s3 + $0x1dac] sm:$0xf] }
 0x37f   : > { %7460 = vmatpush.bf16.msrb.mxu0 %v13132_v55  ;;  %7346 = vmatpush.bf16.msra.mxu3 %v14464_v26  ;;  %v7091_v55 = vpop.f32.mrf.mxu3  ;;  %v13324_v26 = vor.u32 %v17840_v1, %v13321_v3  ;;  %v17785_v1 = vld [vmem:[%s27437_s3 + $0x12f4] sm:$0xf0]  ;;  %v14465_v24 = vld [vmem:[%s27437_s3 + $0x1de8] sm:$0xf0] }
 0x380   : > { %v23371_v52 = vadd.f32 %v7091_v55, %v23114_v5  ;;  %v17712_v5 = vld [vmem:[%s27437_s3 + $0x10b4] sm:$0xf]  ;;  %v13583_v3 = vld [vmem:[%s27437_s3 + $0x16b8] sm:$0xf] }
 0x381   : > { %7473 = vmatpush.bf16.msrb.mxu1 %v13644_v57  ;;  %v13764_v57 = vor.u32 %v17951_v0, %v13761_v41  ;;  %v7210_v6 = vpop.f32.mrf.mxu0  ;;  %v7223_v42 = vpop.f32.mrf.mxu1  ;;  %v13711_v0 = vld [vmem:[%s27437_s3 + $0x17b8] sm:$0xf] }
 0x382   : > { %v13712_v54 = vor.u32 %v17945_v23, %v13711_v0  ;;  %v18143_v6 = vld [vmem:[%s27437_s3 + $0x1e2c] sm:$0xf]  ;;  %v14468_v23 = vor.u32 %v18127_v36, %v14465_v24  ;;  %v14727_v24 = vld [vmem:[%s27437_s3 + $0x1fb0] sm:$0xf] }
 0x383   : > { %7461 = vmatpush.bf16.msrb.mxu0 %v13068_v30  ;;  %7347 = vmatpush.bf16.msra.mxu3 %v14400_v50  ;;  %v14336_v30 = vor.u32 %v18103_v59, %v14335_v35  ;;  %v18024_v50 = vld [vmem:[%s27437_s3 + $0x1a6c] sm:$0xf0]  ;;  %v13647_v35 = vld [vmem:[%s27437_s3 + $0x1738] sm:$0xf] }
 0x384   : > { %7388 = vmatpush.bf16.msrb.mxu2 %v13764_v57  ;;  %v13135_v57 = vld [vmem:[%s27437_s3 + $0x1338] sm:$0xf] }
 0x385   : > { %7474 = vmatpush.bf16.msrb.mxu1 %v13580_v43  ;;  %v12809_v43 = vld [vmem:[%s27437_s3 + $0x10f0] sm:$0xf0] }
 0x386   : > { %v12812_v13 = vor.u32 %v17712_v5, %v12809_v43  ;;  %v13071_v43 = vld [vmem:[%s27437_s3 + $0x12b8] sm:$0xf] }
 0x387   : > { %7462 = vmatpush.bf16.msrb.mxu0 %v13004_v47  ;;  %v18040_v47 = vld [vmem:[%s27437_s3 + $0x1aec] sm:$0xf0]  ;;  %7348 = vmatpush.bf16.msra.mxu3 %v14336_v30  ;;  %v7093_v17 = vpop.f32.mrf.mxu3  ;;  %v13072_v42 = vor.u32 %v17785_v1, %v13071_v43  ;;  %v17865_v43 = vld [vmem:[%s27437_s3 + $0x1574] sm:$0xf0]  ;;  %v18095_v1 = vld [vmem:[%s27437_s3 + $0x1cac] sm:$0xf] }
 0x388   : > { %7433 = vmatpush.bf16.msra.mxu2 %v14216_v21  ;;  %v14088_v41 = vor.u32 %v18040_v47, %v14087_v9  ;;  %v17929_v21 = vld [vmem:[%s27437_s3 + $0x1774] sm:$0xf0]  ;;  %v13831_v17 = vld [vmem:[%s27437_s3 + $0x18b0] sm:$0xf]  ;;  %v7182_v39 = vpop.f32.mrf.mxu2 }
 0x389   : > { %7475 = vmatpush.bf16.msrb.mxu1 %v13516_v14  ;;  %v17696_v14 = vld [vmem:[%s27437_s3 + $0x1034] sm:$0xf]  ;;  %7389 = vmatmul.bf16.vlgmr.msrb.gmra.mxu2 %v21392_v22  ;;  %v13648_v30 = vor.u32 %v17929_v21, %v13647_v35  ;;  %v13007_v47 = vld [vmem:[%s27437_s3 + $0x1238] sm:$0xf]  ;;  %v23522_v0 = vadd.f32 %v7182_v39, %v23146_v38 }
 0x38a   : > { %v12748_v46 = vor.u32 %v17696_v14, %v12745_v29  ;;  %v17769_v14 = vld [vmem:[%s27437_s3 + $0x1274] sm:$0xf0]  ;;  %v18064_v35 = vld [vmem:[%s27437_s3 + $0x1bb4] sm:$0xf] }
 0x38b   : > { %7463 = vmatpush.bf16.msrb.mxu0 %v12940_v44  ;;  %v18175_v44 = vld [vmem:[%s27437_s3 + $0x1f2c] sm:$0xf]  ;;  %7349 = vmatpush.bf16.msra.mxu3 %v14272_v27  ;;  %v13896_v27 = vor.u32 %v17992_v12, %v13895_v10  ;;  %v17897_v29 = vld [vmem:[%s27437_s3 + $0x1674] sm:$0xf0]  ;;  %v13008_v25 = vor.u32 %v17769_v14, %v13007_v47  ;;  %v18048_v10 = vld [vmem:[%s27437_s3 + $0x1b34] sm:$0xf] }
 0x38c   : > { %7434 = vmatpush.bf16.msra.mxu2 %v14152_v8  ;;  %v14660_v55 = vor.u32 %v18175_v44, %v14657_v45  ;;  %v14529_v8 = vld [vmem:[%s27437_s3 + $0x1e68] sm:$0xf0]  ;;  %v12943_v44 = vld [vmem:[%s27437_s3 + $0x11b8] sm:$0xf]  ;;  %v14153_v12 = vld [vmem:[%s27437_s3 + $0x1b70] sm:$0xf0] }
 0x38d   : > { %7476 = vmatpush.bf16.msrb.mxu1 %v13452_v32  ;;  %v14023_v32 = vld [vmem:[%s27437_s3 + $0x1a30] sm:$0xf]  ;;  %v14532_v9 = vor.u32 %v18143_v6, %v14529_v8  ;;  %v17753_v45 = vld [vmem:[%s27437_s3 + $0x11f4] sm:$0xf0]  ;;  %v12880_v8 = vor.u32 %v17737_v63, %v12879_v48  ;;  %v14156_v36 = vor.u32 %v18048_v10, %v14153_v12  ;;  %v14025_v48 = vld [vmem:[%s27437_s3 + $0x1a70] sm:$0xf0] }
 0x38e   : > { %v14024_v59 = vor.u32 %v18024_v50, %v14023_v32  ;;  %7350 = vmatmul.bf16.vlgmr.msra.gmra.mxu3 %v21607_v33  ;;  %v17881_v38 = vld [vmem:[%s27437_s3 + $0x15f4] sm:$0xf0]  ;;  %v18111_v50 = vld [vmem:[%s27437_s3 + $0x1d2c] sm:$0xf]  ;;  %v18168_v10 = vld [vmem:[%s27437_s3 + $0x1eec] sm:$0xf0] }
 0x38f   : > { %7464 = vmatpush.bf16.msrb.mxu0 %v12876_v62  ;;  %7394 = vmatpush.bf16.msrb.mxu3 %v14724_v37  ;;  %v14593_v62 = vld [vmem:[%s27437_s3 + $0x1ee8] sm:$0xf0]  ;;  %v17976_v37 = vld [vmem:[%s27437_s3 + $0x18ec] sm:$0xf0]  ;;  %v13327_v47 = vld [vmem:[%s27437_s3 + $0x14b8] sm:$0xf] }
 0x390   : > { %7435 = vmatpush.bf16.msra.mxu2 %v14088_v41  ;;  %v14596_v5 = vor.u32 %v18159_v61, %v14593_v62  ;;  %v13832_v32 = vor.u32 %v17976_v37, %v13831_v17  ;;  %v7184_v6 = vpop.f32.mrf.mxu2  ;;  %v17849_v14 = vld [vmem:[%s27437_s3 + $0x14f4] sm:$0xf0]  ;;  %v18200_v17 = vld [vmem:[%s27437_s3 + $0x1fec] sm:$0xf0]  ;;  %v18000_v12 = vld [vmem:[%s27437_s3 + $0x19b4] sm:$0xf] }
 0x391   : > { %7477 = vmatpush.bf16.msrb.mxu1 %v13388_v28  ;;  %v13136_v28 = vor.u32 %v17801_v58, %v13135_v57  ;;  %v12944_v58 = vor.u32 %v17753_v45, %v12943_v44  ;;  %v13328_v44 = vor.u32 %v17849_v14, %v13327_v47  ;;  %v13649_v6 = vld [vmem:[%s27437_s3 + $0x1778] sm:$0xf0] }
 0x392   : > { %v17777_v47 = vld [vmem:[%s27437_s3 + $0x12bc] sm:$0xf] }
 0x393   : > { %7465 = vmatpush.bf16.msrb.mxu0 %v12812_v13  ;;  %7395 = vmatpush.bf16.msrb.mxu3 %v14660_v55  ;;  %v13584_v13 = vor.u32 %v17913_v4, %v13583_v3  ;;  %v17960_v55 = vld [vmem:[%s27437_s3 + $0x186c] sm:$0xf0]  ;;  %v14337_v3 = vld [vmem:[%s27437_s3 + $0x1ce8] sm:$0xf0]  ;;  %v13073_v14 = vld [vmem:[%s27437_s3 + $0x12f8] sm:$0xf0] }
 0x394   : > { %7436 = vmatpush.bf16.msra.mxu2 %v14024_v59  ;;  %v14217_v59 = vld [vmem:[%s27437_s3 + $0x1bf0] sm:$0xf0] }
 0x395   : > { %7478 = vmatpush.bf16.msrb.mxu1 %v13324_v26  ;;  %v13519_v26 = vld [vmem:[%s27437_s3 + $0x1638] sm:$0xf]  ;;  %v14220_v4 = vor.u32 %v18064_v35, %v14217_v59  ;;  %v14663_v35 = vld [vmem:[%s27437_s3 + $0x1f30] sm:$0xf] }
 0x396   : > { %v13520_v41 = vor.u32 %v17897_v29, %v13519_v26  ;;  %v18079_v26 = vld [vmem:[%s27437_s3 + $0x1c2c] sm:$0xf]  ;;  %v18184_v59 = vld [vmem:[%s27437_s3 + $0x1f6c] sm:$0xf0] }
 0x397   : > { %7466 = vmatpush.bf16.msrb.mxu0 %v12748_v46  ;;  %7396 = vmatpush.bf16.msrb.mxu3 %v14596_v5  ;;  %v13455_v46 = vld [vmem:[%s27437_s3 + $0x15b8] sm:$0xf] }
 0x398   : > { %7437 = vmatpush.bf16.msra.mxu2 %v13960_v31  ;;  %v13456_v61 = vor.u32 %v17881_v38, %v13455_v46  ;;  %v17705_v46 = vld [vmem:[%s27437_s3 + $0x1074] sm:$0xf0] }
 0x399   : > { %7479 = vmatpush.bf16.msrb.mxu1 %v13260_v15  ;;  %v14401_v15 = vld [vmem:[%s27437_s3 + $0x1d68] sm:$0xf0]  ;;  %v7273_v57 = vpop.f32.mrf.mxu1  ;;  %v17833_v38 = vld [vmem:[%s27437_s3 + $0x1474] sm:$0xf0] }
 0x39a   : > { %7467 = vmatmul.bf16.vlgmr.msrb.gmra.mxu0 %v20959_v7  ;;  %v14404_v62 = vor.u32 %v18111_v50, %v14401_v15  ;;  %v14728_v15 = vor.u32 %v18200_v17, %v14727_v24  ;;  %v18152_v24 = vld [vmem:[%s27437_s3 + $0x1e6c] sm:$0xf0]  ;;  %v17984_v17 = vld [vmem:[%s27437_s3 + $0x1934] sm:$0xf] }
 0x39b   : > { %7511 = vmatpush.bf16.msra.mxu0 %v13200_v49  ;;  %7397 = vmatpush.bf16.msrb.mxu3 %v14532_v9  ;;  %v7260_v49 = vpop.f32.mrf.mxu0  ;;  %v17721_v9 = vld [vmem:[%s27437_s3 + $0x10f4] sm:$0xf0] }
 0x39c   : > { %7480 = vmatmul.bf16.vlgmr.msrb.gmra.mxu1 %v21072_v18  ;;  %7438 = vmatpush.bf16.msra.mxu2 %v13896_v27  ;;  %v23554_v21 = vadd.f32 %v7273_v57, %v7260_v49  ;;  %v14273_v27 = vld [vmem:[%s27437_s3 + $0x1c68] sm:$0xf0]  ;;  %v17809_v49 = vld [vmem:[%s27437_s3 + $0x13bc] sm:$0xf] }
 0x39d   : > { %7524 = vmatpush.bf16.msra.mxu1 %v13712_v54  ;;  %v13767_v54 = vld [vmem:[%s27437_s3 + $0x1830] sm:$0xf]  ;;  %v14276_v45 = vor.u32 %v18079_v26, %v14273_v27  ;;  %v17905_v26 = vld [vmem:[%s27437_s3 + $0x16bc] sm:$0xf] }
 0x39e   : > { %v13768_v5 = vor.u32 %v17960_v55, %v13767_v54  ;;  %v13201_v54 = vld [vmem:[%s27437_s3 + $0x13f8] sm:$0xf0] }
 0x39f   : > { %7512 = vmatpush.bf16.msra.mxu0 %v13136_v28  ;;  %7398 = vmatpush.bf16.msrb.mxu3 %v14468_v23  ;;  %v13391_v28 = vld [vmem:[%s27437_s3 + $0x1538] sm:$0xf]  ;;  %v17937_v55 = vld [vmem:[%s27437_s3 + $0x17bc] sm:$0xf] }
 0x3a0   : > { %7439 = vmatpush.bf16.msra.mxu2 %v13832_v32  ;;  %v12751_v23 = vld [vmem:[%s27437_s3 + $0x1038] sm:$0xf] }
 0x3a1   : > { %7525 = vmatpush.bf16.msra.mxu1 %v13648_v30  ;;  %v7143_v30 = vpop.f32.mrf.mxu3  ;;  %v7275_v37 = vpop.f32.mrf.mxu1  ;;  %v13263_v32 = vld [vmem:[%s27437_s3 + $0x1438] sm:$0xf] }
 0x3a2   : > { %v23575_v31 = vadd.f32 %v7143_v30, %v23318_v60  ;;  %v12815_v60 = vld [vmem:[%s27437_s3 + $0x10b8] sm:$0xf]  ;;  %v13264_v63 = vor.u32 %v17833_v38, %v13263_v32  ;;  %v13897_v37 = vld [vmem:[%s27437_s3 + $0x1970] sm:$0xf0]  ;;  %v13521_v32 = vld [vmem:[%s27437_s3 + $0x1678] sm:$0xf0] }
 0x3a3   : > { %7513 = vmatpush.bf16.msra.mxu0 %v13072_v42  ;;  %7399 = vmatpush.bf16.msrb.mxu3 %v14404_v62  ;;  %v13392_v42 = vor.u32 %v17865_v43, %v13391_v28  ;;  %v7262_v29 = vpop.f32.mrf.mxu0  ;;  %v12816_v39 = vor.u32 %v17721_v9, %v12815_v60  ;;  %v18016_v62 = vld [vmem:[%s27437_s3 + $0x1a34] sm:$0xf]  ;;  %v13204_v28 = vor.u32 %v17809_v49, %v13201_v54  ;;  %v17793_v43 = vld [vmem:[%s27437_s3 + $0x133c] sm:$0xf]  ;;  %v14471_v38 = vld [vmem:[%s27437_s3 + $0x1db0] sm:$0xf] }
 0x3a4   : > { %7440 = vmatpush.bf16.msra.mxu2 %v13768_v5  ;;  %v14664_v5 = vor.u32 %v18184_v59, %v14663_v35  ;;  %v13585_v29 = vld [vmem:[%s27437_s3 + $0x16f8] sm:$0xf0]  ;;  %v13833_v49 = vld [vmem:[%s27437_s3 + $0x18f0] sm:$0xf0] }
 0x3a5   : > { %7526 = vmatpush.bf16.msra.mxu1 %v13584_v13  ;;  %v14340_v13 = vor.u32 %v18095_v1, %v14337_v3  ;;  %v13137_v1 = vld [vmem:[%s27437_s3 + $0x1378] sm:$0xf0] }
 0x3a6   : > { %v17921_v3 = vld [vmem:[%s27437_s3 + $0x173c] sm:$0xf]  ;;  %v7234_v54 = vpop.f32.mrf.mxu2 }
 0x3a7   : > { %7514 = vmatpush.bf16.msra.mxu0 %v13008_v25  ;;  %v18032_v25 = vld [vmem:[%s27437_s3 + $0x1ab4] sm:$0xf]  ;;  %7400 = vmatpush.bf16.msrb.mxu3 %v14340_v13  ;;  %v13140_v13 = vor.u32 %v17793_v43, %v13137_v1  ;;  %v13652_v60 = vor.u32 %v17921_v3, %v13649_v6  ;;  %v17745_v59 = vld [vmem:[%s27437_s3 + $0x11bc] sm:$0xf]  ;;  %v18073_v6 = vld [vmem:[%s27437_s3 + $0x1bf4] sm:$0xf0] }
 0x3a8   : > { %7485 = vmatpush.bf16.msrb.mxu2 %v14220_v4  ;;  %v14028_v4 = vor.u32 %v18016_v62, %v14025_v48  ;;  %v17873_v62 = vld [vmem:[%s27437_s3 + $0x15bc] sm:$0xf]  ;;  %v13769_v43 = vld [vmem:[%s27437_s3 + $0x1870] sm:$0xf0] }
 0x3a9   : > { %7527 = vmatpush.bf16.msra.mxu1 %v13520_v41  ;;  %v14089_v41 = vld [vmem:[%s27437_s3 + $0x1af0] sm:$0xf0]  ;;  %v7145_v50 = vpop.f32.mrf.mxu3  ;;  %7441 = vmatmul.bf16.vlgmr.msra.gmra.mxu2 %v21392_v22 }
 0x3aa   : > { %v14092_v57 = vor.u32 %v18032_v25, %v14089_v41  ;;  %v13588_v25 = vor.u32 %v17905_v26, %v13585_v29  ;;  %v18136_v50 = vld [vmem:[%s27437_s3 + $0x1dec] sm:$0xf0] }
 0x3ab   : > { %7515 = vmatpush.bf16.msra.mxu0 %v12944_v58  ;;  %v13713_v58 = vld [vmem:[%s27437_s3 + $0x17f8] sm:$0xf0]  ;;  %7401 = vmatpush.bf16.msrb.mxu3 %v14276_v45  ;;  %v14472_v35 = vor.u32 %v18136_v50, %v14471_v38  ;;  %v14343_v26 = vld [vmem:[%s27437_s3 + $0x1cb0] sm:$0xf] }
 0x3ac   : > { %7486 = vmatpush.bf16.msrb.mxu2 %v14156_v36  ;;  %v13716_v30 = vor.u32 %v17937_v55, %v13713_v58  ;;  %v14535_v36 = vld [vmem:[%s27437_s3 + $0x1e30] sm:$0xf]  ;;  %v17889_v45 = vld [vmem:[%s27437_s3 + $0x163c] sm:$0xf] }
 0x3ad   : > { %7528 = vmatpush.bf16.msra.mxu1 %v13456_v61  ;;  %v12752_v61 = vor.u32 %v17705_v46, %v12751_v23  ;;  %v14536_v41 = vor.u32 %v18152_v24, %v14535_v36  ;;  %v17761_v23 = vld [vmem:[%s27437_s3 + $0x123c] sm:$0xf]  ;;  %v13900_v46 = vor.u32 %v17984_v17, %v13897_v37  ;;  %v13524_v58 = vor.u32 %v17889_v45, %v13521_v32  ;;  %v14159_v37 = vld [vmem:[%s27437_s3 + $0x1b38] sm:$0xf]  ;;  %v18088_v32 = vld [vmem:[%s27437_s3 + $0x1c6c] sm:$0xf0] }
 0x3ae   : > { %7402 = vmatmul.bf16.vlgmr.msrb.gmra.mxu3 %v21607_v33  ;;  %v7236_v24 = vpop.f32.mrf.mxu2  ;;  %v13329_v45 = vld [vmem:[%s27437_s3 + $0x14f8] sm:$0xf0] }
 0x3af   : > { %7516 = vmatpush.bf16.msra.mxu0 %v12880_v8  ;;  %7446 = vmatpush.bf16.msra.mxu3 %v14728_v15  ;;  %v14599_v8 = vld [vmem:[%s27437_s3 + $0x1eb0] sm:$0xf]  ;;  %v17968_v15 = vld [vmem:[%s27437_s3 + $0x18b4] sm:$0xf] }
 0x3b0   : > { %7487 = vmatpush.bf16.msrb.mxu2 %v14092_v57  ;;  %v14600_v9 = vor.u32 %v18168_v10, %v14599_v8  ;;  %v23726_v57 = vadd.f32 %v7234_v54, %v23350_v16  ;;  %v13836_v48 = vor.u32 %v17968_v15, %v13833_v49  ;;  %v13457_v16 = vld [vmem:[%s27437_s3 + $0x15f8] sm:$0xf0]  ;;  %v18192_v15 = vld [vmem:[%s27437_s3 + $0x1fb4] sm:$0xf] }
 0x3b1   : > { %7529 = vmatpush.bf16.msra.mxu1 %v13392_v42  ;;  %v13961_v42 = vld [vmem:[%s27437_s3 + $0x19f0] sm:$0xf0]  ;;  %v13460_v10 = vor.u32 %v17873_v62, %v13457_v16  ;;  %v17825_v16 = vld [vmem:[%s27437_s3 + $0x143c] sm:$0xf] }
 0x3b2   : > { %v13964_v27 = vor.u32 %v18000_v12, %v13961_v42  ;;  %v17729_v42 = vld [vmem:[%s27437_s3 + $0x113c] sm:$0xf]  ;;  %v14729_v49 = vld [vmem:[%s27437_s3 + $0x1ff0] sm:$0xf0] }
 0x3b3   : > { %7517 = vmatpush.bf16.msra.mxu0 %v12816_v39  ;;  %7447 = vmatpush.bf16.msra.mxu3 %v14664_v5  ;;  %v13076_v39 = vor.u32 %v17777_v47, %v13073_v14  ;;  %v17952_v5 = vld [vmem:[%s27437_s3 + $0x1834] sm:$0xf]  ;;  %v13393_v14 = vld [vmem:[%s27437_s3 + $0x1578] sm:$0xf0] }
 0x3b4   : > { %7488 = vmatpush.bf16.msrb.mxu2 %v14028_v4  ;;  %v14223_v4 = vld [vmem:[%s27437_s3 + $0x1bb8] sm:$0xf]  ;;  %v13772_v47 = vor.u32 %v17952_v5, %v13769_v43  ;;  %v15191_v5 = vld [vmem:[%s27437_s3 + $0x380] sm:$0xf] }
 0x3b5   : > { %7530 = vmatpush.bf16.msra.mxu1 %v13328_v44  ;;  %v13009_v44 = vld [vmem:[%s27437_s3 + $0x1278] sm:$0xf0]  ;;  %v14224_v36 = vor.u32 %v18073_v6, %v14223_v4  ;;  %v17106_v43 = vld [vmem:[%s27437_s3 + $0x3bc] sm:$0xf0]  ;;  %v18176_v6 = vld [vmem:[%s27437_s3 + $0x1f34] sm:$0xf] }
 0x3b6   : > { %v13012_v55 = vor.u32 %v17761_v23, %v13009_v44  ;;  %v12817_v23 = vld [vmem:[%s27437_s3 + $0x10f8] sm:$0xf0]  ;;  %v17234_v4 = vld [vmem:[%s27437_s3 + $0x7bc] sm:$0xf0] }
 0x3b7   : > { %7518 = vmatpush.bf16.msra.mxu0 %v12752_v61  ;;  %7448 = vmatpush.bf16.msra.mxu3 %v14600_v9  ;;  %v12945_v61 = vld [vmem:[%s27437_s3 + $0x11f8] sm:$0xf0]  ;;  %v7195_v9 = vpop.f32.mrf.mxu3 }
 0x3b8   : > { %7489 = vmatpush.bf16.msrb.mxu2 %v13964_v27  ;;  %v12948_v3 = vor.u32 %v17745_v59, %v12945_v61  ;;  %v18104_v27 = vld [vmem:[%s27437_s3 + $0x1cec] sm:$0xf0]  ;;  %v23779_v29 = vadd.f32 %v7195_v9, %v23522_v0  ;;  %v17713_v0 = vld [vmem:[%s27437_s3 + $0x10bc] sm:$0xf]  ;;  %v15192_v9 = vor.u32 %v17106_v43, %v15191_v5 }
 0x3b9   : > { %7531 = vmatpush.bf16.msra.mxu1 %v13264_v63  ;;  %v14407_v63 = vld [vmem:[%s27437_s3 + $0x1d30] sm:$0xf]  ;;  %v7325_v1 = vpop.f32.mrf.mxu1  ;;  %v17841_v44 = vld [vmem:[%s27437_s3 + $0x14bc] sm:$0xf] }
 0x3ba   : > { %7519 = vmatmul.bf16.vlgmr.msra.gmra.mxu0 %v20959_v7  ;;  %v17697_v59 = vld [vmem:[%s27437_s3 + $0x103c] sm:$0xf]  ;;  %v13332_v61 = vor.u32 %v17841_v44, %v13329_v45  ;;  %v15063_v45 = vld [vmem:[%s27437_s3 + $0x280] sm:$0xf] }
 0x3bb   : > { %7563 = vmatpush.bf16.msrb.mxu0 %v13204_v28  ;;  %7449 = vmatpush.bf16.msra.mxu3 %v14536_v41  ;;  %v18120_v28 = vld [vmem:[%s27437_s3 + $0x1d6c] sm:$0xf0]  ;;  %v14344_v41 = vor.u32 %v18104_v27, %v14343_v26  ;;  %v15127_v26 = vld [vmem:[%s27437_s3 + $0x300] sm:$0xf] }
 0x3bc   : > { %7532 = vmatmul.bf16.vlgmr.msra.gmra.mxu1 %v21072_v18  ;;  %7490 = vmatpush.bf16.msrb.mxu2 %v13900_v46  ;;  %v14408_v12 = vor.u32 %v18120_v28, %v14407_v63  ;;  %v14279_v46 = vld [vmem:[%s27437_s3 + $0x1c30] sm:$0xf]  ;;  %v13265_v63 = vld [vmem:[%s27437_s3 + $0x1478] sm:$0xf0]  ;;  %v17090_v27 = vld [vmem:[%s27437_s3 + $0x33c] sm:$0xf0] }
 0x3bd   : > { %7576 = vmatpush.bf16.msrb.mxu1 %v13716_v30  ;;  %v7312_v30 = vpop.f32.mrf.mxu0  ;;  %v14280_v62 = vor.u32 %v18088_v32, %v14279_v46  ;;  %v17074_v46 = vld [vmem:[%s27437_s3 + $0x2bc] sm:$0xf0] }
 0x3be   : > { %v23758_v8 = vadd.f32 %v7325_v1, %v7312_v30  ;;  %v14732_v30 = vor.u32 %v18192_v15, %v14729_v49  ;;  %v15703_v1 = vld [vmem:[%s27437_s3 + $0x780] sm:$0xf]  ;;  %v18144_v15 = vld [vmem:[%s27437_s3 + $0x1e34] sm:$0xf] }
 0x3bf   : > { %7564 = vmatpush.bf16.msrb.mxu0 %v13140_v13  ;;  %7450 = vmatpush.bf16.msra.mxu3 %v14472_v35  ;;  %v12881_v13 = vld [vmem:[%s27437_s3 + $0x1178] sm:$0xf0]  ;;  %v18041_v35 = vld [vmem:[%s27437_s3 + $0x1af4] sm:$0xf0]  ;;  %v7197_v28 = vpop.f32.mrf.mxu3  ;;  %v15575_v32 = vld [vmem:[%s27437_s3 + $0x680] sm:$0xf] }
 0x3c0   : > { %7491 = vmatpush.bf16.msrb.mxu2 %v13836_v48  ;;  %v12884_v17 = vor.u32 %v17729_v42, %v12881_v13  ;;  %v12753_v48 = vld [vmem:[%s27437_s3 + $0x1078] sm:$0xf0]  ;;  %v14031_v42 = vld [vmem:[%s27437_s3 + $0x1a38] sm:$0xf]  ;;  %v14537_v49 = vld [vmem:[%s27437_s3 + $0x1e70] sm:$0xf0] }
 0x3c1   : > { %7577 = vmatpush.bf16.msrb.mxu1 %v13652_v60  ;;  %v17857_v60 = vld [vmem:[%s27437_s3 + $0x153c] sm:$0xf]  ;;  %v7327_v54 = vpop.f32.mrf.mxu1  ;;  %v18025_v13 = vld [vmem:[%s27437_s3 + $0x1a74] sm:$0xf0] }
 0x3c2   : > { %v14032_v24 = vor.u32 %v18025_v13, %v14031_v42  ;;  %v17993_v54 = vld [vmem:[%s27437_s3 + $0x1974] sm:$0xf0]  ;;  %v18112_v13 = vld [vmem:[%s27437_s3 + $0x1d34] sm:$0xf] }
 0x3c3   : > { %7565 = vmatpush.bf16.msrb.mxu0 %v13076_v39  ;;  %v18057_v39 = vld [vmem:[%s27437_s3 + $0x1b74] sm:$0xf0]  ;;  %7451 = vmatpush.bf16.msra.mxu3 %v14408_v12  ;;  %v12756_v12 = vor.u32 %v17697_v59, %v12753_v48  ;;  %v14999_v59 = vld [vmem:[%s27437_s3 + $0x200] sm:$0xf] }
 0x3c4   : > { %7492 = vmatpush.bf16.msrb.mxu2 %v13772_v47  ;;  %v14160_v50 = vor.u32 %v18057_v39, %v14159_v37  ;;  %v15704_v47 = vor.u32 %v17234_v4, %v15703_v1  ;;  %v18160_v37 = vld [vmem:[%s27437_s3 + $0x1eb4] sm:$0xf]  ;;  %v17186_v48 = vld [vmem:[%s27437_s3 + $0x63c] sm:$0xf0]  ;;  %v13839_v28 = vld [vmem:[%s27437_s3 + $0x18b8] sm:$0xf] }
 0x3c5   : > { %7578 = vmatpush.bf16.msrb.mxu1 %v13588_v25  ;;  %v13396_v25 = vor.u32 %v17857_v60, %v13393_v14  ;;  %v7314_v38 = vpop.f32.mrf.mxu0  ;;  %v13268_v60 = vor.u32 %v17825_v16, %v13265_v63  ;;  %v14601_v39 = vld [vmem:[%s27437_s3 + $0x1ef0] sm:$0xf0] }
 0x3c6   : > { %v14604_v44 = vor.u32 %v18160_v37, %v14601_v39  ;;  %v18128_v16 = vld [vmem:[%s27437_s3 + $0x1db4] sm:$0xf]  ;;  %v7286_v5 = vpop.f32.mrf.mxu2 }
 0x3c7   : > { %7566 = vmatpush.bf16.msrb.mxu0 %v13012_v55  ;;  %v12820_v55 = vor.u32 %v17713_v0, %v12817_v23  ;;  %7452 = vmatpush.bf16.msra.mxu3 %v14344_v41  ;;  %v18009_v41 = vld [vmem:[%s27437_s3 + $0x19f4] sm:$0xf0]  ;;  %v15128_v0 = vor.u32 %v17090_v27, %v15127_v26  ;;  %v14473_v63 = vld [vmem:[%s27437_s3 + $0x1df0] sm:$0xf0]  ;;  %v23930_v1 = vadd.f32 %v7286_v5, %v23554_v21  ;;  %v17170_v21 = vld [vmem:[%s27437_s3 + $0x5bc] sm:$0xf0] }
 0x3c8   : > { %7537 = vmatpush.bf16.msra.mxu2 %v14224_v36  ;;  %v15639_v36 = vld [vmem:[%s27437_s3 + $0x700] sm:$0xf]  ;;  %v14476_v4 = vor.u32 %v18128_v16, %v14473_v63  ;;  %v14735_v63 = vld [vmem:[%s27437_s3 + $0x1fb8] sm:$0xf] }
 0x3c9   : > { %7579 = vmatpush.bf16.msrb.mxu1 %v13524_v58  ;;  %v14095_v58 = vld [vmem:[%s27437_s3 + $0x1ab8] sm:$0xf]  ;;  %7493 = vmatmul.bf16.vlgmr.msrb.gmra.mxu2 %v21392_v22 }
 0x3cb   : > { %7567 = vmatpush.bf16.msrb.mxu0 %v12948_v3  ;;  %v14096_v3 = vor.u32 %v18041_v35, %v14095_v58  ;;  %7453 = vmatpush.bf16.msra.mxu3 %v14280_v62  ;;  %v14540_v35 = vor.u32 %v18144_v15, %v14537_v49 }
 0x3cc   : > { %7538 = vmatpush.bf16.msra.mxu2 %v14160_v50  ;;  %v17202_v50 = vld [vmem:[%s27437_s3 + $0x6bc] sm:$0xf0] }
 0x3cd   : > { %7580 = vmatpush.bf16.msrb.mxu1 %v13460_v10  ;;  %v14665_v10 = vld [vmem:[%s27437_s3 + $0x1f70] sm:$0xf0]  ;;  %v15576_v58 = vor.u32 %v17202_v50, %v15575_v32 }
 0x3ce   : > { %v14668_v14 = vor.u32 %v18176_v6, %v14665_v10  ;;  %7454 = vmatmul.bf16.vlgmr.msra.gmra.mxu3 %v21607_v33  ;;  %v14935_v6 = vld [vmem:[%s27437_s3 + $0x180] sm:$0xf]  ;;  %v14345_v32 = vld [vmem:[%s27437_s3 + $0x1cf0] sm:$0xf0]  ;;  %v7288_v15 = vpop.f32.mrf.mxu2 }
 0x3cf   : > { %7568 = vmatpush.bf16.msrb.mxu0 %v12884_v17  ;;  %7498 = vmatpush.bf16.msrb.mxu3 %v14732_v30  ;;  %v17218_v17 = vld [vmem:[%s27437_s3 + $0x73c] sm:$0xf0]  ;;  %v17977_v30 = vld [vmem:[%s27437_s3 + $0x18f4] sm:$0xf0]  ;;  %v15641_v15 = vld [vmem:[%s27437_s3 + $0x740] sm:$0xf0] }
 0x3d0   : > { %7539 = vmatpush.bf16.msra.mxu2 %v14096_v3  ;;  %v15640_v23 = vor.u32 %v17218_v17, %v15639_v36  ;;  %v17042_v10 = vld [vmem:[%s27437_s3 + $0x1bc] sm:$0xf0]  ;;  %v13840_v42 = vor.u32 %v17977_v30, %v13839_v28  ;;  %v18065_v36 = vld [vmem:[%s27437_s3 + $0x1bbc] sm:$0xf]  ;;  %v18201_v28 = vld [vmem:[%s27437_s3 + $0x1ff4] sm:$0xf0] }
 0x3d1   : > { %7581 = vmatpush.bf16.msrb.mxu1 %v13396_v25  ;;  %v13967_v25 = vld [vmem:[%s27437_s3 + $0x19b8] sm:$0xf]  ;;  %v14936_v27 = vor.u32 %v17042_v10, %v14935_v6 }
 0x3d2   : > { %v13968_v38 = vor.u32 %v18009_v41, %v13967_v25  ;;  %v14871_v25 = vld [vmem:[%s27437_s3 + $0x100] sm:$0xf] }
 0x3d3   : > { %7569 = vmatpush.bf16.msrb.mxu0 %v12820_v55  ;;  %7499 = vmatpush.bf16.msrb.mxu3 %v14668_v14  ;;  %v15064_v55 = vor.u32 %v17074_v46, %v15063_v45  ;;  %v17961_v14 = vld [vmem:[%s27437_s3 + $0x1874] sm:$0xf0]  ;;  %v17026_v41 = vld [vmem:[%s27437_s3 + $0x13c] sm:$0xf0]  ;;  %v18096_v46 = vld [vmem:[%s27437_s3 + $0x1cb4] sm:$0xf] }
 0x3d4   : > { %7540 = vmatpush.bf16.msra.mxu2 %v14032_v24  ;;  %v14225_v24 = vld [vmem:[%s27437_s3 + $0x1bf8] sm:$0xf0]  ;;  %v17154_v45 = vld [vmem:[%s27437_s3 + $0x53c] sm:$0xf0]  ;;  %v14872_v49 = vor.u32 %v17026_v41, %v14871_v25  ;;  %v1709_v41 = vmax.f32 %v19708_v2, 0.0 }
 0x3d5   : > { %7582 = vmatpush.bf16.msrb.mxu1 %v13332_v61  ;;  %v15511_v61 = vld [vmem:[%s27437_s3 + $0x600] sm:$0xf]  ;;  %v14228_v50 = vor.u32 %v18065_v36, %v14225_v24  ;;  %v14671_v36 = vld [vmem:[%s27437_s3 + $0x1f38] sm:$0xf]  ;;  %v14033_v25 = vld [vmem:[%s27437_s3 + $0x1a78] sm:$0xf0] }
 0x3d6   : > { %v15512_v3 = vor.u32 %v17186_v48, %v15511_v61  ;;  %v18080_v61 = vld [vmem:[%s27437_s3 + $0x1c34] sm:$0xf]  ;;  %v18185_v24 = vld [vmem:[%s27437_s3 + $0x1f74] sm:$0xf0]  ;;  %v17210_v2 = vld [vmem:[%s27437_s3 + $0x704] sm:$0xf] }
 0x3d7   : > { %7570 = vmatpush.bf16.msrb.mxu0 %v12756_v12  ;;  %7500 = vmatpush.bf16.msrb.mxu3 %v14604_v44  ;;  %v15447_v12 = vld [vmem:[%s27437_s3 + $0x580] sm:$0xf] }
 0x3d8   : > { %7541 = vmatpush.bf16.msra.mxu2 %v13968_v38  ;;  %v15448_v37 = vor.u32 %v17170_v21, %v15447_v12  ;;  %v16994_v12 = vld [vmem:[%s27437_s3 + $0x3c] sm:$0xf0] }
 0x3d9   : > { %7583 = vmatpush.bf16.msrb.mxu1 %v13268_v60  ;;  %v14409_v60 = vld [vmem:[%s27437_s3 + $0x1d70] sm:$0xf0]  ;;  %v7377_v26 = vpop.f32.mrf.mxu1  ;;  %v17122_v21 = vld [vmem:[%s27437_s3 + $0x43c] sm:$0xf0] }
 0x3da   : > { %7571 = vmatmul.bf16.vlgmr.msrb.gmra.mxu0 %v20959_v7  ;;  %v13903_v7 = vld [vmem:[%s27437_s3 + $0x1938] sm:$0xf]  ;;  %v14412_v39 = vor.u32 %v18112_v13, %v14409_v60  ;;  %v14736_v60 = vor.u32 %v18201_v28, %v14735_v63  ;;  %v15577_v63 = vld [vmem:[%s27437_s3 + $0x6c0] sm:$0xf0] }
 0x3db   : > { %10175 = vmatpush.bf16.msra.mxu0 %v15192_v9  ;;  %v13904_v62 = vor.u32 %v17993_v54, %v13903_v7  ;;  %7501 = vmatpush.bf16.msrb.mxu3 %v14540_v35  ;;  %v7364_v9 = vpop.f32.mrf.mxu0  ;;  %v18049_v7 = vld [vmem:[%s27437_s3 + $0x1b3c] sm:$0xf]  ;;  %v17010_v35 = vld [vmem:[%s27437_s3 + $0xbc] sm:$0xf0]  ;;  %v14543_v28 = vld [vmem:[%s27437_s3 + $0x1e38] sm:$0xf] }
 0x3dc   : > { %7584 = vmatmul.bf16.vlgmr.msrb.gmra.mxu1 %v21072_v18  ;;  %v17058_v18 = vld [vmem:[%s27437_s3 + $0x23c] sm:$0xf0]  ;;  %v23962_v17 = vadd.f32 %v7377_v26, %v7364_v9  ;;  %v14161_v54 = vld [vmem:[%s27437_s3 + $0x1b78] sm:$0xf0]  ;;  %v17098_v9 = vld [vmem:[%s27437_s3 + $0x384] sm:$0xf] }
 0x3dd   : > { %10188 = vmatpush.bf16.msra.mxu1 %v15704_v47  ;;  %v15000_v43 = vor.u32 %v17058_v18, %v14999_v59  ;;  %7542 = vmatpush.bf16.msra.mxu2 %v13904_v62  ;;  %v13775_v47 = vld [vmem:[%s27437_s3 + $0x1838] sm:$0xf]  ;;  %v15319_v59 = vld [vmem:[%s27437_s3 + $0x480] sm:$0xf]  ;;  %v14281_v62 = vld [vmem:[%s27437_s3 + $0x1c70] sm:$0xf0]  ;;  %v14164_v16 = vor.u32 %v18049_v7, %v14161_v54 }
 0x3de   : > { %v13776_v44 = vor.u32 %v17961_v14, %v13775_v47  ;;  %v17138_v18 = vld [vmem:[%s27437_s3 + $0x4bc] sm:$0xf0]  ;;  %v14284_v10 = vor.u32 %v18080_v61, %v14281_v62  ;;  %v15193_v47 = vld [vmem:[%s27437_s3 + $0x3c0] sm:$0xf0]  ;;  %v18169_v7 = vld [vmem:[%s27437_s3 + $0x1ef4] sm:$0xf0] }
 0x3df   : > { %10176 = vmatpush.bf16.msra.mxu0 %v15128_v0  ;;  %7502 = vmatpush.bf16.msrb.mxu3 %v14476_v4  ;;  %v15383_v0 = vld [vmem:[%s27437_s3 + $0x500] sm:$0xf]  ;;  %v15320_v6 = vor.u32 %v17138_v18, %v15319_v59  ;;  %v17226_v14 = vld [vmem:[%s27437_s3 + $0x784] sm:$0xf]  ;;  %v18001_v54 = vld [vmem:[%s27437_s3 + $0x19bc] sm:$0xf]  ;;  %v15644_v59 = vor.u32 %v17210_v2, %v15641_v15 }
 0x3e0   : > { %v14743_v4 = vld [vmem:[%s27437_s3] sm:$0xf]  ;;  %v17066_v61 = vld [vmem:[%s27437_s3 + $0x284] sm:$0xf] }
 0x3e1   : > { %10189 = vmatpush.bf16.msra.mxu1 %v15640_v23  ;;  %v7247_v23 = vpop.f32.mrf.mxu3  ;;  %7543 = vmatpush.bf16.msra.mxu2 %v13840_v42  ;;  %v7379_v30 = vpop.f32.mrf.mxu1  ;;  %v15255_v42 = vld [vmem:[%s27437_s3 + $0x400] sm:$0xf]  ;;  %v15065_v62 = vld [vmem:[%s27437_s3 + $0x2c0] sm:$0xf0] }
 0x3e2   : > { %v23983_v38 = vadd.f32 %v7247_v23, %v23726_v57  ;;  %v14807_v57 = vld [vmem:[%s27437_s3 + $0x80] sm:$0xf]  ;;  %v15256_v23 = vor.u32 %v17122_v21, %v15255_v42  ;;  %v18153_v30 = vld [vmem:[%s27437_s3 + $0x1e74] sm:$0xf0]  ;;  %v17178_v42 = vld [vmem:[%s27437_s3 + $0x604] sm:$0xf] }
 0x3e3   : > { %10177 = vmatpush.bf16.msra.mxu0 %v15064_v55  ;;  %7503 = vmatpush.bf16.msrb.mxu3 %v14412_v39  ;;  %v15384_v55 = vor.u32 %v17154_v45, %v15383_v0  ;;  %v7366_v48 = vpop.f32.mrf.mxu0  ;;  %v14808_v5 = vor.u32 %v17010_v35, %v14807_v57  ;;  %v18017_v39 = vld [vmem:[%s27437_s3 + $0x1a3c] sm:$0xf]  ;;  %v1710_v0 = vmax.f32 %v19940_v19, 0.0  ;;  %v17362_v15 = vld [vmem:[%s27437_s3 + $0xbbc] sm:$0xf0] }
 0x3e4   : > { %v14036_v19 = vor.u32 %v18017_v39, %v14033_v25  ;;  %v17194_v48 = vld [vmem:[%s27437_s3 + $0x684] sm:$0xf] }
 0x3e5   : > { %10190 = vmatpush.bf16.msra.mxu1 %v15576_v58  ;;  %v14348_v58 = vor.u32 %v18096_v46, %v14345_v32  ;;  %7544 = vmatpush.bf16.msra.mxu2 %v13776_v44  ;;  %v15196_v44 = vor.u32 %v17098_v9, %v15193_v47  ;;  %v14672_v46 = vor.u32 %v18185_v24, %v14671_v36  ;;  %v17082_v32 = vld [vmem:[%s27437_s3 + $0x304] sm:$0xf]  ;;  %v18137_v9 = vld [vmem:[%s27437_s3 + $0x1df4] sm:$0xf0]  ;;  %v17969_v47 = vld [vmem:[%s27437_s3 + $0x18bc] sm:$0xf] }
 0x3e6   : > { %v24087_v35 = vpack.c.bf16 %v1710_v0, %v1710_v0  ;;  %v17034_v39 = vld [vmem:[%s27437_s3 + $0x184] sm:$0xf] }
 0x3e7   : > { %10178 = vmatpush.bf16.msra.mxu0 %v15000_v43  ;;  %v18033_v43 = vld [vmem:[%s27437_s3 + $0x1abc] sm:$0xf]  ;;  %7504 = vmatpush.bf16.msrb.mxu3 %v14348_v58  ;;  %v24085_v58 = vpack.c.bf16 %v1709_v41, %v1709_v41  ;;  %v14937_v25 = vld [vmem:[%s27437_s3 + $0x1c0] sm:$0xf0] }
 0x3e8   : > { %7545 = vmatmul.bf16.vlgmr.msra.gmra.mxu2 %v21392_v22  ;;  %v17162_v41 = vld [vmem:[%s27437_s3 + $0x584] sm:$0xf]  ;;  %v14940_v2 = vor.u32 %v17034_v39, %v14937_v25 }
 0x3e9   : > { %10191 = vmatpush.bf16.msra.mxu1 %v15512_v3  ;;  %7589 = vmatpush.bf16.msrb.mxu2 %v14228_v50  ;;  %v14097_v3 = vld [vmem:[%s27437_s3 + $0x1af8] sm:$0xf0]  ;;  %v7249_v13 = vpop.f32.mrf.mxu3  ;;  %v15129_v50 = vld [vmem:[%s27437_s3 + $0x340] sm:$0xf0] }
 0x3ea   : > { %v14100_v26 = vor.u32 %v18033_v43, %v14097_v3  ;;  %v15132_v57 = vor.u32 %v17082_v32, %v15129_v50  ;;  %v13905_v43 = vld [vmem:[%s27437_s3 + $0x1978] sm:$0xf0]  ;;  %v15068_v3 = vor.u32 %v17066_v61, %v15065_v62  ;;  %v15513_v13 = vld [vmem:[%s27437_s3 + $0x640] sm:$0xf0] }
 0x3eb   : > { %10179 = vmatpush.bf16.msra.mxu0 %v14936_v27  ;;  %v15705_v27 = vld [vmem:[%s27437_s3 + $0x7c0] sm:$0xf0]  ;;  %7505 = vmatpush.bf16.msrb.mxu3 %v14284_v10  ;;  %v15516_v24 = vor.u32 %v17178_v42, %v15513_v13  ;;  %v13777_v32 = vld [vmem:[%s27437_s3 + $0x1878] sm:$0xf0]  ;;  %v18089_v13 = vld [vmem:[%s27437_s3 + $0x1c74] sm:$0xf0] }
 0x3ec   : > { %v15708_v45 = vor.u32 %v17226_v14, %v15705_v27  ;;  %v17050_v10 = vld [vmem:[%s27437_s3 + $0x204] sm:$0xf]  ;;  %v13841_v14 = vld [vmem:[%s27437_s3 + $0x18f8] sm:$0xf0] }
 0x3ed   : > { %10192 = vmatpush.bf16.msra.mxu1 %v15448_v37  ;;  %7590 = vmatpush.bf16.msrb.mxu2 %v14164_v16  ;;  %v14744_v37 = vor.u32 %v16994_v12, %v14743_v4  ;;  %v15580_v4 = vor.u32 %v17194_v48, %v15577_v63  ;;  %v15001_v12 = vld [vmem:[%s27437_s3 + $0x240] sm:$0xf0]  ;;  %v13844_v0 = vor.u32 %v17969_v47, %v13841_v14  ;;  %v14351_v48 = vld [vmem:[%s27437_s3 + $0x1cb8] sm:$0xf]  ;;  %v18193_v47 = vld [vmem:[%s27437_s3 + $0x1fbc] sm:$0xf] }
 0x3ee   : > { %7506 = vmatmul.bf16.vlgmr.msrb.gmra.mxu3 %v21607_v33  ;;  %v15004_v27 = vor.u32 %v17050_v10, %v15001_v12  ;;  %v15385_v62 = vld [vmem:[%s27437_s3 + $0x540] sm:$0xf0]  ;;  %v14737_v14 = vld [vmem:[%s27437_s3 + $0x1ff8] sm:$0xf0] }
 0x3ef   : > { %10180 = vmatpush.bf16.msra.mxu0 %v14872_v49  ;;  %7550 = vmatpush.bf16.msra.mxu3 %v14736_v60  ;;  %v14607_v49 = vld [vmem:[%s27437_s3 + $0x1eb8] sm:$0xf]  ;;  %v14809_v10 = vld [vmem:[%s27437_s3 + $0xc0] sm:$0xf0] }
 0x3f0   : > { %v14608_v18 = vor.u32 %v18169_v7, %v14607_v49  ;;  %v14479_v60 = vld [vmem:[%s27437_s3 + $0x1db8] sm:$0xf]  ;;  %v17130_v12 = vld [vmem:[%s27437_s3 + $0x484] sm:$0xf] }
 0x3f1   : > { %10193 = vmatpush.bf16.msra.mxu1 %v15384_v55  ;;  %7591 = vmatpush.bf16.msrb.mxu2 %v14100_v26  ;;  %v13969_v55 = vld [vmem:[%s27437_s3 + $0x19f8] sm:$0xf0]  ;;  %v7338_v26 = vpop.f32.mrf.mxu2  ;;  %v15321_v42 = vld [vmem:[%s27437_s3 + $0x4c0] sm:$0xf0] }
 0x3f2   : > { %v13972_v16 = vor.u32 %v18001_v54, %v13969_v55  ;;  %v24140_v36 = vadd.f32 %v7338_v26, %v23758_v8  ;;  %v15449_v8 = vld [vmem:[%s27437_s3 + $0x5c0] sm:$0xf0]  ;;  %v15324_v25 = vor.u32 %v17130_v12, %v15321_v42  ;;  %v15071_v12 = vld [vmem:[%s27437_s3 + $0x288] sm:$0xf] }
 0x3f3   : > { %10181 = vmatpush.bf16.msra.mxu0 %v14808_v5  ;;  %7551 = vmatpush.bf16.msra.mxu3 %v14672_v46  ;;  %v17985_v5 = vld [vmem:[%s27437_s3 + $0x193c] sm:$0xf]  ;;  %v15452_v7 = vor.u32 %v17162_v41, %v15449_v8  ;;  %v17018_v55 = vld [vmem:[%s27437_s3 + $0x104] sm:$0xf]  ;;  %v17075_v42 = vld [vmem:[%s27437_s3 + $0x2c4] sm:$0xf0] }
 0x3f4   : > { %v13908_v21 = vor.u32 %v17985_v5, %v13905_v43  ;;  %v17953_v46 = vld [vmem:[%s27437_s3 + $0x183c] sm:$0xf]  ;;  %v16151_v43 = vld [vmem:[%s27437_s3 + $0xb00] sm:$0xf]  ;;  %v16986_v39 = vld [vmem:[%s27437_s3 + $0x4] sm:$0xf] }
 0x3f5   : > { %10194 = vmatpush.bf16.msra.mxu1 %v15320_v6  ;;  %7592 = vmatpush.bf16.msrb.mxu2 %v14036_v19  ;;  %v14544_v6 = vor.u32 %v18153_v30, %v14543_v28  ;;  %v16215_v19 = vld [vmem:[%s27437_s3 + $0xb80] sm:$0xf]  ;;  %v13780_v61 = vor.u32 %v17953_v46, %v13777_v32  ;;  %v17114_v8 = vld [vmem:[%s27437_s3 + $0x404] sm:$0xf]  ;;  %v15199_v46 = vld [vmem:[%s27437_s3 + $0x388] sm:$0xf] }
 0x3f6   : > { %v16216_v28 = vor.u32 %v17362_v15, %v16215_v19  ;;  %v17107_v32 = vld [vmem:[%s27437_s3 + $0x3c4] sm:$0xf0]  ;;  %v14673_v15 = vld [vmem:[%s27437_s3 + $0x1f78] sm:$0xf0] }
 0x3f7   : > { %10182 = vmatpush.bf16.msra.mxu0 %v14744_v37  ;;  %7552 = vmatpush.bf16.msra.mxu3 %v14608_v18  ;;  %v14480_v37 = vor.u32 %v18137_v9, %v14479_v60  ;;  %v7299_v18 = vpop.f32.mrf.mxu3  ;;  %v17235_v19 = vld [vmem:[%s27437_s3 + $0x7c4] sm:$0xf0] }
 0x3f8   : > { %v24193_v63 = vadd.f32 %v7299_v18, %v23930_v1  ;;  %v17002_v1 = vld [vmem:[%s27437_s3 + $0x84] sm:$0xf] }
 0x3f9   : > { %10195 = vmatpush.bf16.msra.mxu1 %v15256_v23  ;;  %7593 = vmatpush.bf16.msrb.mxu2 %v13972_v16  ;;  %v14415_v23 = vld [vmem:[%s27437_s3 + $0x1d38] sm:$0xf]  ;;  %v7429_v50 = vpop.f32.mrf.mxu1  ;;  %v7340_v30 = vpop.f32.mrf.mxu2 }
 0x3fa   : > { %10183 = vmatmul.bf16.vlgmr.msra.gmra.mxu0 %v24085_v58  ;;  %v18105_v16 = vld [vmem:[%s27437_s3 + $0x1cf4] sm:$0xf0]  ;;  %v17219_v30 = vld [vmem:[%s27437_s3 + $0x744] sm:$0xf0] }
 0x3fb   : > { %10227 = vmatpush.bf16.msrb.mxu0 %v15196_v44  ;;  %7553 = vmatpush.bf16.msra.mxu3 %v14544_v6  ;;  %v18121_v44 = vld [vmem:[%s27437_s3 + $0x1d74] sm:$0xf0]  ;;  %v14352_v6 = vor.u32 %v18105_v16, %v14351_v48  ;;  %v17091_v48 = vld [vmem:[%s27437_s3 + $0x344] sm:$0xf0] }
 0x3fc   : > { %10196 = vmatmul.bf16.vlgmr.msra.gmra.mxu1 %v24087_v35  ;;  %v14416_v54 = vor.u32 %v18121_v44, %v14415_v23  ;;  %v15257_v23 = vld [vmem:[%s27437_s3 + $0x440] sm:$0xf0]  ;;  %v15647_v16 = vld [vmem:[%s27437_s3 + $0x708] sm:$0xf] }
 0x3fd   : > { %10240 = vmatpush.bf16.msrb.mxu1 %v15708_v45  ;;  %7594 = vmatpush.bf16.msrb.mxu2 %v13908_v21  ;;  %v7416_v45 = vpop.f32.mrf.mxu0  ;;  %v14287_v21 = vld [vmem:[%s27437_s3 + $0x1c38] sm:$0xf] }
 0x3fe   : > { %v24172_v49 = vadd.f32 %v7429_v50, %v7416_v45  ;;  %v14288_v41 = vor.u32 %v18089_v13, %v14287_v21  ;;  %v14740_v45 = vor.u32 %v18193_v47, %v14737_v14  ;;  %v15711_v50 = vld [vmem:[%s27437_s3 + $0x788] sm:$0xf]  ;;  %v14545_v47 = vld [vmem:[%s27437_s3 + $0x1e78] sm:$0xf0]  ;;  %v15895_v14 = vld [vmem:[%s27437_s3 + $0x900] sm:$0xf] }
 0x3ff   : > { %10228 = vmatpush.bf16.msrb.mxu0 %v15132_v57  ;;  %7554 = vmatpush.bf16.msra.mxu3 %v14480_v37  ;;  %v14873_v57 = vld [vmem:[%s27437_s3 + $0x140] sm:$0xf0]  ;;  %v17330_v37 = vld [vmem:[%s27437_s3 + $0xabc] sm:$0xf0]  ;;  %v7301_v44 = vpop.f32.mrf.mxu3  ;;  %v15712_v18 = vor.u32 %v17235_v19, %v15711_v50  ;;  %v15583_v21 = vld [vmem:[%s27437_s3 + $0x688] sm:$0xf] }
 0x400   : > { %v14876_v5 = vor.u32 %v17018_v55, %v14873_v57  ;;  %v17314_v55 = vld [vmem:[%s27437_s3 + $0xa3c] sm:$0xf0]  ;;  %v15260_v57 = vor.u32 %v17114_v8, %v15257_v23  ;;  %v17187_v8 = vld [vmem:[%s27437_s3 + $0x644] sm:$0xf0]  ;;  %v18129_v23 = vld [vmem:[%s27437_s3 + $0x1dbc] sm:$0xf] }
 0x401   : > { %10241 = vmatpush.bf16.msrb.mxu1 %v15644_v59  ;;  %v17146_v59 = vld [vmem:[%s27437_s3 + $0x504] sm:$0xf]  ;;  %7595 = vmatpush.bf16.msrb.mxu2 %v13844_v0  ;;  %v7431_v26 = vpop.f32.mrf.mxu1  ;;  %v14481_v44 = vld [vmem:[%s27437_s3 + $0x1df8] sm:$0xf0] }
 0x402   : > { %v14745_v0 = vld [vmem:[%s27437_s3 + $0x40] sm:$0xf0]  ;;  %v17282_v26 = vld [vmem:[%s27437_s3 + $0x93c] sm:$0xf0] }
 0x403   : > { %10229 = vmatpush.bf16.msrb.mxu0 %v15068_v3  ;;  %v17346_v3 = vld [vmem:[%s27437_s3 + $0xb3c] sm:$0xf0]  ;;  %7555 = vmatpush.bf16.msra.mxu3 %v14416_v54 }
 0x404   : > { %v16152_v9 = vor.u32 %v17346_v3, %v16151_v43  ;;  %v16023_v54 = vld [vmem:[%s27437_s3 + $0xa00] sm:$0xf]  ;;  %v14609_v43 = vld [vmem:[%s27437_s3 + $0x1ef8] sm:$0xf0] }
 0x405   : > { %10242 = vmatpush.bf16.msrb.mxu1 %v15580_v4  ;;  %v15388_v4 = vor.u32 %v17146_v59, %v15385_v62  ;;  %7596 = vmatpush.bf16.msrb.mxu2 %v13780_v61  ;;  %v7418_v60 = vpop.f32.mrf.mxu0  ;;  %v15200_v59 = vor.u32 %v17107_v32, %v15199_v46  ;;  %v15135_v62 = vld [vmem:[%s27437_s3 + $0x308] sm:$0xf]  ;;  %v15959_v3 = vld [vmem:[%s27437_s3 + $0x980] sm:$0xf] }
 0x406   : > { %v17203_v60 = vld [vmem:[%s27437_s3 + $0x6c4] sm:$0xf0]  ;;  %v17266_v46 = vld [vmem:[%s27437_s3 + $0x8bc] sm:$0xf0] }
 0x407   : > { %10230 = vmatpush.bf16.msrb.mxu0 %v15004_v27  ;;  %v14812_v27 = vor.u32 %v17002_v1, %v14809_v10  ;;  %7556 = vmatpush.bf16.msra.mxu3 %v14352_v6  ;;  %v15136_v6 = vor.u32 %v17091_v48, %v15135_v62  ;;  %v15648_v1 = vor.u32 %v17219_v30, %v15647_v16  ;;  %v17250_v62 = vld [vmem:[%s27437_s3 + $0x83c] sm:$0xf0]  ;;  %v16217_v30 = vld [vmem:[%s27437_s3 + $0xbc0] sm:$0xf0] }
 0x408   : > { %7597 = vmatmul.bf16.vlgmr.msrb.gmra.mxu2 %v21392_v22  ;;  %v18177_v22 = vld [vmem:[%s27437_s3 + $0x1f3c] sm:$0xf] }
 0x409   : > { %10243 = vmatpush.bf16.msrb.mxu1 %v15516_v24  ;;  %10201 = vmatpush.bf16.msra.mxu2 %v16216_v28  ;;  %v16087_v24 = vld [vmem:[%s27437_s3 + $0xa80] sm:$0xf]  ;;  %v14676_v61 = vor.u32 %v18177_v22, %v14673_v15  ;;  %v16024_v28 = vor.u32 %v17314_v55, %v16023_v54  ;;  %v14484_v22 = vor.u32 %v18129_v23, %v14481_v44  ;;  %v14943_v15 = vld [vmem:[%s27437_s3 + $0x188] sm:$0xf] }
 0x40a   : > { %v15455_v54 = vld [vmem:[%s27437_s3 + $0x588] sm:$0xf] }
 0x40b   : > { %10231 = vmatpush.bf16.msrb.mxu0 %v14940_v2  ;;  %v16088_v2 = vor.u32 %v17330_v37, %v16087_v24  ;;  %7557 = vmatpush.bf16.msra.mxu3 %v14288_v41  ;;  %v15584_v24 = vor.u32 %v17203_v60, %v15583_v21  ;;  %v15519_v41 = vld [vmem:[%s27437_s3 + $0x608] sm:$0xf]  ;;  %v18097_v21 = vld [vmem:[%s27437_s3 + $0x1cbc] sm:$0xf] }
 0x40c   : > { %v7390_v32 = vpop.f32.mrf.mxu2  ;;  %v15520_v19 = vor.u32 %v17187_v8, %v15519_v41  ;;  %v17139_v41 = vld [vmem:[%s27437_s3 + $0x4c4] sm:$0xf0]  ;;  %v14289_v8 = vld [vmem:[%s27437_s3 + $0x1c78] sm:$0xf0] }
 0x40d   : > { %10244 = vmatpush.bf16.msrb.mxu1 %v15452_v7  ;;  %10202 = vmatpush.bf16.msra.mxu2 %v16152_v9  ;;  %v14748_v7 = vor.u32 %v16986_v39, %v14745_v0  ;;  %v18145_v9 = vld [vmem:[%s27437_s3 + $0x1e3c] sm:$0xf]  ;;  %v15007_v39 = vld [vmem:[%s27437_s3 + $0x208] sm:$0xf]  ;;  %v15896_v0 = vor.u32 %v17282_v26, %v15895_v14 }
 0x40e   : > { %7558 = vmatmul.bf16.vlgmr.msra.gmra.mxu3 %v21607_v33  ;;  %v14548_v37 = vor.u32 %v18145_v9, %v14545_v47  ;;  %v1711_v47 = vmax.f32 %v20308_v56, 0.0  ;;  %v17011_v56 = vld [vmem:[%s27437_s3 + $0xc4] sm:$0xf0] }
 0x40f   : > { %10232 = vmatpush.bf16.msrb.mxu0 %v14876_v5  ;;  %7602 = vmatpush.bf16.msrb.mxu3 %v14740_v45  ;;  %v18161_v5 = vld [vmem:[%s27437_s3 + $0x1ebc] sm:$0xf]  ;;  %v15831_v45 = vld [vmem:[%s27437_s3 + $0x880] sm:$0xf] }
 0x410   : > { %v14612_v10 = vor.u32 %v18161_v5, %v14609_v43  ;;  %v15832_v55 = vor.u32 %v17266_v46, %v15831_v45  ;;  %v16727_v45 = vld [vmem:[%s27437_s3 + $0xf80] sm:$0xf] }
 0x411   : > { %10245 = vmatpush.bf16.msrb.mxu1 %v15388_v4  ;;  %10203 = vmatpush.bf16.msra.mxu2 %v16088_v2  ;;  %v17298_v4 = vld [vmem:[%s27437_s3 + $0x9bc] sm:$0xf0]  ;;  %v24344_v2 = vadd.f32 %v7390_v32, %v23962_v17  ;;  %v17171_v17 = vld [vmem:[%s27437_s3 + $0x5c4] sm:$0xf0]  ;;  %v24430_v32 = vpack.c.bf16 %v1711_v47, %v1711_v47  ;;  %v17211_v47 = vld [vmem:[%s27437_s3 + $0x70c] sm:$0xf] }
 0x412   : > { %v15960_v13 = vor.u32 %v17298_v4, %v15959_v3  ;;  %v15456_v43 = vor.u32 %v17171_v17, %v15455_v54  ;;  %v14879_v4 = vld [vmem:[%s27437_s3 + $0x108] sm:$0xf]  ;;  %v17490_v46 = vld [vmem:[%s27437_s3 + $0xfbc] sm:$0xf0] }
 0x413   : > { %10233 = vmatpush.bf16.msrb.mxu0 %v14812_v27  ;;  %7603 = vmatpush.bf16.msrb.mxu3 %v14676_v61  ;;  %v15072_v27 = vor.u32 %v17075_v42, %v15071_v12  ;;  %v15767_v61 = vld [vmem:[%s27437_s3 + $0x800] sm:$0xf]  ;;  %v17155_v42 = vld [vmem:[%s27437_s3 + $0x544] sm:$0xf0] }
 0x414   : > { %v15768_v12 = vor.u32 %v17250_v62, %v15767_v61  ;;  %v7392_v14 = vpop.f32.mrf.mxu2  ;;  %v16995_v17 = vld [vmem:[%s27437_s3 + $0x44] sm:$0xf0]  ;;  %v16728_v61 = vor.u32 %v17490_v46, %v16727_v45  ;;  %v17099_v62 = vld [vmem:[%s27437_s3 + $0x38c] sm:$0xf]  ;;  %v17442_v45 = vld [vmem:[%s27437_s3 + $0xe3c] sm:$0xf0] }
 0x415   : > { %10246 = vmatpush.bf16.msrb.mxu1 %v15324_v25  ;;  %10204 = vmatpush.bf16.msra.mxu2 %v16024_v28  ;;  %v17059_v25 = vld [vmem:[%s27437_s3 + $0x244] sm:$0xf0]  ;;  %v17354_v28 = vld [vmem:[%s27437_s3 + $0xb84] sm:$0xf] }
 0x416   : > { %v15008_v50 = vor.u32 %v17059_v25, %v15007_v39  ;;  %v16220_v9 = vor.u32 %v17354_v28, %v16217_v30  ;;  %v15327_v25 = vld [vmem:[%s27437_s3 + $0x488] sm:$0xf]  ;;  %v15713_v30 = vld [vmem:[%s27437_s3 + $0x7c8] sm:$0xf0]  ;;  %v17274_v46 = vld [vmem:[%s27437_s3 + $0x904] sm:$0xf] }
 0x417   : > { %10234 = vmatpush.bf16.msrb.mxu0 %v14748_v7  ;;  %7604 = vmatpush.bf16.msrb.mxu3 %v14612_v10  ;;  %v17043_v7 = vld [vmem:[%s27437_s3 + $0x1c4] sm:$0xf0]  ;;  %v7351_v10 = vpop.f32.mrf.mxu3  ;;  %v15328_v54 = vor.u32 %v17139_v41, %v15327_v25  ;;  %v15073_v41 = vld [vmem:[%s27437_s3 + $0x2c8] sm:$0xf0] }
 0x418   : > { %v14944_v16 = vor.u32 %v17043_v7, %v14943_v15  ;;  %v24397_v60 = vadd.f32 %v7351_v10, %v24140_v36  ;;  %v14815_v36 = vld [vmem:[%s27437_s3 + $0x88] sm:$0xf]  ;;  %v16089_v15 = vld [vmem:[%s27437_s3 + $0xac0] sm:$0xf0] }
 0x419   : > { %10247 = vmatpush.bf16.msrb.mxu1 %v15260_v57  ;;  %10205 = vmatpush.bf16.msra.mxu2 %v15960_v13  ;;  %v18113_v57 = vld [vmem:[%s27437_s3 + $0x1d3c] sm:$0xf]  ;;  %v7481_v48 = vpop.f32.mrf.mxu1  ;;  %v14751_v7 = vld [vmem:[%s27437_s3 + $0x8] sm:$0xf] }
 0x41a   : > { %10235 = vmatmul.bf16.vlgmr.msrb.gmra.mxu0 %v24085_v58  ;;  %v14353_v13 = vld [vmem:[%s27437_s3 + $0x1cf8] sm:$0xf0] }
 0x41b   : > { %10279 = vmatpush.bf16.msra.mxu0 %v15200_v59  ;;  %7605 = vmatpush.bf16.msrb.mxu3 %v14548_v37  ;;  %v14417_v59 = vld [vmem:[%s27437_s3 + $0x1d78] sm:$0xf0]  ;;  %v14356_v39 = vor.u32 %v18097_v21, %v14353_v13  ;;  %v17083_v13 = vld [vmem:[%s27437_s3 + $0x30c] sm:$0xf] }
 0x41c   : > { %10248 = vmatmul.bf16.vlgmr.msrb.gmra.mxu1 %v24087_v35  ;;  %v14420_v3 = vor.u32 %v18113_v57, %v14417_v59  ;;  %v15263_v57 = vld [vmem:[%s27437_s3 + $0x408] sm:$0xf] }
 0x41d   : > { %10292 = vmatpush.bf16.msra.mxu1 %v15712_v18  ;;  %10206 = vmatpush.bf16.msra.mxu2 %v15896_v0  ;;  %v7468_v18 = vpop.f32.mrf.mxu0  ;;  %v18081_v0 = vld [vmem:[%s27437_s3 + $0x1c3c] sm:$0xf]  ;;  %v17123_v59 = vld [vmem:[%s27437_s3 + $0x444] sm:$0xf0] }
 0x41e   : > { %v24376_v5 = vadd.f32 %v7481_v48, %v7468_v18  ;;  %v15201_v48 = vld [vmem:[%s27437_s3 + $0x3c8] sm:$0xf0]  ;;  %v15264_v10 = vor.u32 %v17123_v59, %v15263_v57  ;;  %v16471_v59 = vld [vmem:[%s27437_s3 + $0xd80] sm:$0xf] }
 0x41f   : > { %10280 = vmatpush.bf16.msra.mxu0 %v15136_v6  ;;  %7606 = vmatpush.bf16.msrb.mxu3 %v14484_v22  ;;  %v17027_v6 = vld [vmem:[%s27437_s3 + $0x144] sm:$0xf0]  ;;  %v17322_v22 = vld [vmem:[%s27437_s3 + $0xa84] sm:$0xf]  ;;  %v7353_v18 = vpop.f32.mrf.mxu3  ;;  %v15521_v57 = vld [vmem:[%s27437_s3 + $0x648] sm:$0xf0] }
 0x420   : > { %v14880_v26 = vor.u32 %v17027_v6, %v14879_v4  ;;  %v16092_v28 = vor.u32 %v17322_v22, %v16089_v15  ;;  %v14752_v4 = vor.u32 %v16995_v17, %v14751_v7  ;;  %v17306_v6 = vld [vmem:[%s27437_s3 + $0xa04] sm:$0xf]  ;;  %v17051_v7 = vld [vmem:[%s27437_s3 + $0x20c] sm:$0xf]  ;;  %v17426_v18 = vld [vmem:[%s27437_s3 + $0xdbc] sm:$0xf0] }
 0x421   : > { %10293 = vmatpush.bf16.msra.mxu1 %v15648_v1  ;;  %v15391_v1 = vld [vmem:[%s27437_s3 + $0x508] sm:$0xf]  ;;  %10207 = vmatpush.bf16.msra.mxu2 %v15832_v55  ;;  %v14292_v55 = vor.u32 %v18081_v0, %v14289_v8  ;;  %v17195_v0 = vld [vmem:[%s27437_s3 + $0x68c] sm:$0xf] }
 0x422   : > { %v15392_v37 = vor.u32 %v17155_v42, %v15391_v1  ;;  %v16025_v1 = vld [vmem:[%s27437_s3 + $0xa40] sm:$0xf0] }
 0x423   : > { %10281 = vmatpush.bf16.msra.mxu0 %v15072_v27  ;;  %v17338_v27 = vld [vmem:[%s27437_s3 + $0xb04] sm:$0xf]  ;;  %7607 = vmatpush.bf16.msrb.mxu3 %v14420_v3  ;;  %v17474_v3 = vld [vmem:[%s27437_s3 + $0xf3c] sm:$0xf0]  ;;  %v16028_v14 = vor.u32 %v17306_v6, %v16025_v1  ;;  %v17163_v6 = vld [vmem:[%s27437_s3 + $0x58c] sm:$0xf] }
 0x425   : > { %10294 = vmatpush.bf16.msra.mxu1 %v15584_v24  ;;  %v16153_v24 = vld [vmem:[%s27437_s3 + $0xb40] sm:$0xf0]  ;;  %10208 = vmatpush.bf16.msra.mxu2 %v15768_v12  ;;  %v7470_v23 = vpop.f32.mrf.mxu0  ;;  %v15204_v12 = vor.u32 %v17099_v62, %v15201_v48 }
 0x426   : > { %v16156_v44 = vor.u32 %v17338_v27, %v16153_v24  ;;  %v16599_v27 = vld [vmem:[%s27437_s3 + $0xe80] sm:$0xf]  ;;  %v15585_v23 = vld [vmem:[%s27437_s3 + $0x6c8] sm:$0xf0]  ;;  %v15833_v62 = vld [vmem:[%s27437_s3 + $0x8c0] sm:$0xf0] }
 0x427   : > { %10282 = vmatpush.bf16.msra.mxu0 %v15008_v50  ;;  %v7483_v50 = vpop.f32.mrf.mxu1  ;;  %7608 = vmatpush.bf16.msrb.mxu3 %v14356_v39  ;;  %v17458_v24 = vld [vmem:[%s27437_s3 + $0xebc] sm:$0xf0]  ;;  %v15961_v39 = vld [vmem:[%s27437_s3 + $0x9c0] sm:$0xf0]  ;;  %v15588_v22 = vor.u32 %v17195_v0, %v15585_v23 }
 0x428   : > { %10209 = vmatmul.bf16.vlgmr.msra.gmra.mxu2 %v24430_v32  ;;  %v16600_v25 = vor.u32 %v17458_v24, %v16599_v27  ;;  %v15897_v50 = vld [vmem:[%s27437_s3 + $0x940] sm:$0xf0]  ;;  %v16343_v0 = vld [vmem:[%s27437_s3 + $0xc80] sm:$0xf] }
 0x429   : > { %10295 = vmatpush.bf16.msra.mxu1 %v15520_v19  ;;  %10253 = vmatpush.bf16.msrb.mxu2 %v16220_v9  ;;  %v14816_v19 = vor.u32 %v17011_v56, %v14815_v36  ;;  %v15137_v9 = vld [vmem:[%s27437_s3 + $0x348] sm:$0xf0]  ;;  %v15900_v17 = vor.u32 %v17274_v46, %v15897_v50  ;;  %v16159_v50 = vld [vmem:[%s27437_s3 + $0xb08] sm:$0xf] }
 0x42a   : > { %v15140_v36 = vor.u32 %v17083_v13, %v15137_v9  ;;  %v15769_v13 = vld [vmem:[%s27437_s3 + $0x840] sm:$0xf0] }
 0x42b   : > { %10283 = vmatpush.bf16.msra.mxu0 %v14944_v16  ;;  %v17227_v16 = vld [vmem:[%s27437_s3 + $0x78c] sm:$0xf]  ;;  %7609 = vmatpush.bf16.msrb.mxu3 %v14292_v55 }
 0x42c   : > { %v15716_v42 = vor.u32 %v17227_v16, %v15713_v30  ;;  %v17179_v55 = vld [vmem:[%s27437_s3 + $0x60c] sm:$0xf]  ;;  %v7442_v48 = vpop.f32.mrf.mxu2 }
 0x42d   : > { %10296 = vmatpush.bf16.msra.mxu1 %v15456_v43  ;;  %10254 = vmatpush.bf16.msrb.mxu2 %v16156_v44  ;;  %v16663_v43 = vld [vmem:[%s27437_s3 + $0xf00] sm:$0xf]  ;;  %v15524_v30 = vor.u32 %v17179_v55, %v15521_v57  ;;  %v15329_v55 = vld [vmem:[%s27437_s3 + $0x4c8] sm:$0xf0] }
 0x42e   : > { %v16664_v21 = vor.u32 %v17474_v3, %v16663_v43  ;;  %7610 = vmatmul.bf16.vlgmr.msrb.gmra.mxu3 %v21607_v33  ;;  %v17067_v33 = vld [vmem:[%s27437_s3 + $0x28c] sm:$0xf]  ;;  %v16535_v44 = vld [vmem:[%s27437_s3 + $0xe00] sm:$0xf]  ;;  %v16472_v43 = vor.u32 %v17426_v18, %v16471_v59  ;;  %v1712_v59 = vmax.f32 %v20542_v11, 0.0 }
 0x42f   : > { %10284 = vmatpush.bf16.msra.mxu0 %v14880_v26  ;;  %10214 = vmatpush.bf16.msra.mxu3 %v16728_v61  ;;  %v15649_v26 = vld [vmem:[%s27437_s3 + $0x748] sm:$0xf0]  ;;  %v16536_v15 = vor.u32 %v17442_v45, %v16535_v44  ;;  %v17258_v61 = vld [vmem:[%s27437_s3 + $0x884] sm:$0xf]  ;;  %v17378_v57 = vld [vmem:[%s27437_s3 + $0xc3c] sm:$0xf0] }
 0x430   : > { %v15652_v56 = vor.u32 %v17211_v47, %v15649_v26  ;;  %v17035_v3 = vld [vmem:[%s27437_s3 + $0x18c] sm:$0xf]  ;;  %v15836_v1 = vor.u32 %v17258_v61, %v15833_v62  ;;  %v17363_v26 = vld [vmem:[%s27437_s3 + $0xbc4] sm:$0xf0]  ;;  %v17482_v62 = vld [vmem:[%s27437_s3 + $0xf84] sm:$0xf] }
 0x431   : > { %10297 = vmatpush.bf16.msra.mxu1 %v15392_v37  ;;  %10255 = vmatpush.bf16.msrb.mxu2 %v16092_v28  ;;  %v17290_v37 = vld [vmem:[%s27437_s3 + $0x984] sm:$0xf]  ;;  %v24551_v28 = vadd.f32 %v7442_v48, %v24172_v49  ;;  %v15457_v49 = vld [vmem:[%s27437_s3 + $0x5c8] sm:$0xf0]  ;;  %v17331_v11 = vld [vmem:[%s27437_s3 + $0xac4] sm:$0xf0] }
 0x432   : > { %v15964_v8 = vor.u32 %v17290_v37, %v15961_v39  ;;  %v15460_v24 = vor.u32 %v17163_v6, %v15457_v49  ;;  %v17019_v39 = vld [vmem:[%s27437_s3 + $0x10c] sm:$0xf]  ;;  %v16729_v48 = vld [vmem:[%s27437_s3 + $0xfc0] sm:$0xf0] }
 0x433   : > { %10285 = vmatpush.bf16.msra.mxu0 %v14816_v19  ;;  %10215 = vmatpush.bf16.msra.mxu3 %v16664_v21  ;;  %v15076_v19 = vor.u32 %v17067_v33, %v15073_v41  ;;  %v17242_v21 = vld [vmem:[%s27437_s3 + $0x804] sm:$0xf]  ;;  %v15393_v41 = vld [vmem:[%s27437_s3 + $0x548] sm:$0xf0] }
 0x434   : > { %v15772_v33 = vor.u32 %v17242_v21, %v15769_v13  ;;  %v7444_v45 = vpop.f32.mrf.mxu2  ;;  %v17115_v49 = vld [vmem:[%s27437_s3 + $0x40c] sm:$0xf]  ;;  %v15207_v21 = vld [vmem:[%s27437_s3 + $0x390] sm:$0xf] }
 0x435   : > { %10298 = vmatpush.bf16.msra.mxu1 %v15328_v54  ;;  %10256 = vmatpush.bf16.msrb.mxu2 %v16028_v14  ;;  %v15009_v54 = vld [vmem:[%s27437_s3 + $0x248] sm:$0xf0]  ;;  %v16223_v14 = vld [vmem:[%s27437_s3 + $0xb88] sm:$0xf]  ;;  %v17108_v13 = vld [vmem:[%s27437_s3 + $0x3cc] sm:$0xf0] }
 0x436   : > { %v15012_v16 = vor.u32 %v17051_v7, %v15009_v54  ;;  %v16224_v44 = vor.u32 %v17363_v26, %v16223_v14  ;;  %v14817_v7 = vld [vmem:[%s27437_s3 + $0xc8] sm:$0xf0]  ;;  %v17236_v14 = vld [vmem:[%s27437_s3 + $0x7cc] sm:$0xf0]  ;;  %v17466_v26 = vld [vmem:[%s27437_s3 + $0xf04] sm:$0xf] }
 0x437   : > { %10286 = vmatpush.bf16.msra.mxu0 %v14752_v4  ;;  %10216 = vmatpush.bf16.msra.mxu3 %v16600_v25  ;;  %v14945_v4 = vld [vmem:[%s27437_s3 + $0x1c8] sm:$0xf0]  ;;  %v7403_v25 = vpop.f32.mrf.mxu3  ;;  %v15655_v45 = vld [vmem:[%s27437_s3 + $0x710] sm:$0xf] }
 0x438   : > { %v14948_v47 = vor.u32 %v17035_v3, %v14945_v4  ;;  %v24604_v23 = vadd.f32 %v7403_v25, %v24344_v2  ;;  %v17003_v2 = vld [vmem:[%s27437_s3 + $0x8c] sm:$0xf]  ;;  %v15208_v25 = vor.u32 %v17108_v13, %v15207_v21  ;;  %v15839_v21 = vld [vmem:[%s27437_s3 + $0x888] sm:$0xf] }
 0x439   : > { %10299 = vmatpush.bf16.msra.mxu1 %v15264_v10  ;;  %10257 = vmatpush.bf16.msrb.mxu2 %v15964_v8  ;;  %v16407_v10 = vld [vmem:[%s27437_s3 + $0xd00] sm:$0xf]  ;;  %v7533_v9 = vpop.f32.mrf.mxu1  ;;  %v17131_v54 = vld [vmem:[%s27437_s3 + $0x48c] sm:$0xf]  ;;  %v17267_v13 = vld [vmem:[%s27437_s3 + $0x8c4] sm:$0xf0] }
 0x43a   : > { %10287 = vmatmul.bf16.vlgmr.msra.gmra.mxu0 %v24085_v58  ;;  %v17394_v8 = vld [vmem:[%s27437_s3 + $0xcbc] sm:$0xf0]  ;;  %v16987_v3 = vld [vmem:[%s27437_s3 + $0xc] sm:$0xf]  ;;  %v15332_v4 = vor.u32 %v17131_v54, %v15329_v55 }
 0x43b   : > { %10331 = vmatpush.bf16.msrb.mxu0 %v15204_v12  ;;  %10217 = vmatpush.bf16.msra.mxu3 %v16536_v15  ;;  %v17410_v12 = vld [vmem:[%s27437_s3 + $0xd3c] sm:$0xf0]  ;;  %v16344_v15 = vor.u32 %v17394_v8, %v16343_v0  ;;  %v15143_v8 = vld [vmem:[%s27437_s3 + $0x310] sm:$0xf] }
 0x43c   : > { %10300 = vmatmul.bf16.vlgmr.msra.gmra.mxu1 %v24087_v35  ;;  %v16408_v37 = vor.u32 %v17410_v12, %v16407_v10  ;;  %v15265_v10 = vld [vmem:[%s27437_s3 + $0x448] sm:$0xf0] }
 0x43d   : > { %10344 = vmatpush.bf16.msrb.mxu1 %v15716_v42  ;;  %10258 = vmatpush.bf16.msrb.mxu2 %v15900_v17  ;;  %v7520_v42 = vpop.f32.mrf.mxu0  ;;  %v16279_v17 = vld [vmem:[%s27437_s3 + $0xc00] sm:$0xf] }
 0x43e   : > { %v24583_v27 = vadd.f32 %v7533_v9, %v7520_v42  ;;  %v16280_v6 = vor.u32 %v17378_v57, %v16279_v17  ;;  %v16732_v42 = vor.u32 %v17482_v62, %v16729_v48  ;;  %v15719_v9 = vld [vmem:[%s27437_s3 + $0x790] sm:$0xf]  ;;  %v17434_v62 = vld [vmem:[%s27437_s3 + $0xe04] sm:$0xf] }
 0x43f   : > { %10332 = vmatpush.bf16.msrb.mxu0 %v15140_v36  ;;  %10218 = vmatpush.bf16.msra.mxu3 %v16472_v43  ;;  %v14881_v36 = vld [vmem:[%s27437_s3 + $0x148] sm:$0xf0]  ;;  %v16095_v43 = vld [vmem:[%s27437_s3 + $0xa88] sm:$0xf]  ;;  %v7405_v12 = vpop.f32.mrf.mxu3  ;;  %v15079_v17 = vld [vmem:[%s27437_s3 + $0x290] sm:$0xf] }
 0x440   : > { %v14884_v46 = vor.u32 %v17019_v39, %v14881_v36  ;;  %v16031_v39 = vld [vmem:[%s27437_s3 + $0xa08] sm:$0xf]  ;;  %v17076_v57 = vld [vmem:[%s27437_s3 + $0x2cc] sm:$0xf0]  ;;  %v16537_v48 = vld [vmem:[%s27437_s3 + $0xe40] sm:$0xf0] }
 0x441   : > { %10345 = vmatpush.bf16.msrb.mxu1 %v15652_v56  ;;  %v17147_v56 = vld [vmem:[%s27437_s3 + $0x50c] sm:$0xf]  ;;  %10259 = vmatpush.bf16.msrb.mxu2 %v15836_v1  ;;  %v17315_v36 = vld [vmem:[%s27437_s3 + $0xa44] sm:$0xf0]  ;;  %v17418_v12 = vld [vmem:[%s27437_s3 + $0xd84] sm:$0xf] }
 0x442   : > { %v14753_v1 = vld [vmem:[%s27437_s3 + $0x48] sm:$0xf0] }
 0x443   : > { %10333 = vmatpush.bf16.msrb.mxu0 %v15076_v19  ;;  %v17347_v19 = vld [vmem:[%s27437_s3 + $0xb44] sm:$0xf0]  ;;  %10219 = vmatpush.bf16.msra.mxu3 %v16408_v37  ;;  %v14756_v37 = vor.u32 %v16987_v3, %v14753_v1  ;;  %v16540_v3 = vor.u32 %v17434_v62, %v16537_v48  ;;  %v15527_v1 = vld [vmem:[%s27437_s3 + $0x610] sm:$0xf] }
 0x444   : > { %v16160_v61 = vor.u32 %v17347_v19, %v16159_v50  ;;  %v17220_v50 = vld [vmem:[%s27437_s3 + $0x74c] sm:$0xf0]  ;;  %v17450_v19 = vld [vmem:[%s27437_s3 + $0xe84] sm:$0xf] }
 0x445   : > { %10346 = vmatpush.bf16.msrb.mxu1 %v15588_v22  ;;  %v15396_v22 = vor.u32 %v17147_v56, %v15393_v41  ;;  %10260 = vmatpush.bf16.msrb.mxu2 %v15772_v33  ;;  %v7522_v18 = vpop.f32.mrf.mxu0  ;;  %v15268_v56 = vor.u32 %v17115_v49, %v15265_v10  ;;  %v24680_v33 = vpack.c.bf16 %v1712_v59, %v1712_v59  ;;  %v15591_v59 = vld [vmem:[%s27437_s3 + $0x690] sm:$0xf] }
 0x446   : > { %v15720_v41 = vor.u32 %v17236_v14, %v15719_v9  ;;  %v15656_v54 = vor.u32 %v17220_v50, %v15655_v45  ;;  %v17188_v10 = vld [vmem:[%s27437_s3 + $0x64c] sm:$0xf0]  ;;  %v17355_v50 = vld [vmem:[%s27437_s3 + $0xb8c] sm:$0xf] }
 0x447   : > { %10334 = vmatpush.bf16.msrb.mxu0 %v15012_v16  ;;  %v7535_v16 = vpop.f32.mrf.mxu1  ;;  %10220 = vmatpush.bf16.msra.mxu3 %v16344_v15  ;;  %v15967_v15 = vld [vmem:[%s27437_s3 + $0x988] sm:$0xf] }
 0x448   : > { %10261 = vmatmul.bf16.vlgmr.msrb.gmra.mxu2 %v24430_v32  ;;  %v15903_v16 = vld [vmem:[%s27437_s3 + $0x908] sm:$0xf] }
 0x449   : > { %10347 = vmatpush.bf16.msrb.mxu1 %v15524_v30  ;;  %10305 = vmatpush.bf16.msra.mxu2 %v16224_v44  ;;  %v14820_v30 = vor.u32 %v17003_v2, %v14817_v7  ;;  %v17092_v44 = vld [vmem:[%s27437_s3 + $0x34c] sm:$0xf0]  ;;  %v17299_v2 = vld [vmem:[%s27437_s3 + $0x9c4] sm:$0xf0] }
 0x44a   : > { %v15144_v7 = vor.u32 %v17092_v44, %v15143_v8  ;;  %v15968_v18 = vor.u32 %v17299_v2, %v15967_v15  ;;  %v15775_v8 = vld [vmem:[%s27437_s3 + $0x808] sm:$0xf] }
 0x44b   : > { %10335 = vmatpush.bf16.msrb.mxu0 %v14948_v47  ;;  %v16096_v47 = vor.u32 %v17331_v11, %v16095_v43  ;;  %10221 = vmatpush.bf16.msra.mxu3 %v16280_v6  ;;  %v15080_v43 = vor.u32 %v17076_v57, %v15079_v17  ;;  %v17060_v6 = vld [vmem:[%s27437_s3 + $0x24c] sm:$0xf0]  ;;  %v17251_v44 = vld [vmem:[%s27437_s3 + $0x844] sm:$0xf0] }
 0x44c   : > { %v7494_v9 = vpop.f32.mrf.mxu2  ;;  %v15776_v57 = vor.u32 %v17251_v44, %v15775_v8  ;;  %v17100_v44 = vld [vmem:[%s27437_s3 + $0x394] sm:$0xf] }
 0x44d   : > { %10348 = vmatpush.bf16.msrb.mxu1 %v15460_v24  ;;  %10306 = vmatpush.bf16.msra.mxu2 %v16160_v61  ;;  %v16665_v24 = vld [vmem:[%s27437_s3 + $0xf40] sm:$0xf0]  ;;  %v17204_v61 = vld [vmem:[%s27437_s3 + $0x6cc] sm:$0xf0]  ;;  %v24758_v14 = vadd.f32 %v7494_v9, %v24376_v5  ;;  %v17491_v9 = vld [vmem:[%s27437_s3 + $0xfc4] sm:$0xf0] }
 0x44e   : > { %v16668_v0 = vor.u32 %v17466_v26, %v16665_v24  ;;  %10222 = vmatmul.bf16.vlgmr.msra.gmra.mxu3 %v24680_v33  ;;  %v15592_v11 = vor.u32 %v17204_v61, %v15591_v59  ;;  %v15528_v26 = vor.u32 %v17188_v10, %v15527_v1  ;;  %v17172_v5 = vld [vmem:[%s27437_s3 + $0x5cc] sm:$0xf0]  ;;  %v16345_v61 = vld [vmem:[%s27437_s3 + $0xcc0] sm:$0xf0] }
 0x44f   : > { %10336 = vmatpush.bf16.msrb.mxu0 %v14884_v46  ;;  %10266 = vmatpush.bf16.msrb.mxu3 %v16732_v42  ;;  %v16032_v46 = vor.u32 %v17315_v36, %v16031_v39  ;;  %v16473_v42 = vld [vmem:[%s27437_s3 + $0xdc0] sm:$0xf0]  ;;  %v17044_v39 = vld [vmem:[%s27437_s3 + $0x1cc] sm:$0xf0] }
 0x450   : > { %v16476_v24 = vor.u32 %v17418_v12, %v16473_v42  ;;  %v15463_v36 = vld [vmem:[%s27437_s3 + $0x590] sm:$0xf]  ;;  %v17370_v10 = vld [vmem:[%s27437_s3 + $0xc04] sm:$0xf] }
 0x451   : > { %10349 = vmatpush.bf16.msrb.mxu1 %v15396_v22  ;;  %10307 = vmatpush.bf16.msra.mxu2 %v16096_v47  ;;  %v16601_v22 = vld [vmem:[%s27437_s3 + $0xec0] sm:$0xf0]  ;;  %v15464_v15 = vor.u32 %v17172_v5, %v15463_v36  ;;  %v7455_v17 = vpop.f32.mrf.mxu3  ;;  %v17156_v59 = vld [vmem:[%s27437_s3 + $0x54c] sm:$0xf0] }
 0x452   : > { %v16604_v55 = vor.u32 %v17450_v19, %v16601_v22  ;;  %v16225_v19 = vld [vmem:[%s27437_s3 + $0xbc8] sm:$0xf0]  ;;  %v24811_v62 = vadd.f32 %v7455_v17, %v24551_v28  ;;  %v14823_v28 = vld [vmem:[%s27437_s3 + $0x90] sm:$0xf]  ;;  %v16281_v12 = vld [vmem:[%s27437_s3 + $0xc40] sm:$0xf0] }
 0x453   : > { %10337 = vmatpush.bf16.msrb.mxu0 %v14820_v30  ;;  %10267 = vmatpush.bf16.msrb.mxu3 %v16668_v0  ;;  %v17283_v30 = vld [vmem:[%s27437_s3 + $0x944] sm:$0xf0]  ;;  %v16228_v48 = vor.u32 %v17355_v50, %v16225_v19  ;;  %v15335_v1 = vld [vmem:[%s27437_s3 + $0x490] sm:$0xf]  ;;  %v15721_v19 = vld [vmem:[%s27437_s3 + $0x7d0] sm:$0xf0] }
 0x454   : > { %v15904_v49 = vor.u32 %v17283_v30, %v15903_v16  ;;  %v7496_v16 = vpop.f32.mrf.mxu2  ;;  %v16996_v5 = vld [vmem:[%s27437_s3 + $0x4c] sm:$0xf0] }
 0x455   : > { %10350 = vmatpush.bf16.msrb.mxu1 %v15332_v4  ;;  %10308 = vmatpush.bf16.msra.mxu2 %v16032_v46  ;;  %v15015_v4 = vld [vmem:[%s27437_s3 + $0x210] sm:$0xf]  ;;  %v17212_v16 = vld [vmem:[%s27437_s3 + $0x714] sm:$0xf] }
 0x456   : > { %v15016_v47 = vor.u32 %v17060_v6, %v15015_v4  ;;  %v17012_v6 = vld [vmem:[%s27437_s3 + $0xcc] sm:$0xf0] }
 0x457   : > { %10338 = vmatpush.bf16.msrb.mxu0 %v14756_v37  ;;  %10268 = vmatpush.bf16.msrb.mxu3 %v16604_v55  ;;  %v14951_v37 = vld [vmem:[%s27437_s3 + $0x190] sm:$0xf]  ;;  %v7572_v0 = vpop.f32.mrf.mxu0 }
 0x458   : > { %v14952_v46 = vor.u32 %v17044_v39, %v14951_v37  ;;  %v15399_v55 = vld [vmem:[%s27437_s3 + $0x510] sm:$0xf]  ;;  %v16097_v37 = vld [vmem:[%s27437_s3 + $0xac8] sm:$0xf0] }
 0x459   : > { %10351 = vmatpush.bf16.msrb.mxu1 %v15268_v56  ;;  %10309 = vmatpush.bf16.msra.mxu2 %v15968_v18  ;;  %v15840_v56 = vor.u32 %v17267_v13, %v15839_v21  ;;  %v7585_v45 = vpop.f32.mrf.mxu1  ;;  %v17386_v18 = vld [vmem:[%s27437_s3 + $0xc84] sm:$0xf]  ;;  %v16735_v13 = vld [vmem:[%s27437_s3 + $0xf88] sm:$0xf]  ;;  %v14759_v39 = vld [vmem:[%s27437_s3 + $0x10] sm:$0xf] }
 0x45a   : > { %10339 = vmatmul.bf16.vlgmr.msrb.gmra.mxu0 %v24085_v58  ;;  %v24790_v22 = vadd.f32 %v7585_v45, %v7572_v0  ;;  %v16348_v4 = vor.u32 %v17386_v18, %v16345_v61  ;;  %v7457_v0 = vpop.f32.mrf.mxu3  ;;  %v16736_v8 = vor.u32 %v17491_v9, %v16735_v13  ;;  %v15209_v45 = vld [vmem:[%s27437_s3 + $0x3d0] sm:$0xf0]  ;;  %v16543_v9 = vld [vmem:[%s27437_s3 + $0xe08] sm:$0xf] }
 0x45b   : > { %10383 = vmatpush.bf16.msra.mxu0 %v15208_v25  ;;  %10269 = vmatpush.bf16.msrb.mxu3 %v16540_v3  ;;  %v17402_v25 = vld [vmem:[%s27437_s3 + $0xd04] sm:$0xf]  ;;  %v15400_v3 = vor.u32 %v17156_v59, %v15399_v55  ;;  %v16033_v55 = vld [vmem:[%s27437_s3 + $0xa48] sm:$0xf0]  ;;  %v17084_v61 = vld [vmem:[%s27437_s3 + $0x314] sm:$0xf] }
 0x45c   : > { %10352 = vmatmul.bf16.vlgmr.msrb.gmra.mxu1 %v24087_v35  ;;  %v15593_v13 = vld [vmem:[%s27437_s3 + $0x6d0] sm:$0xf0] }
 0x45d   : > { %10396 = vmatpush.bf16.msra.mxu1 %v15720_v41  ;;  %10310 = vmatpush.bf16.msra.mxu2 %v15904_v49  ;;  %v16409_v41 = vld [vmem:[%s27437_s3 + $0xd40] sm:$0xf0]  ;;  %v17140_v49 = vld [vmem:[%s27437_s3 + $0x4cc] sm:$0xf0]  ;;  %v15529_v0 = vld [vmem:[%s27437_s3 + $0x650] sm:$0xf0] }
 0x45e   : > { %v16412_v2 = vor.u32 %v17402_v25, %v16409_v41  ;;  %v15336_v36 = vor.u32 %v17140_v49, %v15335_v1  ;;  %v15271_v25 = vld [vmem:[%s27437_s3 + $0x410] sm:$0xf] }
 0x45f   : > { %10384 = vmatpush.bf16.msra.mxu0 %v15144_v7  ;;  %10270 = vmatpush.bf16.msrb.mxu3 %v16476_v24  ;;  %v14887_v7 = vld [vmem:[%s27437_s3 + $0x110] sm:$0xf]  ;;  %v7574_v42 = vpop.f32.mrf.mxu0  ;;  %v17323_v24 = vld [vmem:[%s27437_s3 + $0xa8c] sm:$0xf] }
 0x460   : > { %v17124_v41 = vld [vmem:[%s27437_s3 + $0x44c] sm:$0xf0]  ;;  %v16100_v50 = vor.u32 %v17323_v24, %v16097_v37  ;;  %v17196_v42 = vld [vmem:[%s27437_s3 + $0x694] sm:$0xf]  ;;  %v15905_v24 = vld [vmem:[%s27437_s3 + $0x948] sm:$0xf0] }
 0x461   : > { %10397 = vmatpush.bf16.msra.mxu1 %v15656_v54  ;;  %v17028_v54 = vld [vmem:[%s27437_s3 + $0x14c] sm:$0xf0]  ;;  %10311 = vmatpush.bf16.msra.mxu2 %v15840_v56  ;;  %v16284_v56 = vor.u32 %v17370_v10, %v16281_v12  ;;  %v15272_v17 = vor.u32 %v17124_v41, %v15271_v25  ;;  %v17068_v10 = vld [vmem:[%s27437_s3 + $0x294] sm:$0xf] }
 0x462   : > { %v14888_v30 = vor.u32 %v17028_v54, %v14887_v7  ;;  %v14760_v7 = vor.u32 %v16996_v5, %v14759_v39  ;;  %v17307_v54 = vld [vmem:[%s27437_s3 + $0xa0c] sm:$0xf]  ;;  %v15081_v12 = vld [vmem:[%s27437_s3 + $0x2d0] sm:$0xf0]  ;;  %v15596_v39 = vor.u32 %v17196_v42, %v15593_v13  ;;  %v16351_v13 = vld [vmem:[%s27437_s3 + $0xc88] sm:$0xf] }
 0x463   : > { %10385 = vmatpush.bf16.msra.mxu0 %v15080_v43  ;;  %v17339_v43 = vld [vmem:[%s27437_s3 + $0xb0c] sm:$0xf]  ;;  %10271 = vmatpush.bf16.msrb.mxu3 %v16412_v2  ;;  %v17475_v2 = vld [vmem:[%s27437_s3 + $0xf44] sm:$0xf0]  ;;  %v15084_v37 = vor.u32 %v17068_v10, %v15081_v12  ;;  %v15017_v5 = vld [vmem:[%s27437_s3 + $0x250] sm:$0xf0] }
 0x464   : > { %v17180_v25 = vld [vmem:[%s27437_s3 + $0x614] sm:$0xf] }
 0x465   : > { %10398 = vmatpush.bf16.msra.mxu1 %v15592_v11  ;;  %v16161_v11 = vld [vmem:[%s27437_s3 + $0xb48] sm:$0xf0]  ;;  %10312 = vmatpush.bf16.msra.mxu2 %v15776_v57  ;;  %v15212_v57 = vor.u32 %v17100_v44, %v15209_v45  ;;  %v17427_v44 = vld [vmem:[%s27437_s3 + $0xdc4] sm:$0xf0] }
 0x466   : > { %v16164_v21 = vor.u32 %v17339_v43, %v16161_v11  ;;  %v15657_v43 = vld [vmem:[%s27437_s3 + $0x750] sm:$0xf0]  ;;  %v16607_v11 = vld [vmem:[%s27437_s3 + $0xe88] sm:$0xf]  ;;  %v17259_v45 = vld [vmem:[%s27437_s3 + $0x88c] sm:$0xf] }
 0x467   : > { %10386 = vmatpush.bf16.msra.mxu0 %v15016_v47  ;;  %v7587_v47 = vpop.f32.mrf.mxu1  ;;  %10272 = vmatpush.bf16.msrb.mxu3 %v16348_v4  ;;  %v17291_v4 = vld [vmem:[%s27437_s3 + $0x98c] sm:$0xf]  ;;  %v15660_v1 = vor.u32 %v17212_v16, %v15657_v43 }
 0x468   : > { %10313 = vmatmul.bf16.vlgmr.msra.gmra.mxu2 %v24430_v32  ;;  %v17443_v47 = vld [vmem:[%s27437_s3 + $0xe44] sm:$0xf0]  ;;  %v15777_v16 = vld [vmem:[%s27437_s3 + $0x848] sm:$0xf0] }
 0x469   : > { %10399 = vmatpush.bf16.msra.mxu1 %v15528_v26  ;;  %10357 = vmatpush.bf16.msrb.mxu2 %v16228_v48  ;;  %v14824_v26 = vor.u32 %v17012_v6, %v14823_v28  ;;  %v15145_v48 = vld [vmem:[%s27437_s3 + $0x350] sm:$0xf0]  ;;  %v15969_v28 = vld [vmem:[%s27437_s3 + $0x9c8] sm:$0xf0] }
 0x46a   : > { %v15148_v6 = vor.u32 %v17084_v61, %v15145_v48  ;;  %v17243_v48 = vld [vmem:[%s27437_s3 + $0x80c] sm:$0xf] }
 0x46b   : > { %10387 = vmatpush.bf16.msra.mxu0 %v14952_v46  ;;  %v17228_v46 = vld [vmem:[%s27437_s3 + $0x794] sm:$0xf]  ;;  %10273 = vmatpush.bf16.msrb.mxu3 %v16284_v56  ;;  %v15780_v42 = vor.u32 %v17243_v48, %v15777_v16 }
 0x46c   : > { %v15724_v59 = vor.u32 %v17228_v46, %v15721_v19  ;;  %v17052_v56 = vld [vmem:[%s27437_s3 + $0x214] sm:$0xf]  ;;  %v15841_v46 = vld [vmem:[%s27437_s3 + $0x8c8] sm:$0xf0] }
 0x46d   : > { %10400 = vmatpush.bf16.msra.mxu1 %v15464_v15  ;;  %10358 = vmatpush.bf16.msrb.mxu2 %v16164_v21  ;;  %v16671_v15 = vld [vmem:[%s27437_s3 + $0xf08] sm:$0xf]  ;;  %v15972_v21 = vor.u32 %v17291_v4, %v15969_v28  ;;  %v15020_v19 = vor.u32 %v17052_v56, %v15017_v5  ;;  %v17364_v4 = vld [vmem:[%s27437_s3 + $0xbcc] sm:$0xf0] }
 0x46e   : > { %v16672_v18 = vor.u32 %v17475_v2, %v16671_v15  ;;  %10274 = vmatmul.bf16.vlgmr.msrb.gmra.mxu3 %v24680_v33  ;;  %v15532_v2 = vor.u32 %v17180_v25, %v15529_v0  ;;  %v14825_v25 = vld [vmem:[%s27437_s3 + $0xd0] sm:$0xf0] }
 0x46f   : > { %10388 = vmatpush.bf16.msra.mxu0 %v14888_v30  ;;  %10318 = vmatpush.bf16.msra.mxu3 %v16736_v8  ;;  %v16036_v30 = vor.u32 %v17307_v54, %v16033_v55  ;;  %v16479_v8 = vld [vmem:[%s27437_s3 + $0xd88] sm:$0xf]  ;;  %v17036_v54 = vld [vmem:[%s27437_s3 + $0x194] sm:$0xf] }
 0x470   : > { %v14953_v55 = vld [vmem:[%s27437_s3 + $0x1d0] sm:$0xf0] }
 0x471   : > { %10401 = vmatpush.bf16.msra.mxu1 %v15400_v3  ;;  %10359 = vmatpush.bf16.msrb.mxu2 %v16100_v50  ;;  %v17459_v3 = vld [vmem:[%s27437_s3 + $0xec4] sm:$0xf0]  ;;  %v7546_v50 = vpop.f32.mrf.mxu2  ;;  %v7507_v12 = vpop.f32.mrf.mxu3  ;;  %v15337_v0 = vld [vmem:[%s27437_s3 + $0x4d0] sm:$0xf0] }
 0x472   : > { %v16608_v49 = vor.u32 %v17459_v3, %v16607_v11  ;;  %v24962_v15 = vadd.f32 %v7546_v50, %v24583_v27  ;;  %v15465_v27 = vld [vmem:[%s27437_s3 + $0x5d0] sm:$0xf0]  ;;  %v14956_v11 = vor.u32 %v17036_v54, %v14953_v55  ;;  %v16231_v3 = vld [vmem:[%s27437_s3 + $0xb90] sm:$0xf]  ;;  %v17483_v50 = vld [vmem:[%s27437_s3 + $0xf8c] sm:$0xf] }
 0x473   : > { %10389 = vmatpush.bf16.msra.mxu0 %v14824_v26  ;;  %10319 = vmatpush.bf16.msra.mxu3 %v16672_v18  ;;  %v17275_v26 = vld [vmem:[%s27437_s3 + $0x90c] sm:$0xf]  ;;  %v17411_v18 = vld [vmem:[%s27437_s3 + $0xd44] sm:$0xf0]  ;;  %v16103_v54 = vld [vmem:[%s27437_s3 + $0xa90] sm:$0xf] }
 0x474   : > { %v15908_v41 = vor.u32 %v17275_v26, %v15905_v24  ;;  %v16232_v26 = vor.u32 %v17364_v4, %v16231_v3  ;;  %v17332_v55 = vld [vmem:[%s27437_s3 + $0xacc] sm:$0xf0]  ;;  %v17237_v4 = vld [vmem:[%s27437_s3 + $0x7d4] sm:$0xf0] }
 0x475   : > { %10402 = vmatpush.bf16.msra.mxu1 %v15336_v36  ;;  %10360 = vmatpush.bf16.msrb.mxu2 %v16036_v30  ;;  %v16544_v36 = vor.u32 %v17443_v47, %v16543_v9  ;;  %v17395_v9 = vld [vmem:[%s27437_s3 + $0xcc4] sm:$0xf0]  ;;  %v25016_v47 = vadd.f32 %v7507_v12, %v24758_v14  ;;  %v17004_v14 = vld [vmem:[%s27437_s3 + $0x94] sm:$0xf]  ;;  %v16104_v3 = vor.u32 %v17332_v55, %v16103_v54  ;;  %v17284_v54 = vld [vmem:[%s27437_s3 + $0x94c] sm:$0xf0] }
 0x476   : > { %v16352_v5 = vor.u32 %v17395_v9, %v16351_v13  ;;  %v15151_v9 = vld [vmem:[%s27437_s3 + $0x318] sm:$0xf] }
 0x477   : > { %10390 = vmatpush.bf16.msra.mxu0 %v14760_v7  ;;  %10320 = vmatpush.bf16.msra.mxu3 %v16608_v49  ;;  %v16480_v7 = vor.u32 %v17427_v44, %v16479_v8  ;;  %v10184_v61 = vpop.f32.mrf.mxu0  ;;  %v17148_v49 = vld [vmem:[%s27437_s3 + $0x514] sm:$0xf]  ;;  %v16287_v8 = vld [vmem:[%s27437_s3 + $0xc08] sm:$0xf] }
 0x478   : > { %v10185_v30 = vadd.f32 %v10184_v61, %v22528_v34  ;;  %v14889_v34 = vld [vmem:[%s27437_s3 + $0x150] sm:$0xf0]  ;;  %v17379_v44 = vld [vmem:[%s27437_s3 + $0xc44] sm:$0xf0] }
 0x479   : > { %10403 = vmatpush.bf16.msra.mxu1 %v15272_v17  ;;  %10361 = vmatpush.bf16.msrb.mxu2 %v15972_v21  ;;  %v17164_v17 = vld [vmem:[%s27437_s3 + $0x594] sm:$0xf]  ;;  %v10197_v43 = vpop.f32.mrf.mxu1  ;;  %v7548_v24 = vpop.f32.mrf.mxu2 }
 0x47a   : > { %10391 = vmatmul.bf16.vlgmr.msra.gmra.mxu0 %v24085_v58  ;;  %v15468_v28 = vor.u32 %v17164_v17, %v15465_v27  ;;  %v25004_v10 = vadd.f32 %v10197_v43, %v10185_v30  ;;  %v15401_v21 = vld [vmem:[%s27437_s3 + $0x550] sm:$0xf0]  ;;  %v16288_v27 = vor.u32 %v17379_v44, %v16287_v8  ;;  %v7509_v48 = vpop.f32.mrf.mxu3  ;;  %v15215_v30 = vld [vmem:[%s27437_s3 + $0x398] sm:$0xf] }
 0x47b   : > { %10435 = vmatpush.bf16.msrb.mxu0 %v15212_v57  ;;  %10321 = vmatpush.bf16.msra.mxu3 %v16544_v36  ;;  %v15844_v57 = vor.u32 %v17259_v45, %v15841_v46  ;;  %v17348_v36 = vld [vmem:[%s27437_s3 + $0xb4c] sm:$0xf0]  ;;  %v15404_v56 = vor.u32 %v17148_v49, %v15401_v21  ;;  %v16988_v17 = vld [vmem:[%s27437_s3 + $0x14] sm:$0xf]  ;;  %v17109_v43 = vld [vmem:[%s27437_s3 + $0x3d4] sm:$0xf0] }
 0x47c   : > { %10404 = vmatmul.bf16.vlgmr.msra.gmra.mxu1 %v24087_v35  ;;  %v15273_v61 = vld [vmem:[%s27437_s3 + $0x450] sm:$0xf0]  ;;  %v17316_v49 = vld [vmem:[%s27437_s3 + $0xa4c] sm:$0xf0]  ;;  %v15663_v24 = vld [vmem:[%s27437_s3 + $0x718] sm:$0xf] }
 0x47d   : > { %10448 = vmatpush.bf16.msrb.mxu1 %v15724_v59  ;;  %10362 = vmatpush.bf16.msrb.mxu2 %v15908_v41  ;;  %v16415_v59 = vld [vmem:[%s27437_s3 + $0xd08] sm:$0xf]  ;;  %v17132_v41 = vld [vmem:[%s27437_s3 + $0x494] sm:$0xf]  ;;  %v15087_v8 = vld [vmem:[%s27437_s3 + $0x298] sm:$0xf] }
 0x47e   : > { %v17077_v44 = vld [vmem:[%s27437_s3 + $0x2d4] sm:$0xf0] }
 0x47f   : > { %10436 = vmatpush.bf16.msrb.mxu0 %v15148_v6  ;;  %10322 = vmatpush.bf16.msra.mxu3 %v16480_v7  ;;  %v16416_v6 = vor.u32 %v17411_v18, %v16415_v59  ;;  %v10186_v45 = vpop.f32.mrf.mxu0  ;;  %v14828_v7 = vor.u32 %v17004_v14, %v14825_v25  ;;  %v14761_v59 = vld [vmem:[%s27437_s3 + $0x50] sm:$0xf0]  ;;  %v17300_v14 = vld [vmem:[%s27437_s3 + $0x9cc] sm:$0xf0]  ;;  %v15088_v55 = vor.u32 %v17077_v44, %v15087_v8  ;;  %v17189_v48 = vld [vmem:[%s27437_s3 + $0x654] sm:$0xf0] }
 0x480   : > { %v17116_v18 = vld [vmem:[%s27437_s3 + $0x414] sm:$0xf]  ;;  %v15599_v45 = vld [vmem:[%s27437_s3 + $0x698] sm:$0xf] }
 0x481   : > { %10449 = vmatpush.bf16.msrb.mxu1 %v15660_v1  ;;  %v17020_v1 = vld [vmem:[%s27437_s3 + $0x114] sm:$0xf]  ;;  %10363 = vmatpush.bf16.msrb.mxu2 %v15844_v57  ;;  %v15340_v57 = vor.u32 %v17132_v41, %v15337_v0  ;;  %v15276_v12 = vor.u32 %v17116_v18, %v15273_v61  ;;  %v15535_v18 = vld [vmem:[%s27437_s3 + $0x618] sm:$0xf] }
 0x483   : > { %10437 = vmatpush.bf16.msrb.mxu0 %v15084_v37  ;;  %v14892_v37 = vor.u32 %v17020_v1, %v14889_v34  ;;  %10323 = vmatpush.bf16.msra.mxu3 %v16416_v6  ;;  %v16673_v6 = vld [vmem:[%s27437_s3 + $0xf48] sm:$0xf0]  ;;  %v14764_v1 = vor.u32 %v16988_v17, %v14761_v59  ;;  %v16039_v34 = vld [vmem:[%s27437_s3 + $0xa10] sm:$0xf]  ;;  %v17061_v59 = vld [vmem:[%s27437_s3 + $0x254] sm:$0xf0] }
 0x485   : > { %10450 = vmatpush.bf16.msrb.mxu1 %v15596_v39  ;;  %v16167_v39 = vld [vmem:[%s27437_s3 + $0xb10] sm:$0xf]  ;;  %10364 = vmatpush.bf16.msrb.mxu2 %v15780_v42  ;;  %v15216_v42 = vor.u32 %v17109_v43, %v15215_v30  ;;  %v16481_v30 = vld [vmem:[%s27437_s3 + $0xdc8] sm:$0xf0] }
 0x486   : > { %v16168_v46 = vor.u32 %v17348_v36, %v16167_v39  ;;  %v17221_v39 = vld [vmem:[%s27437_s3 + $0x754] sm:$0xf0]  ;;  %v17451_v36 = vld [vmem:[%s27437_s3 + $0xe8c] sm:$0xf]  ;;  %v15847_v43 = vld [vmem:[%s27437_s3 + $0x890] sm:$0xf] }
 0x487   : > { %10438 = vmatpush.bf16.msrb.mxu0 %v15020_v19  ;;  %v16737_v19 = vld [vmem:[%s27437_s3 + $0xfc8] sm:$0xf0]  ;;  %10324 = vmatpush.bf16.msra.mxu3 %v16352_v5  ;;  %v15975_v5 = vld [vmem:[%s27437_s3 + $0x990] sm:$0xf]  ;;  %v15664_v41 = vor.u32 %v17221_v39, %v15663_v24 }
 0x488   : > { %10365 = vmatmul.bf16.vlgmr.msrb.gmra.mxu2 %v24430_v32  ;;  %v16740_v16 = vor.u32 %v17483_v50, %v16737_v19  ;;  %v17205_v50 = vld [vmem:[%s27437_s3 + $0x6d4] sm:$0xf0]  ;;  %v17435_v19 = vld [vmem:[%s27437_s3 + $0xe0c] sm:$0xf]  ;;  %v17252_v24 = vld [vmem:[%s27437_s3 + $0x84c] sm:$0xf0] }
 0x489   : > { %10451 = vmatpush.bf16.msrb.mxu1 %v15532_v2  ;;  %10409 = vmatpush.bf16.msra.mxu2 %v16232_v26  ;;  %v10199_v2 = vpop.f32.mrf.mxu1  ;;  %v17093_v26 = vld [vmem:[%s27437_s3 + $0x354] sm:$0xf0]  ;;  %v15600_v17 = vor.u32 %v17205_v50, %v15599_v45  ;;  %v17387_v50 = vld [vmem:[%s27437_s3 + $0xc8c] sm:$0xf] }
 0x48a   : > { %v15152_v25 = vor.u32 %v17093_v26, %v15151_v9  ;;  %v16545_v2 = vld [vmem:[%s27437_s3 + $0xe48] sm:$0xf0]  ;;  %v15783_v26 = vld [vmem:[%s27437_s3 + $0x810] sm:$0xf] }
 0x48b   : > { %10439 = vmatpush.bf16.msrb.mxu0 %v14956_v11  ;;  %v15727_v11 = vld [vmem:[%s27437_s3 + $0x798] sm:$0xf]  ;;  %10325 = vmatpush.bf16.msra.mxu3 %v16288_v27  ;;  %v15784_v45 = vor.u32 %v17252_v24, %v15783_v26 }
 0x48c   : > { %v15728_v21 = vor.u32 %v17237_v4, %v15727_v11  ;;  %v15023_v27 = vld [vmem:[%s27437_s3 + $0x218] sm:$0xf]  ;;  %v17268_v11 = vld [vmem:[%s27437_s3 + $0x8cc] sm:$0xf0] }
 0x48d   : > { %10452 = vmatpush.bf16.msrb.mxu1 %v15468_v28  ;;  %10410 = vmatpush.bf16.msra.mxu2 %v16168_v46  ;;  %v17467_v28 = vld [vmem:[%s27437_s3 + $0xf0c] sm:$0xf]  ;;  %v15976_v46 = vor.u32 %v17300_v14, %v15975_v5  ;;  %v15024_v4 = vor.u32 %v17061_v59, %v15023_v27  ;;  %v16233_v5 = vld [vmem:[%s27437_s3 + $0xbd0] sm:$0xf0] }
 0x48e   : > { %v16676_v13 = vor.u32 %v17467_v28, %v16673_v6  ;;  %10326 = vmatmul.bf16.vlgmr.msra.gmra.mxu3 %v24680_v33  ;;  %v15536_v6 = vor.u32 %v17189_v48, %v15535_v18  ;;  %v17013_v18 = vld [vmem:[%s27437_s3 + $0xd4] sm:$0xf0] }
 0x48f   : > { %10440 = vmatpush.bf16.msrb.mxu0 %v14892_v37  ;;  %10370 = vmatpush.bf16.msrb.mxu3 %v16740_v16  ;;  %v16040_v37 = vor.u32 %v17316_v49, %v16039_v34  ;;  %v17419_v16 = vld [vmem:[%s27437_s3 + $0xd8c] sm:$0xf]  ;;  %v14959_v34 = vld [vmem:[%s27437_s3 + $0x198] sm:$0xf] }
 0x490   : > { %v17045_v49 = vld [vmem:[%s27437_s3 + $0x1d4] sm:$0xf0] }
 0x491   : > { %10453 = vmatpush.bf16.msrb.mxu1 %v15404_v56  ;;  %10411 = vmatpush.bf16.msra.mxu2 %v16104_v3  ;;  %v16609_v56 = vld [vmem:[%s27437_s3 + $0xec8] sm:$0xf0]  ;;  %v7598_v3 = vpop.f32.mrf.mxu2  ;;  %v7559_v44 = vpop.f32.mrf.mxu3  ;;  %v17141_v48 = vld [vmem:[%s27437_s3 + $0x4d4] sm:$0xf0] }
 0x492   : > { %v16612_v0 = vor.u32 %v17451_v36, %v16609_v56  ;;  %v25167_v28 = vadd.f32 %v7598_v3, %v24790_v22  ;;  %v17173_v22 = vld [vmem:[%s27437_s3 + $0x5d4] sm:$0xf0]  ;;  %v14960_v36 = vor.u32 %v17045_v49, %v14959_v34  ;;  %v17356_v56 = vld [vmem:[%s27437_s3 + $0xb94] sm:$0xf]  ;;  %v16743_v3 = vld [vmem:[%s27437_s3 + $0xf90] sm:$0xf] }
 0x493   : > { %10441 = vmatpush.bf16.msrb.mxu0 %v14828_v7  ;;  %10371 = vmatpush.bf16.msrb.mxu3 %v16676_v13  ;;  %v15911_v7 = vld [vmem:[%s27437_s3 + $0x910] sm:$0xf]  ;;  %v16417_v13 = vld [vmem:[%s27437_s3 + $0xd48] sm:$0xf0]  ;;  %v17324_v34 = vld [vmem:[%s27437_s3 + $0xa94] sm:$0xf] }
 0x494   : > { %v15912_v61 = vor.u32 %v17284_v54, %v15911_v7  ;;  %v16236_v7 = vor.u32 %v17356_v56, %v16233_v5  ;;  %v16105_v49 = vld [vmem:[%s27437_s3 + $0xad0] sm:$0xf0]  ;;  %v15729_v5 = vld [vmem:[%s27437_s3 + $0x7d8] sm:$0xf0] }
 0x495   : > { %10454 = vmatpush.bf16.msrb.mxu1 %v15340_v57  ;;  %10412 = vmatpush.bf16.msra.mxu2 %v16040_v37  ;;  %v16548_v57 = vor.u32 %v17435_v19, %v16545_v2  ;;  %v16353_v19 = vld [vmem:[%s27437_s3 + $0xcc8] sm:$0xf0]  ;;  %v25221_v2 = vadd.f32 %v7559_v44, %v24962_v15  ;;  %v14831_v15 = vld [vmem:[%s27437_s3 + $0x98] sm:$0xf]  ;;  %v16108_v56 = vor.u32 %v17324_v34, %v16105_v49  ;;  %v15913_v34 = vld [vmem:[%s27437_s3 + $0x950] sm:$0xf0] }
 0x496   : > { %v16356_v59 = vor.u32 %v17387_v50, %v16353_v19  ;;  %v17085_v19 = vld [vmem:[%s27437_s3 + $0x31c] sm:$0xf] }
 0x497   : > { %10442 = vmatpush.bf16.msrb.mxu0 %v14764_v1  ;;  %10372 = vmatpush.bf16.msrb.mxu3 %v16612_v0  ;;  %v16484_v1 = vor.u32 %v17419_v16, %v16481_v30  ;;  %v10236_v9 = vpop.f32.mrf.mxu0  ;;  %v15407_v0 = vld [vmem:[%s27437_s3 + $0x518] sm:$0xf]  ;;  %v17371_v16 = vld [vmem:[%s27437_s3 + $0xc0c] sm:$0xf] }
 0x498   : > { %v10237_v37 = vadd.f32 %v10236_v9, %v22646_v20  ;;  %v17029_v20 = vld [vmem:[%s27437_s3 + $0x154] sm:$0xf0]  ;;  %v16289_v30 = vld [vmem:[%s27437_s3 + $0xc48] sm:$0xf0] }
 0x499   : > { %10455 = vmatpush.bf16.msrb.mxu1 %v15276_v12  ;;  %10413 = vmatpush.bf16.msra.mxu2 %v15976_v46  ;;  %v15471_v12 = vld [vmem:[%s27437_s3 + $0x598] sm:$0xf]  ;;  %v10249_v39 = vpop.f32.mrf.mxu1  ;;  %v7600_v54 = vpop.f32.mrf.mxu2 }
 0x49a   : > { %10443 = vmatmul.bf16.vlgmr.msrb.gmra.mxu0 %v24085_v58  ;;  %v15472_v14 = vor.u32 %v17173_v22, %v15471_v12  ;;  %v25209_v8 = vadd.f32 %v10249_v39, %v10237_v37  ;;  %v17157_v46 = vld [vmem:[%s27437_s3 + $0x554] sm:$0xf0]  ;;  %v16292_v22 = vor.u32 %v17371_v16, %v16289_v30  ;;  %v7561_v26 = vpop.f32.mrf.mxu3  ;;  %v17101_v37 = vld [vmem:[%s27437_s3 + $0x39c] sm:$0xf] }
 0x49b   : > { %10487 = vmatpush.bf16.msra.mxu0 %v15216_v42  ;;  %10373 = vmatpush.bf16.msrb.mxu3 %v16548_v57  ;;  %v15848_v42 = vor.u32 %v17268_v11, %v15847_v43  ;;  %v16169_v57 = vld [vmem:[%s27437_s3 + $0xb50] sm:$0xf0]  ;;  %v15408_v27 = vor.u32 %v17157_v46, %v15407_v0  ;;  %v14767_v12 = vld [vmem:[%s27437_s3 + $0x18] sm:$0xf]  ;;  %v15217_v39 = vld [vmem:[%s27437_s3 + $0x3d8] sm:$0xf0] }
 0x49c   : > { %10456 = vmatmul.bf16.vlgmr.msrb.gmra.mxu1 %v24087_v35  ;;  %v17125_v9 = vld [vmem:[%s27437_s3 + $0x454] sm:$0xf0]  ;;  %v16041_v0 = vld [vmem:[%s27437_s3 + $0xa50] sm:$0xf0]  ;;  %v17213_v54 = vld [vmem:[%s27437_s3 + $0x71c] sm:$0xf] }
 0x49d   : > { %10500 = vmatpush.bf16.msra.mxu1 %v15728_v21  ;;  %10414 = vmatpush.bf16.msra.mxu2 %v15912_v61  ;;  %v17403_v21 = vld [vmem:[%s27437_s3 + $0xd0c] sm:$0xf]  ;;  %v15343_v61 = vld [vmem:[%s27437_s3 + $0x498] sm:$0xf]  ;;  %v17069_v16 = vld [vmem:[%s27437_s3 + $0x29c] sm:$0xf] }
 0x49e   : > { %v15089_v30 = vld [vmem:[%s27437_s3 + $0x2d8] sm:$0xf0] }
 0x49f   : > { %10488 = vmatpush.bf16.msra.mxu0 %v15152_v25  ;;  %10374 = vmatpush.bf16.msrb.mxu3 %v16484_v1  ;;  %v16420_v25 = vor.u32 %v17403_v21, %v16417_v13  ;;  %v10238_v43 = vpop.f32.mrf.mxu0  ;;  %v14832_v1 = vor.u32 %v17013_v18, %v14831_v15  ;;  %v16997_v21 = vld [vmem:[%s27437_s3 + $0x54] sm:$0xf0]  ;;  %v15977_v15 = vld [vmem:[%s27437_s3 + $0x9d0] sm:$0xf0]  ;;  %v15092_v49 = vor.u32 %v17069_v16, %v15089_v30  ;;  %v15537_v26 = vld [vmem:[%s27437_s3 + $0x658] sm:$0xf0] }
 0x4a0   : > { %v15279_v13 = vld [vmem:[%s27437_s3 + $0x418] sm:$0xf]  ;;  %v17197_v43 = vld [vmem:[%s27437_s3 + $0x69c] sm:$0xf] }
 0x4a1   : > { %10501 = vmatpush.bf16.msra.mxu1 %v15664_v41  ;;  %v14895_v41 = vld [vmem:[%s27437_s3 + $0x118] sm:$0xf]  ;;  %10415 = vmatpush.bf16.msra.mxu2 %v15848_v42  ;;  %v15344_v42 = vor.u32 %v17141_v48, %v15343_v61  ;;  %v15280_v44 = vor.u32 %v17125_v9, %v15279_v13  ;;  %v17181_v13 = vld [vmem:[%s27437_s3 + $0x61c] sm:$0xf] }
 0x4a3   : > { %10489 = vmatpush.bf16.msra.mxu0 %v15088_v55  ;;  %v14896_v55 = vor.u32 %v17029_v20, %v14895_v41  ;;  %10375 = vmatpush.bf16.msrb.mxu3 %v16420_v25  ;;  %v17476_v25 = vld [vmem:[%s27437_s3 + $0xf4c] sm:$0xf0]  ;;  %v14768_v41 = vor.u32 %v16997_v21, %v14767_v12  ;;  %v17308_v20 = vld [vmem:[%s27437_s3 + $0xa14] sm:$0xf]  ;;  %v15025_v21 = vld [vmem:[%s27437_s3 + $0x258] sm:$0xf0] }
 0x4a5   : > { %10502 = vmatpush.bf16.msra.mxu1 %v15600_v17  ;;  %v17340_v17 = vld [vmem:[%s27437_s3 + $0xb14] sm:$0xf]  ;;  %10416 = vmatpush.bf16.msra.mxu2 %v15784_v45  ;;  %v15220_v45 = vor.u32 %v17101_v37, %v15217_v39  ;;  %v17428_v37 = vld [vmem:[%s27437_s3 + $0xdcc] sm:$0xf0] }
 0x4a6   : > { %v16172_v11 = vor.u32 %v17340_v17, %v16169_v57  ;;  %v15665_v17 = vld [vmem:[%s27437_s3 + $0x758] sm:$0xf0]  ;;  %v16615_v57 = vld [vmem:[%s27437_s3 + $0xe90] sm:$0xf]  ;;  %v17260_v39 = vld [vmem:[%s27437_s3 + $0x894] sm:$0xf] }
 0x4a7   : > { %10490 = vmatpush.bf16.msra.mxu0 %v15024_v4  ;;  %v17492_v4 = vld [vmem:[%s27437_s3 + $0xfcc] sm:$0xf0]  ;;  %10376 = vmatpush.bf16.msrb.mxu3 %v16356_v59  ;;  %v17292_v59 = vld [vmem:[%s27437_s3 + $0x994] sm:$0xf]  ;;  %v15668_v61 = vor.u32 %v17213_v54, %v15665_v17 }
 0x4a8   : > { %10417 = vmatmul.bf16.vlgmr.msra.gmra.mxu2 %v24430_v32  ;;  %v16744_v24 = vor.u32 %v17492_v4, %v16743_v3  ;;  %v15601_v3 = vld [vmem:[%s27437_s3 + $0x6d8] sm:$0xf0]  ;;  %v16551_v4 = vld [vmem:[%s27437_s3 + $0xe10] sm:$0xf]  ;;  %v15785_v54 = vld [vmem:[%s27437_s3 + $0x850] sm:$0xf0] }
 0x4a9   : > { %10503 = vmatpush.bf16.msra.mxu1 %v15536_v6  ;;  %10461 = vmatpush.bf16.msrb.mxu2 %v16236_v7  ;;  %v10251_v6 = vpop.f32.mrf.mxu1  ;;  %v15153_v7 = vld [vmem:[%s27437_s3 + $0x358] sm:$0xf0]  ;;  %v15604_v12 = vor.u32 %v17197_v43, %v15601_v3  ;;  %v16359_v3 = vld [vmem:[%s27437_s3 + $0xc90] sm:$0xf] }
 0x4aa   : > { %v15156_v18 = vor.u32 %v17085_v19, %v15153_v7  ;;  %v17444_v6 = vld [vmem:[%s27437_s3 + $0xe4c] sm:$0xf0]  ;;  %v17244_v7 = vld [vmem:[%s27437_s3 + $0x814] sm:$0xf] }
 0x4ab   : > { %10491 = vmatpush.bf16.msra.mxu0 %v14960_v36  ;;  %v17229_v36 = vld [vmem:[%s27437_s3 + $0x79c] sm:$0xf]  ;;  %10377 = vmatpush.bf16.msrb.mxu3 %v16292_v22  ;;  %v15788_v43 = vor.u32 %v17244_v7, %v15785_v54 }
 0x4ac   : > { %v15732_v46 = vor.u32 %v17229_v36, %v15729_v5  ;;  %v17053_v22 = vld [vmem:[%s27437_s3 + $0x21c] sm:$0xf]  ;;  %v15849_v36 = vld [vmem:[%s27437_s3 + $0x8d0] sm:$0xf0] }
 0x4ad   : > { %10504 = vmatpush.bf16.msra.mxu1 %v15472_v14  ;;  %10462 = vmatpush.bf16.msrb.mxu2 %v16172_v11  ;;  %v16679_v14 = vld [vmem:[%s27437_s3 + $0xf10] sm:$0xf]  ;;  %v15980_v11 = vor.u32 %v17292_v59, %v15977_v15  ;;  %v15028_v5 = vor.u32 %v17053_v22, %v15025_v21  ;;  %v17365_v59 = vld [vmem:[%s27437_s3 + $0xbd4] sm:$0xf0]  ;;  %v15281_v7 = vld [vmem:[%s27437_s3 + $0x458] sm:$0xf0] }
 0x4ae   : > { %v16680_v50 = vor.u32 %v17476_v25, %v16679_v14  ;;  %10378 = vmatmul.bf16.vlgmr.msrb.gmra.mxu3 %v24680_v33  ;;  %v15540_v14 = vor.u32 %v17181_v13, %v15537_v26  ;;  %v14833_v13 = vld [vmem:[%s27437_s3 + $0xd8] sm:$0xf0] }
 0x4af   : > { %10492 = vmatpush.bf16.msra.mxu0 %v14896_v55  ;;  %10422 = vmatpush.bf16.msra.mxu3 %v16744_v24  ;;  %v16044_v55 = vor.u32 %v17308_v20, %v16041_v0  ;;  %v16487_v24 = vld [vmem:[%s27437_s3 + $0xd90] sm:$0xf]  ;;  %v14961_v20 = vld [vmem:[%s27437_s3 + $0x1d8] sm:$0xf0] }
 0x4b0   : > { %v16488_v25 = vor.u32 %v17428_v37, %v16487_v24  ;;  %v17165_v0 = vld [vmem:[%s27437_s3 + $0x59c] sm:$0xf]  ;;  %v16295_v24 = vld [vmem:[%s27437_s3 + $0xc10] sm:$0xf] }
 0x4b1   : > { %10505 = vmatpush.bf16.msra.mxu1 %v15408_v27  ;;  %10463 = vmatpush.bf16.msrb.mxu2 %v16108_v56  ;;  %v17460_v27 = vld [vmem:[%s27437_s3 + $0xecc] sm:$0xf0]  ;;  %v25371_v56 = vpop.f32.mrf.mxu2  ;;  %v7611_v30 = vpop.f32.mrf.mxu3  ;;  %v15345_v26 = vld [vmem:[%s27437_s3 + $0x4d8] sm:$0xf0] }
 0x4b2   : > { %v16616_v48 = vor.u32 %v17460_v27, %v16615_v57  ;;  %v16239_v27 = vld [vmem:[%s27437_s3 + $0xb98] sm:$0xf]  ;;  %v17380_v37 = vld [vmem:[%s27437_s3 + $0xc4c] sm:$0xf0] }
 0x4b3   : > { %10493 = vmatpush.bf16.msra.mxu0 %v14832_v1  ;;  %10423 = vmatpush.bf16.msra.mxu3 %v16680_v50  ;;  %v17276_v1 = vld [vmem:[%s27437_s3 + $0x914] sm:$0xf]  ;;  %v17412_v50 = vld [vmem:[%s27437_s3 + $0xd4c] sm:$0xf0] }
 0x4b4   : > { %v15916_v9 = vor.u32 %v17276_v1, %v15913_v34  ;;  %v16240_v1 = vor.u32 %v17365_v59, %v16239_v27  ;;  %v15735_v27 = vld [vmem:[%s27437_s3 + $0x7a0] sm:$0xf] }
 0x4b5   : > { %10506 = vmatpush.bf16.msra.mxu1 %v15344_v42  ;;  %10464 = vmatpush.bf16.msrb.mxu2 %v16044_v55  ;;  %v16552_v42 = vor.u32 %v17444_v6, %v16551_v4  ;;  %v17396_v4 = vld [vmem:[%s27437_s3 + $0xccc] sm:$0xf0]  ;;  %v25425_v6 = vadd.f32 %v7611_v30, %v25167_v28  ;;  %v17005_v28 = vld [vmem:[%s27437_s3 + $0x9c] sm:$0xf]  ;;  %v17317_v30 = vld [vmem:[%s27437_s3 + $0xa54] sm:$0xf0] }
 0x4b6   : > { %v16360_v21 = vor.u32 %v17396_v4, %v16359_v3 }
 0x4b7   : > { %10494 = vmatpush.bf16.msra.mxu0 %v14768_v41  ;;  %10424 = vmatpush.bf16.msra.mxu3 %v16616_v48  ;;  %v17037_v41 = vld [vmem:[%s27437_s3 + $0x19c] sm:$0xf]  ;;  %v10288_v19 = vpop.f32.mrf.mxu0 }
 0x4b8   : > { %v10289_v55 = vadd.f32 %v10288_v19, %v22759_v51  ;;  %v14964_v57 = vor.u32 %v17037_v41, %v14961_v20  ;;  %v14897_v51 = vld [vmem:[%s27437_s3 + $0x158] sm:$0xf0]  ;;  %v14836_v41 = vor.u32 %v17005_v28, %v14833_v13  ;;  %v16111_v20 = vld [vmem:[%s27437_s3 + $0xa98] sm:$0xf] }
 0x4b9   : > { %10507 = vmatpush.bf16.msra.mxu1 %v15280_v44  ;;  %10465 = vmatpush.bf16.msrb.mxu2 %v15980_v11  ;;  %v15852_v44 = vor.u32 %v17260_v39, %v15849_v36  ;;  %v10301_v17 = vpop.f32.mrf.mxu1  ;;  %v17149_v48 = vld [vmem:[%s27437_s3 + $0x51c] sm:$0xf]  ;;  %v10212_v34 = vpop.f32.mrf.mxu2  ;;  %v15983_v28 = vld [vmem:[%s27437_s3 + $0x998] sm:$0xf] }
 0x4ba   : > { %10495 = vmatmul.bf16.vlgmr.msra.gmra.mxu0 %v24085_v58  ;;  %v25413_v16 = vadd.f32 %v10301_v17, %v10289_v55  ;;  %v15409_v11 = vld [vmem:[%s27437_s3 + $0x558] sm:$0xf0]  ;;  %v7613_v54 = vpop.f32.mrf.mxu3  ;;  %v15223_v17 = vld [vmem:[%s27437_s3 + $0x3a0] sm:$0xf]  ;;  %v17301_v13 = vld [vmem:[%s27437_s3 + $0x9d4] sm:$0xf0] }
 0x4bb   : > { %10539 = vmatpush.bf16.msrb.mxu0 %v15220_v45  ;;  %10425 = vmatpush.bf16.msra.mxu3 %v16552_v42  ;;  %v15473_v45 = vld [vmem:[%s27437_s3 + $0x5d8] sm:$0xf0]  ;;  %v17349_v42 = vld [vmem:[%s27437_s3 + $0xb54] sm:$0xf0]  ;;  %v15412_v22 = vor.u32 %v17149_v48, %v15409_v11  ;;  %v17094_v34 = vld [vmem:[%s27437_s3 + $0x35c] sm:$0xf0] }
 0x4bc   : > { %10508 = vmatmul.bf16.vlgmr.msra.gmra.mxu1 %v24087_v35  ;;  %v15476_v15 = vor.u32 %v17165_v0, %v15473_v45  ;;  %v17333_v0 = vld [vmem:[%s27437_s3 + $0xad4] sm:$0xf0]  ;;  %v17117_v19 = vld [vmem:[%s27437_s3 + $0x41c] sm:$0xf] }
 0x4bd   : > { %10552 = vmatpush.bf16.msrb.mxu1 %v15732_v46  ;;  %10466 = vmatpush.bf16.msrb.mxu2 %v15916_v9  ;;  %v16423_v46 = vld [vmem:[%s27437_s3 + $0xd10] sm:$0xf]  ;;  %v17133_v9 = vld [vmem:[%s27437_s3 + $0x49c] sm:$0xf]  ;;  %v16112_v59 = vor.u32 %v17333_v0, %v16111_v20  ;;  %v16047_v48 = vld [vmem:[%s27437_s3 + $0xa18] sm:$0xf] }
 0x4be   : > { %v15348_v45 = vor.u32 %v17133_v9, %v15345_v26  ;;  %v15919_v20 = vld [vmem:[%s27437_s3 + $0x918] sm:$0xf] }
 0x4bf   : > { %10540 = vmatpush.bf16.msrb.mxu0 %v15156_v18  ;;  %10426 = vmatpush.bf16.msra.mxu3 %v16488_v25  ;;  %v16424_v18 = vor.u32 %v17412_v50, %v16423_v46  ;;  %v10290_v39 = vpop.f32.mrf.mxu0  ;;  %v16296_v46 = vor.u32 %v17380_v37, %v16295_v24  ;;  %v14769_v50 = vld [vmem:[%s27437_s3 + $0x58] sm:$0xf0]  ;;  %v15095_v37 = vld [vmem:[%s27437_s3 + $0x2a0] sm:$0xf]  ;;  %v17285_v0 = vld [vmem:[%s27437_s3 + $0x954] sm:$0xf0] }
 0x4c0   : > { %v17078_v39 = vld [vmem:[%s27437_s3 + $0x2dc] sm:$0xf0]  ;;  %v15920_v54 = vor.u32 %v17285_v0, %v15919_v20  ;;  %v16361_v20 = vld [vmem:[%s27437_s3 + $0xcd0] sm:$0xf0] }
 0x4c1   : > { %10553 = vmatpush.bf16.msrb.mxu1 %v15668_v61  ;;  %v17021_v61 = vld [vmem:[%s27437_s3 + $0x11c] sm:$0xf]  ;;  %10467 = vmatpush.bf16.msrb.mxu2 %v15852_v44  ;;  %v10303_v25 = vpop.f32.mrf.mxu1 }
 0x4c2   : > { %v16989_v44 = vld [vmem:[%s27437_s3 + $0x1c] sm:$0xf]  ;;  %v17436_v25 = vld [vmem:[%s27437_s3 + $0xe14] sm:$0xf] }
 0x4c3   : > { %10541 = vmatpush.bf16.msrb.mxu0 %v15092_v49  ;;  %v14900_v49 = vor.u32 %v17021_v61, %v14897_v51  ;;  %10427 = vmatpush.bf16.msra.mxu3 %v16424_v18  ;;  %v17468_v18 = vld [vmem:[%s27437_s3 + $0xf14] sm:$0xf]  ;;  %v14772_v51 = vor.u32 %v16989_v44, %v14769_v50  ;;  %v15096_v44 = vor.u32 %v17078_v39, %v15095_v37  ;;  %v15031_v50 = vld [vmem:[%s27437_s3 + $0x220] sm:$0xf] }
 0x4c4   : > { %v16681_v61 = vld [vmem:[%s27437_s3 + $0xf50] sm:$0xf0]  ;;  %v14903_v39 = vld [vmem:[%s27437_s3 + $0x120] sm:$0xf] }
 0x4c5   : > { %10554 = vmatpush.bf16.msrb.mxu1 %v15604_v12  ;;  %v16175_v12 = vld [vmem:[%s27437_s3 + $0xb18] sm:$0xf]  ;;  %10468 = vmatpush.bf16.msrb.mxu2 %v15788_v43  ;;  %v15284_v43 = vor.u32 %v17117_v19, %v15281_v7  ;;  %v16684_v4 = vor.u32 %v17468_v18, %v16681_v61  ;;  %v17062_v19 = vld [vmem:[%s27437_s3 + $0x25c] sm:$0xf0] }
 0x4c6   : > { %v16176_v36 = vor.u32 %v17349_v42, %v16175_v12  ;;  %v16048_v12 = vor.u32 %v17317_v30, %v16047_v48  ;;  %v17222_v42 = vld [vmem:[%s27437_s3 + $0x75c] sm:$0xf0]  ;;  %v15032_v18 = vor.u32 %v17062_v19, %v15031_v50  ;;  %v17341_v50 = vld [vmem:[%s27437_s3 + $0xb1c] sm:$0xf] }
 0x4c7   : > { %10542 = vmatpush.bf16.msrb.mxu0 %v15028_v5  ;;  %v17484_v5 = vld [vmem:[%s27437_s3 + $0xf94] sm:$0xf]  ;;  %10428 = vmatpush.bf16.msra.mxu3 %v16360_v21  ;;  %v15543_v7 = vld [vmem:[%s27437_s3 + $0x620] sm:$0xf]  ;;  %v16177_v19 = vld [vmem:[%s27437_s3 + $0xb58] sm:$0xf0] }
 0x4c8   : > { %10469 = vmatmul.bf16.vlgmr.msrb.gmra.mxu2 %v24430_v32  ;;  %v16617_v21 = vld [vmem:[%s27437_s3 + $0xed0] sm:$0xf0]  ;;  %v14967_v61 = vld [vmem:[%s27437_s3 + $0x1a0] sm:$0xf] }
 0x4c9   : > { %10555 = vmatpush.bf16.msrb.mxu1 %v15540_v14  ;;  %10513 = vmatpush.bf16.msra.mxu2 %v16240_v1  ;;  %v16745_v14 = vld [vmem:[%s27437_s3 + $0xfd0] sm:$0xf0]  ;;  %v15159_v1 = vld [vmem:[%s27437_s3 + $0x320] sm:$0xf] }
 0x4ca   : > { %v16748_v55 = vor.u32 %v17484_v5, %v16745_v14  ;;  %v15160_v9 = vor.u32 %v17094_v34, %v15159_v1  ;;  %v15984_v5 = vor.u32 %v17301_v13, %v15983_v28  ;;  %v17206_v14 = vld [vmem:[%s27437_s3 + $0x6dc] sm:$0xf0]  ;;  %v17404_v1 = vld [vmem:[%s27437_s3 + $0xd14] sm:$0xf] }
 0x4cb   : > { %10543 = vmatpush.bf16.msrb.mxu0 %v14964_v57  ;;  %v17110_v57 = vld [vmem:[%s27437_s3 + $0x3dc] sm:$0xf0]  ;;  %10429 = vmatpush.bf16.msra.mxu3 %v16296_v46  ;;  %v16425_v34 = vld [vmem:[%s27437_s3 + $0xd50] sm:$0xf0] }
 0x4cc   : > { %v15224_v11 = vor.u32 %v17110_v57, %v15223_v17  ;;  %v17420_v17 = vld [vmem:[%s27437_s3 + $0xd94] sm:$0xf]  ;;  %v25584_v30 = vld [vmem:[%s27438_s4] sm:$0xff]  ;;  %v16428_v37 = vor.u32 %v17404_v1, %v16425_v34  ;;  %v17325_v1 = vld [vmem:[%s27437_s3 + $0xa9c] sm:$0xf] }
 0x4cd   : > { %10556 = vmatpush.bf16.msrb.mxu1 %v15476_v15  ;;  %10514 = vmatpush.bf16.msra.mxu2 %v16176_v36  ;;  %v17238_v15 = vld [vmem:[%s27437_s3 + $0x7dc] sm:$0xf0]  ;;  %v16489_v57 = vld [vmem:[%s27437_s3 + $0xdd0] sm:$0xf0]  ;;  %v11011_v28 = vperm.slane %v25584_v30, 0 }
 0x4ce   : > { %v15736_v3 = vor.u32 %v17238_v15, %v15735_v27  ;;  %10430 = vmatmul.bf16.vlgmr.msra.gmra.mxu3 %v24680_v33  ;;  %v15607_v36 = vld [vmem:[%s27437_s3 + $0x6a0] sm:$0xf]  ;;  %v15855_v27 = vld [vmem:[%s27437_s3 + $0x898] sm:$0xf]  ;;  %v25575_v15 = vpop.f32.mrf.mxu2  ;;  %v16492_v48 = vor.u32 %v17420_v17, %v16489_v57  ;;  %v16113_v34 = vld [vmem:[%s27437_s3 + $0xad8] sm:$0xf0] }
 0x4cf   : > { %10544 = vmatpush.bf16.msrb.mxu0 %v14900_v49  ;;  %10474 = vmatpush.bf16.msrb.mxu3 %v16748_v55  ;;  %v15671_v49 = vld [vmem:[%s27437_s3 + $0x720] sm:$0xf] }
 0x4d0   : > { %v15672_v26 = vor.u32 %v17222_v42, %v15671_v49  ;;  %v17190_v55 = vld [vmem:[%s27437_s3 + $0x65c] sm:$0xf0]  ;;  %v17253_v42 = vld [vmem:[%s27437_s3 + $0x854] sm:$0xf0] }
 0x4d1   : > { %10557 = vmatpush.bf16.msrb.mxu1 %v15412_v22  ;;  %10515 = vmatpush.bf16.msra.mxu2 %v16112_v59  ;;  %v17452_v22 = vld [vmem:[%s27437_s3 + $0xe94] sm:$0xf]  ;;  %v17269_v59 = vld [vmem:[%s27437_s3 + $0x8d4] sm:$0xf0]  ;;  %v14839_v17 = vld [vmem:[%s27437_s3 + $0xa0] sm:$0xf] }
 0x4d2   : > { %v16620_v24 = vor.u32 %v17452_v22, %v16617_v21  ;;  %v17014_v57 = vld [vmem:[%s27437_s3 + $0xdc] sm:$0xf0] }
 0x4d3   : > { %10545 = vmatpush.bf16.msrb.mxu0 %v14836_v41  ;;  %10475 = vmatpush.bf16.msrb.mxu3 %v16684_v4  ;;  %v16553_v41 = vld [vmem:[%s27437_s3 + $0xe50] sm:$0xf0]  ;;  %v17174_v4 = vld [vmem:[%s27437_s3 + $0x5dc] sm:$0xf0] }
 0x4d4   : > { %v16556_v46 = vor.u32 %v17436_v25, %v16553_v41  ;;  %v10223_v25 = vpop.f32.mrf.mxu3  ;;  %v17388_v41 = vld [vmem:[%s27437_s3 + $0xc94] sm:$0xf] }
 0x4d5   : > { %10558 = vmatpush.bf16.msrb.mxu1 %v15348_v45  ;;  %10516 = vmatpush.bf16.msra.mxu2 %v16048_v12  ;;  %v15608_v45 = vor.u32 %v17206_v14, %v15607_v36  ;;  %v15791_v12 = vld [vmem:[%s27437_s3 + $0x818] sm:$0xf]  ;;  %v17030_v36 = vld [vmem:[%s27437_s3 + $0x15c] sm:$0xf0] }
 0x4d7   : > { %10546 = vmatpush.bf16.msrb.mxu0 %v14772_v51  ;;  %10476 = vmatpush.bf16.msrb.mxu3 %v16620_v24  ;;  %v15544_v51 = vor.u32 %v17190_v55, %v15543_v7  ;;  %v10340_v49 = vpop.f32.mrf.mxu0  ;;  %v10211_v24 = vadd.f32 %v25371_v56, %v25004_v10  ;;  %v15792_v10 = vor.u32 %v17253_v42, %v15791_v12  ;;  %v17158_v56 = vld [vmem:[%s27437_s3 + $0x55c] sm:$0xf0] }
 0x4d8   : > { %v10341_v22 = vadd.f32 %v10340_v49, %v22963_v40  ;;  %v16364_v55 = vor.u32 %v17388_v41, %v16361_v20  ;;  %v14775_v49 = vld [vmem:[%s27437_s3 + $0x20] sm:$0xf] }
 0x4d9   : > { %10559 = vmatpush.bf16.msrb.mxu1 %v15284_v43  ;;  %10517 = vmatpush.bf16.msra.mxu2 %v15984_v5  ;;  %v17046_v43 = vld [vmem:[%s27437_s3 + $0x1dc] sm:$0xf0]  ;;  %v10353_v21 = vpop.f32.mrf.mxu1  ;;  %v10224_v0 = vadd.f32 %v10223_v25, %v10211_v24  ;;  %v15225_v24 = vld [vmem:[%s27437_s3 + $0x3e0] sm:$0xf0] }
 0x4da   : > { %10547 = vmatmul.bf16.vlgmr.msrb.gmra.mxu0 %v24085_v58  ;;  %v14968_v13 = vor.u32 %v17046_v43, %v14967_v61  ;;  %v15415_v5 = vld [vmem:[%s27437_s3 + $0x520] sm:$0xf]  ;;  %v25630_v14 = vadd.f32 %v10353_v21, %v10341_v22  ;;  %v16297_v61 = vld [vmem:[%s27437_s3 + $0xc50] sm:$0xf0]  ;;  %v16751_v43 = vld [vmem:[%s27437_s3 + $0xf98] sm:$0xf] }
 0x4db   : > { %10591 = vmatpush.bf16.msra.mxu0 %v15224_v11  ;;  %10477 = vmatpush.bf16.msrb.mxu3 %v16556_v46  ;;  %v15479_v11 = vld [vmem:[%s27437_s3 + $0x5a0] sm:$0xf]  ;;  %v14904_v46 = vor.u32 %v17030_v36, %v14903_v39  ;;  %v11043_v7 = vadd.f32 %v11011_v28, %v10224_v0  ;;  %v15737_v39 = vld [vmem:[%s27437_s3 + $0x7e0] sm:$0xf0]  ;;  %v16687_v36 = vld [vmem:[%s27437_s3 + $0xf18] sm:$0xf] }
 0x4dc   : > { %10560 = vmatmul.bf16.vlgmr.msrb.gmra.mxu1 %v24087_v35  ;;  %v15480_v40 = vor.u32 %v17174_v4, %v15479_v11  ;;  %v17493_v11 = vld [vmem:[%s27437_s3 + $0xfd4] sm:$0xf0]  ;;  %v14840_v4 = vor.u32 %v17014_v57, %v14839_v17  ;;  %v16998_v22 = vld [vmem:[%s27437_s3 + $0x5c] sm:$0xf0]  ;;  %v17293_v17 = vld [vmem:[%s27437_s3 + $0x99c] sm:$0xf] }
 0x4dd   : > { %10604 = vmatpush.bf16.msra.mxu1 %v15736_v3  ;;  %10518 = vmatpush.bf16.msra.mxu2 %v15920_v54  ;;  %v15856_v3 = vor.u32 %v17269_v59, %v15855_v27  ;;  %v15416_v54 = vor.u32 %v17158_v56, %v15415_v5  ;;  %v15351_v27 = vld [vmem:[%s27437_s3 + $0x4a0] sm:$0xf]  ;;  %11059 = vst [vmem:[%s25666_s13] sm:$0xff] %v11043_v7  ;;  %v17477_v5 = vld [vmem:[%s27437_s3 + $0xf54] sm:$0xf0]  ;;  %v16049_v56 = vld [vmem:[%s27437_s3 + $0xa58] sm:$0xf0] }
 0x4de   : > { %v17142_v59 = vld [vmem:[%s27437_s3 + $0x4dc] sm:$0xf0]  ;;  %v14776_v25 = vor.u32 %v16998_v22, %v14775_v49  ;;  %v15673_v7 = vld [vmem:[%s27437_s3 + $0x760] sm:$0xf0]  ;;  %v15985_v57 = vld [vmem:[%s27437_s3 + $0x9d8] sm:$0xf0] }
 0x4df   : > { %10592 = vmatpush.bf16.msra.mxu0 %v15160_v9  ;;  %v17357_v9 = vld [vmem:[%s27437_s3 + $0xb9c] sm:$0xf]  ;;  %10478 = vmatpush.bf16.msrb.mxu3 %v16492_v48  ;;  %v16180_v48 = vor.u32 %v17341_v50, %v16177_v19  ;;  %v15352_v12 = vor.u32 %v17142_v59, %v15351_v27  ;;  %v15287_v21 = vld [vmem:[%s27437_s3 + $0x420] sm:$0xf]  ;;  %v17214_v50 = vld [vmem:[%s27437_s3 + $0x724] sm:$0xf] }
 0x4e0   : > { %v17126_v28 = vld [vmem:[%s27437_s3 + $0x45c] sm:$0xf0]  ;;  %v15676_v59 = vor.u32 %v17214_v50, %v15673_v7  ;;  %v17054_v22 = vld [vmem:[%s27437_s3 + $0x224] sm:$0xf]  ;;  %v17245_v50 = vld [vmem:[%s27437_s3 + $0x81c] sm:$0xf] }
 0x4e1   : > { %10605 = vmatpush.bf16.msra.mxu1 %v15672_v26  ;;  %v16241_v26 = vld [vmem:[%s27437_s3 + $0xbd8] sm:$0xf0]  ;;  %10519 = vmatpush.bf16.msra.mxu2 %v15856_v3  ;;  %v10355_v3 = vpop.f32.mrf.mxu1  ;;  %v15288_v41 = vor.u32 %v17126_v28, %v15287_v21  ;;  %v15033_v21 = vld [vmem:[%s27437_s3 + $0x260] sm:$0xf0] }
 0x4e2   : > { %v16559_v3 = vld [vmem:[%s27437_s3 + $0xe18] sm:$0xf]  ;;  %v17182_v28 = vld [vmem:[%s27437_s3 + $0x624] sm:$0xf] }
 0x4e3   : > { %10593 = vmatpush.bf16.msra.mxu0 %v15096_v44  ;;  %v16244_v44 = vor.u32 %v17357_v9, %v16241_v26  ;;  %10479 = vmatpush.bf16.msrb.mxu3 %v16428_v37  ;;  %v16752_v9 = vor.u32 %v17493_v11, %v16751_v43  ;;  %v17102_v26 = vld [vmem:[%s27437_s3 + $0x3a4] sm:$0xf]  ;;  %v16116_v37 = vor.u32 %v17325_v1, %v16113_v34  ;;  %v17277_v1 = vld [vmem:[%s27437_s3 + $0x91c] sm:$0xf] }
 0x4e4   : > { %v15228_v20 = vor.u32 %v17102_v26, %v15225_v24  ;;  %v15988_v43 = vor.u32 %v17293_v17, %v15985_v57  ;;  %v15609_v11 = vld [vmem:[%s27437_s3 + $0x6e0] sm:$0xf0]  ;;  %v15921_v34 = vld [vmem:[%s27437_s3 + $0x958] sm:$0xf0]  ;;  %v16495_v26 = vld [vmem:[%s27437_s3 + $0xd98] sm:$0xf] }
 0x4e5   : > { %10606 = vmatpush.bf16.msra.mxu1 %v15608_v45  ;;  %v10264_v45 = vpop.f32.mrf.mxu2  ;;  %10520 = vmatpush.bf16.msra.mxu2 %v15792_v10  ;;  %v17309_v10 = vld [vmem:[%s27437_s3 + $0xa1c] sm:$0xf]  ;;  %v17429_v24 = vld [vmem:[%s27437_s3 + $0xdd4] sm:$0xf0]  ;;  %v16247_v57 = vld [vmem:[%s27437_s3 + $0xba0] sm:$0xf] }
 0x4e6   : > { %v17086_v45 = vld [vmem:[%s27437_s3 + $0x324] sm:$0xf]  ;;  %v16052_v19 = vor.u32 %v17309_v10, %v16049_v56 }
 0x4e7   : > { %10594 = vmatpush.bf16.msra.mxu0 %v15032_v18  ;;  %v17372_v18 = vld [vmem:[%s27437_s3 + $0xc14] sm:$0xf]  ;;  %10480 = vmatpush.bf16.msrb.mxu3 %v16364_v55  ;;  %v17461_v55 = vld [vmem:[%s27437_s3 + $0xed4] sm:$0xf0]  ;;  %v17038_v10 = vld [vmem:[%s27437_s3 + $0x1a4] sm:$0xf] }
 0x4e8   : > { %v16300_v42 = vor.u32 %v17372_v18, %v16297_v61  ;;  %10521 = vmatmul.bf16.vlgmr.msra.gmra.mxu2 %v24430_v32  ;;  %v17070_v61 = vld [vmem:[%s27437_s3 + $0x2a4] sm:$0xf] }
 0x4e9   : > { %10607 = vmatpush.bf16.msra.mxu1 %v15544_v51  ;;  %v10342_v51 = vpop.f32.mrf.mxu0  ;;  %10565 = vmatpush.bf16.msrb.mxu2 %v16244_v44  ;;  %v16688_v44 = vor.u32 %v17477_v5, %v16687_v36  ;;  %v15036_v36 = vor.u32 %v17054_v22, %v15033_v21  ;;  %v14969_v56 = vld [vmem:[%s27437_s3 + $0x1e0] sm:$0xf0]  ;;  %v17350_v22 = vld [vmem:[%s27437_s3 + $0xb5c] sm:$0xf0] }
 0x4ea   : > { %v15097_v51 = vld [vmem:[%s27437_s3 + $0x2e0] sm:$0xf0]  ;;  %v14972_v17 = vor.u32 %v17038_v10, %v14969_v56  ;;  %v17485_v10 = vld [vmem:[%s27437_s3 + $0xf9c] sm:$0xf] }
 0x4eb   : > { %10595 = vmatpush.bf16.msra.mxu0 %v14968_v13  ;;  %v10225_v13 = vpop.f32.mrf.mxu3  ;;  %10481 = vmatpush.bf16.msrb.mxu3 %v16300_v42  ;;  %v15100_v49 = vor.u32 %v17070_v61, %v15097_v51  ;;  %v17022_v61 = vld [vmem:[%s27437_s3 + $0x124] sm:$0xf]  ;;  %v16753_v56 = vld [vmem:[%s27437_s3 + $0xfd8] sm:$0xf0] }
 0x4ec   : > { %v15924_v13 = vor.u32 %v17277_v1, %v15921_v34  ;;  %v14905_v51 = vld [vmem:[%s27437_s3 + $0x160] sm:$0xf0] }
 0x4ed   : > { %10608 = vmatpush.bf16.msra.mxu1 %v15480_v40  ;;  %v17230_v40 = vld [vmem:[%s27437_s3 + $0x7a4] sm:$0xf]  ;;  %10566 = vmatpush.bf16.msrb.mxu2 %v16180_v48 }
 0x4ee   : > { %v15740_v0 = vor.u32 %v17230_v40, %v15737_v39  ;;  %10482 = vmatmul.bf16.vlgmr.msrb.gmra.mxu3 %v24680_v33  ;;  %v17198_v48 = vld [vmem:[%s27437_s3 + $0x6a4] sm:$0xf]  ;;  %v17261_v40 = vld [vmem:[%s27437_s3 + $0x89c] sm:$0xf]  ;;  %v25793_v39 = vpop.f32.mrf.mxu2 }
 0x4ef   : > { %10596 = vmatpush.bf16.msra.mxu0 %v14904_v46  ;;  %10526 = vmatpush.bf16.msra.mxu3 %v16752_v9  ;;  %v15161_v46 = vld [vmem:[%s27437_s3 + $0x360] sm:$0xf0] }
 0x4f0   : > { %v15164_v27 = vor.u32 %v17086_v45, %v15161_v46  ;;  %v15545_v9 = vld [vmem:[%s27437_s3 + $0x660] sm:$0xf0]  ;;  %v17413_v45 = vld [vmem:[%s27437_s3 + $0xd54] sm:$0xf0] }
 0x4f1   : > { %10609 = vmatpush.bf16.msra.mxu1 %v15416_v54  ;;  %10567 = vmatpush.bf16.msrb.mxu2 %v16116_v37  ;;  %v16623_v54 = vld [vmem:[%s27437_s3 + $0xe98] sm:$0xf]  ;;  %v15857_v37 = vld [vmem:[%s27437_s3 + $0x8d8] sm:$0xf0]  ;;  %v15548_v5 = vor.u32 %v17182_v28, %v15545_v9  ;;  %v17006_v9 = vld [vmem:[%s27437_s3 + $0xa4] sm:$0xf] }
 0x4f2   : > { %v16624_v18 = vor.u32 %v17461_v55, %v16623_v54  ;;  %v11012_v55 = vperm.slane %v25584_v30, 1 }
 0x4f3   : > { %10597 = vmatpush.bf16.msra.mxu0 %v14840_v4  ;;  %10527 = vmatpush.bf16.msra.mxu3 %v16688_v44  ;;  %v17445_v4 = vld [vmem:[%s27437_s3 + $0xe54] sm:$0xf0] }
 0x4f4   : > { %v16560_v42 = vor.u32 %v17445_v4, %v16559_v3  ;;  %v16431_v44 = vld [vmem:[%s27437_s3 + $0xd18] sm:$0xf] }
 0x4f5   : > { %10610 = vmatpush.bf16.msra.mxu1 %v15352_v12  ;;  %10568 = vmatpush.bf16.msrb.mxu2 %v16052_v19  ;;  %v15612_v12 = vor.u32 %v17198_v48, %v15609_v11  ;;  %v15793_v19 = vld [vmem:[%s27437_s3 + $0x858] sm:$0xf0]  ;;  %v17150_v48 = vld [vmem:[%s27437_s3 + $0x524] sm:$0xf]  ;;  %v10275_v11 = vpop.f32.mrf.mxu3  ;;  %v16367_v3 = vld [vmem:[%s27437_s3 + $0xc98] sm:$0xf] }
 0x4f6   : > { %v17397_v4 = vld [vmem:[%s27437_s3 + $0xcd4] sm:$0xf0] }
 0x4f7   : > { %10598 = vmatpush.bf16.msra.mxu0 %v14776_v25  ;;  %10528 = vmatpush.bf16.msra.mxu3 %v16624_v18  ;;  %v16496_v25 = vor.u32 %v17429_v24, %v16495_v26  ;;  %v10392_v46 = vpop.f32.mrf.mxu0  ;;  %v14841_v26 = vld [vmem:[%s27437_s3 + $0xe0] sm:$0xf0] }
 0x4f8   : > { %v10393_v7 = vadd.f32 %v10392_v46, %v23167_v53  ;;  %v16432_v53 = vor.u32 %v17413_v45, %v16431_v44  ;;  %v17134_v24 = vld [vmem:[%s27437_s3 + $0x4a4] sm:$0xf]  ;;  %v17334_v44 = vld [vmem:[%s27437_s3 + $0xadc] sm:$0xf0] }
 0x4f9   : > { %10611 = vmatpush.bf16.msra.mxu1 %v15288_v41  ;;  %10569 = vmatpush.bf16.msrb.mxu2 %v15988_v43  ;;  %v17166_v41 = vld [vmem:[%s27437_s3 + $0x5a4] sm:$0xf]  ;;  %v10405_v54 = vpop.f32.mrf.mxu1 }
 0x4fa   : > { %10599 = vmatmul.bf16.vlgmr.msra.gmra.mxu0 %v24085_v58  ;;  %v25838_v43 = vadd.f32 %v10405_v54, %v10393_v7  ;;  %v16990_v45 = vld [vmem:[%s27437_s3 + $0x24] sm:$0xf] }
 0x4fb   : > { %10643 = vmatpush.bf16.msrb.mxu0 %v15228_v20  ;;  %10529 = vmatpush.bf16.msra.mxu3 %v16560_v42  ;;  %v15860_v20 = vor.u32 %v17261_v40, %v15857_v37  ;;  %v16183_v42 = vld [vmem:[%s27437_s3 + $0xb20] sm:$0xf]  ;;  %v15353_v40 = vld [vmem:[%s27437_s3 + $0x4e0] sm:$0xf0]  ;;  %v16303_v37 = vld [vmem:[%s27437_s3 + $0xc18] sm:$0xf] }
 0x4fc   : > { %10612 = vmatmul.bf16.vlgmr.msra.gmra.mxu1 %v24087_v35  ;;  %v15356_v46 = vor.u32 %v17134_v24, %v15353_v40  ;;  %v17118_v7 = vld [vmem:[%s27437_s3 + $0x424] sm:$0xf] }
 0x4fd   : > { %10656 = vmatpush.bf16.msrb.mxu1 %v15740_v0  ;;  %10570 = vmatpush.bf16.msrb.mxu2 %v15924_v13  ;;  %v15481_v0 = vld [vmem:[%s27437_s3 + $0x5e0] sm:$0xf0]  ;;  %v16368_v13 = vor.u32 %v17397_v4, %v16367_v3 }
 0x4fe   : > { %v15484_v18 = vor.u32 %v17166_v41, %v15481_v0  ;;  %v16119_v0 = vld [vmem:[%s27437_s3 + $0xaa0] sm:$0xf]  ;;  %v15289_v54 = vld [vmem:[%s27437_s3 + $0x460] sm:$0xf0] }
 0x4ff   : > { %10644 = vmatpush.bf16.msrb.mxu0 %v15164_v27  ;;  %v17366_v27 = vld [vmem:[%s27437_s3 + $0xbdc] sm:$0xf0]  ;;  %10530 = vmatpush.bf16.msra.mxu3 %v16496_v25  ;;  %v16184_v25 = vor.u32 %v17350_v22, %v16183_v42  ;;  %v17223_v22 = vld [vmem:[%s27437_s3 + $0x764] sm:$0xf0] }
 0x500   : > { %v16248_v34 = vor.u32 %v17366_v27, %v16247_v57  ;;  %v15231_v57 = vld [vmem:[%s27437_s3 + $0x3a8] sm:$0xf] }
 0x501   : > { %10657 = vmatpush.bf16.msrb.mxu1 %v15676_v59  ;;  %v10263_v59 = vadd.f32 %v25575_v15, %v25209_v8  ;;  %10571 = vmatpush.bf16.msrb.mxu2 %v15860_v20  ;;  %v15796_v8 = vor.u32 %v17245_v50, %v15793_v19  ;;  %v15417_v15 = vld [vmem:[%s27437_s3 + $0x560] sm:$0xf0]  ;;  %v10407_v41 = vpop.f32.mrf.mxu1  ;;  %v14844_v20 = vor.u32 %v17006_v9, %v14841_v26  ;;  %v17111_v27 = vld [vmem:[%s27437_s3 + $0x3e4] sm:$0xf0]  ;;  %v17302_v9 = vld [vmem:[%s27437_s3 + $0x9dc] sm:$0xf0] }
 0x502   : > { %v15420_v28 = vor.u32 %v17150_v48, %v15417_v15  ;;  %v14777_v19 = vld [vmem:[%s27437_s3 + $0x60] sm:$0xf0]  ;;  %v15292_v15 = vor.u32 %v17118_v7, %v15289_v54  ;;  %v15232_v3 = vor.u32 %v17111_v27, %v15231_v57  ;;  %v16561_v41 = vld [vmem:[%s27437_s3 + $0xe58] sm:$0xf0]  ;;  %v15551_v7 = vld [vmem:[%s27437_s3 + $0x628] sm:$0xf] }
 0x503   : > { %10645 = vmatpush.bf16.msrb.mxu0 %v15100_v49  ;;  %v10276_v1 = vadd.f32 %v10275_v11, %v10263_v59  ;;  %v10316_v49 = vpop.f32.mrf.mxu2  ;;  %10531 = vmatpush.bf16.msra.mxu3 %v16432_v53  ;;  %v15743_v59 = vld [vmem:[%s27437_s3 + $0x7a8] sm:$0xf]  ;;  %v14780_v48 = vor.u32 %v16990_v45, %v14777_v19  ;;  %v16055_v11 = vld [vmem:[%s27437_s3 + $0xa20] sm:$0xf]  ;;  %v16497_v57 = vld [vmem:[%s27437_s3 + $0xdd8] sm:$0xf0] }
 0x504   : > { %v17239_v53 = vld [vmem:[%s27437_s3 + $0x7e4] sm:$0xf0]  ;;  %v15863_v27 = vld [vmem:[%s27437_s3 + $0x8a0] sm:$0xf] }
 0x505   : > { %10658 = vmatpush.bf16.msrb.mxu1 %v15612_v12  ;;  %v14908_v12 = vor.u32 %v17022_v61, %v14905_v51  ;;  %v11044_v21 = vadd.f32 %v11012_v55, %v10276_v1  ;;  %10572 = vmatpush.bf16.msrb.mxu2 %v15796_v8  ;;  %v10277_v55 = vpop.f32.mrf.mxu3  ;;  %v17469_v61 = vld [vmem:[%s27437_s3 + $0xf1c] sm:$0xf]  ;;  %v17318_v8 = vld [vmem:[%s27437_s3 + $0xa5c] sm:$0xf0]  ;;  %v15744_v4 = vor.u32 %v17239_v53, %v15743_v59  ;;  %v17095_v49 = vld [vmem:[%s27437_s3 + $0x364] sm:$0xf0] }
 0x506   : > { %v16689_v51 = vld [vmem:[%s27437_s3 + $0xf58] sm:$0xf0]  ;;  %v16056_v42 = vor.u32 %v17318_v8, %v16055_v11  ;;  %v17063_v19 = vld [vmem:[%s27437_s3 + $0x264] sm:$0xf0]  ;;  %v17270_v59 = vld [vmem:[%s27437_s3 + $0x8dc] sm:$0xf0] }
 0x507   : > { %10646 = vmatpush.bf16.msrb.mxu0 %v15036_v36  ;;  %v17381_v36 = vld [vmem:[%s27437_s3 + $0xc54] sm:$0xf0]  ;;  %11060 = vst [vmem:[%s25666_s13 + $0x8] sm:$0xff] %v11044_v21  ;;  %10532 = vmatpush.bf16.msra.mxu3 %v16368_v13  ;;  %v16692_v1 = vor.u32 %v17469_v61, %v16689_v51  ;;  %v17453_v21 = vld [vmem:[%s27437_s3 + $0xe9c] sm:$0xf] }
 0x508   : > { %v16304_v50 = vor.u32 %v17381_v36, %v16303_v37  ;;  %10573 = vmatmul.bf16.vlgmr.msrb.gmra.mxu2 %v24430_v32  ;;  %v15991_v13 = vld [vmem:[%s27437_s3 + $0x9a0] sm:$0xf]  ;;  %v15103_v37 = vld [vmem:[%s27437_s3 + $0x2a8] sm:$0xf] }
 0x509   : > { %10659 = vmatpush.bf16.msrb.mxu1 %v15548_v5  ;;  %v10394_v5 = vpop.f32.mrf.mxu0  ;;  %10617 = vmatpush.bf16.msra.mxu2 %v16248_v34  ;;  %v15167_v34 = vld [vmem:[%s27437_s3 + $0x328] sm:$0xf] }
 0x50a   : > { %v15168_v26 = vor.u32 %v17095_v49, %v15167_v34  ;;  %v17079_v36 = vld [vmem:[%s27437_s3 + $0x2e4] sm:$0xf0]  ;;  %v15799_v49 = vld [vmem:[%s27437_s3 + $0x820] sm:$0xf] }
 0x50b   : > { %10647 = vmatpush.bf16.msrb.mxu0 %v14972_v17  ;;  %v16756_v17 = vor.u32 %v17485_v10, %v16753_v56  ;;  %10533 = vmatpush.bf16.msra.mxu3 %v16304_v50  ;;  %v15615_v5 = vld [vmem:[%s27437_s3 + $0x6a8] sm:$0xf]  ;;  %v17437_v56 = vld [vmem:[%s27437_s3 + $0xe1c] sm:$0xf] }
 0x50c   : > { %v17207_v10 = vld [vmem:[%s27437_s3 + $0x6e4] sm:$0xf0] }
 0x50d   : > { %10660 = vmatpush.bf16.msrb.mxu1 %v15484_v18  ;;  %10618 = vmatpush.bf16.msra.mxu2 %v16184_v25  ;;  %v16120_v18 = vor.u32 %v17334_v44, %v16119_v0  ;;  %v15992_v25 = vor.u32 %v17302_v9, %v15991_v13  ;;  %v17286_v0 = vld [vmem:[%s27437_s3 + $0x95c] sm:$0xf0]  ;;  %v15104_v44 = vor.u32 %v17079_v36, %v15103_v37  ;;  %v15039_v50 = vld [vmem:[%s27437_s3 + $0x228] sm:$0xf]  ;;  %v17358_v13 = vld [vmem:[%s27437_s3 + $0xba4] sm:$0xf] }
 0x50e   : > { %10534 = vmatmul.bf16.vlgmr.msra.gmra.mxu3 %v24680_v33  ;;  %v15616_v45 = vor.u32 %v17207_v10, %v15615_v5  ;;  %v17191_v55 = vld [vmem:[%s27437_s3 + $0x664] sm:$0xf0]  ;;  %v15040_v53 = vor.u32 %v17063_v19, %v15039_v50  ;;  %v16249_v9 = vld [vmem:[%s27437_s3 + $0xbe0] sm:$0xf0]  ;;  %v17389_v10 = vld [vmem:[%s27437_s3 + $0xc9c] sm:$0xf] }
 0x50f   : > { %10648 = vmatpush.bf16.msrb.mxu0 %v14908_v12  ;;  %10578 = vmatpush.bf16.msrb.mxu3 %v16756_v17  ;;  %v15679_v12 = vld [vmem:[%s27437_s3 + $0x728] sm:$0xf]  ;;  %v17421_v17 = vld [vmem:[%s27437_s3 + $0xd9c] sm:$0xf]  ;;  %v15552_v61 = vor.u32 %v17191_v55, %v15551_v7 }
 0x510   : > { %v15680_v24 = vor.u32 %v17223_v22, %v15679_v12  ;;  %v16500_v51 = vor.u32 %v17421_v17, %v16497_v57  ;;  %v17047_v11 = vld [vmem:[%s27437_s3 + $0x1e4] sm:$0xf0]  ;;  %v17254_v12 = vld [vmem:[%s27437_s3 + $0x85c] sm:$0xf0] }
 0x511   : > { %10661 = vmatpush.bf16.msrb.mxu1 %v15420_v28  ;;  %10619 = vmatpush.bf16.msra.mxu2 %v16120_v18  ;;  %v16625_v28 = vld [vmem:[%s27437_s3 + $0xed8] sm:$0xf0]  ;;  %v25998_v18 = vpop.f32.mrf.mxu2  ;;  %v15487_v8 = vld [vmem:[%s27437_s3 + $0x5a8] sm:$0xf] }
 0x512   : > { %v16628_v40 = vor.u32 %v17453_v21, %v16625_v28  ;;  %v11013_v21 = vperm.slane %v25584_v30, 2  ;;  %v17031_v37 = vld [vmem:[%s27437_s3 + $0x164] sm:$0xf0] }
 0x513   : > { %10649 = vmatpush.bf16.msrb.mxu0 %v14844_v20  ;;  %10579 = vmatpush.bf16.msrb.mxu3 %v16692_v1  ;;  %v15927_v20 = vld [vmem:[%s27437_s3 + $0x920] sm:$0xf]  ;;  %v16433_v1 = vld [vmem:[%s27437_s3 + $0xd58] sm:$0xf0]  ;;  %v15423_v36 = vld [vmem:[%s27437_s3 + $0x528] sm:$0xf] }
 0x514   : > { %v15928_v54 = vor.u32 %v17286_v0, %v15927_v20  ;;  %v16252_v20 = vor.u32 %v17358_v13, %v16249_v9  ;;  %v17015_v55 = vld [vmem:[%s27437_s3 + $0xe4] sm:$0xf0]  ;;  %v15233_v13 = vld [vmem:[%s27437_s3 + $0x3e8] sm:$0xf0] }
 0x515   : > { %10662 = vmatpush.bf16.msrb.mxu1 %v15356_v46  ;;  %10620 = vmatpush.bf16.msra.mxu2 %v16056_v42  ;;  %v16564_v46 = vor.u32 %v17437_v56, %v16561_v41  ;;  %v16369_v56 = vld [vmem:[%s27437_s3 + $0xcd8] sm:$0xf0]  ;;  %v15359_v17 = vld [vmem:[%s27437_s3 + $0x4a8] sm:$0xf]  ;;  %v17231_v9 = vld [vmem:[%s27437_s3 + $0x7ac] sm:$0xf] }
 0x516   : > { %v16372_v7 = vor.u32 %v17389_v10, %v16369_v56  ;;  %v17143_v57 = vld [vmem:[%s27437_s3 + $0x4e4] sm:$0xf0] }
 0x517   : > { %10650 = vmatpush.bf16.msrb.mxu0 %v14780_v48  ;;  %10580 = vmatpush.bf16.msrb.mxu3 %v16628_v40  ;;  %v14975_v48 = vld [vmem:[%s27437_s3 + $0x1a8] sm:$0xf]  ;;  %v10444_v34 = vpop.f32.mrf.mxu0 }
 0x518   : > { %v10445_v42 = vadd.f32 %v10444_v34, %v23371_v52  ;;  %v14976_v28 = vor.u32 %v17047_v11, %v14975_v48  ;;  %v14911_v40 = vld [vmem:[%s27437_s3 + $0x128] sm:$0xf]  ;;  %v17494_v48 = vld [vmem:[%s27437_s3 + $0xfdc] sm:$0xf0] }
 0x519   : > { %10663 = vmatpush.bf16.msrb.mxu1 %v15292_v15  ;;  %10621 = vmatpush.bf16.msra.mxu2 %v15992_v25  ;;  %v15864_v15 = vor.u32 %v17270_v59, %v15863_v27  ;;  %v10457_v22 = vpop.f32.mrf.mxu1  ;;  %v10327_v25 = vpop.f32.mrf.mxu3  ;;  %v17373_v27 = vld [vmem:[%s27437_s3 + $0xc1c] sm:$0xf] }
 0x51a   : > { %10651 = vmatmul.bf16.vlgmr.msrb.gmra.mxu0 %v24085_v58  ;;  %v26043_v5 = vadd.f32 %v10457_v22, %v10445_v42  ;;  %v10368_v0 = vpop.f32.mrf.mxu2  ;;  %v16305_v59 = vld [vmem:[%s27437_s3 + $0xc58] sm:$0xf0]  ;;  %v17127_v42 = vld [vmem:[%s27437_s3 + $0x464] sm:$0xf0] }
 0x51b   : > { %10695 = vmatpush.bf16.msra.mxu0 %v15232_v3  ;;  %10581 = vmatpush.bf16.msrb.mxu3 %v16564_v46  ;;  %v17175_v3 = vld [vmem:[%s27437_s3 + $0x5e4] sm:$0xf0]  ;;  %v16185_v46 = vld [vmem:[%s27437_s3 + $0xb60] sm:$0xf0]  ;;  %v16308_v34 = vor.u32 %v17373_v27, %v16305_v59  ;;  %v17215_v0 = vld [vmem:[%s27437_s3 + $0x72c] sm:$0xf] }
 0x51c   : > { %10664 = vmatmul.bf16.vlgmr.msrb.gmra.mxu1 %v24087_v35  ;;  %v15105_v27 = vld [vmem:[%s27437_s3 + $0x2e8] sm:$0xf0] }
 0x51d   : > { %10708 = vmatpush.bf16.msra.mxu1 %v15744_v4  ;;  %10622 = vmatpush.bf16.msra.mxu2 %v15928_v54  ;;  %v17405_v4 = vld [vmem:[%s27437_s3 + $0xd1c] sm:$0xf]  ;;  %v14847_v54 = vld [vmem:[%s27437_s3 + $0xa8] sm:$0xf]  ;;  %v17199_v59 = vld [vmem:[%s27437_s3 + $0x6ac] sm:$0xf] }
 0x51e   : > { %v16436_v52 = vor.u32 %v17405_v4, %v16433_v1  ;;  %v14783_v4 = vld [vmem:[%s27437_s3 + $0x28] sm:$0xf]  ;;  %v15360_v1 = vor.u32 %v17143_v57, %v15359_v17  ;;  %v17071_v57 = vld [vmem:[%s27437_s3 + $0x2ac] sm:$0xf] }
 0x51f   : > { %10696 = vmatpush.bf16.msra.mxu0 %v15168_v26  ;;  %v10315_v26 = vadd.f32 %v25793_v39, %v25413_v16  ;;  %10582 = vmatpush.bf16.msrb.mxu3 %v16500_v51  ;;  %v15800_v16 = vor.u32 %v17254_v12, %v15799_v49  ;;  %v17159_v39 = vld [vmem:[%s27437_s3 + $0x564] sm:$0xf0]  ;;  %v16759_v51 = vld [vmem:[%s27437_s3 + $0xfa0] sm:$0xf] }
 0x520   : > { %v15424_v19 = vor.u32 %v17159_v39, %v15423_v36  ;;  %v16999_v49 = vld [vmem:[%s27437_s3 + $0x64] sm:$0xf0]  ;;  %v17310_v36 = vld [vmem:[%s27437_s3 + $0xa24] sm:$0xf] }
 0x521   : > { %10709 = vmatpush.bf16.msra.mxu1 %v15680_v24  ;;  %v15488_v24 = vor.u32 %v17175_v3, %v15487_v8  ;;  %10623 = vmatpush.bf16.msra.mxu2 %v15864_v15  ;;  %v10328_v41 = vadd.f32 %v10327_v25, %v10315_v26  ;;  %v10459_v11 = vpop.f32.mrf.mxu1  ;;  %v14848_v8 = vor.u32 %v17015_v55, %v14847_v54  ;;  %v17326_v15 = vld [vmem:[%s27437_s3 + $0xaa4] sm:$0xf]  ;;  %v15295_v12 = vld [vmem:[%s27437_s3 + $0x428] sm:$0xf]  ;;  %v10329_v22 = vpop.f32.mrf.mxu3 }
 0x522   : > { %v16121_v3 = vld [vmem:[%s27437_s3 + $0xae0] sm:$0xf0]  ;;  %v16503_v22 = vld [vmem:[%s27437_s3 + $0xda0] sm:$0xf] }
 0x523   : > { %10697 = vmatpush.bf16.msra.mxu0 %v15104_v44  ;;  %v14912_v44 = vor.u32 %v17031_v37, %v14911_v40  ;;  %v11045_v50 = vadd.f32 %v11013_v21, %v10328_v41  ;;  %10583 = vmatpush.bf16.msrb.mxu3 %v16436_v52  ;;  %v16760_v21 = vor.u32 %v17494_v48, %v16759_v51  ;;  %v16695_v52 = vld [vmem:[%s27437_s3 + $0xf20] sm:$0xf]  ;;  %v16057_v25 = vld [vmem:[%s27437_s3 + $0xa60] sm:$0xf0]  ;;  %v17087_v41 = vld [vmem:[%s27437_s3 + $0x32c] sm:$0xf] }
 0x524   : > { %v16124_v26 = vor.u32 %v17326_v15, %v16121_v3  ;;  %v17478_v40 = vld [vmem:[%s27437_s3 + $0xf5c] sm:$0xf0]  ;;  %v14784_v37 = vor.u32 %v16999_v49, %v14783_v4  ;;  %v17278_v11 = vld [vmem:[%s27437_s3 + $0x924] sm:$0xf]  ;;  %v15108_v15 = vor.u32 %v17071_v57, %v15105_v27  ;;  %v17183_v49 = vld [vmem:[%s27437_s3 + $0x62c] sm:$0xf] }
 0x525   : > { %10710 = vmatpush.bf16.msra.mxu1 %v15616_v45  ;;  %v17342_v45 = vld [vmem:[%s27437_s3 + $0xb24] sm:$0xf]  ;;  %10624 = vmatpush.bf16.msra.mxu2 %v15800_v16  ;;  %11061 = vst [vmem:[%s25666_s13 + $0x10] sm:$0xff] %v11045_v50  ;;  %v15296_v16 = vor.u32 %v17127_v42, %v15295_v12  ;;  %v16696_v56 = vor.u32 %v17478_v40, %v16695_v52  ;;  %v17462_v50 = vld [vmem:[%s27437_s3 + $0xedc] sm:$0xf0] }
 0x526   : > { %v16567_v51 = vld [vmem:[%s27437_s3 + $0xe20] sm:$0xf]  ;;  %v15553_v42 = vld [vmem:[%s27437_s3 + $0x668] sm:$0xf0] }
 0x527   : > { %10698 = vmatpush.bf16.msra.mxu0 %v15040_v53  ;;  %v10446_v53 = vpop.f32.mrf.mxu0  ;;  %10584 = vmatpush.bf16.msrb.mxu3 %v16372_v7  ;;  %v15993_v7 = vld [vmem:[%s27437_s3 + $0x9e0] sm:$0xf0]  ;;  %v17446_v48 = vld [vmem:[%s27437_s3 + $0xe5c] sm:$0xf0]  ;;  %v17039_v40 = vld [vmem:[%s27437_s3 + $0x1ac] sm:$0xf] }
 0x528   : > { %10625 = vmatmul.bf16.vlgmr.msra.gmra.mxu2 %v24430_v32  ;;  %v16568_v4 = vor.u32 %v17446_v48, %v16567_v51 }
 0x529   : > { %10711 = vmatpush.bf16.msra.mxu1 %v15552_v61  ;;  %10669 = vmatpush.bf16.msrb.mxu2 %v16252_v20  ;;  %v16188_v61 = vor.u32 %v17342_v45, %v16185_v46  ;;  %v15169_v20 = vld [vmem:[%s27437_s3 + $0x368] sm:$0xf0]  ;;  %v16631_v46 = vld [vmem:[%s27437_s3 + $0xea0] sm:$0xf] }
 0x52a   : > { %v15681_v45 = vld [vmem:[%s27437_s3 + $0x768] sm:$0xf0]  ;;  %v15172_v54 = vor.u32 %v17087_v41, %v15169_v20  ;;  %v16632_v17 = vor.u32 %v17462_v50, %v16631_v46  ;;  %v17246_v41 = vld [vmem:[%s27437_s3 + $0x824] sm:$0xf]  ;;  %v16255_v50 = vld [vmem:[%s27437_s3 + $0xba8] sm:$0xf] }
 0x52b   : > { %10699 = vmatpush.bf16.msra.mxu0 %v14976_v28  ;;  %v17103_v28 = vld [vmem:[%s27437_s3 + $0x3ac] sm:$0xf]  ;;  %10585 = vmatpush.bf16.msrb.mxu3 %v16308_v34  ;;  %v15684_v55 = vor.u32 %v17215_v0, %v15681_v45  ;;  %v15801_v20 = vld [vmem:[%s27437_s3 + $0x860] sm:$0xf0]  ;;  %v11014_v45 = vperm.slane %v25584_v30, 3 }
 0x52c   : > { %v15236_v39 = vor.u32 %v17103_v28, %v15233_v13  ;;  %v15041_v34 = vld [vmem:[%s27437_s3 + $0x268] sm:$0xf0]  ;;  %v17262_v28 = vld [vmem:[%s27437_s3 + $0x8a4] sm:$0xf] }
 0x52d   : > { %10712 = vmatpush.bf16.msra.mxu1 %v15488_v24  ;;  %10670 = vmatpush.bf16.msrb.mxu2 %v16188_v61  ;;  %v15745_v24 = vld [vmem:[%s27437_s3 + $0x7e8] sm:$0xf0]  ;;  %v15865_v13 = vld [vmem:[%s27437_s3 + $0x8e0] sm:$0xf0] }
 0x52e   : > { %v15748_v10 = vor.u32 %v17231_v9, %v15745_v24  ;;  %10586 = vmatmul.bf16.vlgmr.msrb.gmra.mxu3 %v24680_v33  ;;  %v15617_v61 = vld [vmem:[%s27437_s3 + $0x6e8] sm:$0xf0]  ;;  %v26203_v9 = vpop.f32.mrf.mxu2  ;;  %v15556_v24 = vor.u32 %v17183_v49, %v15553_v42 }
 0x52f   : > { %10700 = vmatpush.bf16.msra.mxu0 %v14912_v44  ;;  %10630 = vmatpush.bf16.msra.mxu3 %v16760_v21  ;;  %v16060_v44 = vor.u32 %v17310_v36, %v16057_v25  ;;  %v15620_v3 = vor.u32 %v17199_v59, %v15617_v61  ;;  %v17430_v21 = vld [vmem:[%s27437_s3 + $0xddc] sm:$0xf0]  ;;  %v17167_v36 = vld [vmem:[%s27437_s3 + $0x5ac] sm:$0xf]  ;;  %v15868_v25 = vor.u32 %v17262_v28, %v15865_v13 }
 0x530   : > { %v16504_v52 = vor.u32 %v17430_v21, %v16503_v22  ;;  %v17023_v30 = vld [vmem:[%s27437_s3 + $0x12c] sm:$0xf]  ;;  %v16375_v59 = vld [vmem:[%s27437_s3 + $0xca0] sm:$0xf] }
 0x531   : > { %10713 = vmatpush.bf16.msra.mxu1 %v15424_v19  ;;  %10671 = vmatpush.bf16.msrb.mxu2 %v16124_v26  ;;  %v17294_v19 = vld [vmem:[%s27437_s3 + $0x9a4] sm:$0xf]  ;;  %v10379_v27 = vpop.f32.mrf.mxu3  ;;  %v14849_v49 = vld [vmem:[%s27437_s3 + $0xe8] sm:$0xf0]  ;;  %v16311_v22 = vld [vmem:[%s27437_s3 + $0xc20] sm:$0xf] }
 0x532   : > { %v15996_v53 = vor.u32 %v17294_v19, %v15993_v7  ;;  %v17367_v19 = vld [vmem:[%s27437_s3 + $0xbe4] sm:$0xf0]  ;;  %v10367_v7 = vadd.f32 %v25998_v18, %v25630_v14  ;;  %v15804_v14 = vor.u32 %v17246_v41, %v15801_v20  ;;  %v15425_v18 = vld [vmem:[%s27437_s3 + $0x568] sm:$0xf0]  ;;  %v17382_v21 = vld [vmem:[%s27437_s3 + $0xc5c] sm:$0xf0] }
 0x533   : > { %10701 = vmatpush.bf16.msra.mxu0 %v14848_v8  ;;  %10631 = vmatpush.bf16.msra.mxu3 %v16696_v56  ;;  %v15929_v8 = vld [vmem:[%s27437_s3 + $0x960] sm:$0xf0]  ;;  %v16256_v51 = vor.u32 %v17367_v19, %v16255_v50  ;;  %v15361_v42 = vld [vmem:[%s27437_s3 + $0x4e8] sm:$0xf0]  ;;  %v17240_v19 = vld [vmem:[%s27437_s3 + $0x7ec] sm:$0xf0] }
 0x534   : > { %v15932_v12 = vor.u32 %v17278_v11, %v15929_v8  ;;  %v10380_v61 = vadd.f32 %v10379_v27, %v10367_v7  ;;  %v16191_v8 = vld [vmem:[%s27437_s3 + $0xb28] sm:$0xf]  ;;  %v15297_v41 = vld [vmem:[%s27437_s3 + $0x468] sm:$0xf0]  ;;  %v17470_v7 = vld [vmem:[%s27437_s3 + $0xf24] sm:$0xf] }
 0x535   : > { %10714 = vmatpush.bf16.msra.mxu1 %v15360_v1  ;;  %10672 = vmatpush.bf16.msrb.mxu2 %v16060_v44  ;;  %v17055_v1 = vld [vmem:[%s27437_s3 + $0x22c] sm:$0xf] }
 0x536   : > { %v15044_v26 = vor.u32 %v17055_v1, %v15041_v34  ;;  %v10420_v48 = vpop.f32.mrf.mxu2  ;;  %v17007_v34 = vld [vmem:[%s27437_s3 + $0xac] sm:$0xf] }
 0x537   : > { %10702 = vmatpush.bf16.msra.mxu0 %v14784_v37  ;;  %10632 = vmatpush.bf16.msra.mxu3 %v16632_v17  ;;  %v14977_v37 = vld [vmem:[%s27437_s3 + $0x1e8] sm:$0xf0]  ;;  %v10496_v56 = vpop.f32.mrf.mxu0  ;;  %v17224_v48 = vld [vmem:[%s27437_s3 + $0x76c] sm:$0xf0] }
 0x538   : > { %v10497_v0 = vadd.f32 %v10496_v56, %v23575_v31  ;;  %v14980_v46 = vor.u32 %v17039_v40, %v14977_v37  ;;  %v17151_v17 = vld [vmem:[%s27437_s3 + $0x52c] sm:$0xf]  ;;  %v14852_v40 = vor.u32 %v17007_v34, %v14849_v49  ;;  %v16127_v37 = vld [vmem:[%s27437_s3 + $0xaa8] sm:$0xf]  ;;  %v15111_v49 = vld [vmem:[%s27437_s3 + $0x2b0] sm:$0xf] }
 0x539   : > { %10715 = vmatpush.bf16.msra.mxu1 %v15296_v16  ;;  %10673 = vmatpush.bf16.msrb.mxu2 %v15996_v53  ;;  %v15489_v16 = vld [vmem:[%s27437_s3 + $0x5e8] sm:$0xf0]  ;;  %v10509_v44 = vpop.f32.mrf.mxu1  ;;  %v17398_v53 = vld [vmem:[%s27437_s3 + $0xcdc] sm:$0xf0]  ;;  %v10381_v20 = vpop.f32.mrf.mxu3 }
 0x53a   : > { %10703 = vmatmul.bf16.vlgmr.msra.gmra.mxu0 %v24085_v58  ;;  %v26248_v57 = vadd.f32 %v10509_v44, %v10497_v0  ;;  %v16376_v1 = vor.u32 %v17398_v53, %v16375_v59  ;;  %v17119_v56 = vld [vmem:[%s27437_s3 + $0x42c] sm:$0xf]  ;;  %v15239_v44 = vld [vmem:[%s27437_s3 + $0x3b0] sm:$0xf]  ;;  %v15871_v20 = vld [vmem:[%s27437_s3 + $0x8a8] sm:$0xf] }
 0x53b   : > { %10747 = vmatpush.bf16.msrb.mxu0 %v15236_v39  ;;  %10633 = vmatpush.bf16.msra.mxu3 %v16568_v4  ;;  %v16439_v39 = vld [vmem:[%s27437_s3 + $0xd20] sm:$0xf]  ;;  %v15428_v4 = vor.u32 %v17151_v17, %v15425_v18  ;;  %v15300_v17 = vor.u32 %v17119_v56, %v15297_v41  ;;  %v15175_v59 = vld [vmem:[%s27437_s3 + $0x330] sm:$0xf]  ;;  %v17422_v56 = vld [vmem:[%s27437_s3 + $0xda4] sm:$0xf] }
 0x53c   : > { %10716 = vmatmul.bf16.vlgmr.msra.gmra.mxu1 %v24087_v35  ;;  %v17096_v53 = vld [vmem:[%s27437_s3 + $0x36c] sm:$0xf0]  ;;  %v16505_v41 = vld [vmem:[%s27437_s3 + $0xde0] sm:$0xf0] }
 0x53d   : > { %10760 = vmatpush.bf16.msrb.mxu1 %v15748_v10  ;;  %10674 = vmatpush.bf16.msrb.mxu2 %v15932_v12  ;;  %v17414_v10 = vld [vmem:[%s27437_s3 + $0xd5c] sm:$0xf0]  ;;  %v17135_v12 = vld [vmem:[%s27437_s3 + $0x4ac] sm:$0xf] }
 0x53e   : > { %v16440_v31 = vor.u32 %v17414_v10, %v16439_v39  ;;  %v16312_v39 = vor.u32 %v17382_v21, %v16311_v22  ;;  %v14785_v10 = vld [vmem:[%s27437_s3 + $0x68] sm:$0xf0]  ;;  %v17208_v21 = vld [vmem:[%s27437_s3 + $0x6ec] sm:$0xf0] }
 0x53f   : > { %10748 = vmatpush.bf16.msrb.mxu0 %v15172_v54  ;;  %10634 = vmatpush.bf16.msra.mxu3 %v16504_v52  ;;  %v15492_v54 = vor.u32 %v17167_v36, %v15489_v16  ;;  %v10498_v28 = vpop.f32.mrf.mxu0  ;;  %v17335_v36 = vld [vmem:[%s27437_s3 + $0xae4] sm:$0xf0]  ;;  %v15364_v16 = vor.u32 %v17135_v12, %v15361_v42  ;;  %v17080_v12 = vld [vmem:[%s27437_s3 + $0x2ec] sm:$0xf0] }
 0x540   : > { %v16128_v50 = vor.u32 %v17335_v36, %v16127_v37  ;;  %v15623_v42 = vld [vmem:[%s27437_s3 + $0x6b0] sm:$0xf]  ;;  %v17438_v28 = vld [vmem:[%s27437_s3 + $0xe24] sm:$0xf] }
 0x541   : > { %10761 = vmatpush.bf16.msrb.mxu1 %v15684_v55  ;;  %v14913_v55 = vld [vmem:[%s27437_s3 + $0x168] sm:$0xf0]  ;;  %10675 = vmatpush.bf16.msrb.mxu2 %v15868_v25  ;;  %v10511_v52 = vpop.f32.mrf.mxu1  ;;  %v15047_v36 = vld [vmem:[%s27437_s3 + $0x230] sm:$0xf] }
 0x542   : > { %v14916_v11 = vor.u32 %v17023_v30, %v14913_v55  ;;  %v16991_v25 = vld [vmem:[%s27437_s3 + $0x2c] sm:$0xf]  ;;  %v16063_v30 = vld [vmem:[%s27437_s3 + $0xa28] sm:$0xf]  ;;  %v15112_v52 = vor.u32 %v17080_v12, %v15111_v49 }
 0x543   : > { %10749 = vmatpush.bf16.msrb.mxu0 %v15108_v15  ;;  %v17351_v15 = vld [vmem:[%s27437_s3 + $0xb64] sm:$0xf0]  ;;  %10635 = vmatpush.bf16.msra.mxu3 %v16440_v31  ;;  %v14788_v31 = vor.u32 %v16991_v25, %v14785_v10  ;;  %v17064_v25 = vld [vmem:[%s27437_s3 + $0x26c] sm:$0xf0] }
 0x544   : > { %v16192_v13 = vor.u32 %v17351_v15, %v16191_v8  ;;  %v17319_v55 = vld [vmem:[%s27437_s3 + $0xa64] sm:$0xf0]  ;;  %v16633_v8 = vld [vmem:[%s27437_s3 + $0xee0] sm:$0xf0]  ;;  %v17192_v10 = vld [vmem:[%s27437_s3 + $0x66c] sm:$0xf0] }
 0x545   : > { %10762 = vmatpush.bf16.msrb.mxu1 %v15620_v3  ;;  %v11046_v3 = vadd.f32 %v11014_v45, %v10380_v61  ;;  %10676 = vmatpush.bf16.msrb.mxu2 %v15804_v14  ;;  %v17112_v45 = vld [vmem:[%s27437_s3 + $0x3ec] sm:$0xf0]  ;;  %v15999_v15 = vld [vmem:[%s27437_s3 + $0x9a8] sm:$0xf] }
 0x546   : > { %v15240_v27 = vor.u32 %v17112_v45, %v15239_v44  ;;  %v15687_v61 = vld [vmem:[%s27437_s3 + $0x730] sm:$0xf]  ;;  %v15048_v45 = vor.u32 %v17064_v25, %v15047_v36 }
 0x547   : > { %10750 = vmatpush.bf16.msrb.mxu0 %v15044_v26  ;;  %11062 = vst [vmem:[%s25666_s13 + $0x18] sm:$0xff] %v11046_v3  ;;  %v17486_v26 = vld [vmem:[%s27437_s3 + $0xfa4] sm:$0xf]  ;;  %10636 = vmatpush.bf16.msra.mxu3 %v16376_v1  ;;  %v17303_v3 = vld [vmem:[%s27437_s3 + $0x9e4] sm:$0xf0]  ;;  %v15688_v1 = vor.u32 %v17224_v48, %v15687_v61 }
 0x548   : > { %10677 = vmatmul.bf16.vlgmr.msrb.gmra.mxu2 %v24430_v32  ;;  %v16000_v22 = vor.u32 %v17303_v3, %v15999_v15  ;;  %v26438_v61 = vld [vmem:[%s27438_s4] sm:$0xff]  ;;  %v14855_v25 = vld [vmem:[%s27437_s3 + $0xb0] sm:$0xf] }
 0x549   : > { %10763 = vmatpush.bf16.msrb.mxu1 %v15556_v24  ;;  %10721 = vmatpush.bf16.msra.mxu2 %v16256_v51  ;;  %v16761_v24 = vld [vmem:[%s27437_s3 + $0xfe0] sm:$0xf0]  ;;  %v16064_v51 = vor.u32 %v17319_v55, %v16063_v30  ;;  %v17176_v30 = vld [vmem:[%s27437_s3 + $0x5ec] sm:$0xf0] }
 0x54a   : > { %v16764_v0 = vor.u32 %v17486_v26, %v16761_v24  ;;  %v15935_v26 = vld [vmem:[%s27437_s3 + $0x928] sm:$0xf]  ;;  %v17406_v55 = vld [vmem:[%s27437_s3 + $0xd24] sm:$0xf] }
 0x54b   : > { %10751 = vmatpush.bf16.msrb.mxu0 %v14980_v46  ;;  %v15751_v46 = vld [vmem:[%s27437_s3 + $0x7b0] sm:$0xf]  ;;  %10637 = vmatpush.bf16.msra.mxu3 %v16312_v39  ;;  %v17287_v24 = vld [vmem:[%s27437_s3 + $0x964] sm:$0xf0]  ;;  %v26408_v44 = vpop.f32.mrf.mxu2 }
 0x54c   : > { %v15752_v14 = vor.u32 %v17240_v19, %v15751_v46  ;;  %v15936_v39 = vor.u32 %v17287_v24, %v15935_v26  ;;  %v14983_v19 = vld [vmem:[%s27437_s3 + $0x1b0] sm:$0xf]  ;;  %v17343_v24 = vld [vmem:[%s27437_s3 + $0xb2c] sm:$0xf] }
 0x54d   : > { %10764 = vmatpush.bf16.msrb.mxu1 %v15492_v54  ;;  %10722 = vmatpush.bf16.msra.mxu2 %v16192_v13  ;;  %v16697_v54 = vld [vmem:[%s27437_s3 + $0xf60] sm:$0xf0] }
 0x54e   : > { %v16700_v18 = vor.u32 %v17470_v7, %v16697_v54  ;;  %10638 = vmatmul.bf16.vlgmr.msra.gmra.mxu3 %v24680_v33  ;;  %v16569_v13 = vld [vmem:[%s27437_s3 + $0xe60] sm:$0xf0]  ;;  %v17048_v7 = vld [vmem:[%s27437_s3 + $0x1ec] sm:$0xf0] }
 0x54f   : > { %10752 = vmatpush.bf16.msrb.mxu0 %v14916_v11  ;;  %10682 = vmatpush.bf16.msrb.mxu3 %v16764_v0  ;;  %v17454_v11 = vld [vmem:[%s27437_s3 + $0xea4] sm:$0xf]  ;;  %v16572_v37 = vor.u32 %v17438_v28, %v16569_v13  ;;  %v17271_v0 = vld [vmem:[%s27437_s3 + $0x8e4] sm:$0xf0]  ;;  %v15495_v54 = vld [vmem:[%s27437_s3 + $0x5b0] sm:$0xf]  ;;  %v14984_v48 = vor.u32 %v17048_v7, %v14983_v19 }
 0x550   : > { %v16636_v34 = vor.u32 %v17454_v11, %v16633_v8  ;;  %v17359_v11 = vld [vmem:[%s27437_s3 + $0xbac] sm:$0xf]  ;;  %v15496_v15 = vor.u32 %v17176_v30, %v15495_v54 }
 0x551   : > { %10765 = vmatpush.bf16.msrb.mxu1 %v15428_v4  ;;  %10723 = vmatpush.bf16.msra.mxu2 %v16128_v50  ;;  %v15176_v4 = vor.u32 %v17096_v53, %v15175_v59  ;;  %v16508_v50 = vor.u32 %v17422_v56, %v16505_v41  ;;  %v16257_v8 = vld [vmem:[%s27437_s3 + $0xbe8] sm:$0xf0]  ;;  %v10431_v12 = vpop.f32.mrf.mxu3  ;;  %v17374_v56 = vld [vmem:[%s27437_s3 + $0xc24] sm:$0xf] }
 0x552   : > { %v16260_v28 = vor.u32 %v17359_v11, %v16257_v8  ;;  %v16313_v41 = vld [vmem:[%s27437_s3 + $0xc60] sm:$0xf0]  ;;  %v17327_v7 = vld [vmem:[%s27437_s3 + $0xaac] sm:$0xf]  ;;  %v15753_v8 = vld [vmem:[%s27437_s3 + $0x7f0] sm:$0xf0] }
 0x553   : > { %10753 = vmatpush.bf16.msrb.mxu0 %v14852_v40  ;;  %10683 = vmatpush.bf16.msrb.mxu3 %v16700_v18  ;;  %v15624_v40 = vor.u32 %v17208_v21, %v15623_v42  ;;  %v17255_v18 = vld [vmem:[%s27437_s3 + $0x864] sm:$0xf0]  ;;  %v17390_v42 = vld [vmem:[%s27437_s3 + $0xca4] sm:$0xf]  ;;  %v10472_v13 = vpop.f32.mrf.mxu2  ;;  %v16129_v54 = vld [vmem:[%s27437_s3 + $0xae8] sm:$0xf0] }
 0x554   : > { %v16132_v11 = vor.u32 %v17327_v7, %v16129_v54  ;;  %v15689_v13 = vld [vmem:[%s27437_s3 + $0x770] sm:$0xf0] }
 0x555   : > { %10766 = vmatpush.bf16.msrb.mxu1 %v15364_v16  ;;  %10724 = vmatpush.bf16.msra.mxu2 %v16064_v51  ;;  %v15559_v16 = vld [vmem:[%s27437_s3 + $0x630] sm:$0xf]  ;;  %v11015_v51 = vperm.slane %v26438_v61, 4  ;;  %v17056_v54 = vld [vmem:[%s27437_s3 + $0x234] sm:$0xf] }
 0x556   : > { %v15560_v46 = vor.u32 %v17192_v10, %v15559_v16  ;;  %v17016_v16 = vld [vmem:[%s27437_s3 + $0xec] sm:$0xf0] }
 0x557   : > { %10754 = vmatpush.bf16.msrb.mxu0 %v14788_v31  ;;  %10684 = vmatpush.bf16.msrb.mxu3 %v16636_v34  ;;  %v15872_v31 = vor.u32 %v17271_v0, %v15871_v20  ;;  %v15431_v34 = vld [vmem:[%s27437_s3 + $0x530] sm:$0xf]  ;;  %v14856_v19 = vor.u32 %v17016_v16, %v14855_v25  ;;  %v17072_v16 = vld [vmem:[%s27437_s3 + $0x2b4] sm:$0xf] }
 0x558   : > { %v17144_v10 = vld [vmem:[%s27437_s3 + $0x4ec] sm:$0xf0] }
 0x559   : > { %10767 = vmatpush.bf16.msrb.mxu1 %v15300_v17  ;;  %10725 = vmatpush.bf16.msra.mxu2 %v16000_v22  ;;  %v16441_v17 = vld [vmem:[%s27437_s3 + $0xd60] sm:$0xf0]  ;;  %v10561_v53 = vpop.f32.mrf.mxu1 }
 0x55a   : > { %10755 = vmatmul.bf16.vlgmr.msrb.gmra.mxu0 %v24085_v58  ;;  %v16444_v3 = vor.u32 %v17406_v55, %v16441_v17  ;;  %v16377_v22 = vld [vmem:[%s27437_s3 + $0xce0] sm:$0xf0]  ;;  %v16316_v55 = vor.u32 %v17374_v56, %v16313_v41  ;;  %v17000_v17 = vld [vmem:[%s27437_s3 + $0x6c] sm:$0xf0]  ;;  %v15625_v41 = vld [vmem:[%s27437_s3 + $0x6f0] sm:$0xf0] }
 0x55b   : > { %10799 = vmatpush.bf16.msra.mxu0 %v15240_v27  ;;  %10685 = vmatpush.bf16.msrb.mxu3 %v16572_v37  ;;  %v10548_v27 = vpop.f32.mrf.mxu0  ;;  %v16380_v36 = vor.u32 %v17390_v42, %v16377_v22  ;;  %v17088_v42 = vld [vmem:[%s27437_s3 + $0x334] sm:$0xf] }
 0x55c   : > { %10768 = vmatmul.bf16.vlgmr.msrb.gmra.mxu1 %v24087_v35  ;;  %v10549_v59 = vadd.f32 %v10548_v27, %v23779_v29  ;;  %v10419_v29 = vadd.f32 %v26203_v9, %v25838_v43  ;;  %v17160_v9 = vld [vmem:[%s27437_s3 + $0x56c] sm:$0xf0]  ;;  %v15177_v22 = vld [vmem:[%s27437_s3 + $0x370] sm:$0xf0] }
 0x55d   : > { %10812 = vmatpush.bf16.msra.mxu1 %v15752_v14  ;;  %10726 = vmatpush.bf16.msra.mxu2 %v15936_v39  ;;  %v15807_v14 = vld [vmem:[%s27437_s3 + $0x828] sm:$0xf]  ;;  %v15432_v37 = vor.u32 %v17160_v9, %v15431_v34  ;;  %v15367_v39 = vld [vmem:[%s27437_s3 + $0x4b0] sm:$0xf] }
 0x55e   : > { %v26458_v49 = vadd.f32 %v10561_v53, %v10549_v59  ;;  %v15808_v43 = vor.u32 %v17255_v18, %v15807_v14  ;;  %v10432_v21 = vadd.f32 %v10431_v12, %v10419_v29  ;;  %v15368_v30 = vor.u32 %v17144_v10, %v15367_v39  ;;  %v15303_v27 = vld [vmem:[%s27437_s3 + $0x430] sm:$0xf]  ;;  %v10433_v18 = vpop.f32.mrf.mxu3  ;;  %v17104_v53 = vld [vmem:[%s27437_s3 + $0x3b4] sm:$0xf]  ;;  %v16703_v29 = vld [vmem:[%s27437_s3 + $0xf28] sm:$0xf] }
 0x55f   : > { %10800 = vmatpush.bf16.msra.mxu0 %v15176_v4  ;;  %10686 = vmatpush.bf16.msrb.mxu3 %v16508_v50  ;;  %v14919_v4 = vld [vmem:[%s27437_s3 + $0x130] sm:$0xf]  ;;  %v15113_v39 = vld [vmem:[%s27437_s3 + $0x2f0] sm:$0xf0]  ;;  %v17263_v18 = vld [vmem:[%s27437_s3 + $0x8ac] sm:$0xf] }
 0x560   : > { %v17128_v14 = vld [vmem:[%s27437_s3 + $0x46c] sm:$0xf0]  ;;  %v17200_v10 = vld [vmem:[%s27437_s3 + $0x6b4] sm:$0xf] }
 0x561   : > { %10813 = vmatpush.bf16.msra.mxu1 %v15688_v1  ;;  %v17032_v1 = vld [vmem:[%s27437_s3 + $0x16c] sm:$0xf0]  ;;  %10727 = vmatpush.bf16.msra.mxu2 %v15872_v31  ;;  %v10563_v50 = vpop.f32.mrf.mxu1  ;;  %v15304_v34 = vor.u32 %v17128_v14, %v15303_v27  ;;  %v16511_v27 = vld [vmem:[%s27437_s3 + $0xda8] sm:$0xf] }
 0x562   : > { %v14920_v26 = vor.u32 %v17032_v1, %v14919_v4  ;;  %v14791_v31 = vld [vmem:[%s27437_s3 + $0x30] sm:$0xf]  ;;  %v17311_v4 = vld [vmem:[%s27437_s3 + $0xa2c] sm:$0xf]  ;;  %v15116_v50 = vor.u32 %v17072_v16, %v15113_v39  ;;  %v17431_v14 = vld [vmem:[%s27437_s3 + $0xde4] sm:$0xf0] }
 0x563   : > { %10801 = vmatpush.bf16.msra.mxu0 %v15112_v52  ;;  %v16193_v52 = vld [vmem:[%s27437_s3 + $0xb68] sm:$0xf0]  ;;  %10687 = vmatpush.bf16.msrb.mxu3 %v16444_v3  ;;  %v10550_v20 = vpop.f32.mrf.mxu0  ;;  %v14792_v3 = vor.u32 %v17000_v17, %v14791_v31  ;;  %v15049_v31 = vld [vmem:[%s27437_s3 + $0x270] sm:$0xf0]  ;;  %v16383_v39 = vld [vmem:[%s27437_s3 + $0xca8] sm:$0xf] }
 0x564   : > { %v16196_v0 = vor.u32 %v17343_v24, %v16193_v52  ;;  %v16065_v1 = vld [vmem:[%s27437_s3 + $0xa68] sm:$0xf0]  ;;  %v17463_v24 = vld [vmem:[%s27437_s3 + $0xee4] sm:$0xf0]  ;;  %v15561_v17 = vld [vmem:[%s27437_s3 + $0x670] sm:$0xf0] }
 0x565   : > { %10814 = vmatpush.bf16.msra.mxu1 %v15624_v40  ;;  %v11047_v40 = vadd.f32 %v11015_v51, %v10432_v21  ;;  %10728 = vmatpush.bf16.msra.mxu2 %v15808_v43  ;;  %v15241_v51 = vld [vmem:[%s27437_s3 + $0x3f0] sm:$0xf0]  ;;  %v17295_v52 = vld [vmem:[%s27437_s3 + $0x9ac] sm:$0xf]  ;;  %v16575_v20 = vld [vmem:[%s27437_s3 + $0xe28] sm:$0xf] }
 0x566   : > { %v15244_v12 = vor.u32 %v17104_v53, %v15241_v51  ;;  %v17216_v21 = vld [vmem:[%s27437_s3 + $0x734] sm:$0xf]  ;;  %v15052_v51 = vor.u32 %v17056_v54, %v15049_v31 }
 0x567   : > { %10802 = vmatpush.bf16.msra.mxu0 %v15048_v45  ;;  %11063 = vst [vmem:[%s25666_s13 + $0x20] sm:$0xff] %v11047_v40  ;;  %v16767_v45 = vld [vmem:[%s27437_s3 + $0xfa8] sm:$0xf]  ;;  %10688 = vmatpush.bf16.msrb.mxu3 %v16380_v36  ;;  %v16001_v40 = vld [vmem:[%s27437_s3 + $0x9e8] sm:$0xf0]  ;;  %v15692_v36 = vor.u32 %v17216_v21, %v15689_v13  ;;  %v11016_v21 = vperm.slane %v26438_v61, 5 }
 0x568   : > { %10729 = vmatmul.bf16.vlgmr.msra.gmra.mxu2 %v24430_v32  ;;  %v16004_v56 = vor.u32 %v17295_v52, %v16001_v40  ;;  %v16263_v13 = vld [vmem:[%s27437_s3 + $0xbb0] sm:$0xf]  ;;  %v17024_v40 = vld [vmem:[%s27437_s3 + $0x134] sm:$0xf] }
 0x569   : > { %10815 = vmatpush.bf16.msra.mxu1 %v15560_v46  ;;  %10773 = vmatpush.bf16.msrb.mxu2 %v16260_v28  ;;  %v17495_v46 = vld [vmem:[%s27437_s3 + $0xfe4] sm:$0xf0]  ;;  %v16068_v28 = vor.u32 %v17311_v4, %v16065_v1  ;;  %v15497_v4 = vld [vmem:[%s27437_s3 + $0x5f0] sm:$0xf0] }
 0x56a   : > { %v16768_v59 = vor.u32 %v17495_v46, %v16767_v45  ;;  %v17279_v45 = vld [vmem:[%s27437_s3 + $0x92c] sm:$0xf]  ;;  %v16447_v1 = vld [vmem:[%s27437_s3 + $0xd28] sm:$0xf]  ;;  %v17008_v54 = vld [vmem:[%s27437_s3 + $0xb4] sm:$0xf] }
 0x56b   : > { %10803 = vmatpush.bf16.msra.mxu0 %v14984_v48  ;;  %v17232_v48 = vld [vmem:[%s27437_s3 + $0x7b4] sm:$0xf]  ;;  %10689 = vmatpush.bf16.msrb.mxu3 %v16316_v55  ;;  %v15937_v46 = vld [vmem:[%s27437_s3 + $0x968] sm:$0xf0]  ;;  %v26618_v53 = vpop.f32.mrf.mxu2 }
 0x56c   : > { %v15756_v43 = vor.u32 %v17232_v48, %v15753_v8  ;;  %v15940_v55 = vor.u32 %v17279_v45, %v15937_v46  ;;  %v17040_v8 = vld [vmem:[%s27437_s3 + $0x1b4] sm:$0xf]  ;;  %v16199_v45 = vld [vmem:[%s27437_s3 + $0xb30] sm:$0xf] }
 0x56d   : > { %10816 = vmatpush.bf16.msra.mxu1 %v15496_v15  ;;  %10774 = vmatpush.bf16.msrb.mxu2 %v16196_v0  ;;  %v17479_v15 = vld [vmem:[%s27437_s3 + $0xf64] sm:$0xf0]  ;;  %v17352_v46 = vld [vmem:[%s27437_s3 + $0xb6c] sm:$0xf0]  ;;  %v14857_v31 = vld [vmem:[%s27437_s3 + $0xf0] sm:$0xf0] }
 0x56e   : > { %v16704_v9 = vor.u32 %v17479_v15, %v16703_v29  ;;  %10690 = vmatmul.bf16.vlgmr.msrb.gmra.mxu3 %v24680_v33  ;;  %v17447_v0 = vld [vmem:[%s27437_s3 + $0xe64] sm:$0xf0]  ;;  %v14985_v29 = vld [vmem:[%s27437_s3 + $0x1f0] sm:$0xf0] }
 0x56f   : > { %10804 = vmatpush.bf16.msra.mxu0 %v14920_v26  ;;  %10734 = vmatpush.bf16.msra.mxu3 %v16768_v59  ;;  %v16639_v26 = vld [vmem:[%s27437_s3 + $0xea8] sm:$0xf]  ;;  %v16576_v7 = vor.u32 %v17447_v0, %v16575_v20  ;;  %v15873_v59 = vld [vmem:[%s27437_s3 + $0x8e8] sm:$0xf0]  ;;  %v17168_v15 = vld [vmem:[%s27437_s3 + $0x5b4] sm:$0xf] }
 0x570   : > { %v16640_v25 = vor.u32 %v17463_v24, %v16639_v26  ;;  %v17368_v26 = vld [vmem:[%s27437_s3 + $0xbec] sm:$0xf0]  ;;  %v10471_v24 = vadd.f32 %v26408_v44, %v26043_v5  ;;  %v15500_v52 = vor.u32 %v17168_v15, %v15497_v4  ;;  %v15433_v44 = vld [vmem:[%s27437_s3 + $0x570] sm:$0xf0] }
 0x571   : > { %10817 = vmatpush.bf16.msra.mxu1 %v15432_v37  ;;  %10775 = vmatpush.bf16.msrb.mxu2 %v16132_v11  ;;  %v15180_v37 = vor.u32 %v17088_v42, %v15177_v22  ;;  %v16512_v11 = vor.u32 %v17431_v14, %v16511_v27  ;;  %v10483_v16 = vpop.f32.mrf.mxu3  ;;  %v17383_v27 = vld [vmem:[%s27437_s3 + $0xc64] sm:$0xf0]  ;;  %v16992_v15 = vld [vmem:[%s27437_s3 + $0x34] sm:$0xf] }
 0x573   : > { %10805 = vmatpush.bf16.msra.mxu0 %v14856_v19  ;;  %10735 = vmatpush.bf16.msra.mxu3 %v16704_v9  ;;  %v15628_v19 = vor.u32 %v17200_v10, %v15625_v41  ;;  %v15809_v9 = vld [vmem:[%s27437_s3 + $0x868] sm:$0xf0]  ;;  %v17399_v10 = vld [vmem:[%s27437_s3 + $0xce4] sm:$0xf0]  ;;  %v16264_v41 = vor.u32 %v17368_v26, %v16263_v13  ;;  %v10524_v20 = vpop.f32.mrf.mxu2  ;;  %v17241_v13 = vld [vmem:[%s27437_s3 + $0x7f4] sm:$0xf0] }
 0x574   : > { %v17471_v26 = vld [vmem:[%s27437_s3 + $0xf2c] sm:$0xf] }
 0x575   : > { %10818 = vmatpush.bf16.msra.mxu1 %v15368_v30  ;;  %10776 = vmatpush.bf16.msrb.mxu2 %v16068_v28  ;;  %v17184_v30 = vld [vmem:[%s27437_s3 + $0x634] sm:$0xf]  ;;  %v14988_v28 = vor.u32 %v17040_v8, %v14985_v29  ;;  %v16135_v8 = vld [vmem:[%s27437_s3 + $0xab0] sm:$0xf]  ;;  %v17455_v20 = vld [vmem:[%s27437_s3 + $0xeac] sm:$0xf] }
 0x576   : > { %v15564_v48 = vor.u32 %v17184_v30, %v15561_v17  ;;  %v17136_v30 = vld [vmem:[%s27437_s3 + $0x4b4] sm:$0xf]  ;;  %v16319_v17 = vld [vmem:[%s27437_s3 + $0xc28] sm:$0xf]  ;;  %v17336_v29 = vld [vmem:[%s27437_s3 + $0xaec] sm:$0xf0] }
 0x577   : > { %10806 = vmatpush.bf16.msra.mxu0 %v14792_v3  ;;  %10736 = vmatpush.bf16.msra.mxu3 %v16640_v25  ;;  %v15876_v3 = vor.u32 %v17263_v18, %v15873_v59  ;;  %v16200_v18 = vor.u32 %v17352_v46, %v16199_v45  ;;  %v17487_v59 = vld [vmem:[%s27437_s3 + $0xfac] sm:$0xf]  ;;  %v16320_v4 = vor.u32 %v17383_v27, %v16319_v17  ;;  %v16007_v45 = vld [vmem:[%s27437_s3 + $0x9b0] sm:$0xf]  ;;  %v17209_v17 = vld [vmem:[%s27437_s3 + $0x6f4] sm:$0xf0] }
 0x578   : > { %v17304_v46 = vld [vmem:[%s27437_s3 + $0x9ec] sm:$0xf0]  ;;  %v17439_v27 = vld [vmem:[%s27437_s3 + $0xe2c] sm:$0xf] }
 0x579   : > { %10819 = vmatpush.bf16.msra.mxu1 %v15304_v34  ;;  %10777 = vmatpush.bf16.msrb.mxu2 %v16004_v56  ;;  %v17415_v34 = vld [vmem:[%s27437_s3 + $0xd64] sm:$0xf0]  ;;  %v10613_v22 = vpop.f32.mrf.mxu1  ;;  %v10484_v56 = vadd.f32 %v10483_v16, %v10471_v24  ;;  %v16705_v24 = vld [vmem:[%s27437_s3 + $0xf68] sm:$0xf0] }
 0x57a   : > { %10807 = vmatmul.bf16.vlgmr.msra.gmra.mxu0 %v24085_v58 }
 0x57b   : > { %10851 = vmatpush.bf16.msrb.mxu0 %v15244_v12  ;;  %10737 = vmatpush.bf16.msra.mxu3 %v16576_v7  ;;  %v10600_v12 = vpop.f32.mrf.mxu0  ;;  %v16384_v7 = vor.u32 %v17399_v10, %v16383_v39  ;;  %v17097_v39 = vld [vmem:[%s27437_s3 + $0x374] sm:$0xf0] }
 0x57c   : > { %10820 = vmatmul.bf16.vlgmr.msra.gmra.mxu1 %v24087_v35  ;;  %v10601_v42 = vadd.f32 %v10600_v12, %v23983_v38  ;;  %v16448_v38 = vor.u32 %v17415_v34, %v16447_v1  ;;  %v14793_v1 = vld [vmem:[%s27437_s3 + $0x70] sm:$0xf0]  ;;  %v15695_v10 = vld [vmem:[%s27437_s3 + $0x738] sm:$0xf] }
 0x57d   : > { %10864 = vmatpush.bf16.msrb.mxu1 %v15756_v43  ;;  %10778 = vmatpush.bf16.msrb.mxu2 %v15940_v55  ;;  %v17247_v43 = vld [vmem:[%s27437_s3 + $0x82c] sm:$0xf]  ;;  %v15369_v55 = vld [vmem:[%s27437_s3 + $0x4f0] sm:$0xf0] }
 0x57e   : > { %v26663_v25 = vadd.f32 %v10613_v22, %v10601_v42  ;;  %v15812_v5 = vor.u32 %v17247_v43, %v15809_v9  ;;  %v17120_v34 = vld [vmem:[%s27437_s3 + $0x434] sm:$0xf]  ;;  %v10485_v43 = vpop.f32.mrf.mxu3  ;;  %v15247_v42 = vld [vmem:[%s27437_s3 + $0x3b8] sm:$0xf] }
 0x57f   : > { %10852 = vmatpush.bf16.msrb.mxu0 %v15180_v37  ;;  %10738 = vmatpush.bf16.msra.mxu3 %v16512_v11  ;;  %v14921_v37 = vld [vmem:[%s27437_s3 + $0x170] sm:$0xf0]  ;;  %v14860_v11 = vor.u32 %v17008_v54, %v14857_v31  ;;  %v17113_v22 = vld [vmem:[%s27437_s3 + $0x3f4] sm:$0xf0]  ;;  %v17272_v43 = vld [vmem:[%s27437_s3 + $0x8ec] sm:$0xf0] }
 0x580   : > { %v14924_v0 = vor.u32 %v17024_v40, %v14921_v37  ;;  %v15305_v12 = vld [vmem:[%s27437_s3 + $0x470] sm:$0xf0]  ;;  %v17320_v40 = vld [vmem:[%s27437_s3 + $0xa6c] sm:$0xf0]  ;;  %v15119_v54 = vld [vmem:[%s27437_s3 + $0x2b8] sm:$0xf] }
 0x581   : > { %10865 = vmatpush.bf16.msrb.mxu1 %v15692_v36  ;;  %v17152_v36 = vld [vmem:[%s27437_s3 + $0x534] sm:$0xf]  ;;  %10779 = vmatpush.bf16.msrb.mxu2 %v15876_v3  ;;  %v15372_v3 = vor.u32 %v17136_v30, %v15369_v55  ;;  %v15308_v37 = vor.u32 %v17120_v34, %v15305_v12  ;;  %v17081_v31 = vld [vmem:[%s27437_s3 + $0x2f4] sm:$0xf0]  ;;  %v16008_v55 = vor.u32 %v17304_v46, %v16007_v45  ;;  %v16513_v34 = vld [vmem:[%s27437_s3 + $0xde8] sm:$0xf0] }
 0x582   : > { %v15631_v30 = vld [vmem:[%s27437_s3 + $0x6b8] sm:$0xf]  ;;  %v15879_v12 = vld [vmem:[%s27437_s3 + $0x8b0] sm:$0xf] }
 0x583   : > { %10853 = vmatpush.bf16.msrb.mxu0 %v15116_v50  ;;  %v11048_v50 = vadd.f32 %v11016_v21, %v10484_v56  ;;  %10739 = vmatpush.bf16.msra.mxu3 %v16448_v38  ;;  %v10602_v14 = vpop.f32.mrf.mxu0  ;;  %v15759_v21 = vld [vmem:[%s27437_s3 + $0x7b8] sm:$0xf]  ;;  %v16071_v38 = vld [vmem:[%s27437_s3 + $0xa30] sm:$0xf] }
 0x584   : > { %v15760_v16 = vor.u32 %v17241_v13, %v15759_v21  ;;  %v16072_v56 = vor.u32 %v17320_v40, %v16071_v38  ;;  %v16577_v14 = vld [vmem:[%s27437_s3 + $0xe68] sm:$0xf0]  ;;  %v17049_v13 = vld [vmem:[%s27437_s3 + $0x1f4] sm:$0xf0] }
 0x585   : > { %10866 = vmatpush.bf16.msrb.mxu1 %v15628_v19  ;;  %v15436_v19 = vor.u32 %v17152_v36, %v15433_v44  ;;  %10780 = vmatpush.bf16.msrb.mxu2 %v15812_v5  ;;  %11064 = vst [vmem:[%s25666_s13 + $0x28] sm:$0xff] %v11048_v50  ;;  %v15248_v36 = vor.u32 %v17113_v22, %v15247_v42  ;;  %v15183_v44 = vld [vmem:[%s27437_s3 + $0x338] sm:$0xf]  ;;  %v17407_v38 = vld [vmem:[%s27437_s3 + $0xd2c] sm:$0xf] }
 0x586   : > { %v16708_v5 = vor.u32 %v17471_v26, %v16705_v24  ;;  %v15184_v50 = vor.u32 %v17097_v39, %v15183_v44  ;;  %v15503_v26 = vld [vmem:[%s27437_s3 + $0x5b8] sm:$0xf]  ;;  %v15880_v24 = vor.u32 %v17272_v43, %v15879_v12  ;;  %v16449_v40 = vld [vmem:[%s27437_s3 + $0xd68] sm:$0xf0]  ;;  %v11017_v39 = vperm.slane %v26438_v61, 6 }
 0x587   : > { %10854 = vmatpush.bf16.msrb.mxu0 %v15052_v51  ;;  %v16769_v51 = vld [vmem:[%s27437_s3 + $0xfe8] sm:$0xf0]  ;;  %10740 = vmatpush.bf16.msra.mxu3 %v16384_v7  ;;  %v14927_v45 = vld [vmem:[%s27437_s3 + $0x138] sm:$0xf]  ;;  %v16775_v12 = vld [vmem:[%s27437_s3 + $0xfb0] sm:$0xf] }
 0x588   : > { %10781 = vmatmul.bf16.vlgmr.msrb.gmra.mxu2 %v24430_v32  ;;  %v16772_v9 = vor.u32 %v17487_v59, %v16769_v51  ;;  %v17288_v59 = vld [vmem:[%s27437_s3 + $0x96c] sm:$0xf0]  ;;  %v15120_v51 = vor.u32 %v17081_v31, %v15119_v54  ;;  %v17033_v46 = vld [vmem:[%s27437_s3 + $0x174] sm:$0xf0]  ;;  %v17391_v54 = vld [vmem:[%s27437_s3 + $0xcac] sm:$0xf] }
 0x589   : > { %10867 = vmatpush.bf16.msrb.mxu1 %v15564_v48  ;;  %10825 = vmatpush.bf16.msra.mxu2 %v16264_v41  ;;  %v10615_v48 = vpop.f32.mrf.mxu1  ;;  %v17225_v41 = vld [vmem:[%s27437_s3 + $0x774] sm:$0xf0]  ;;  %v16385_v31 = vld [vmem:[%s27437_s3 + $0xce8] sm:$0xf0]  ;;  %v17496_v43 = vld [vmem:[%s27437_s3 + $0xfec] sm:$0xf0] }
 0x58a   : > { %v15632_v48 = vor.u32 %v17209_v17, %v15631_v30 }
 0x58b   : > { %10855 = vmatpush.bf16.msrb.mxu0 %v14988_v28  ;;  %v16136_v28 = vor.u32 %v17336_v29, %v16135_v8  ;;  %10741 = vmatpush.bf16.msra.mxu3 %v16320_v4  ;;  %v15055_v8 = vld [vmem:[%s27437_s3 + $0x238] sm:$0xf] }
 0x58c   : > { %v17065_v29 = vld [vmem:[%s27437_s3 + $0x274] sm:$0xf0] }
 0x58d   : > { %10868 = vmatpush.bf16.msrb.mxu1 %v15500_v52  ;;  %10826 = vmatpush.bf16.msra.mxu2 %v16200_v18  ;;  %v14796_v52 = vor.u32 %v16992_v15, %v14793_v1  ;;  %v15943_v18 = vld [vmem:[%s27437_s3 + $0x930] sm:$0xf]  ;;  %v15567_v15 = vld [vmem:[%s27437_s3 + $0x638] sm:$0xf]  ;;  %v17423_v1 = vld [vmem:[%s27437_s3 + $0xdac] sm:$0xf]  ;;  %v15056_v42 = vor.u32 %v17065_v29, %v15055_v8 }
 0x58e   : > { %10742 = vmatmul.bf16.vlgmr.msra.gmra.mxu3 %v24680_v33  ;;  %v17193_v4 = vld [vmem:[%s27437_s3 + $0x674] sm:$0xf0]  ;;  %v16516_v21 = vor.u32 %v17423_v1, %v16513_v34 }
 0x58f   : > { %10856 = vmatpush.bf16.msrb.mxu0 %v14924_v0  ;;  %10786 = vmatpush.bf16.msrb.mxu3 %v16772_v9  ;;  %v16641_v0 = vld [vmem:[%s27437_s3 + $0xee8] sm:$0xf0]  ;;  %v26823_v9 = vpop.f32.mrf.mxu2  ;;  %v15568_v22 = vor.u32 %v17193_v4, %v15567_v15  ;;  %v17017_v8 = vld [vmem:[%s27437_s3 + $0xf4] sm:$0xf0] }
 0x590   : > { %v16644_v7 = vor.u32 %v17455_v20, %v16641_v0  ;;  %v10523_v20 = vadd.f32 %v26618_v53, %v26248_v57  ;;  %v17161_v53 = vld [vmem:[%s27437_s3 + $0x574] sm:$0xf0]  ;;  %v16321_v4 = vld [vmem:[%s27437_s3 + $0xc68] sm:$0xf0] }
 0x591   : > { %10869 = vmatpush.bf16.msrb.mxu1 %v15436_v19  ;;  %10827 = vmatpush.bf16.msra.mxu2 %v16136_v28  ;;  %v15696_v19 = vor.u32 %v17225_v41, %v15695_v10  ;;  %v14991_v28 = vld [vmem:[%s27437_s3 + $0x1b8] sm:$0xf]  ;;  %v16265_v41 = vld [vmem:[%s27437_s3 + $0xbf0] sm:$0xf0] }
 0x592   : > { %v14992_v10 = vor.u32 %v17049_v13, %v14991_v28  ;;  %v15375_v29 = vld [vmem:[%s27437_s3 + $0x4b8] sm:$0xf]  ;;  %v16137_v28 = vld [vmem:[%s27437_s3 + $0xaf0] sm:$0xf0] }
 0x593   : > { %10857 = vmatpush.bf16.msrb.mxu0 %v14860_v11  ;;  %10787 = vmatpush.bf16.msrb.mxu3 %v16708_v5  ;;  %v16580_v11 = vor.u32 %v17439_v27, %v16577_v14  ;;  %v14928_v27 = vor.u32 %v17033_v46, %v14927_v45  ;;  %v17344_v14 = vld [vmem:[%s27437_s3 + $0xb34] sm:$0xf]  ;;  %v17145_v15 = vld [vmem:[%s27437_s3 + $0x4f4] sm:$0xf0] }
 0x594   : > { %v14799_v13 = vld [vmem:[%s27437_s3 + $0x38] sm:$0xf] }
 0x595   : > { %10870 = vmatpush.bf16.msrb.mxu1 %v15372_v3  ;;  %10828 = vmatpush.bf16.msra.mxu2 %v16072_v56  ;;  %v15944_v3 = vor.u32 %v17288_v59, %v15943_v18  ;;  %v17360_v56 = vld [vmem:[%s27437_s3 + $0xbb4] sm:$0xf] }
 0x596   : > { %v16201_v18 = vld [vmem:[%s27437_s3 + $0xb70] sm:$0xf0] }
 0x597   : > { %10858 = vmatpush.bf16.msrb.mxu0 %v14796_v52  ;;  %10788 = vmatpush.bf16.msrb.mxu3 %v16644_v7  ;;  %v17177_v52 = vld [vmem:[%s27437_s3 + $0x5f4] sm:$0xf0]  ;;  %v10535_v7 = vpop.f32.mrf.mxu3  ;;  %v10576_v17 = vpop.f32.mrf.mxu2  ;;  %v16204_v34 = vor.u32 %v17344_v14, %v16201_v18  ;;  %v16009_v14 = vld [vmem:[%s27437_s3 + $0x9f0] sm:$0xf0] }
 0x598   : > { %v15504_v0 = vor.u32 %v17177_v52, %v15503_v26  ;;  %v10536_v30 = vadd.f32 %v10535_v7, %v10523_v20  ;;  %v15376_v26 = vor.u32 %v17145_v15, %v15375_v29  ;;  %v17001_v52 = vld [vmem:[%s27437_s3 + $0x74] sm:$0xf0]  ;;  %v17464_v17 = vld [vmem:[%s27437_s3 + $0xeec] sm:$0xf0]  ;;  %v15633_v15 = vld [vmem:[%s27437_s3 + $0x6f8] sm:$0xf0] }
 0x599   : > { %10871 = vmatpush.bf16.msrb.mxu1 %v15308_v37  ;;  %10829 = vmatpush.bf16.msra.mxu2 %v16008_v55  ;;  %v10652_v37 = vpop.f32.mrf.mxu0  ;;  %v10665_v44 = vpop.f32.mrf.mxu1  ;;  %v16268_v55 = vor.u32 %v17360_v56, %v16265_v41  ;;  %v16711_v56 = vld [vmem:[%s27437_s3 + $0xf30] sm:$0xf]  ;;  %v14800_v20 = vor.u32 %v17001_v52, %v14799_v13 }
 0x59a   : > { %10859 = vmatmul.bf16.vlgmr.msrb.gmra.mxu0 %v24085_v58  ;;  %v10653_v5 = vadd.f32 %v10652_v37, %v24193_v63  ;;  %v16452_v63 = vor.u32 %v17407_v38, %v16449_v40  ;;  %v11049_v59 = vadd.f32 %v11017_v39, %v10536_v30  ;;  %v15311_v38 = vld [vmem:[%s27437_s3 + $0x438] sm:$0xf]  ;;  %v17480_v41 = vld [vmem:[%s27437_s3 + $0xf6c] sm:$0xf0]  ;;  %v15697_v30 = vld [vmem:[%s27437_s3 + $0x778] sm:$0xf0] }
 0x59b   : > { %10903 = vmatpush.bf16.msra.mxu0 %v15248_v36  ;;  %10789 = vmatpush.bf16.msrb.mxu3 %v16580_v11  ;;  %v15815_v36 = vld [vmem:[%s27437_s3 + $0x830] sm:$0xf]  ;;  %v14863_v11 = vld [vmem:[%s27437_s3 + $0xb8] sm:$0xf]  ;;  %v16712_v7 = vor.u32 %v17480_v41, %v16711_v56  ;;  %v15505_v41 = vld [vmem:[%s27437_s3 + $0x5f8] sm:$0xf0] }
 0x59c   : > { %10872 = vmatmul.bf16.vlgmr.msrb.gmra.mxu1 %v24087_v35  ;;  %11065 = vst [vmem:[%s25666_s13 + $0x30] sm:$0xff] %v11049_v59  ;;  %v17129_v40 = vld [vmem:[%s27437_s3 + $0x474] sm:$0xf0]  ;;  %v17432_v52 = vld [vmem:[%s27437_s3 + $0xdec] sm:$0xf0] }
 0x59d   : > { %10916 = vmatpush.bf16.msra.mxu1 %v15760_v16  ;;  %10830 = vmatpush.bf16.msra.mxu2 %v15944_v3  ;;  %v17256_v16 = vld [vmem:[%s27437_s3 + $0x86c] sm:$0xf0]  ;;  %v17375_v3 = vld [vmem:[%s27437_s3 + $0xc2c] sm:$0xf]  ;;  %v15312_v45 = vor.u32 %v17129_v40, %v15311_v38  ;;  %v17264_v38 = vld [vmem:[%s27437_s3 + $0x8b4] sm:$0xf] }
 0x59e   : > { %v15816_v57 = vor.u32 %v17256_v16, %v15815_v36  ;;  %v16776_v36 = vor.u32 %v17496_v43, %v16775_v12  ;;  %v17105_v16 = vld [vmem:[%s27437_s3 + $0x3bc] sm:$0xf]  ;;  %v15881_v40 = vld [vmem:[%s27437_s3 + $0x8f0] sm:$0xf0] }
 0x59f   : > { %10904 = vmatpush.bf16.msra.mxu0 %v15184_v50  ;;  %10790 = vmatpush.bf16.msrb.mxu3 %v16516_v21  ;;  %v15439_v50 = vld [vmem:[%s27437_s3 + $0x538] sm:$0xf]  ;;  %v17328_v21 = vld [vmem:[%s27437_s3 + $0xab4] sm:$0xf]  ;;  %v10537_v37 = vpop.f32.mrf.mxu3  ;;  %v15884_v56 = vor.u32 %v17264_v38, %v15881_v40 }
 0x5a0   : > { %v16140_v39 = vor.u32 %v17328_v21, %v16137_v28  ;;  %v15057_v21 = vld [vmem:[%s27437_s3 + $0x278] sm:$0xf0] }
 0x5a1   : > { %10917 = vmatpush.bf16.msra.mxu1 %v15696_v19  ;;  %v26868_v19 = vadd.f32 %v10665_v44, %v10653_v5  ;;  %10831 = vmatpush.bf16.msra.mxu2 %v15880_v24  ;;  %v10654_v1 = vpop.f32.mrf.mxu0  ;;  %v16324_v24 = vor.u32 %v17375_v3, %v16321_v4  ;;  %v15249_v5 = vld [vmem:[%s27437_s3 + $0x3f8] sm:$0xf0]  ;;  %v16583_v3 = vld [vmem:[%s27437_s3 + $0xe30] sm:$0xf] }
 0x5a2   : > { %v17233_v44 = vld [vmem:[%s27437_s3 + $0x7bc] sm:$0xf]  ;;  %v15252_v46 = vor.u32 %v17105_v16, %v15249_v5  ;;  %v17448_v4 = vld [vmem:[%s27437_s3 + $0xe6c] sm:$0xf0]  ;;  %v17280_v1 = vld [vmem:[%s27437_s3 + $0x934] sm:$0xf] }
 0x5a3   : > { %10905 = vmatpush.bf16.msra.mxu0 %v15120_v51  ;;  %10791 = vmatpush.bf16.msrb.mxu3 %v16452_v63  ;;  %v15440_v51 = vor.u32 %v17161_v53, %v15439_v50  ;;  %v16073_v63 = vld [vmem:[%s27437_s3 + $0xa70] sm:$0xf0]  ;;  %v15185_v53 = vld [vmem:[%s27437_s3 + $0x378] sm:$0xf0] }
 0x5a4   : > { %v17185_v28 = vld [vmem:[%s27437_s3 + $0x63c] sm:$0xf] }
 0x5a5   : > { %10918 = vmatpush.bf16.msra.mxu1 %v15632_v48  ;;  %v16388_v48 = vor.u32 %v17391_v54, %v16385_v31  ;;  %10832 = vmatpush.bf16.msra.mxu2 %v15816_v57  ;;  %v17089_v57 = vld [vmem:[%s27437_s3 + $0x33c] sm:$0xf] }
 0x5a6   : > { %v17217_v54 = vld [vmem:[%s27437_s3 + $0x73c] sm:$0xf]  ;;  %v15188_v18 = vor.u32 %v17089_v57, %v15185_v53  ;;  %v11018_v57 = vperm.slane %v26438_v61, 7 }
 0x5a7   : > { %10906 = vmatpush.bf16.msra.mxu0 %v15056_v42  ;;  %v10667_v42 = vpop.f32.mrf.mxu1  ;;  %10792 = vmatpush.bf16.msrb.mxu3 %v16388_v48  ;;  %v15700_v59 = vor.u32 %v17217_v54, %v15697_v30  ;;  %v17073_v48 = vld [vmem:[%s27437_s3 + $0x2bc] sm:$0xf]  ;;  %v16271_v54 = vld [vmem:[%s27437_s3 + $0xbb8] sm:$0xf]  ;;  %v10575_v30 = vadd.f32 %v26823_v9, %v26458_v49 }
 0x5a8   : > { %10833 = vmatmul.bf16.vlgmr.msra.gmra.mxu2 %v24430_v32  ;;  %v16584_v42 = vor.u32 %v17448_v4, %v16583_v3  ;;  %v17025_v61 = vld [vmem:[%s27437_s3 + $0x13c] sm:$0xf]  ;;  %v17353_v3 = vld [vmem:[%s27437_s3 + $0xb74] sm:$0xf0] }
 0x5a9   : > { %10919 = vmatpush.bf16.msra.mxu1 %v15568_v22  ;;  %10877 = vmatpush.bf16.msrb.mxu2 %v16268_v55  ;;  %v14864_v22 = vor.u32 %v17017_v8, %v14863_v11  ;;  %v16647_v55 = vld [vmem:[%s27437_s3 + $0xeb0] sm:$0xf]  ;;  %v15121_v11 = vld [vmem:[%s27437_s3 + $0x2f8] sm:$0xf0] }
 0x5aa   : > { %v17201_v8 = vld [vmem:[%s27437_s3 + $0x6bc] sm:$0xf]  ;;  %v15124_v12 = vor.u32 %v17073_v48, %v15121_v11 }
 0x5ab   : > { %10907 = vmatpush.bf16.msra.mxu0 %v14992_v10  ;;  %v15761_v10 = vld [vmem:[%s27437_s3 + $0x7f8] sm:$0xf0]  ;;  %10793 = vmatpush.bf16.msrb.mxu3 %v16324_v24  ;;  %v15636_v43 = vor.u32 %v17201_v8, %v15633_v15  ;;  %v16519_v24 = vld [vmem:[%s27437_s3 + $0xdb0] sm:$0xf]  ;;  %v27028_v37 = vpop.f32.mrf.mxu2  ;;  %v16207_v15 = vld [vmem:[%s27437_s3 + $0xb38] sm:$0xf] }
 0x5ac   : > { %v15764_v50 = vor.u32 %v17233_v44, %v15761_v10  ;;  %v16520_v5 = vor.u32 %v17432_v52, %v16519_v24  ;;  %v17041_v44 = vld [vmem:[%s27437_s3 + $0x1bc] sm:$0xf]  ;;  %v17488_v24 = vld [vmem:[%s27437_s3 + $0xfb4] sm:$0xf] }
 0x5ad   : > { %10920 = vmatpush.bf16.msra.mxu1 %v15504_v0  ;;  %10878 = vmatpush.bf16.msrb.mxu2 %v16204_v34  ;;  %v17312_v0 = vld [vmem:[%s27437_s3 + $0xa34] sm:$0xf]  ;;  %v17169_v10 = vld [vmem:[%s27437_s3 + $0x5bc] sm:$0xf] }
 0x5ae   : > { %v16076_v31 = vor.u32 %v17312_v0, %v16073_v63  ;;  %10794 = vmatmul.bf16.vlgmr.msrb.gmra.mxu3 %v24680_v33  ;;  %v15945_v34 = vld [vmem:[%s27437_s3 + $0x970] sm:$0xf0]  ;;  %v17416_v0 = vld [vmem:[%s27437_s3 + $0xd6c] sm:$0xf0]  ;;  %v15441_v9 = vld [vmem:[%s27437_s3 + $0x578] sm:$0xf0] }
 0x5af   : > { %10908 = vmatpush.bf16.msra.mxu0 %v14928_v27  ;;  %10838 = vmatpush.bf16.msra.mxu3 %v16776_v36  ;;  %v17296_v27 = vld [vmem:[%s27437_s3 + $0x9b4] sm:$0xf]  ;;  %v15948_v13 = vor.u32 %v17280_v1, %v15945_v34 }
 0x5b0   : > { %v16012_v29 = vor.u32 %v17296_v27, %v16009_v14  ;;  %v17153_v27 = vld [vmem:[%s27437_s3 + $0x53c] sm:$0xf]  ;;  %v16777_v52 = vld [vmem:[%s27437_s3 + $0xff0] sm:$0xf0] }
 0x5b1   : > { %10921 = vmatpush.bf16.msra.mxu1 %v15440_v51  ;;  %10879 = vmatpush.bf16.msrb.mxu2 %v16140_v39  ;;  %v16648_v51 = vor.u32 %v17464_v17, %v16647_v55  ;;  %v14993_v39 = vld [vmem:[%s27437_s3 + $0x1f8] sm:$0xf0]  ;;  %v15508_v55 = vor.u32 %v17169_v10, %v15505_v41  ;;  %v15444_v1 = vor.u32 %v17153_v27, %v15441_v9  ;;  %v15951_v9 = vld [vmem:[%s27437_s3 + $0x938] sm:$0xf] }
 0x5b2   : > { %v14996_v53 = vor.u32 %v17041_v44, %v14993_v39  ;;  %v14929_v17 = vld [vmem:[%s27437_s3 + $0x178] sm:$0xf0]  ;;  %v16780_v41 = vor.u32 %v17488_v24, %v16777_v52 }
 0x5b3   : > { %10909 = vmatpush.bf16.msra.mxu0 %v14864_v22  ;;  %10839 = vmatpush.bf16.msra.mxu3 %v16712_v7  ;;  %v17057_v22 = vld [vmem:[%s27437_s3 + $0x23c] sm:$0xf]  ;;  %v10628_v8 = vpop.f32.mrf.mxu2 }
 0x5b4   : > { %v15060_v36 = vor.u32 %v17057_v22, %v15057_v21  ;;  %v15377_v22 = vld [vmem:[%s27437_s3 + $0x4f8] sm:$0xf0]  ;;  %v16327_v21 = vld [vmem:[%s27437_s3 + $0xc30] sm:$0xf]  ;;  %v17273_v8 = vld [vmem:[%s27437_s3 + $0x8f4] sm:$0xf0] }
 0x5b5   : > { %10922 = vmatpush.bf16.msra.mxu1 %v15376_v26  ;;  %10880 = vmatpush.bf16.msrb.mxu2 %v16076_v31  ;;  %v15569_v26 = vld [vmem:[%s27437_s3 + $0x678] sm:$0xf0]  ;;  %v17369_v31 = vld [vmem:[%s27437_s3 + $0xbf4] sm:$0xf0] }
 0x5b6   : > { %v15572_v16 = vor.u32 %v17185_v28, %v15569_v26  ;;  %v16272_v11 = vor.u32 %v17369_v31, %v16271_v54  ;;  %v17384_v28 = vld [vmem:[%s27437_s3 + $0xc6c] sm:$0xf0]  ;;  %v16208_v26 = vor.u32 %v17353_v3, %v16207_v15  ;;  %v16993_v39 = vld [vmem:[%s27437_s3 + $0x3c] sm:$0xf]  ;;  %v27190_v3 = vld [vmem:[%s27438_s4 + $0x8] sm:$0xff] }
 0x5b7   : > { %10910 = vmatpush.bf16.msra.mxu0 %v14800_v20  ;;  %10840 = vmatpush.bf16.msra.mxu3 %v16648_v51  ;;  %v16455_v20 = vld [vmem:[%s27437_s3 + $0xd30] sm:$0xf]  ;;  %v10704_v63 = vpop.f32.mrf.mxu0  ;;  %v16328_v44 = vor.u32 %v17384_v28, %v16327_v21  ;;  %v14801_v10 = vld [vmem:[%s27437_s3 + $0x78] sm:$0xf0]  ;;  %v11019_v24 = vperm.slane %v27190_v3, 0 }
 0x5b8   : > { %v17400_v51 = vld [vmem:[%s27437_s3 + $0xcec] sm:$0xf0]  ;;  %v17361_v28 = vld [vmem:[%s27437_s3 + $0xbbc] sm:$0xf] }
 0x5b9   : > { %10923 = vmatpush.bf16.msra.mxu1 %v15312_v45  ;;  %10881 = vmatpush.bf16.msrb.mxu2 %v16012_v29  ;;  %v17248_v45 = vld [vmem:[%s27437_s3 + $0x834] sm:$0xf]  ;;  %v10717_v7 = vpop.f32.mrf.mxu1  ;;  %v14932_v29 = vor.u32 %v17025_v61, %v14929_v17  ;;  %v17305_v61 = vld [vmem:[%s27437_s3 + $0x9f4] sm:$0xf0] }
 0x5ba   : > { %10911 = vmatmul.bf16.vlgmr.msra.gmra.mxu0 %v24085_v58 }
 0x5bb   : > { %10955 = vmatpush.bf16.msrb.mxu0 %v15252_v46  ;;  %10841 = vmatpush.bf16.msra.mxu3 %v16584_v42  ;;  %v15817_v46 = vld [vmem:[%s27437_s3 + $0x870] sm:$0xf0]  ;;  %v17137_v42 = vld [vmem:[%s27437_s3 + $0x4bc] sm:$0xf] }
 0x5bc   : > { %10924 = vmatmul.bf16.vlgmr.msra.gmra.mxu1 %v24087_v35  ;;  %v15820_v49 = vor.u32 %v17248_v45, %v15817_v46  ;;  %v17472_v45 = vld [vmem:[%s27437_s3 + $0xf34] sm:$0xf] }
 0x5bd   : > { %10968 = vmatpush.bf16.msrb.mxu1 %v15764_v50  ;;  %10882 = vmatpush.bf16.msrb.mxu2 %v15948_v13  ;;  %v10705_v50 = vadd.f32 %v10704_v63, %v24397_v60  ;;  %v16456_v60 = vor.u32 %v17416_v0, %v16455_v20  ;;  %v17121_v20 = vld [vmem:[%s27437_s3 + $0x43c] sm:$0xf]  ;;  %v16713_v46 = vld [vmem:[%s27437_s3 + $0xf70] sm:$0xf0] }
 0x5be   : > { %v15313_v0 = vld [vmem:[%s27437_s3 + $0x478] sm:$0xf0]  ;;  %v16716_v54 = vor.u32 %v17472_v45, %v16713_v46  ;;  %v16783_v45 = vld [vmem:[%s27437_s3 + $0xfb8] sm:$0xf] }
 0x5bf   : > { %10956 = vmatpush.bf16.msrb.mxu0 %v15188_v18  ;;  %10842 = vmatpush.bf16.msra.mxu3 %v16520_v5  ;;  %v27073_v14 = vadd.f32 %v10717_v7, %v10705_v50  ;;  %v10587_v18 = vpop.f32.mrf.mxu3  ;;  %v10706_v13 = vpop.f32.mrf.mxu0  ;;  %v15380_v5 = vor.u32 %v17137_v42, %v15377_v22  ;;  %v14804_v50 = vor.u32 %v16993_v39, %v14801_v10  ;;  %v16079_v7 = vld [vmem:[%s27437_s3 + $0xa38] sm:$0xf]  ;;  %v16209_v39 = vld [vmem:[%s27437_s3 + $0xb78] sm:$0xf0] }
 0x5c0   : > { %v10588_v48 = vadd.f32 %v10587_v18, %v10575_v30  ;;  %v17456_v30 = vld [vmem:[%s27437_s3 + $0xeb4] sm:$0xf]  ;;  %v17257_v42 = vld [vmem:[%s27437_s3 + $0x874] sm:$0xf0]  ;;  %v16273_v13 = vld [vmem:[%s27437_s3 + $0xbf8] sm:$0xf0] }
 0x5c1   : > { %10969 = vmatpush.bf16.msrb.mxu1 %v15700_v59  ;;  %10883 = vmatpush.bf16.msrb.mxu2 %v15884_v56  ;;  %v16391_v59 = vld [vmem:[%s27437_s3 + $0xcb0] sm:$0xf]  ;;  %v10719_v38 = vpop.f32.mrf.mxu1  ;;  %v17440_v18 = vld [vmem:[%s27437_s3 + $0xe34] sm:$0xf]  ;;  %v17497_v46 = vld [vmem:[%s27437_s3 + $0xff4] sm:$0xf0] }
 0x5c2   : > { %v11050_v4 = vadd.f32 %v11018_v57, %v10588_v48  ;;  %v16392_v34 = vor.u32 %v17400_v51, %v16391_v59  ;;  %v17321_v57 = vld [vmem:[%s27437_s3 + $0xa74] sm:$0xf0]  ;;  %v17424_v48 = vld [vmem:[%s27437_s3 + $0xdb4] sm:$0xf] }
 0x5c3   : > { %10957 = vmatpush.bf16.msrb.mxu0 %v15124_v12  ;;  %10843 = vmatpush.bf16.msra.mxu3 %v16456_v60  ;;  %v17009_v12 = vld [vmem:[%s27437_s3 + $0xbc] sm:$0xf]  ;;  %v16080_v31 = vor.u32 %v17321_v57, %v16079_v7  ;;  %v16015_v60 = vld [vmem:[%s27437_s3 + $0x9b8] sm:$0xf] }
 0x5c4   : > { %11066 = vst [vmem:[%s25666_s13 + $0x38] sm:$0xff] %v11050_v4  ;;  %v16016_v27 = vor.u32 %v17305_v61, %v16015_v60  ;;  %v17329_v7 = vld [vmem:[%s27437_s3 + $0xabc] sm:$0xf]  ;;  %v17481_v60 = vld [vmem:[%s27437_s3 + $0xf74] sm:$0xf0] }
 0x5c5   : > { %10970 = vmatpush.bf16.msrb.mxu1 %v15636_v43  ;;  %v14865_v43 = vld [vmem:[%s27437_s3 + $0xf8] sm:$0xf0]  ;;  %10884 = vmatpush.bf16.msrb.mxu2 %v15820_v49  ;;  %v16585_v49 = vld [vmem:[%s27437_s3 + $0xe70] sm:$0xf0] }
 0x5c6   : > { %v14868_v40 = vor.u32 %v17009_v12, %v14865_v43  ;;  %v16588_v59 = vor.u32 %v17440_v18, %v16585_v49  ;;  %v15823_v43 = vld [vmem:[%s27437_s3 + $0x838] sm:$0xf]  ;;  %v16145_v57 = vld [vmem:[%s27437_s3 + $0xaf8] sm:$0xf0] }
 0x5c7   : > { %10958 = vmatpush.bf16.msrb.mxu0 %v15060_v36  ;;  %v16143_v36 = vld [vmem:[%s27437_s3 + $0xab8] sm:$0xf]  ;;  %10844 = vmatpush.bf16.msra.mxu3 %v16392_v34  ;;  %v10589_v56 = vpop.f32.mrf.mxu3  ;;  %v16457_v34 = vld [vmem:[%s27437_s3 + $0xd70] sm:$0xf0]  ;;  %v17313_v61 = vld [vmem:[%s27437_s3 + $0xa3c] sm:$0xf] }
 0x5c8   : > { %10885 = vmatmul.bf16.vlgmr.msrb.gmra.mxu2 %v24430_v32  ;;  %v16655_v49 = vld [vmem:[%s27437_s3 + $0xeb8] sm:$0xf] }
 0x5c9   : > { %10971 = vmatpush.bf16.msrb.mxu1 %v15572_v16  ;;  %10929 = vmatpush.bf16.msra.mxu2 %v16272_v11  ;;  %v17337_v16 = vld [vmem:[%s27437_s3 + $0xaf4] sm:$0xf0] }
 0x5ca   : > { %v16144_v63 = vor.u32 %v17337_v16, %v16143_v36  ;;  %v15887_v11 = vld [vmem:[%s27437_s3 + $0x8b8] sm:$0xf]  ;;  %v17392_v36 = vld [vmem:[%s27437_s3 + $0xcb4] sm:$0xf] }
 0x5cb   : > { %10959 = vmatpush.bf16.msrb.mxu0 %v14996_v53  ;;  %10845 = vmatpush.bf16.msra.mxu3 %v16328_v44  ;;  %v15316_v53 = vor.u32 %v17121_v20, %v15313_v0  ;;  %v15888_v4 = vor.u32 %v17273_v8, %v15887_v11  ;;  %v16393_v16 = vld [vmem:[%s27437_s3 + $0xcf0] sm:$0xf0]  ;;  %v17345_v44 = vld [vmem:[%s27437_s3 + $0xb3c] sm:$0xf]  ;;  %v17449_v11 = vld [vmem:[%s27437_s3 + $0xe74] sm:$0xf0] }
 0x5cc   : > { %v16396_v56 = vor.u32 %v17392_v36, %v16393_v16  ;;  %v16329_v20 = vld [vmem:[%s27437_s3 + $0xc70] sm:$0xf0]  ;;  %v17281_v8 = vld [vmem:[%s27437_s3 + $0x93c] sm:$0xf] }
 0x5cd   : > { %10972 = vmatpush.bf16.msrb.mxu1 %v15508_v55  ;;  %10930 = vmatpush.bf16.msra.mxu2 %v16208_v26  ;;  %v16649_v55 = vld [vmem:[%s27437_s3 + $0xef0] sm:$0xf0]  ;;  %v10627_v26 = vadd.f32 %v27028_v37, %v26663_v25  ;;  %v16276_v25 = vor.u32 %v17361_v28, %v16273_v13  ;;  %v16463_v13 = vld [vmem:[%s27437_s3 + $0xd38] sm:$0xf] }
 0x5ce   : > { %10846 = vmatmul.bf16.vlgmr.msra.gmra.mxu3 %v24680_v33  ;;  %v16652_v17 = vor.u32 %v17456_v30, %v16649_v55  ;;  %v16148_v30 = vor.u32 %v17329_v7, %v16145_v57  ;;  %v16719_v55 = vld [vmem:[%s27437_s3 + $0xf38] sm:$0xf] }
 0x5cf   : > { %10960 = vmatpush.bf16.msrb.mxu0 %v14932_v29  ;;  %10890 = vmatpush.bf16.msrb.mxu3 %v16780_v41  ;;  %v27185_v29 = vpop.f32.mrf.mxu2  ;;  %v17376_v41 = vld [vmem:[%s27437_s3 + $0xc34] sm:$0xf] }
 0x5d0   : > { %v10679_v16 = vadd.f32 %v27185_v29, %v26868_v19 }
 0x5d1   : > { %10973 = vmatpush.bf16.msrb.mxu1 %v15444_v1  ;;  %10931 = vmatpush.bf16.msra.mxu2 %v16144_v63  ;;  %v17408_v1 = vld [vmem:[%s27437_s3 + $0xd34] sm:$0xf]  ;;  %v16212_v63 = vor.u32 %v17345_v44, %v16209_v39 }
 0x5d2   : > { %v16460_v52 = vor.u32 %v17408_v1, %v16457_v34  ;;  %v16527_v34 = vld [vmem:[%s27437_s3 + $0xdb8] sm:$0xf] }
 0x5d3   : > { %10961 = vmatpush.bf16.msrb.mxu0 %v14868_v40  ;;  %10891 = vmatpush.bf16.msrb.mxu3 %v16716_v54  ;;  %v10639_v40 = vpop.f32.mrf.mxu3 }
 0x5d5   : > { %10974 = vmatpush.bf16.msrb.mxu1 %v15380_v5  ;;  %10932 = vmatpush.bf16.msra.mxu2 %v16080_v31  ;;  %v10640_v5 = vadd.f32 %v10639_v40, %v10627_v26  ;;  %v16784_v31 = vor.u32 %v17497_v46, %v16783_v45  ;;  %v17417_v26 = vld [vmem:[%s27437_s3 + $0xd74] sm:$0xf0]  ;;  %v15825_v40 = vld [vmem:[%s27437_s3 + $0x878] sm:$0xf0] }
 0x5d6   : > { %v17489_v45 = vld [vmem:[%s27437_s3 + $0xfbc] sm:$0xf] }
 0x5d7   : > { %10962 = vmatpush.bf16.msrb.mxu0 %v14804_v50  ;;  %10892 = vmatpush.bf16.msrb.mxu3 %v16652_v17  ;;  %v10756_v12 = vpop.f32.mrf.mxu0  ;;  %v10680_v37 = vpop.f32.mrf.mxu2  ;;  %v11051_v10 = vadd.f32 %v11019_v24, %v10640_v5  ;;  %v16081_v17 = vld [vmem:[%s27437_s3 + $0xa78] sm:$0xf0]  ;;  %v11020_v5 = vperm.slane %v27190_v3, 1 }
 0x5d8   : > { %v10757_v22 = vadd.f32 %v10756_v12, %v24604_v23  ;;  %v15824_v23 = vor.u32 %v17257_v42, %v15823_v43  ;;  %v16084_v18 = vor.u32 %v17313_v61, %v16081_v17  ;;  %v17433_v12 = vld [vmem:[%s27437_s3 + $0xdf4] sm:$0xf0]  ;;  %v17265_v43 = vld [vmem:[%s27437_s3 + $0x8bc] sm:$0xf] }
 0x5d9   : > { %10975 = vmatpush.bf16.msrb.mxu1 %v15316_v53  ;;  %10933 = vmatpush.bf16.msra.mxu2 %v16016_v27  ;;  %v10769_v21 = vpop.f32.mrf.mxu1  ;;  %11067 = vst [vmem:[%s25666_s13 + $0x40] sm:$0xff] %v11051_v10  ;;  %v16332_v53 = vor.u32 %v17376_v41, %v16329_v20  ;;  %v16720_v27 = vor.u32 %v17481_v60, %v16719_v55  ;;  %v15889_v42 = vld [vmem:[%s27437_s3 + $0x8f8] sm:$0xf0]  ;;  %v16399_v10 = vld [vmem:[%s27437_s3 + $0xcb8] sm:$0xf] }
 0x5da   : > { %10963 = vmatmul.bf16.vlgmr.msrb.gmra.mxu0 %v24085_v58  ;;  %v17289_v58 = vld [vmem:[%s27437_s3 + $0x974] sm:$0xf0]  ;;  %v27214_v38 = vadd.f32 %v10769_v21, %v10757_v22  ;;  %v16528_v21 = vor.u32 %v17433_v12, %v16527_v34  ;;  %v15892_v28 = vor.u32 %v17265_v43, %v15889_v42  ;;  %v16785_v46 = vld [vmem:[%s27437_s3 + $0xff8] sm:$0xf0] }
 0x5db   : > { %v15952_v51 = vor.u32 %v17289_v58, %v15951_v9  ;;  %10893 = vmatpush.bf16.msrb.mxu3 %v16588_v59  ;;  %v10641_v54 = vpop.f32.mrf.mxu3  ;;  %v17465_v9 = vld [vmem:[%s27437_s3 + $0xef4] sm:$0xf0]  ;;  %v17297_v58 = vld [vmem:[%s27437_s3 + $0x9bc] sm:$0xf] }
 0x5dc   : > { %10976 = vmatmul.bf16.vlgmr.msrb.gmra.mxu1 %v24087_v35  ;;  %v16521_v35 = vld [vmem:[%s27437_s3 + $0xdf0] sm:$0xf0]  ;;  %v16017_v59 = vld [vmem:[%s27437_s3 + $0x9f8] sm:$0xf0]  ;;  %v16335_v20 = vld [vmem:[%s27437_s3 + $0xc38] sm:$0xf] }
 0x5dd   : > { %v16524_v15 = vor.u32 %v17424_v48, %v16521_v35  ;;  %10934 = vmatpush.bf16.msra.mxu2 %v15952_v51  ;;  %v16656_v51 = vor.u32 %v17465_v9, %v16655_v49  ;;  %v16020_v48 = vor.u32 %v17297_v58, %v16017_v59  ;;  %v16591_v35 = vld [vmem:[%s27437_s3 + $0xe38] sm:$0xf]  ;;  %v17473_v54 = vld [vmem:[%s27437_s3 + $0xf3c] sm:$0xf] }
 0x5de   : > { %v17457_v55 = vld [vmem:[%s27437_s3 + $0xebc] sm:$0xf] }
 0x5df   : > { %10894 = vmatpush.bf16.msrb.mxu3 %v16524_v15  ;;  %v10758_v0 = vpop.f32.mrf.mxu0  ;;  %v15953_v15 = vld [vmem:[%s27437_s3 + $0x978] sm:$0xf0] }
 0x5e0   : > { %v15956_v1 = vor.u32 %v17281_v8, %v15953_v15  ;;  %v17385_v0 = vld [vmem:[%s27437_s3 + $0xc74] sm:$0xf0]  ;;  %v17441_v61 = vld [vmem:[%s27437_s3 + $0xe3c] sm:$0xf]  ;;  %v11021_v15 = vperm.slane %v27190_v3, 2 }
 0x5e1   : > { %10935 = vmatpush.bf16.msra.mxu2 %v15888_v4  ;;  %v10771_v50 = vpop.f32.mrf.mxu1  ;;  %v16592_v4 = vor.u32 %v17449_v11, %v16591_v35  ;;  %v16336_v7 = vor.u32 %v17385_v0, %v16335_v20  ;;  %v16593_v17 = vld [vmem:[%s27437_s3 + $0xe78] sm:$0xf0] }
 0x5e2   : > { %v16529_v49 = vld [vmem:[%s27437_s3 + $0xdf8] sm:$0xf0] }
 0x5e3   : > { %10895 = vmatpush.bf16.msrb.mxu3 %v16460_v52  ;;  %v17249_v52 = vld [vmem:[%s27437_s3 + $0x83c] sm:$0xf] }
 0x5e4   : > { %v15828_v39 = vor.u32 %v17249_v52, %v15825_v40  ;;  %v17409_v59 = vld [vmem:[%s27437_s3 + $0xd3c] sm:$0xf] }
 0x5e5   : > { %10936 = vmatpush.bf16.msra.mxu2 %v15824_v23  ;;  %v17393_v12 = vld [vmem:[%s27437_s3 + $0xcbc] sm:$0xf] }
 0x5e6   : > { %v16401_v43 = vld [vmem:[%s27437_s3 + $0xcf8] sm:$0xf0] }
 0x5e7   : > { %10896 = vmatpush.bf16.msrb.mxu3 %v16396_v56 }
 0x5e8   : > { %10937 = vmatmul.bf16.vlgmr.msra.gmra.mxu2 %v24430_v32 }
 0x5e9   : > { %10981 = vmatpush.bf16.msrb.mxu2 %v16276_v25  ;;  %v16464_v25 = vor.u32 %v17417_v26, %v16463_v13 }
 0x5eb   : > { %10897 = vmatpush.bf16.msrb.mxu3 %v16332_v53  ;;  %v27297_v22 = vpop.f32.mrf.mxu2  ;;  %v16788_v53 = vor.u32 %v17489_v45, %v16785_v46 }
 0x5ec   : > { %v10731_v8 = vadd.f32 %v27297_v22, %v27073_v14  ;;  %v17377_v14 = vld [vmem:[%s27437_s3 + $0xc3c] sm:$0xf] }
 0x5ed   : > { %10982 = vmatpush.bf16.msrb.mxu2 %v16212_v63  ;;  %v16337_v22 = vld [vmem:[%s27437_s3 + $0xc78] sm:$0xf0] }
 0x5ee   : > { %10898 = vmatmul.bf16.vlgmr.msrb.gmra.mxu3 %v24680_v33 }
 0x5ef   : > { %10942 = vmatpush.bf16.msra.mxu3 %v16784_v31  ;;  %v16721_v31 = vld [vmem:[%s27437_s3 + $0xf78] sm:$0xf0] }
 0x5f1   : > { %10983 = vmatpush.bf16.msrb.mxu2 %v16148_v30  ;;  %v10691_v44 = vpop.f32.mrf.mxu3  ;;  %v16724_v30 = vor.u32 %v17473_v54, %v16721_v31 }
 0x5f2   : > { %v10692_v56 = vadd.f32 %v10691_v44, %v10679_v16 }
 0x5f3   : > { %10943 = vmatpush.bf16.msra.mxu3 %v16720_v27  ;;  %v10732_v19 = vpop.f32.mrf.mxu2  ;;  %v16596_v27 = vor.u32 %v17441_v61, %v16593_v17 }
 0x5f4   : > { %v11052_v29 = vadd.f32 %v11020_v5, %v10692_v56 }
 0x5f5   : > { %10984 = vmatpush.bf16.msrb.mxu2 %v16084_v18  ;;  %v17425_v18 = vld [vmem:[%s27437_s3 + $0xdbc] sm:$0xf] }
 0x5f6   : > { %11068 = vst [vmem:[%s25666_s13 + $0x48] sm:$0xff] %v11052_v29  ;;  %v16532_v58 = vor.u32 %v17425_v18, %v16529_v49  ;;  %v11025_v49 = vperm.slane %v27190_v3, 6 }
 0x5f7   : > { %10944 = vmatpush.bf16.msra.mxu3 %v16656_v51  ;;  %v10808_v24 = vpop.f32.mrf.mxu0  ;;  %v16465_v51 = vld [vmem:[%s27437_s3 + $0xd78] sm:$0xf0] }
 0x5f8   : > { %v10809_v23 = vadd.f32 %v10808_v24, %v24811_v62  ;;  %v17401_v62 = vld [vmem:[%s27437_s3 + $0xcf4] sm:$0xf0]  ;;  %v16340_v24 = vor.u32 %v17377_v14, %v16337_v22 }
 0x5f9   : > { %10985 = vmatpush.bf16.msrb.mxu2 %v16020_v48  ;;  %v10821_v36 = vpop.f32.mrf.mxu1  ;;  %v16400_v41 = vor.u32 %v17401_v62, %v16399_v10  ;;  %v10693_v57 = vpop.f32.mrf.mxu3 }
 0x5fa   : > { %v27315_v37 = vadd.f32 %v10821_v36, %v10809_v23 }
 0x5fb   : > { %10945 = vmatpush.bf16.msra.mxu3 %v16592_v4  ;;  %v16468_v4 = vor.u32 %v17409_v59, %v16465_v51 }
 0x5fd   : > { %10986 = vmatpush.bf16.msrb.mxu2 %v15956_v1 }
 0x5ff   : > { %10946 = vmatpush.bf16.msra.mxu3 %v16528_v21  ;;  %v10810_v63 = vpop.f32.mrf.mxu0 }
 0x601   : > { %10987 = vmatpush.bf16.msrb.mxu2 %v15892_v28  ;;  %v10823_v50 = vpop.f32.mrf.mxu1  ;;  %v16404_v28 = vor.u32 %v17393_v12, %v16401_v43 }
 0x603   : > { %10947 = vmatpush.bf16.msra.mxu3 %v16464_v25  ;;  %v11022_v25 = vperm.slane %v27190_v3, 3 }
 0x605   : > { %10988 = vmatpush.bf16.msrb.mxu2 %v15828_v39 }
 0x607   : > { %10948 = vmatpush.bf16.msra.mxu3 %v16400_v41 }
 0x608   : > { %10989 = vmatmul.bf16.vlgmr.msrb.gmra.mxu2 %v24430_v32  ;;  %v16657_v32 = vld [vmem:[%s27437_s3 + $0xef8] sm:$0xf0] }
 0x609   : > { %v16660_v60 = vor.u32 %v17457_v55, %v16657_v32 }
 0x60b   : > { %10949 = vmatpush.bf16.msra.mxu3 %v16336_v7  ;;  %v10782_v9 = vpop.f32.mrf.mxu2 }
 0x60c   : > { %v10783_v5 = vadd.f32 %v10782_v9, %v27214_v38  ;;  %v11023_v38 = vperm.slane %v27190_v3, 4 }
 0x60e   : > { %10950 = vmatmul.bf16.vlgmr.msra.gmra.mxu3 %v24680_v33 }
 0x60f   : > { %10994 = vmatpush.bf16.msrb.mxu3 %v16788_v53 }
 0x611   : > { %v10743_v34 = vpop.f32.mrf.mxu3 }
 0x613   : > { %10995 = vmatpush.bf16.msrb.mxu3 %v16724_v30  ;;  %v10784_v42 = vpop.f32.mrf.mxu2 }
 0x617   : > { %10996 = vmatpush.bf16.msrb.mxu3 %v16660_v60  ;;  %v10860_v48 = vpop.f32.mrf.mxu0 }
 0x618   : > { %v10861_v35 = vadd.f32 %v10860_v48, %v25016_v47  ;;  %v10744_v47 = vadd.f32 %v10743_v34, %v10731_v8 }
 0x619   : > { %v10873_v11 = vpop.f32.mrf.mxu1  ;;  %v10745_v52 = vpop.f32.mrf.mxu3 }
 0x61a   : > { %v10874_v1 = vadd.f32 %v10873_v11, %v10861_v35  ;;  %v11053_v21 = vadd.f32 %v11021_v15, %v10744_v47  ;;  %v11026_v11 = vperm.slane %v27190_v3, 7 }
 0x61b   : > { %10997 = vmatpush.bf16.msrb.mxu3 %v16596_v27 }
 0x61c   : > { %11069 = vst [vmem:[%s25666_s13 + $0x50] sm:$0xff] %v11053_v21 }
 0x61f   : > { %10998 = vmatpush.bf16.msrb.mxu3 %v16532_v58  ;;  %v10862_v13 = vpop.f32.mrf.mxu0 }
 0x621   : > { %v10875_v26 = vpop.f32.mrf.mxu1 }
 0x623   : > { %10999 = vmatpush.bf16.msrb.mxu3 %v16468_v4 }
 0x627   : > { %11000 = vmatpush.bf16.msrb.mxu3 %v16404_v28 }
 0x62b   : > { %11001 = vmatpush.bf16.msrb.mxu3 %v16340_v24  ;;  %v10834_v40 = vpop.f32.mrf.mxu2 }
 0x62c   : > { %v10835_v63 = vadd.f32 %v10834_v40, %v27315_v37 }
 0x62e   : > { %11002 = vmatmul.bf16.vlgmr.msrb.gmra.mxu3 %v24680_v33 }
 0x631   : > { %v10795_v39 = vpop.f32.mrf.mxu3 }
 0x632   : > { %v10796_v10 = vadd.f32 %v10795_v39, %v10783_v5 }
 0x633   : > { %v10836_v62 = vpop.f32.mrf.mxu2 }
 0x634   : > { %v11054_v56 = vadd.f32 %v11022_v25, %v10796_v10 }
 0x636   : > { %11070 = vst [vmem:[%s25666_s13 + $0x58] sm:$0xff] %v11054_v56 }
 0x637   : > { %v10912_v23 = vpop.f32.mrf.mxu0 }
 0x638   : > { %v10913_v36 = vadd.f32 %v10912_v23, %v25221_v2 }
 0x639   : > { %v10925_v16 = vpop.f32.mrf.mxu1  ;;  %v10797_v41 = vpop.f32.mrf.mxu3 }
 0x63a   : > { %v10926_v44 = vadd.f32 %v10925_v16, %v10913_v36 }
 0x63f   : > { %v10914_v19 = vpop.f32.mrf.mxu0 }
 0x641   : > { %v10927_v29 = vpop.f32.mrf.mxu1 }
 0x64b   : > { %v10886_v33 = vpop.f32.mrf.mxu2 }
 0x64c   : > { %v10887_v55 = vadd.f32 %v10886_v33, %v10874_v1 }
 0x651   : > { %v10847_v46 = vpop.f32.mrf.mxu3 }
 0x652   : > { %v10848_v50 = vadd.f32 %v10847_v46, %v10835_v63 }
 0x653   : > { %v10888_v7 = vpop.f32.mrf.mxu2 }
 0x654   : > { %v11055_v57 = vadd.f32 %v11023_v38, %v10848_v50 }
 0x656   : > { %11071 = vst [vmem:[%s25666_s13 + $0x60] sm:$0xff] %v11055_v57 }
 0x657   : > { %v10964_v20 = vpop.f32.mrf.mxu0 }
 0x658   : > { %v10965_v0 = vadd.f32 %v10964_v20, %v25425_v6  ;;  %v11024_v6 = vperm.slane %v27190_v3, 5 }
 0x659   : > { %v10977_v2 = vpop.f32.mrf.mxu1  ;;  %v10849_v31 = vpop.f32.mrf.mxu3 }
 0x65a   : > { %v10978_v45 = vadd.f32 %v10977_v2, %v10965_v0 }
 0x65f   : > { %v10966_v53 = vpop.f32.mrf.mxu0 }
 0x661   : > { %v10979_v54 = vpop.f32.mrf.mxu1 }
 0x66b   : > { %v10938_v30 = vpop.f32.mrf.mxu2 }
 0x66c   : > { %v10939_v18 = vadd.f32 %v10938_v30, %v10926_v44 }
 0x671   : > { %v10899_v32 = vpop.f32.mrf.mxu3 }
 0x672   : > { %v10900_v37 = vadd.f32 %v10899_v32, %v10887_v55 }
 0x673   : > { %v10940_v60 = vpop.f32.mrf.mxu2 }
 0x674   : > { %v11056_v61 = vadd.f32 %v11024_v6, %v10900_v37 }
 0x676   : > { %11072 = vst [vmem:[%s25666_s13 + $0x68] sm:$0xff] %v11056_v61 }
 0x679   : > { %v10901_v17 = vpop.f32.mrf.mxu3 }
 0x68b   : > { %v10990_v27 = vpop.f32.mrf.mxu2 }
 0x68c   : > { %v10991_v35 = vadd.f32 %v10990_v27, %v10978_v45 }
 0x691   : > { %v10951_v9 = vpop.f32.mrf.mxu3 }
 0x692   : > { %v10952_v58 = vadd.f32 %v10951_v9, %v10939_v18 }
 0x693   : > { %v10992_v59 = vpop.f32.mrf.mxu2 }
 0x694   : > { %v11057_v51 = vadd.f32 %v11025_v49, %v10952_v58 }
 0x696   : > { %11073 = vst [vmem:[%s25666_s13 + $0x70] sm:$0xff] %v11057_v51 }
 0x699   : > { %v10953_v48 = vpop.f32.mrf.mxu3 }
 0x6b1   : > { %v11003_v8 = vpop.f32.mrf.mxu3 }
 0x6b2   : > { %v11004_v15 = vadd.f32 %v11003_v8, %v10991_v35 }
 0x6b4   : > { %v11058_v4 = vadd.f32 %v11026_v11, %v11004_v15 }
 0x6b6   : > { %11074 = vst [vmem:[%s25666_s13 + $0x78] sm:$0xff] %v11058_v4 }
 0x6b7   : > { %18272 = shalt.err (!%p18269_p3)
}
 0x6b8   : > { %18204 = dma.vmem_to_hbm [thread:$0]  (%p18377_p5), %s11090_s14, 2048, %s11092_s15, %s11076_s16  }
 0x6b9   : > { %v11005_v3 = vpop.f32.mrf.mxu3 }
 0x6ba PF: > { %p18210_p4 = scmp.ge.s32.totalorder %s18307_s21, 2  ;;  %s11103_s9 = sand.u32 1, %s18295_s18  }
 0x6bb   : > { %s11104_s13 = scalar_lea.sflag [#allocation3], %s11103_s9 }
 0x6bc   : > { %p18207_p7 = pnand %p18210_p4, %p18381_p6 }
 0x6be   : > { %p18208_p8 = pneg %p18207_p7 }
 0x6c0   : > { %18290 = dma.done.wait (%p18208_p8), %s11104_s13, 2048  }
 0x6c1   : > { %18292 = vsyncadd (%p18208_p8), %s11104_s13, 4294965248  ;;  %p15_p9 = scmp.ge.s32.totalorder %s18364_s24, 4   ;;  %s27442_s18 = smov %s18299_s19 }
 0x6c2   : > { %s27443_s19 = smov %s18303_s20  ;;  %s27444_s20 = smov %s18375_s27 }
 0x6c3   : > { %s27445_s21 = smov %s18364_s24  ;;  %17 = sbr.rel (!%p15_p9) target bundleno = 3 (0x3), region = 75 }
 0x6c8   :  { %11110 = vsyncpa [#allocation3], 1 }
 0x6c9   :  { %11112 = vsyncpa [#allocation3 + $0x1], 1 }

</bundles_post_ra>
